<compile_context>
chip_gen: v5e
topology: v5e:2x2
jax: 0.10.0
libtpu: 0.0.40
codegen_flags: <defaults>
</compile_context>

<pallas_src>
import jax
import jax.numpy as jnp
from jax.experimental import pallas as pl
from jax.experimental.pallas import tpu as pltpu

NEG_SLOPE = 0.2
BN_EPS = 1e-5


def _lrelu(v):
    return jnp.where(v > 0, v, NEG_SLOPE * v)


# --------------------------------------------------------------------------- #
# Kernel 1: per-point feature extractor + global max  ->  (B, 1024) feature
# --------------------------------------------------------------------------- #
def feat_kernel(x_ref, w1_ref, w2_ref, w3_ref, shift_ref, out_ref):
    n = pl.program_id(1)

    @pl.when(n == 0)
    def _init():
        out_ref[...] = jnp.full_like(out_ref, -jnp.inf)

    K = x_ref.shape[1]

    w1 = w1_ref[...]                       # (64, 6)    bf16, BN scale folded in
    w2 = w2_ref[...]                       # (128, 64)  bf16, BN scale folded in
    w3 = w3_ref[...]                       # (1024,128) bf16, BN scale folded in
    t1 = shift_ref[0:64, 0:1]              # (64, 1)    f32 BN shift
    t2 = shift_ref[0:128, 1:2]             # (128, 1)
    t3 = shift_ref[:, 2:3]                 # (1024, 1)

    # conv1 + conv2 per neighbour k with a running max over K (the neighbour max).
    # K is a leading (untiled) block dim, so x_ref[0, k] is a clean (6, Nt) plane
    # view: no relayout and no (8,128) divisibility constraint on K.
    h2max = None
    for k in range(K):                     # static unroll; K is small (~8-40)
        xk = x_ref[0, k]                   # (6, Nt) bf16
        h1 = jnp.dot(w1, xk, preferred_element_type=jnp.float32)     # (64, Nt)
        h1 = _lrelu(h1 + t1).astype(jnp.bfloat16)
        h2 = jnp.dot(w2, h1, preferred_element_type=jnp.float32)     # (128, Nt)
        h2 = _lrelu(h2 + t2)
        h2max = h2 if h2max is None else jnp.maximum(h2max, h2)

    # conv3 on the K-maxed feature, then max over the point tile (lane reduce).
    h3 = jnp.dot(w3, h2max.astype(jnp.bfloat16),
                 preferred_element_type=jnp.float32)                 # (1024, Nt)
    h3 = _lrelu(h3 + t3)
    tile_max = jnp.max(h3, axis=1, keepdims=True)                    # (1024, 1)

    # running max over the point axis N, accumulated in the resident out block
    out_ref[0] = jnp.maximum(out_ref[0], tile_max)


# --------------------------------------------------------------------------- #
# Kernel 2: tiny MLP head (runs once over the whole batch)
# --------------------------------------------------------------------------- #
def head_kernel(g_ref, wl1_ref, wl2_ref, wt_ref, bn_ref, out_ref):
    g = g_ref[...]                                              # (B, 1024) f32
    t4 = bn_ref[0:1, 0:512]                                     # (1, 512)
    t5 = bn_ref[1:2, 0:256]                                     # (1, 256)
    bt = bn_ref[2:3, 0:9]                                       # (1, 9)
    h = _lrelu(jnp.dot(g, wl1_ref[...],
                       preferred_element_type=jnp.float32) + t4)
    h = _lrelu(jnp.dot(h, wl2_ref[...],
                       preferred_element_type=jnp.float32) + t5)
    out_ref[...] = jnp.dot(h, wt_ref[...],
                           preferred_element_type=jnp.float32) + bt


# --------------------------------------------------------------------------- #
# Builders
# --------------------------------------------------------------------------- #
def _vmem_limit_bytes():
    cap = 64 << 20                       # conservative default (v7x: 64 MiB / TC)
    try:
        cap = pltpu.get_tpu_info().vmem_capacity_bytes
    except Exception:                    # info query unavailable -> keep default
        pass
    # v7x (64 MiB)  -> ~48 MiB limit ; v5e/v6e (128 MiB) -> ~96 MiB limit
    return int(min(0.75 * cap, 100 << 20))


def _pick_n_tile(N, K, vmem_limit):
    """Largest divisor of N (multiple of 128) whose working set fits the budget."""
    if N <= 128:
        return N
    # per-point VMEM bytes: double-buffered bf16 input block (K x 8 x 2B x 2) plus
    # f32 conv intermediates (h3 at 4 KB/point dominates) + margin.
    per_point = 32 * K + 8192
    budget = max(0, int(0.7 * vmem_limit) - (4 << 20))   # leave room for weights
    cap = max(128, budget // per_point)
    best = None
    d = 128
    while d <= min(N, cap):
        if N % d == 0:
            best = d
        d += 128
    # TODO(synk): pad N to a multiple of 128 in the wrapper instead of falling
    #             back to a full-N tile when no suitable divisor exists.
    return best if best is not None else N


def _feat_call(B, K, N, Nt, vmem_limit):
    n_n = N // Nt
    return pl.pallas_call(
        feat_kernel,
        out_shape=jax.ShapeDtypeStruct((B, 1024, 1), jnp.float32),
        grid_spec=pltpu.PrefetchScalarGridSpec(
            num_scalar_prefetch=0,
            grid=(B, n_n),                              # reduction axis (N) last
            in_specs=[
                pl.BlockSpec((1, K, 6, Nt), lambda b, n: (b, 0, 0, n)),
                pl.BlockSpec((64, 6),     lambda b, n: (0, 0)),
                pl.BlockSpec((128, 64),   lambda b, n: (0, 0)),
                pl.BlockSpec((1024, 128), lambda b, n: (0, 0)),
                pl.BlockSpec((1024, 3),   lambda b, n: (0, 0)),
            ],
            out_specs=pl.BlockSpec((1, 1024, 1), lambda b, n: (b, 0, 0)),
        ),
        compiler_params=pltpu.CompilerParams(
            dimension_semantics=("parallel", "arbitrary"),
            vmem_limit_bytes=vmem_limit,
        ),
    )


def _head_call(B):
    def full(shape):
        return pl.BlockSpec(shape, lambda i, _nd=len(shape): (0,) * _nd)
    return pl.pallas_call(
        head_kernel,
        out_shape=jax.ShapeDtypeStruct((B, 9), jnp.float32),
        grid_spec=pltpu.PrefetchScalarGridSpec(
            num_scalar_prefetch=0,
            grid=(1,),
            in_specs=[full((B, 1024)), full((1024, 512)), full((512, 256)),
                      full((256, 9)), full((3, 512))],
            out_specs=full((B, 9)),
        ),
        compiler_params=pltpu.CompilerParams(
            dimension_semantics=("arbitrary",)),
    )


# --------------------------------------------------------------------------- #
# Params: fold BN (inference semantics) and cast for the kernels
# --------------------------------------------------------------------------- #
def fold_bn(gamma, beta, mean, var):
    scale = gamma / jnp.sqrt(var + BN_EPS)
    shift = beta - mean * scale
    return scale.astype(jnp.float32), shift.astype(jnp.float32)


def fold_params(p):
    """Math-form params -> kernel-form (transposed, BN-scale-folded, bf16 convs)."""
    w1f = (p['s1'][:, None] * p['w1'].T).astype(jnp.bfloat16)      # (64, 6)
    w2f = (p['s2'][:, None] * p['w2'].T).astype(jnp.bfloat16)      # (128, 64)
    w3f = (p['s3'][:, None] * p['w3'].T).astype(jnp.bfloat16)      # (1024, 128)
    shifts = jnp.zeros((1024, 3), jnp.float32)
    shifts = shifts.at[:64, 0].set(p['t1'])
    shifts = shifts.at[:128, 1].set(p['t2'])
    shifts = shifts.at[:, 2].set(p['t3'])
    # head stays f32 (negligible work); BN scales folded into the weights
    wl1f = p['wl1'] * p['s4'][None, :]                             # (1024, 512)
    wl2f = p['wl2'] * p['s5'][None, :]                             # (512, 256)
    head_bn = jnp.zeros((3, 512), jnp.float32)
    head_bn = head_bn.at[0, :512].set(p['t4'])
    head_bn = head_bn.at[1, :256].set(p['t5'])
    head_bn = head_bn.at[2, :9].set(p['bt'])
    return dict(w1f=w1f, w2f=w2f, w3f=w3f, shifts=shifts,
                wl1f=wl1f, wl2f=wl2f, wt=p['wt'].astype(jnp.float32),
                head_bn=head_bn)


# --------------------------------------------------------------------------- #
# Public wrapper
# --------------------------------------------------------------------------- #
def transform_net(x, params, *, n_tile=None):
    """x: (B, 6, N, K) float32 (PyTorch layout).  Returns (B, 3, 3) float32."""
    B, C, N, K = x.shape
    assert C == 6, "Transform_Net expects 6 input channels"

    kp = fold_params(params)
    vmem_limit = _vmem_limit_bytes()
    Nt = n_tile if n_tile is not None else _pick_n_tile(N, K, vmem_limit)
    assert N % Nt == 0 and (Nt % 128 == 0 or Nt == N), "bad point-axis tile"

    # lane-dense kernel layout (B, K, 6, N), bf16: pure layout plumbing in XLA.
    x_t = jnp.transpose(x, (0, 3, 1, 2)).astype(jnp.bfloat16)

    g = _feat_call(B, K, N, Nt, vmem_limit)(
        x_t, kp['w1f'], kp['w2f'], kp['w3f'], kp['shifts'])
    g = g.reshape(B, 1024)                               # (B, 1024, 1) -> (B, 1024)

    out9 = _head_call(B)(g, kp['wl1f'], kp['wl2f'], kp['wt'], kp['head_bn'])
    return out9.reshape(B, 3, 3)


# --------------------------------------------------------------------------- #
# Random params (math form) and pure-JAX reference with identical quantization
# --------------------------------------------------------------------------- #
def make_params(key):
    ks = jax.random.split(key, 16)

    def bn_params(k, c):
        k1, k2, k3, k4 = jax.random.split(k, 4)
        gamma = 1.0 + 0.1 * jax.random.normal(k1, (c,), jnp.float32)
        beta = 0.05 * jax.random.normal(k2, (c,), jnp.float32)
        mean = 0.1 * jax.random.normal(k3, (c,), jnp.float32)
        var = jax.random.uniform(k4, (c,), jnp.float32, 0.5, 1.5)
        return fold_bn(gamma, beta, mean, var)

    s1, t1 = bn_params(ks[0], 64)
    s2, t2 = bn_params(ks[1], 128)
    s3, t3 = bn_params(ks[2], 1024)
    s4, t4 = bn_params(ks[3], 512)
    s5, t5 = bn_params(ks[4], 256)

    return dict(
        w1=0.1 * jax.random.normal(ks[5], (6, 64), jnp.float32),
        w2=0.1 * jax.random.normal(ks[6], (64, 128), jnp.float32),
        w3=0.05 * jax.random.normal(ks[7], (128, 1024), jnp.float32),
        wl1=0.05 * jax.random.normal(ks[8], (1024, 512), jnp.float32),
        wl2=0.05 * jax.random.normal(ks[9], (512, 256), jnp.float32),
        wt=jnp.zeros((256, 9), jnp.float32),            # transform weight init (0)
        bt=jnp.eye(3, dtype=jnp.float32).reshape(9),    # transform bias init (eye)
        s1=s1, t1=t1, s2=s2, t2=t2, s3=s3, t3=t3, s4=s4, t4=t4, s5=s5, t5=t5,
    )


def reference_transform_net(x, params):
    """Pure-JAX reference using the same folded/bf16-quantized parameters."""
    kp = fold_params(params)
    t1 = kp['shifts'][:64, 0]
    t2 = kp['shifts'][:128, 1]
    t3 = kp['shifts'][:, 2]
    xb = x.astype(jnp.bfloat16)
    h = jnp.einsum('dc,bcnk->bdnk', kp['w1f'], xb,
                   preferred_element_type=jnp.float32)
    h = _lrelu(h + t1[None, :, None, None]).astype(jnp.bfloat16)
    h = jnp.einsum('ed,bdnk->benk', kp['w2f'], h,
                   preferred_element_type=jnp.float32)
    h = _lrelu(h + t2[None, :, None, None])
    h = jnp.max(h, axis=-1)                                        # K-max
    h = jnp.einsum('fe,ben->bfn', kp['w3f'], h.astype(jnp.bfloat16),
                   preferred_element_type=jnp.float32)
    h = _lrelu(h + t3[None, :, None])
    g = jnp.max(h, axis=-1)                                        # N-max -> (B,1024)
    t4 = kp['head_bn'][0, :512]
    t5 = kp['head_bn'][1, :256]
    bt = kp['head_bn'][2, :9]
    g = _lrelu(g @ kp['wl1f'] + t4)
    g = _lrelu(g @ kp['wl2f'] + t5)
    o = g @ kp['wt'] + bt
    return o.reshape(-1, 3, 3)


# --------------------------------------------------------------------------- #
if __name__ == "__main__":
    key = jax.random.PRNGKey(0)
    kx, kparam, kw, kx2 = jax.random.split(key, 4)

    params = make_params(kparam)

    # ---- test 1: small shapes, single point-tile, default (identity) head ----
    B, C_IN, N, K = 2, 6, 16, 20
    x = jax.random.normal(kx, (B, C_IN, N, K), jnp.float32)

    out = jax.block_until_ready(transform_net(x, params))
    ref = reference_transform_net(x, params)
    assert out.shape == (B, 3, 3)
    assert jnp.allclose(out, ref, atol=1e-3, rtol=1e-3), "mismatch vs JAX reference"
    # with the module init (transform weight = 0, bias = eye) the output must be I
    assert jnp.allclose(out, jnp.broadcast_to(jnp.eye(3), (B, 3, 3)), atol=1e-5)

    # ---- test 2: multi-tile N (running-max accumulator path) + non-zero head ----
    params_alt = dict(params)
    params_alt['wt'] = 0.05 * jax.random.normal(kw, (256, 9), jnp.float32)
    B2, N2, K2 = 2, 256, 8
    x2 = jax.random.normal(kx2, (B2, C_IN, N2, K2), jnp.float32)
    out2 = jax.block_until_ready(transform_net(x2, params_alt, n_tile=128))
    ref2 = reference_transform_net(x2, params_alt)
    assert jnp.allclose(out2, ref2, atol=1e-3, rtol=1e-3), "mismatch (multi-tile)"

    print("KERNEL_OK")
</pallas_src>

<mosaic_0001>
module attributes {stable_mosaic.version = 11 : i64} {
  func.func @feat_kernel(%arg0: i32, %arg1: i32, %arg2: memref<1x20x6x16xbf16, #tpu.memory_space<vmem>>, %arg3: memref<64x6xbf16, #tpu.memory_space<vmem>>, %arg4: memref<128x64xbf16, #tpu.memory_space<vmem>>, %arg5: memref<1024x128xbf16, #tpu.memory_space<vmem>>, %arg6: memref<1024x3xf32, #tpu.memory_space<vmem>>, %arg7: memref<1x1024x1xf32, #tpu.memory_space<vmem>>) attributes {dimension_semantics = [#tpu.dimension_semantics<parallel>, #tpu.dimension_semantics<arbitrary>], iteration_bounds = array<i64: 2, 1>, scalar_prefetch = 0 : i64, scratch_operands = 0 : i64, tpu.core_type = #tpu.core_type<tc>, window_params = [{transform_indices = @transform_0, window_bounds = array<i64: 1, 20, 6, 16>}, {pipeline_mode = #tpu.pipeline_mode<synchronous>, transform_indices = @transform_1, window_bounds = array<i64: 64, 6>}, {pipeline_mode = #tpu.pipeline_mode<synchronous>, transform_indices = @transform_2, window_bounds = array<i64: 128, 64>}, {pipeline_mode = #tpu.pipeline_mode<synchronous>, transform_indices = @transform_3, window_bounds = array<i64: 1024, 128>}, {pipeline_mode = #tpu.pipeline_mode<synchronous>, transform_indices = @transform_4, window_bounds = array<i64: 1024, 3>}, {transform_indices = @transform_5, window_bounds = array<i64: 1, 1024, 1>}]} {
    %c0_i32 = arith.constant 0 : i32
    %0 = arith.cmpi eq, %arg1, %c0_i32 : i32
    %1 = arith.extui %0 : i1 to i32
    %c0_i32_0 = arith.constant 0 : i32
    %2 = arith.cmpi ne, %1, %c0_i32_0 : i32
    scf.if %2 {
      %cst_202 = arith.constant 0xFF800000 : f32
      %425 = vector.broadcast %cst_202 : f32 to vector<1x1024x1xf32>
      %c0_203 = arith.constant 0 : index
      %c0_204 = arith.constant 0 : index
      %c0_205 = arith.constant 0 : index
      %426 = vector.load %arg7[%c0_203, %c0_204, %c0_205] : memref<1x1024x1xf32, #tpu.memory_space<vmem>>, vector<1x1024x1xf32>
      tpu.vector_store %arg7[%c0_203, %c0_204, %c0_205], %425 {strides = array<i32>} : memref<1x1024x1xf32, #tpu.memory_space<vmem>>, vector<1x1024x1xf32>,
    } else {
    }
    %c0 = arith.constant 0 : index
    %c0_1 = arith.constant 0 : index
    %3 = vector.load %arg3[%c0, %c0_1] : memref<64x6xbf16, #tpu.memory_space<vmem>>, vector<64x6xbf16>
    %c0_2 = arith.constant 0 : index
    %c0_3 = arith.constant 0 : index
    %4 = vector.load %arg4[%c0_2, %c0_3] : memref<128x64xbf16, #tpu.memory_space<vmem>>, vector<128x64xbf16>
    %c0_4 = arith.constant 0 : index
    %c0_5 = arith.constant 0 : index
    %5 = vector.load %arg5[%c0_4, %c0_5] : memref<1024x128xbf16, #tpu.memory_space<vmem>>, vector<1024x128xbf16>
    %c0_6 = arith.constant 0 : index
    %c0_7 = arith.constant 0 : index
    %6 = vector.load %arg6[%c0_6, %c0_7] : memref<1024x3xf32, #tpu.memory_space<vmem>>, vector<64x1xf32>
    %c0_8 = arith.constant 0 : index
    %c1 = arith.constant 1 : index
    %7 = vector.load %arg6[%c0_8, %c1] : memref<1024x3xf32, #tpu.memory_space<vmem>>, vector<128x1xf32>
    %c0_9 = arith.constant 0 : index
    %c2 = arith.constant 2 : index
    %8 = vector.load %arg6[%c0_9, %c2] : memref<1024x3xf32, #tpu.memory_space<vmem>>, vector<1024x1xf32>
    %c0_10 = arith.constant 0 : index
    %c0_11 = arith.constant 0 : index
    %c0_12 = arith.constant 0 : index
    %c0_13 = arith.constant 0 : index
    %9 = vector.load %arg2[%c0_10, %c0_11, %c0_12, %c0_13] : memref<1x20x6x16xbf16, #tpu.memory_space<vmem>>, vector<1x1x6x16xbf16>
    %10 = vector.shape_cast %9 : vector<1x1x6x16xbf16> to vector<6x16xbf16>
    %cst = arith.constant dense<0.000000e+00> : vector<64x16xf32>
    %11 = tpu.matmul %3, %10, %cst {dimension_numbers = #tpu.dot_dimension_numbers<[1], [0], [0], [1], [0, 0, 1, 1], [], []>} : vector<64x6xbf16>, vector<6x16xbf16>, vector<64x16xf32> -> vector<64x16xf32>
    %12 = vector.broadcast %6 : vector<64x1xf32> to vector<64x16xf32>
    %13 = arith.addf %11, %12 : vector<64x16xf32>
    %cst_14 = arith.constant 0.000000e+00 : f32
    %14 = vector.broadcast %cst_14 : f32 to vector<64x16xf32>
    %15 = arith.cmpf ogt, %13, %14 : vector<64x16xf32>
    %cst_15 = arith.constant 2.000000e-01 : f32
    %16 = vector.broadcast %cst_15 : f32 to vector<64x16xf32>
    %17 = arith.mulf %16, %13 : vector<64x16xf32>
    %18 = arith.select %15, %13, %17 : vector<64x16xi1>, vector<64x16xf32>
    %19 = arith.truncf %18 : vector<64x16xf32> to vector<64x16xbf16>
    %cst_16 = arith.constant dense<0.000000e+00> : vector<128x16xf32>
    %20 = tpu.matmul %4, %19, %cst_16 {dimension_numbers = #tpu.dot_dimension_numbers<[1], [0], [0], [1], [0, 0, 1, 1], [], []>} : vector<128x64xbf16>, vector<64x16xbf16>, vector<128x16xf32> -> vector<128x16xf32>
    %21 = vector.broadcast %7 : vector<128x1xf32> to vector<128x16xf32>
    %22 = arith.addf %20, %21 : vector<128x16xf32>
    %cst_17 = arith.constant 0.000000e+00 : f32
    %23 = vector.broadcast %cst_17 : f32 to vector<128x16xf32>
    %24 = arith.cmpf ogt, %22, %23 : vector<128x16xf32>
    %cst_18 = arith.constant 2.000000e-01 : f32
    %25 = vector.broadcast %cst_18 : f32 to vector<128x16xf32>
    %26 = arith.mulf %25, %22 : vector<128x16xf32>
    %27 = arith.select %24, %22, %26 : vector<128x16xi1>, vector<128x16xf32>
    %c0_19 = arith.constant 0 : index
    %c1_20 = arith.constant 1 : index
    %c0_21 = arith.constant 0 : index
    %c0_22 = arith.constant 0 : index
    %28 = vector.load %arg2[%c0_19, %c1_20, %c0_21, %c0_22] : memref<1x20x6x16xbf16, #tpu.memory_space<vmem>>, vector<1x1x6x16xbf16>
    %29 = vector.shape_cast %28 : vector<1x1x6x16xbf16> to vector<6x16xbf16>
    %cst_23 = arith.constant dense<0.000000e+00> : vector<64x16xf32>
    %30 = tpu.matmul %3, %29, %cst_23 {dimension_numbers = #tpu.dot_dimension_numbers<[1], [0], [0], [1], [0, 0, 1, 1], [], []>} : vector<64x6xbf16>, vector<6x16xbf16>, vector<64x16xf32> -> vector<64x16xf32>
    %31 = vector.broadcast %6 : vector<64x1xf32> to vector<64x16xf32>
    %32 = arith.addf %30, %31 : vector<64x16xf32>
    %cst_24 = arith.constant 0.000000e+00 : f32
    %33 = vector.broadcast %cst_24 : f32 to vector<64x16xf32>
    %34 = arith.cmpf ogt, %32, %33 : vector<64x16xf32>
    %cst_25 = arith.constant 2.000000e-01 : f32
    %35 = vector.broadcast %cst_25 : f32 to vector<64x16xf32>
    %36 = arith.mulf %35, %32 : vector<64x16xf32>
    %37 = arith.select %34, %32, %36 : vector<64x16xi1>, vector<64x16xf32>
    %38 = arith.truncf %37 : vector<64x16xf32> to vector<64x16xbf16>
    %cst_26 = arith.constant dense<0.000000e+00> : vector<128x16xf32>
    %39 = tpu.matmul %4, %38, %cst_26 {dimension_numbers = #tpu.dot_dimension_numbers<[1], [0], [0], [1], [0, 0, 1, 1], [], []>} : vector<128x64xbf16>, vector<64x16xbf16>, vector<128x16xf32> -> vector<128x16xf32>
    %40 = vector.broadcast %7 : vector<128x1xf32> to vector<128x16xf32>
    %41 = arith.addf %39, %40 : vector<128x16xf32>
    %cst_27 = arith.constant 0.000000e+00 : f32
    %42 = vector.broadcast %cst_27 : f32 to vector<128x16xf32>
    %43 = arith.cmpf ogt, %41, %42 : vector<128x16xf32>
    %cst_28 = arith.constant 2.000000e-01 : f32
    %44 = vector.broadcast %cst_28 : f32 to vector<128x16xf32>
    %45 = arith.mulf %44, %41 : vector<128x16xf32>
    %46 = arith.select %43, %41, %45 : vector<128x16xi1>, vector<128x16xf32>
    %47 = arith.maximumf %27, %46 : vector<128x16xf32>
    %c0_29 = arith.constant 0 : index
    %c2_30 = arith.constant 2 : index
    %c0_31 = arith.constant 0 : index
    %c0_32 = arith.constant 0 : index
    %48 = vector.load %arg2[%c0_29, %c2_30, %c0_31, %c0_32] : memref<1x20x6x16xbf16, #tpu.memory_space<vmem>>, vector<1x1x6x16xbf16>
    %49 = vector.shape_cast %48 : vector<1x1x6x16xbf16> to vector<6x16xbf16>
    %cst_33 = arith.constant dense<0.000000e+00> : vector<64x16xf32>
    %50 = tpu.matmul %3, %49, %cst_33 {dimension_numbers = #tpu.dot_dimension_numbers<[1], [0], [0], [1], [0, 0, 1, 1], [], []>} : vector<64x6xbf16>, vector<6x16xbf16>, vector<64x16xf32> -> vector<64x16xf32>
    %51 = vector.broadcast %6 : vector<64x1xf32> to vector<64x16xf32>
    %52 = arith.addf %50, %51 : vector<64x16xf32>
    %cst_34 = arith.constant 0.000000e+00 : f32
    %53 = vector.broadcast %cst_34 : f32 to vector<64x16xf32>
    %54 = arith.cmpf ogt, %52, %53 : vector<64x16xf32>
    %cst_35 = arith.constant 2.000000e-01 : f32
    %55 = vector.broadcast %cst_35 : f32 to vector<64x16xf32>
    %56 = arith.mulf %55, %52 : vector<64x16xf32>
    %57 = arith.select %54, %52, %56 : vector<64x16xi1>, vector<64x16xf32>
    %58 = arith.truncf %57 : vector<64x16xf32> to vector<64x16xbf16>
    %cst_36 = arith.constant dense<0.000000e+00> : vector<128x16xf32>
    %59 = tpu.matmul %4, %58, %cst_36 {dimension_numbers = #tpu.dot_dimension_numbers<[1], [0], [0], [1], [0, 0, 1, 1], [], []>} : vector<128x64xbf16>, vector<64x16xbf16>, vector<128x16xf32> -> vector<128x16xf32>
    %60 = vector.broadcast %7 : vector<128x1xf32> to vector<128x16xf32>
    %61 = arith.addf %59, %60 : vector<128x16xf32>
    %cst_37 = arith.constant 0.000000e+00 : f32
    %62 = vector.broadcast %cst_37 : f32 to vector<128x16xf32>
    %63 = arith.cmpf ogt, %61, %62 : vector<128x16xf32>
    %cst_38 = arith.constant 2.000000e-01 : f32
    %64 = vector.broadcast %cst_38 : f32 to vector<128x16xf32>
    %65 = arith.mulf %64, %61 : vector<128x16xf32>
    %66 = arith.select %63, %61, %65 : vector<128x16xi1>, vector<128x16xf32>
    %67 = arith.maximumf %47, %66 : vector<128x16xf32>
    %c0_39 = arith.constant 0 : index
    %c3 = arith.constant 3 : index
    %c0_40 = arith.constant 0 : index
    %c0_41 = arith.constant 0 : index
    %68 = vector.load %arg2[%c0_39, %c3, %c0_40, %c0_41] : memref<1x20x6x16xbf16, #tpu.memory_space<vmem>>, vector<1x1x6x16xbf16>
    %69 = vector.shape_cast %68 : vector<1x1x6x16xbf16> to vector<6x16xbf16>
    %cst_42 = arith.constant dense<0.000000e+00> : vector<64x16xf32>
    %70 = tpu.matmul %3, %69, %cst_42 {dimension_numbers = #tpu.dot_dimension_numbers<[1], [0], [0], [1], [0, 0, 1, 1], [], []>} : vector<64x6xbf16>, vector<6x16xbf16>, vector<64x16xf32> -> vector<64x16xf32>
    %71 = vector.broadcast %6 : vector<64x1xf32> to vector<64x16xf32>
    %72 = arith.addf %70, %71 : vector<64x16xf32>
    %cst_43 = arith.constant 0.000000e+00 : f32
    %73 = vector.broadcast %cst_43 : f32 to vector<64x16xf32>
    %74 = arith.cmpf ogt, %72, %73 : vector<64x16xf32>
    %cst_44 = arith.constant 2.000000e-01 : f32
    %75 = vector.broadcast %cst_44 : f32 to vector<64x16xf32>
    %76 = arith.mulf %75, %72 : vector<64x16xf32>
    %77 = arith.select %74, %72, %76 : vector<64x16xi1>, vector<64x16xf32>
    %78 = arith.truncf %77 : vector<64x16xf32> to vector<64x16xbf16>
    %cst_45 = arith.constant dense<0.000000e+00> : vector<128x16xf32>
    %79 = tpu.matmul %4, %78, %cst_45 {dimension_numbers = #tpu.dot_dimension_numbers<[1], [0], [0], [1], [0, 0, 1, 1], [], []>} : vector<128x64xbf16>, vector<64x16xbf16>, vector<128x16xf32> -> vector<128x16xf32>
    %80 = vector.broadcast %7 : vector<128x1xf32> to vector<128x16xf32>
    %81 = arith.addf %79, %80 : vector<128x16xf32>
    %cst_46 = arith.constant 0.000000e+00 : f32
    %82 = vector.broadcast %cst_46 : f32 to vector<128x16xf32>
    %83 = arith.cmpf ogt, %81, %82 : vector<128x16xf32>
    %cst_47 = arith.constant 2.000000e-01 : f32
    %84 = vector.broadcast %cst_47 : f32 to vector<128x16xf32>
    %85 = arith.mulf %84, %81 : vector<128x16xf32>
    %86 = arith.select %83, %81, %85 : vector<128x16xi1>, vector<128x16xf32>
    %87 = arith.maximumf %67, %86 : vector<128x16xf32>
    %c0_48 = arith.constant 0 : index
    %c4 = arith.constant 4 : index
    %c0_49 = arith.constant 0 : index
    %c0_50 = arith.constant 0 : index
    %88 = vector.load %arg2[%c0_48, %c4, %c0_49, %c0_50] : memref<1x20x6x16xbf16, #tpu.memory_space<vmem>>, vector<1x1x6x16xbf16>
    %89 = vector.shape_cast %88 : vector<1x1x6x16xbf16> to vector<6x16xbf16>
    %cst_51 = arith.constant dense<0.000000e+00> : vector<64x16xf32>
    %90 = tpu.matmul %3, %89, %cst_51 {dimension_numbers = #tpu.dot_dimension_numbers<[1], [0], [0], [1], [0, 0, 1, 1], [], []>} : vector<64x6xbf16>, vector<6x16xbf16>, vector<64x16xf32> -> vector<64x16xf32>
    %91 = vector.broadcast %6 : vector<64x1xf32> to vector<64x16xf32>
    %92 = arith.addf %90, %91 : vector<64x16xf32>
    %cst_52 = arith.constant 0.000000e+00 : f32
    %93 = vector.broadcast %cst_52 : f32 to vector<64x16xf32>
    %94 = arith.cmpf ogt, %92, %93 : vector<64x16xf32>
    %cst_53 = arith.constant 2.000000e-01 : f32
    %95 = vector.broadcast %cst_53 : f32 to vector<64x16xf32>
    %96 = arith.mulf %95, %92 : vector<64x16xf32>
    %97 = arith.select %94, %92, %96 : vector<64x16xi1>, vector<64x16xf32>
    %98 = arith.truncf %97 : vector<64x16xf32> to vector<64x16xbf16>
    %cst_54 = arith.constant dense<0.000000e+00> : vector<128x16xf32>
    %99 = tpu.matmul %4, %98, %cst_54 {dimension_numbers = #tpu.dot_dimension_numbers<[1], [0], [0], [1], [0, 0, 1, 1], [], []>} : vector<128x64xbf16>, vector<64x16xbf16>, vector<128x16xf32> -> vector<128x16xf32>
    %100 = vector.broadcast %7 : vector<128x1xf32> to vector<128x16xf32>
    %101 = arith.addf %99, %100 : vector<128x16xf32>
    %cst_55 = arith.constant 0.000000e+00 : f32
    %102 = vector.broadcast %cst_55 : f32 to vector<128x16xf32>
    %103 = arith.cmpf ogt, %101, %102 : vector<128x16xf32>
    %cst_56 = arith.constant 2.000000e-01 : f32
    %104 = vector.broadcast %cst_56 : f32 to vector<128x16xf32>
    %105 = arith.mulf %104, %101 : vector<128x16xf32>
    %106 = arith.select %103, %101, %105 : vector<128x16xi1>, vector<128x16xf32>
    %107 = arith.maximumf %87, %106 : vector<128x16xf32>
    %c0_57 = arith.constant 0 : index
    %c5 = arith.constant 5 : index
    %c0_58 = arith.constant 0 : index
    %c0_59 = arith.constant 0 : index
    %108 = vector.load %arg2[%c0_57, %c5, %c0_58, %c0_59] : memref<1x20x6x16xbf16, #tpu.memory_space<vmem>>, vector<1x1x6x16xbf16>
    %109 = vector.shape_cast %108 : vector<1x1x6x16xbf16> to vector<6x16xbf16>
    %cst_60 = arith.constant dense<0.000000e+00> : vector<64x16xf32>
    %110 = tpu.matmul %3, %109, %cst_60 {dimension_numbers = #tpu.dot_dimension_numbers<[1], [0], [0], [1], [0, 0, 1, 1], [], []>} : vector<64x6xbf16>, vector<6x16xbf16>, vector<64x16xf32> -> vector<64x16xf32>
    %111 = vector.broadcast %6 : vector<64x1xf32> to vector<64x16xf32>
    %112 = arith.addf %110, %111 : vector<64x16xf32>
    %cst_61 = arith.constant 0.000000e+00 : f32
    %113 = vector.broadcast %cst_61 : f32 to vector<64x16xf32>
    %114 = arith.cmpf ogt, %112, %113 : vector<64x16xf32>
    %cst_62 = arith.constant 2.000000e-01 : f32
    %115 = vector.broadcast %cst_62 : f32 to vector<64x16xf32>
    %116 = arith.mulf %115, %112 : vector<64x16xf32>
    %117 = arith.select %114, %112, %116 : vector<64x16xi1>, vector<64x16xf32>
    %118 = arith.truncf %117 : vector<64x16xf32> to vector<64x16xbf16>
    %cst_63 = arith.constant dense<0.000000e+00> : vector<128x16xf32>
    %119 = tpu.matmul %4, %118, %cst_63 {dimension_numbers = #tpu.dot_dimension_numbers<[1], [0], [0], [1], [0, 0, 1, 1], [], []>} : vector<128x64xbf16>, vector<64x16xbf16>, vector<128x16xf32> -> vector<128x16xf32>
    %120 = vector.broadcast %7 : vector<128x1xf32> to vector<128x16xf32>
    %121 = arith.addf %119, %120 : vector<128x16xf32>
    %cst_64 = arith.constant 0.000000e+00 : f32
    %122 = vector.broadcast %cst_64 : f32 to vector<128x16xf32>
    %123 = arith.cmpf ogt, %121, %122 : vector<128x16xf32>
    %cst_65 = arith.constant 2.000000e-01 : f32
    %124 = vector.broadcast %cst_65 : f32 to vector<128x16xf32>
    %125 = arith.mulf %124, %121 : vector<128x16xf32>
    %126 = arith.select %123, %121, %125 : vector<128x16xi1>, vector<128x16xf32>
    %127 = arith.maximumf %107, %126 : vector<128x16xf32>
    %c0_66 = arith.constant 0 : index
    %c6 = arith.constant 6 : index
    %c0_67 = arith.constant 0 : index
    %c0_68 = arith.constant 0 : index
    %128 = vector.load %arg2[%c0_66, %c6, %c0_67, %c0_68] : memref<1x20x6x16xbf16, #tpu.memory_space<vmem>>, vector<1x1x6x16xbf16>
    %129 = vector.shape_cast %128 : vector<1x1x6x16xbf16> to vector<6x16xbf16>
    %cst_69 = arith.constant dense<0.000000e+00> : vector<64x16xf32>
    %130 = tpu.matmul %3, %129, %cst_69 {dimension_numbers = #tpu.dot_dimension_numbers<[1], [0], [0], [1], [0, 0, 1, 1], [], []>} : vector<64x6xbf16>, vector<6x16xbf16>, vector<64x16xf32> -> vector<64x16xf32>
    %131 = vector.broadcast %6 : vector<64x1xf32> to vector<64x16xf32>
    %132 = arith.addf %130, %131 : vector<64x16xf32>
    %cst_70 = arith.constant 0.000000e+00 : f32
    %133 = vector.broadcast %cst_70 : f32 to vector<64x16xf32>
    %134 = arith.cmpf ogt, %132, %133 : vector<64x16xf32>
    %cst_71 = arith.constant 2.000000e-01 : f32
    %135 = vector.broadcast %cst_71 : f32 to vector<64x16xf32>
    %136 = arith.mulf %135, %132 : vector<64x16xf32>
    %137 = arith.select %134, %132, %136 : vector<64x16xi1>, vector<64x16xf32>
    %138 = arith.truncf %137 : vector<64x16xf32> to vector<64x16xbf16>
    %cst_72 = arith.constant dense<0.000000e+00> : vector<128x16xf32>
    %139 = tpu.matmul %4, %138, %cst_72 {dimension_numbers = #tpu.dot_dimension_numbers<[1], [0], [0], [1], [0, 0, 1, 1], [], []>} : vector<128x64xbf16>, vector<64x16xbf16>, vector<128x16xf32> -> vector<128x16xf32>
    %140 = vector.broadcast %7 : vector<128x1xf32> to vector<128x16xf32>
    %141 = arith.addf %139, %140 : vector<128x16xf32>
    %cst_73 = arith.constant 0.000000e+00 : f32
    %142 = vector.broadcast %cst_73 : f32 to vector<128x16xf32>
    %143 = arith.cmpf ogt, %141, %142 : vector<128x16xf32>
    %cst_74 = arith.constant 2.000000e-01 : f32
    %144 = vector.broadcast %cst_74 : f32 to vector<128x16xf32>
    %145 = arith.mulf %144, %141 : vector<128x16xf32>
    %146 = arith.select %143, %141, %145 : vector<128x16xi1>, vector<128x16xf32>
    %147 = arith.maximumf %127, %146 : vector<128x16xf32>
    %c0_75 = arith.constant 0 : index
    %c7 = arith.constant 7 : index
    %c0_76 = arith.constant 0 : index
    %c0_77 = arith.constant 0 : index
    %148 = vector.load %arg2[%c0_75, %c7, %c0_76, %c0_77] : memref<1x20x6x16xbf16, #tpu.memory_space<vmem>>, vector<1x1x6x16xbf16>
    %149 = vector.shape_cast %148 : vector<1x1x6x16xbf16> to vector<6x16xbf16>
    %cst_78 = arith.constant dense<0.000000e+00> : vector<64x16xf32>
    %150 = tpu.matmul %3, %149, %cst_78 {dimension_numbers = #tpu.dot_dimension_numbers<[1], [0], [0], [1], [0, 0, 1, 1], [], []>} : vector<64x6xbf16>, vector<6x16xbf16>, vector<64x16xf32> -> vector<64x16xf32>
    %151 = vector.broadcast %6 : vector<64x1xf32> to vector<64x16xf32>
    %152 = arith.addf %150, %151 : vector<64x16xf32>
    %cst_79 = arith.constant 0.000000e+00 : f32
    %153 = vector.broadcast %cst_79 : f32 to vector<64x16xf32>
    %154 = arith.cmpf ogt, %152, %153 : vector<64x16xf32>
    %cst_80 = arith.constant 2.000000e-01 : f32
    %155 = vector.broadcast %cst_80 : f32 to vector<64x16xf32>
    %156 = arith.mulf %155, %152 : vector<64x16xf32>
    %157 = arith.select %154, %152, %156 : vector<64x16xi1>, vector<64x16xf32>
    %158 = arith.truncf %157 : vector<64x16xf32> to vector<64x16xbf16>
    %cst_81 = arith.constant dense<0.000000e+00> : vector<128x16xf32>
    %159 = tpu.matmul %4, %158, %cst_81 {dimension_numbers = #tpu.dot_dimension_numbers<[1], [0], [0], [1], [0, 0, 1, 1], [], []>} : vector<128x64xbf16>, vector<64x16xbf16>, vector<128x16xf32> -> vector<128x16xf32>
    %160 = vector.broadcast %7 : vector<128x1xf32> to vector<128x16xf32>
    %161 = arith.addf %159, %160 : vector<128x16xf32>
    %cst_82 = arith.constant 0.000000e+00 : f32
    %162 = vector.broadcast %cst_82 : f32 to vector<128x16xf32>
    %163 = arith.cmpf ogt, %161, %162 : vector<128x16xf32>
    %cst_83 = arith.constant 2.000000e-01 : f32
    %164 = vector.broadcast %cst_83 : f32 to vector<128x16xf32>
    %165 = arith.mulf %164, %161 : vector<128x16xf32>
    %166 = arith.select %163, %161, %165 : vector<128x16xi1>, vector<128x16xf32>
    %167 = arith.maximumf %147, %166 : vector<128x16xf32>
    %c0_84 = arith.constant 0 : index
    %c8 = arith.constant 8 : index
    %c0_85 = arith.constant 0 : index
    %c0_86 = arith.constant 0 : index
    %168 = vector.load %arg2[%c0_84, %c8, %c0_85, %c0_86] : memref<1x20x6x16xbf16, #tpu.memory_space<vmem>>, vector<1x1x6x16xbf16>
    %169 = vector.shape_cast %168 : vector<1x1x6x16xbf16> to vector<6x16xbf16>
    %cst_87 = arith.constant dense<0.000000e+00> : vector<64x16xf32>
    %170 = tpu.matmul %3, %169, %cst_87 {dimension_numbers = #tpu.dot_dimension_numbers<[1], [0], [0], [1], [0, 0, 1, 1], [], []>} : vector<64x6xbf16>, vector<6x16xbf16>, vector<64x16xf32> -> vector<64x16xf32>
    %171 = vector.broadcast %6 : vector<64x1xf32> to vector<64x16xf32>
    %172 = arith.addf %170, %171 : vector<64x16xf32>
    %cst_88 = arith.constant 0.000000e+00 : f32
    %173 = vector.broadcast %cst_88 : f32 to vector<64x16xf32>
    %174 = arith.cmpf ogt, %172, %173 : vector<64x16xf32>
    %cst_89 = arith.constant 2.000000e-01 : f32
    %175 = vector.broadcast %cst_89 : f32 to vector<64x16xf32>
    %176 = arith.mulf %175, %172 : vector<64x16xf32>
    %177 = arith.select %174, %172, %176 : vector<64x16xi1>, vector<64x16xf32>
    %178 = arith.truncf %177 : vector<64x16xf32> to vector<64x16xbf16>
    %cst_90 = arith.constant dense<0.000000e+00> : vector<128x16xf32>
    %179 = tpu.matmul %4, %178, %cst_90 {dimension_numbers = #tpu.dot_dimension_numbers<[1], [0], [0], [1], [0, 0, 1, 1], [], []>} : vector<128x64xbf16>, vector<64x16xbf16>, vector<128x16xf32> -> vector<128x16xf32>
    %180 = vector.broadcast %7 : vector<128x1xf32> to vector<128x16xf32>
    %181 = arith.addf %179, %180 : vector<128x16xf32>
    %cst_91 = arith.constant 0.000000e+00 : f32
    %182 = vector.broadcast %cst_91 : f32 to vector<128x16xf32>
    %183 = arith.cmpf ogt, %181, %182 : vector<128x16xf32>
    %cst_92 = arith.constant 2.000000e-01 : f32
    %184 = vector.broadcast %cst_92 : f32 to vector<128x16xf32>
    %185 = arith.mulf %184, %181 : vector<128x16xf32>
    %186 = arith.select %183, %181, %185 : vector<128x16xi1>, vector<128x16xf32>
    %187 = arith.maximumf %167, %186 : vector<128x16xf32>
    %c0_93 = arith.constant 0 : index
    %c9 = arith.constant 9 : index
    %c0_94 = arith.constant 0 : index
    %c0_95 = arith.constant 0 : index
    %188 = vector.load %arg2[%c0_93, %c9, %c0_94, %c0_95] : memref<1x20x6x16xbf16, #tpu.memory_space<vmem>>, vector<1x1x6x16xbf16>
    %189 = vector.shape_cast %188 : vector<1x1x6x16xbf16> to vector<6x16xbf16>
    %cst_96 = arith.constant dense<0.000000e+00> : vector<64x16xf32>
    %190 = tpu.matmul %3, %189, %cst_96 {dimension_numbers = #tpu.dot_dimension_numbers<[1], [0], [0], [1], [0, 0, 1, 1], [], []>} : vector<64x6xbf16>, vector<6x16xbf16>, vector<64x16xf32> -> vector<64x16xf32>
    %191 = vector.broadcast %6 : vector<64x1xf32> to vector<64x16xf32>
    %192 = arith.addf %190, %191 : vector<64x16xf32>
    %cst_97 = arith.constant 0.000000e+00 : f32
    %193 = vector.broadcast %cst_97 : f32 to vector<64x16xf32>
    %194 = arith.cmpf ogt, %192, %193 : vector<64x16xf32>
    %cst_98 = arith.constant 2.000000e-01 : f32
    %195 = vector.broadcast %cst_98 : f32 to vector<64x16xf32>
    %196 = arith.mulf %195, %192 : vector<64x16xf32>
    %197 = arith.select %194, %192, %196 : vector<64x16xi1>, vector<64x16xf32>
    %198 = arith.truncf %197 : vector<64x16xf32> to vector<64x16xbf16>
    %cst_99 = arith.constant dense<0.000000e+00> : vector<128x16xf32>
    %199 = tpu.matmul %4, %198, %cst_99 {dimension_numbers = #tpu.dot_dimension_numbers<[1], [0], [0], [1], [0, 0, 1, 1], [], []>} : vector<128x64xbf16>, vector<64x16xbf16>, vector<128x16xf32> -> vector<128x16xf32>
    %200 = vector.broadcast %7 : vector<128x1xf32> to vector<128x16xf32>
    %201 = arith.addf %199, %200 : vector<128x16xf32>
    %cst_100 = arith.constant 0.000000e+00 : f32
    %202 = vector.broadcast %cst_100 : f32 to vector<128x16xf32>
    %203 = arith.cmpf ogt, %201, %202 : vector<128x16xf32>
    %cst_101 = arith.constant 2.000000e-01 : f32
    %204 = vector.broadcast %cst_101 : f32 to vector<128x16xf32>
    %205 = arith.mulf %204, %201 : vector<128x16xf32>
    %206 = arith.select %203, %201, %205 : vector<128x16xi1>, vector<128x16xf32>
    %207 = arith.maximumf %187, %206 : vector<128x16xf32>
    %c0_102 = arith.constant 0 : index
    %c10 = arith.constant 10 : index
    %c0_103 = arith.constant 0 : index
    %c0_104 = arith.constant 0 : index
    %208 = vector.load %arg2[%c0_102, %c10, %c0_103, %c0_104] : memref<1x20x6x16xbf16, #tpu.memory_space<vmem>>, vector<1x1x6x16xbf16>
    %209 = vector.shape_cast %208 : vector<1x1x6x16xbf16> to vector<6x16xbf16>
    %cst_105 = arith.constant dense<0.000000e+00> : vector<64x16xf32>
    %210 = tpu.matmul %3, %209, %cst_105 {dimension_numbers = #tpu.dot_dimension_numbers<[1], [0], [0], [1], [0, 0, 1, 1], [], []>} : vector<64x6xbf16>, vector<6x16xbf16>, vector<64x16xf32> -> vector<64x16xf32>
    %211 = vector.broadcast %6 : vector<64x1xf32> to vector<64x16xf32>
    %212 = arith.addf %210, %211 : vector<64x16xf32>
    %cst_106 = arith.constant 0.000000e+00 : f32
    %213 = vector.broadcast %cst_106 : f32 to vector<64x16xf32>
    %214 = arith.cmpf ogt, %212, %213 : vector<64x16xf32>
    %cst_107 = arith.constant 2.000000e-01 : f32
    %215 = vector.broadcast %cst_107 : f32 to vector<64x16xf32>
    %216 = arith.mulf %215, %212 : vector<64x16xf32>
    %217 = arith.select %214, %212, %216 : vector<64x16xi1>, vector<64x16xf32>
    %218 = arith.truncf %217 : vector<64x16xf32> to vector<64x16xbf16>
    %cst_108 = arith.constant dense<0.000000e+00> : vector<128x16xf32>
    %219 = tpu.matmul %4, %218, %cst_108 {dimension_numbers = #tpu.dot_dimension_numbers<[1], [0], [0], [1], [0, 0, 1, 1], [], []>} : vector<128x64xbf16>, vector<64x16xbf16>, vector<128x16xf32> -> vector<128x16xf32>
    %220 = vector.broadcast %7 : vector<128x1xf32> to vector<128x16xf32>
    %221 = arith.addf %219, %220 : vector<128x16xf32>
    %cst_109 = arith.constant 0.000000e+00 : f32
    %222 = vector.broadcast %cst_109 : f32 to vector<128x16xf32>
    %223 = arith.cmpf ogt, %221, %222 : vector<128x16xf32>
    %cst_110 = arith.constant 2.000000e-01 : f32
    %224 = vector.broadcast %cst_110 : f32 to vector<128x16xf32>
    %225 = arith.mulf %224, %221 : vector<128x16xf32>
    %226 = arith.select %223, %221, %225 : vector<128x16xi1>, vector<128x16xf32>
    %227 = arith.maximumf %207, %226 : vector<128x16xf32>
    %c0_111 = arith.constant 0 : index
    %c11 = arith.constant 11 : index
    %c0_112 = arith.constant 0 : index
    %c0_113 = arith.constant 0 : index
    %228 = vector.load %arg2[%c0_111, %c11, %c0_112, %c0_113] : memref<1x20x6x16xbf16, #tpu.memory_space<vmem>>, vector<1x1x6x16xbf16>
    %229 = vector.shape_cast %228 : vector<1x1x6x16xbf16> to vector<6x16xbf16>
    %cst_114 = arith.constant dense<0.000000e+00> : vector<64x16xf32>
    %230 = tpu.matmul %3, %229, %cst_114 {dimension_numbers = #tpu.dot_dimension_numbers<[1], [0], [0], [1], [0, 0, 1, 1], [], []>} : vector<64x6xbf16>, vector<6x16xbf16>, vector<64x16xf32> -> vector<64x16xf32>
    %231 = vector.broadcast %6 : vector<64x1xf32> to vector<64x16xf32>
    %232 = arith.addf %230, %231 : vector<64x16xf32>
    %cst_115 = arith.constant 0.000000e+00 : f32
    %233 = vector.broadcast %cst_115 : f32 to vector<64x16xf32>
    %234 = arith.cmpf ogt, %232, %233 : vector<64x16xf32>
    %cst_116 = arith.constant 2.000000e-01 : f32
    %235 = vector.broadcast %cst_116 : f32 to vector<64x16xf32>
    %236 = arith.mulf %235, %232 : vector<64x16xf32>
    %237 = arith.select %234, %232, %236 : vector<64x16xi1>, vector<64x16xf32>
    %238 = arith.truncf %237 : vector<64x16xf32> to vector<64x16xbf16>
    %cst_117 = arith.constant dense<0.000000e+00> : vector<128x16xf32>
    %239 = tpu.matmul %4, %238, %cst_117 {dimension_numbers = #tpu.dot_dimension_numbers<[1], [0], [0], [1], [0, 0, 1, 1], [], []>} : vector<128x64xbf16>, vector<64x16xbf16>, vector<128x16xf32> -> vector<128x16xf32>
    %240 = vector.broadcast %7 : vector<128x1xf32> to vector<128x16xf32>
    %241 = arith.addf %239, %240 : vector<128x16xf32>
    %cst_118 = arith.constant 0.000000e+00 : f32
    %242 = vector.broadcast %cst_118 : f32 to vector<128x16xf32>
    %243 = arith.cmpf ogt, %241, %242 : vector<128x16xf32>
    %cst_119 = arith.constant 2.000000e-01 : f32
    %244 = vector.broadcast %cst_119 : f32 to vector<128x16xf32>
    %245 = arith.mulf %244, %241 : vector<128x16xf32>
    %246 = arith.select %243, %241, %245 : vector<128x16xi1>, vector<128x16xf32>
    %247 = arith.maximumf %227, %246 : vector<128x16xf32>
    %c0_120 = arith.constant 0 : index
    %c12 = arith.constant 12 : index
    %c0_121 = arith.constant 0 : index
    %c0_122 = arith.constant 0 : index
    %248 = vector.load %arg2[%c0_120, %c12, %c0_121, %c0_122] : memref<1x20x6x16xbf16, #tpu.memory_space<vmem>>, vector<1x1x6x16xbf16>
    %249 = vector.shape_cast %248 : vector<1x1x6x16xbf16> to vector<6x16xbf16>
    %cst_123 = arith.constant dense<0.000000e+00> : vector<64x16xf32>
    %250 = tpu.matmul %3, %249, %cst_123 {dimension_numbers = #tpu.dot_dimension_numbers<[1], [0], [0], [1], [0, 0, 1, 1], [], []>} : vector<64x6xbf16>, vector<6x16xbf16>, vector<64x16xf32> -> vector<64x16xf32>
    %251 = vector.broadcast %6 : vector<64x1xf32> to vector<64x16xf32>
    %252 = arith.addf %250, %251 : vector<64x16xf32>
    %cst_124 = arith.constant 0.000000e+00 : f32
    %253 = vector.broadcast %cst_124 : f32 to vector<64x16xf32>
    %254 = arith.cmpf ogt, %252, %253 : vector<64x16xf32>
    %cst_125 = arith.constant 2.000000e-01 : f32
    %255 = vector.broadcast %cst_125 : f32 to vector<64x16xf32>
    %256 = arith.mulf %255, %252 : vector<64x16xf32>
    %257 = arith.select %254, %252, %256 : vector<64x16xi1>, vector<64x16xf32>
    %258 = arith.truncf %257 : vector<64x16xf32> to vector<64x16xbf16>
    %cst_126 = arith.constant dense<0.000000e+00> : vector<128x16xf32>
    %259 = tpu.matmul %4, %258, %cst_126 {dimension_numbers = #tpu.dot_dimension_numbers<[1], [0], [0], [1], [0, 0, 1, 1], [], []>} : vector<128x64xbf16>, vector<64x16xbf16>, vector<128x16xf32> -> vector<128x16xf32>
    %260 = vector.broadcast %7 : vector<128x1xf32> to vector<128x16xf32>
    %261 = arith.addf %259, %260 : vector<128x16xf32>
    %cst_127 = arith.constant 0.000000e+00 : f32
    %262 = vector.broadcast %cst_127 : f32 to vector<128x16xf32>
    %263 = arith.cmpf ogt, %261, %262 : vector<128x16xf32>
    %cst_128 = arith.constant 2.000000e-01 : f32
    %264 = vector.broadcast %cst_128 : f32 to vector<128x16xf32>
    %265 = arith.mulf %264, %261 : vector<128x16xf32>
    %266 = arith.select %263, %261, %265 : vector<128x16xi1>, vector<128x16xf32>
    %267 = arith.maximumf %247, %266 : vector<128x16xf32>
    %c0_129 = arith.constant 0 : index
    %c13 = arith.constant 13 : index
    %c0_130 = arith.constant 0 : index
    %c0_131 = arith.constant 0 : index
    %268 = vector.load %arg2[%c0_129, %c13, %c0_130, %c0_131] : memref<1x20x6x16xbf16, #tpu.memory_space<vmem>>, vector<1x1x6x16xbf16>
    %269 = vector.shape_cast %268 : vector<1x1x6x16xbf16> to vector<6x16xbf16>
    %cst_132 = arith.constant dense<0.000000e+00> : vector<64x16xf32>
    %270 = tpu.matmul %3, %269, %cst_132 {dimension_numbers = #tpu.dot_dimension_numbers<[1], [0], [0], [1], [0, 0, 1, 1], [], []>} : vector<64x6xbf16>, vector<6x16xbf16>, vector<64x16xf32> -> vector<64x16xf32>
    %271 = vector.broadcast %6 : vector<64x1xf32> to vector<64x16xf32>
    %272 = arith.addf %270, %271 : vector<64x16xf32>
    %cst_133 = arith.constant 0.000000e+00 : f32
    %273 = vector.broadcast %cst_133 : f32 to vector<64x16xf32>
    %274 = arith.cmpf ogt, %272, %273 : vector<64x16xf32>
    %cst_134 = arith.constant 2.000000e-01 : f32
    %275 = vector.broadcast %cst_134 : f32 to vector<64x16xf32>
    %276 = arith.mulf %275, %272 : vector<64x16xf32>
    %277 = arith.select %274, %272, %276 : vector<64x16xi1>, vector<64x16xf32>
    %278 = arith.truncf %277 : vector<64x16xf32> to vector<64x16xbf16>
    %cst_135 = arith.constant dense<0.000000e+00> : vector<128x16xf32>
    %279 = tpu.matmul %4, %278, %cst_135 {dimension_numbers = #tpu.dot_dimension_numbers<[1], [0], [0], [1], [0, 0, 1, 1], [], []>} : vector<128x64xbf16>, vector<64x16xbf16>, vector<128x16xf32> -> vector<128x16xf32>
    %280 = vector.broadcast %7 : vector<128x1xf32> to vector<128x16xf32>
    %281 = arith.addf %279, %280 : vector<128x16xf32>
    %cst_136 = arith.constant 0.000000e+00 : f32
    %282 = vector.broadcast %cst_136 : f32 to vector<128x16xf32>
    %283 = arith.cmpf ogt, %281, %282 : vector<128x16xf32>
    %cst_137 = arith.constant 2.000000e-01 : f32
    %284 = vector.broadcast %cst_137 : f32 to vector<128x16xf32>
    %285 = arith.mulf %284, %281 : vector<128x16xf32>
    %286 = arith.select %283, %281, %285 : vector<128x16xi1>, vector<128x16xf32>
    %287 = arith.maximumf %267, %286 : vector<128x16xf32>
    %c0_138 = arith.constant 0 : index
    %c14 = arith.constant 14 : index
    %c0_139 = arith.constant 0 : index
    %c0_140 = arith.constant 0 : index
    %288 = vector.load %arg2[%c0_138, %c14, %c0_139, %c0_140] : memref<1x20x6x16xbf16, #tpu.memory_space<vmem>>, vector<1x1x6x16xbf16>
    %289 = vector.shape_cast %288 : vector<1x1x6x16xbf16> to vector<6x16xbf16>
    %cst_141 = arith.constant dense<0.000000e+00> : vector<64x16xf32>
    %290 = tpu.matmul %3, %289, %cst_141 {dimension_numbers = #tpu.dot_dimension_numbers<[1], [0], [0], [1], [0, 0, 1, 1], [], []>} : vector<64x6xbf16>, vector<6x16xbf16>, vector<64x16xf32> -> vector<64x16xf32>
    %291 = vector.broadcast %6 : vector<64x1xf32> to vector<64x16xf32>
    %292 = arith.addf %290, %291 : vector<64x16xf32>
    %cst_142 = arith.constant 0.000000e+00 : f32
    %293 = vector.broadcast %cst_142 : f32 to vector<64x16xf32>
    %294 = arith.cmpf ogt, %292, %293 : vector<64x16xf32>
    %cst_143 = arith.constant 2.000000e-01 : f32
    %295 = vector.broadcast %cst_143 : f32 to vector<64x16xf32>
    %296 = arith.mulf %295, %292 : vector<64x16xf32>
    %297 = arith.select %294, %292, %296 : vector<64x16xi1>, vector<64x16xf32>
    %298 = arith.truncf %297 : vector<64x16xf32> to vector<64x16xbf16>
    %cst_144 = arith.constant dense<0.000000e+00> : vector<128x16xf32>
    %299 = tpu.matmul %4, %298, %cst_144 {dimension_numbers = #tpu.dot_dimension_numbers<[1], [0], [0], [1], [0, 0, 1, 1], [], []>} : vector<128x64xbf16>, vector<64x16xbf16>, vector<128x16xf32> -> vector<128x16xf32>
    %300 = vector.broadcast %7 : vector<128x1xf32> to vector<128x16xf32>
    %301 = arith.addf %299, %300 : vector<128x16xf32>
    %cst_145 = arith.constant 0.000000e+00 : f32
    %302 = vector.broadcast %cst_145 : f32 to vector<128x16xf32>
    %303 = arith.cmpf ogt, %301, %302 : vector<128x16xf32>
    %cst_146 = arith.constant 2.000000e-01 : f32
    %304 = vector.broadcast %cst_146 : f32 to vector<128x16xf32>
    %305 = arith.mulf %304, %301 : vector<128x16xf32>
    %306 = arith.select %303, %301, %305 : vector<128x16xi1>, vector<128x16xf32>
    %307 = arith.maximumf %287, %306 : vector<128x16xf32>
    %c0_147 = arith.constant 0 : index
    %c15 = arith.constant 15 : index
    %c0_148 = arith.constant 0 : index
    %c0_149 = arith.constant 0 : index
    %308 = vector.load %arg2[%c0_147, %c15, %c0_148, %c0_149] : memref<1x20x6x16xbf16, #tpu.memory_space<vmem>>, vector<1x1x6x16xbf16>
    %309 = vector.shape_cast %308 : vector<1x1x6x16xbf16> to vector<6x16xbf16>
    %cst_150 = arith.constant dense<0.000000e+00> : vector<64x16xf32>
    %310 = tpu.matmul %3, %309, %cst_150 {dimension_numbers = #tpu.dot_dimension_numbers<[1], [0], [0], [1], [0, 0, 1, 1], [], []>} : vector<64x6xbf16>, vector<6x16xbf16>, vector<64x16xf32> -> vector<64x16xf32>
    %311 = vector.broadcast %6 : vector<64x1xf32> to vector<64x16xf32>
    %312 = arith.addf %310, %311 : vector<64x16xf32>
    %cst_151 = arith.constant 0.000000e+00 : f32
    %313 = vector.broadcast %cst_151 : f32 to vector<64x16xf32>
    %314 = arith.cmpf ogt, %312, %313 : vector<64x16xf32>
    %cst_152 = arith.constant 2.000000e-01 : f32
    %315 = vector.broadcast %cst_152 : f32 to vector<64x16xf32>
    %316 = arith.mulf %315, %312 : vector<64x16xf32>
    %317 = arith.select %314, %312, %316 : vector<64x16xi1>, vector<64x16xf32>
    %318 = arith.truncf %317 : vector<64x16xf32> to vector<64x16xbf16>
    %cst_153 = arith.constant dense<0.000000e+00> : vector<128x16xf32>
    %319 = tpu.matmul %4, %318, %cst_153 {dimension_numbers = #tpu.dot_dimension_numbers<[1], [0], [0], [1], [0, 0, 1, 1], [], []>} : vector<128x64xbf16>, vector<64x16xbf16>, vector<128x16xf32> -> vector<128x16xf32>
    %320 = vector.broadcast %7 : vector<128x1xf32> to vector<128x16xf32>
    %321 = arith.addf %319, %320 : vector<128x16xf32>
    %cst_154 = arith.constant 0.000000e+00 : f32
    %322 = vector.broadcast %cst_154 : f32 to vector<128x16xf32>
    %323 = arith.cmpf ogt, %321, %322 : vector<128x16xf32>
    %cst_155 = arith.constant 2.000000e-01 : f32
    %324 = vector.broadcast %cst_155 : f32 to vector<128x16xf32>
    %325 = arith.mulf %324, %321 : vector<128x16xf32>
    %326 = arith.select %323, %321, %325 : vector<128x16xi1>, vector<128x16xf32>
    %327 = arith.maximumf %307, %326 : vector<128x16xf32>
    %c0_156 = arith.constant 0 : index
    %c16 = arith.constant 16 : index
    %c0_157 = arith.constant 0 : index
    %c0_158 = arith.constant 0 : index
    %328 = vector.load %arg2[%c0_156, %c16, %c0_157, %c0_158] : memref<1x20x6x16xbf16, #tpu.memory_space<vmem>>, vector<1x1x6x16xbf16>
    %329 = vector.shape_cast %328 : vector<1x1x6x16xbf16> to vector<6x16xbf16>
    %cst_159 = arith.constant dense<0.000000e+00> : vector<64x16xf32>
    %330 = tpu.matmul %3, %329, %cst_159 {dimension_numbers = #tpu.dot_dimension_numbers<[1], [0], [0], [1], [0, 0, 1, 1], [], []>} : vector<64x6xbf16>, vector<6x16xbf16>, vector<64x16xf32> -> vector<64x16xf32>
    %331 = vector.broadcast %6 : vector<64x1xf32> to vector<64x16xf32>
    %332 = arith.addf %330, %331 : vector<64x16xf32>
    %cst_160 = arith.constant 0.000000e+00 : f32
    %333 = vector.broadcast %cst_160 : f32 to vector<64x16xf32>
    %334 = arith.cmpf ogt, %332, %333 : vector<64x16xf32>
    %cst_161 = arith.constant 2.000000e-01 : f32
    %335 = vector.broadcast %cst_161 : f32 to vector<64x16xf32>
    %336 = arith.mulf %335, %332 : vector<64x16xf32>
    %337 = arith.select %334, %332, %336 : vector<64x16xi1>, vector<64x16xf32>
    %338 = arith.truncf %337 : vector<64x16xf32> to vector<64x16xbf16>
    %cst_162 = arith.constant dense<0.000000e+00> : vector<128x16xf32>
    %339 = tpu.matmul %4, %338, %cst_162 {dimension_numbers = #tpu.dot_dimension_numbers<[1], [0], [0], [1], [0, 0, 1, 1], [], []>} : vector<128x64xbf16>, vector<64x16xbf16>, vector<128x16xf32> -> vector<128x16xf32>
    %340 = vector.broadcast %7 : vector<128x1xf32> to vector<128x16xf32>
    %341 = arith.addf %339, %340 : vector<128x16xf32>
    %cst_163 = arith.constant 0.000000e+00 : f32
    %342 = vector.broadcast %cst_163 : f32 to vector<128x16xf32>
    %343 = arith.cmpf ogt, %341, %342 : vector<128x16xf32>
    %cst_164 = arith.constant 2.000000e-01 : f32
    %344 = vector.broadcast %cst_164 : f32 to vector<128x16xf32>
    %345 = arith.mulf %344, %341 : vector<128x16xf32>
    %346 = arith.select %343, %341, %345 : vector<128x16xi1>, vector<128x16xf32>
    %347 = arith.maximumf %327, %346 : vector<128x16xf32>
    %c0_165 = arith.constant 0 : index
    %c17 = arith.constant 17 : index
    %c0_166 = arith.constant 0 : index
    %c0_167 = arith.constant 0 : index
    %348 = vector.load %arg2[%c0_165, %c17, %c0_166, %c0_167] : memref<1x20x6x16xbf16, #tpu.memory_space<vmem>>, vector<1x1x6x16xbf16>
    %349 = vector.shape_cast %348 : vector<1x1x6x16xbf16> to vector<6x16xbf16>
    %cst_168 = arith.constant dense<0.000000e+00> : vector<64x16xf32>
    %350 = tpu.matmul %3, %349, %cst_168 {dimension_numbers = #tpu.dot_dimension_numbers<[1], [0], [0], [1], [0, 0, 1, 1], [], []>} : vector<64x6xbf16>, vector<6x16xbf16>, vector<64x16xf32> -> vector<64x16xf32>
    %351 = vector.broadcast %6 : vector<64x1xf32> to vector<64x16xf32>
    %352 = arith.addf %350, %351 : vector<64x16xf32>
    %cst_169 = arith.constant 0.000000e+00 : f32
    %353 = vector.broadcast %cst_169 : f32 to vector<64x16xf32>
    %354 = arith.cmpf ogt, %352, %353 : vector<64x16xf32>
    %cst_170 = arith.constant 2.000000e-01 : f32
    %355 = vector.broadcast %cst_170 : f32 to vector<64x16xf32>
    %356 = arith.mulf %355, %352 : vector<64x16xf32>
    %357 = arith.select %354, %352, %356 : vector<64x16xi1>, vector<64x16xf32>
    %358 = arith.truncf %357 : vector<64x16xf32> to vector<64x16xbf16>
    %cst_171 = arith.constant dense<0.000000e+00> : vector<128x16xf32>
    %359 = tpu.matmul %4, %358, %cst_171 {dimension_numbers = #tpu.dot_dimension_numbers<[1], [0], [0], [1], [0, 0, 1, 1], [], []>} : vector<128x64xbf16>, vector<64x16xbf16>, vector<128x16xf32> -> vector<128x16xf32>
    %360 = vector.broadcast %7 : vector<128x1xf32> to vector<128x16xf32>
    %361 = arith.addf %359, %360 : vector<128x16xf32>
    %cst_172 = arith.constant 0.000000e+00 : f32
    %362 = vector.broadcast %cst_172 : f32 to vector<128x16xf32>
    %363 = arith.cmpf ogt, %361, %362 : vector<128x16xf32>
    %cst_173 = arith.constant 2.000000e-01 : f32
    %364 = vector.broadcast %cst_173 : f32 to vector<128x16xf32>
    %365 = arith.mulf %364, %361 : vector<128x16xf32>
    %366 = arith.select %363, %361, %365 : vector<128x16xi1>, vector<128x16xf32>
    %367 = arith.maximumf %347, %366 : vector<128x16xf32>
    %c0_174 = arith.constant 0 : index
    %c18 = arith.constant 18 : index
    %c0_175 = arith.constant 0 : index
    %c0_176 = arith.constant 0 : index
    %368 = vector.load %arg2[%c0_174, %c18, %c0_175, %c0_176] : memref<1x20x6x16xbf16, #tpu.memory_space<vmem>>, vector<1x1x6x16xbf16>
    %369 = vector.shape_cast %368 : vector<1x1x6x16xbf16> to vector<6x16xbf16>
    %cst_177 = arith.constant dense<0.000000e+00> : vector<64x16xf32>
    %370 = tpu.matmul %3, %369, %cst_177 {dimension_numbers = #tpu.dot_dimension_numbers<[1], [0], [0], [1], [0, 0, 1, 1], [], []>} : vector<64x6xbf16>, vector<6x16xbf16>, vector<64x16xf32> -> vector<64x16xf32>
    %371 = vector.broadcast %6 : vector<64x1xf32> to vector<64x16xf32>
    %372 = arith.addf %370, %371 : vector<64x16xf32>
    %cst_178 = arith.constant 0.000000e+00 : f32
    %373 = vector.broadcast %cst_178 : f32 to vector<64x16xf32>
    %374 = arith.cmpf ogt, %372, %373 : vector<64x16xf32>
    %cst_179 = arith.constant 2.000000e-01 : f32
    %375 = vector.broadcast %cst_179 : f32 to vector<64x16xf32>
    %376 = arith.mulf %375, %372 : vector<64x16xf32>
    %377 = arith.select %374, %372, %376 : vector<64x16xi1>, vector<64x16xf32>
    %378 = arith.truncf %377 : vector<64x16xf32> to vector<64x16xbf16>
    %cst_180 = arith.constant dense<0.000000e+00> : vector<128x16xf32>
    %379 = tpu.matmul %4, %378, %cst_180 {dimension_numbers = #tpu.dot_dimension_numbers<[1], [0], [0], [1], [0, 0, 1, 1], [], []>} : vector<128x64xbf16>, vector<64x16xbf16>, vector<128x16xf32> -> vector<128x16xf32>
    %380 = vector.broadcast %7 : vector<128x1xf32> to vector<128x16xf32>
    %381 = arith.addf %379, %380 : vector<128x16xf32>
    %cst_181 = arith.constant 0.000000e+00 : f32
    %382 = vector.broadcast %cst_181 : f32 to vector<128x16xf32>
    %383 = arith.cmpf ogt, %381, %382 : vector<128x16xf32>
    %cst_182 = arith.constant 2.000000e-01 : f32
    %384 = vector.broadcast %cst_182 : f32 to vector<128x16xf32>
    %385 = arith.mulf %384, %381 : vector<128x16xf32>
    %386 = arith.select %383, %381, %385 : vector<128x16xi1>, vector<128x16xf32>
    %387 = arith.maximumf %367, %386 : vector<128x16xf32>
    %c0_183 = arith.constant 0 : index
    %c19 = arith.constant 19 : index
    %c0_184 = arith.constant 0 : index
    %c0_185 = arith.constant 0 : index
    %388 = vector.load %arg2[%c0_183, %c19, %c0_184, %c0_185] : memref<1x20x6x16xbf16, #tpu.memory_space<vmem>>, vector<1x1x6x16xbf16>
    %389 = vector.shape_cast %388 : vector<1x1x6x16xbf16> to vector<6x16xbf16>
    %cst_186 = arith.constant dense<0.000000e+00> : vector<64x16xf32>
    %390 = tpu.matmul %3, %389, %cst_186 {dimension_numbers = #tpu.dot_dimension_numbers<[1], [0], [0], [1], [0, 0, 1, 1], [], []>} : vector<64x6xbf16>, vector<6x16xbf16>, vector<64x16xf32> -> vector<64x16xf32>
    %391 = vector.broadcast %6 : vector<64x1xf32> to vector<64x16xf32>
    %392 = arith.addf %390, %391 : vector<64x16xf32>
    %cst_187 = arith.constant 0.000000e+00 : f32
    %393 = vector.broadcast %cst_187 : f32 to vector<64x16xf32>
    %394 = arith.cmpf ogt, %392, %393 : vector<64x16xf32>
    %cst_188 = arith.constant 2.000000e-01 : f32
    %395 = vector.broadcast %cst_188 : f32 to vector<64x16xf32>
    %396 = arith.mulf %395, %392 : vector<64x16xf32>
    %397 = arith.select %394, %392, %396 : vector<64x16xi1>, vector<64x16xf32>
    %398 = arith.truncf %397 : vector<64x16xf32> to vector<64x16xbf16>
    %cst_189 = arith.constant dense<0.000000e+00> : vector<128x16xf32>
    %399 = tpu.matmul %4, %398, %cst_189 {dimension_numbers = #tpu.dot_dimension_numbers<[1], [0], [0], [1], [0, 0, 1, 1], [], []>} : vector<128x64xbf16>, vector<64x16xbf16>, vector<128x16xf32> -> vector<128x16xf32>
    %400 = vector.broadcast %7 : vector<128x1xf32> to vector<128x16xf32>
    %401 = arith.addf %399, %400 : vector<128x16xf32>
    %cst_190 = arith.constant 0.000000e+00 : f32
    %402 = vector.broadcast %cst_190 : f32 to vector<128x16xf32>
    %403 = arith.cmpf ogt, %401, %402 : vector<128x16xf32>
    %cst_191 = arith.constant 2.000000e-01 : f32
    %404 = vector.broadcast %cst_191 : f32 to vector<128x16xf32>
    %405 = arith.mulf %404, %401 : vector<128x16xf32>
    %406 = arith.select %403, %401, %405 : vector<128x16xi1>, vector<128x16xf32>
    %407 = arith.maximumf %387, %406 : vector<128x16xf32>
    %408 = arith.truncf %407 : vector<128x16xf32> to vector<128x16xbf16>
    %cst_192 = arith.constant dense<0.000000e+00> : vector<1024x16xf32>
    %409 = tpu.matmul %5, %408, %cst_192 {dimension_numbers = #tpu.dot_dimension_numbers<[1], [0], [0], [1], [0, 0, 1, 1], [], []>} : vector<1024x128xbf16>, vector<128x16xbf16>, vector<1024x16xf32> -> vector<1024x16xf32>
    %410 = vector.broadcast %8 : vector<1024x1xf32> to vector<1024x16xf32>
    %411 = arith.addf %409, %410 : vector<1024x16xf32>
    %cst_193 = arith.constant 0.000000e+00 : f32
    %412 = vector.broadcast %cst_193 : f32 to vector<1024x16xf32>
    %413 = arith.cmpf ogt, %411, %412 : vector<1024x16xf32>
    %cst_194 = arith.constant 2.000000e-01 : f32
    %414 = vector.broadcast %cst_194 : f32 to vector<1024x16xf32>
    %415 = arith.mulf %414, %411 : vector<1024x16xf32>
    %416 = arith.select %413, %411, %415 : vector<1024x16xi1>, vector<1024x16xf32>
    %cst_195 = arith.constant dense<0xFF800000> : vector<1024xf32>
    %417 = vector.multi_reduction <maximumf>, %416, %cst_195 [1] : vector<1024x16xf32> to vector<1024xf32>
    %418 = vector.shape_cast %417 : vector<1024xf32> to vector<1024x1xf32>
    %c0_196 = arith.constant 0 : index
    %c0_197 = arith.constant 0 : index
    %c0_198 = arith.constant 0 : index
    %419 = vector.load %arg7[%c0_196, %c0_197, %c0_198] : memref<1x1024x1xf32, #tpu.memory_space<vmem>>, vector<1x1024x1xf32>
    %420 = vector.shape_cast %419 : vector<1x1024x1xf32> to vector<1024x1xf32>
    %421 = arith.maximumf %420, %418 : vector<1024x1xf32>
    %c0_199 = arith.constant 0 : index
    %c0_200 = arith.constant 0 : index
    %c0_201 = arith.constant 0 : index
    %422 = vector.load %arg7[%c0_199, %c0_200, %c0_201] : memref<1x1024x1xf32, #tpu.memory_space<vmem>>, vector<1x1024x1xf32>
    %423 = vector.shape_cast %422 : vector<1x1024x1xf32> to vector<1024x1xf32>
    %424 = vector.shape_cast %421 : vector<1024x1xf32> to vector<1x1024x1xf32>
    tpu.vector_store %arg7[%c0_199, %c0_200, %c0_201], %424 {strides = array<i32>} : memref<1x1024x1xf32, #tpu.memory_space<vmem>>, vector<1x1024x1xf32>,
    return
  }
  func.func @transform_0(%arg0: i32, %arg1: i32) -> (i32, i32, i32, i32) {
    %c0_i32 = arith.constant 0 : i32
    %c0_i32_0 = arith.constant 0 : i32
    %c0_i32_1 = arith.constant 0 : i32
    return %arg0, %c0_i32, %c0_i32_0, %arg1 : i32, i32, i32, i32
  }
  func.func @transform_1(%arg0: i32, %arg1: i32) -> (i32, i32) {
    %c0_i32 = arith.constant 0 : i32
    %c0_i32_0 = arith.constant 0 : i32
    %c0_i32_1 = arith.constant 0 : i32
    return %c0_i32, %c0_i32_0 : i32, i32
  }
  func.func @transform_2(%arg0: i32, %arg1: i32) -> (i32, i32) {
    %c0_i32 = arith.constant 0 : i32
    %c0_i32_0 = arith.constant 0 : i32
    %c0_i32_1 = arith.constant 0 : i32
    return %c0_i32, %c0_i32_0 : i32, i32
  }
  func.func @transform_3(%arg0: i32, %arg1: i32) -> (i32, i32) {
    %c0_i32 = arith.constant 0 : i32
    %c0_i32_0 = arith.constant 0 : i32
    %c0_i32_1 = arith.constant 0 : i32
    return %c0_i32, %c0_i32_0 : i32, i32
  }
  func.func @transform_4(%arg0: i32, %arg1: i32) -> (i32, i32) {
    %c0_i32 = arith.constant 0 : i32
    %c0_i32_0 = arith.constant 0 : i32
    %c0_i32_1 = arith.constant 0 : i32
    return %c0_i32, %c0_i32_0 : i32, i32
  }
  func.func @transform_5(%arg0: i32, %arg1: i32) -> (i32, i32, i32) {
    %c0_i32 = arith.constant 0 : i32
    %c0_i32_0 = arith.constant 0 : i32
    %c0_i32_1 = arith.constant 0 : i32
    return %arg0, %c0_i32, %c0_i32_0 : i32, i32, i32
  }
}

</mosaic_0001>

<bundles_post_ra>
// kernel: tpu_custom_call.1
= control target key start
LH: loop header
LB: loop body
LE: loop exit
PB: predicated region body
PF: predicated region fallthrough
CT: control target
= control target key end

     0   :  { %s7752_s18 = smov 0   ;;  %s7754_s19 = smov 0   ;;  %s12587_s0 = inlined_call_operand.vmem [shape: bf16[2,20,6,16], index: 0, kind: input, shape index: {}]   ;;  %s12588_s1 = inlined_call_operand.vmem [shape: bf16[64,6], index: 1, kind: input, shape index: {}]   ;;  %s12589_s2 = inlined_call_operand.vmem [shape: bf16[128,64], index: 2, kind: input, shape index: {}]   ;;  %s12590_s3 = inlined_call_operand.vmem [shape: bf16[1024,128], index: 3, kind: input, shape index: {}]   ;;  %s12591_s4 = inlined_call_operand.vmem [shape: f32[1024,3], index: 4, kind: input, shape index: {}]   ;;  %s12592_s5 = inlined_call_operand.vmem [shape: f32[2,1024,1], index: 5, kind: output, shape index: {}]  }
   0x1   :  { %s7756_s20 = smov 0  }
   0x2 LB: > { %s27_s21 = sadd.s32 1, %s7712_s19  ;;  %p6928_p0 = scmp.ge.s32.totalorder %s7716_s20, 1  ;;  %s7716_s20 = sphi %s7756_s20, %s15_s20   ;;  %s7712_s19 = sphi %s7754_s19, %s13041_s19   ;;  %s7708_s18 = sphi %s7752_s18, %s13040_s18  }
   0x3   : > { %p29_p1 = scmp.ge.s32.totalorder %s27_s21, 2  ;;  %p204_p2 = scmp.lt.s32.totalorder %s7716_s20, 3 }
   0x5   : > { %s13043_s21 = smov (%p29_p1, %s27_s21), 0  ;;  %p205_p3 = pnand %p6928_p0, %p204_p2 }
   0x7   : > { %208 = sbr.rel (%p205_p3) target bundleno = 3164 (0xc5c), region = 40 }
   0xc   : > { %p235_p4 = scmp.lt.s32.totalorder %s7708_s18, 1  ;;  %v7773_v0 = vld [vmem:[%s12591_s4 + $0x30] sm:$0xff]  ;;  %v7718_v1 = vmov 0   ;;  %v7778_v2 = vld [vmem:[%s12591_s4 + $0x20] sm:$0xff]  ;;  %vm736_vm0 = vcmask 1042432   ;;  %v7793_v3 = vld [vmem:[%s12591_s4 + $0x38] sm:$0xff] }
   0xd   : > { %7627 = vset.pattern.permute.xlu0 %v7718_v1  ;;  %7628 = vset.pattern.permute.xlu1 %v7718_v1  ;;  %v7800_v6 = vld [vmem:[%s12591_s4 + $0x28] sm:$0xff]  ;;  %v7807_v9 = vld [vmem:[%s12588_s1] sm:$0xff]  ;;  %vm723_vm1 = vcmask 48128   ;;  %v7839_v13 = vld [vmem:[%s12591_s4 + $0x10] sm:$0xff] }
   0xe   : > { %s13045_s18 = smov (!%p235_p4, %s7708_s18), 1  ;;  %695 = vperm.xlu0 %7627, %v7773_v0   ;;  %685 = vperm.xlu1 %7628, %v7778_v2   ;;  %v7818_v10 = vld [vmem:[%s12591_s4] sm:$0xff]  ;;  %v7823_v11 = vld [vmem:[%s12591_s4 + $0x8] sm:$0xff]  ;;  %v7847_v16 = vld [vmem:[%s12588_s1 + $0x10] sm:$0xff] }
   0xf   : > { %7629 = vset.pattern.permute.xlu2 %v7718_v1  ;;  %s7598_s26 = smul.u32 80, %s13045_s18  ;;  %v7830_v12 = vld [vmem:[%s12588_s1 + $0x8] sm:$0xff]  ;;  %v7856_v17 = vld [vmem:[%s12591_s4 + $0x18] sm:$0xff]  ;;  %s7497_s6 = sshll.u32 %s13045_s18, 10 }
  0x10   : > { %675 = vperm.xlu2 %7629, %v7839_v13   ;;  %v7862_v18 = vld [vmem:[%s12588_s1 + $0x18] sm:$0xff]  ;;  %s11382_s9 = scalar_lea.vmem %s12592_s5, %s7497_s6 }
  0x11   : > { %s7788_s29 = scalar_lea.vmem %s12587_s0, %s7598_s26 }
  0x12   : > { %v662_v4 = vld [vmem:[%s7788_s29] sm:$0x7]  ;;  %v6992_v5 = vld [vmem:[%s7788_s29 + $0x4] sm:$0x7]  ;;  %v7005_v14 = vld [vmem:[%s7788_s29 + $0x8] sm:$0x7] }
  0x13   : > { %v738_v7 = vsel %vm736_vm0, %v662_v4, 0  ;;  %v1034_v8 = vsel %vm736_vm0, %v6992_v5, 0  ;;  %v1209_v15 = vsel %vm736_vm0, %v7005_v14, 0  ;;  %v7018_v19 = vld [vmem:[%s7788_s29 + $0xc] sm:$0x7] }
  0x14   : > { %747 = vmatpush.bf16.msra.mxu0 %v738_v7  ;;  %1043 = vmatpush.bf16.msra.mxu2 %v1034_v8  ;;  %v1384_v20 = vsel %vm736_vm0, %v7018_v19, 0 }
  0x16   : > { %700 = vperm.xlu0 %7627, %v7793_v3   ;;  %690 = vperm.xlu1 %7628, %v7800_v6  }
  0x17   : > { %6948 = vmatmul.msk.bf16.vlgmr.msra.gmra.mxu0 %vm723_vm1, %v7807_v9  ;;  %6993 = vmatmul.msk.bf16.vlgmr.msra.gmra.mxu2 %vm723_vm1, %v7807_v9 }
  0x18   : > { %1218 = vmatpush.bf16.msrb.mxu0 %v1209_v15  ;;  %680 = vperm.xlu2 %7629, %v7856_v17  }
  0x1c   : > { %1393 = vmatpush.bf16.msra.mxu0 %v1384_v20 }
  0x1e   : > { %665 = vperm.xlu0 %7627, %v7818_v10   ;;  %670 = vperm.xlu1 %7628, %v7823_v11  }
  0x27   : > { %6949 = vmatmul.msk.bf16.gmra.mxu0 %vm723_vm1, %v7830_v12  ;;  %6994 = vmatmul.msk.bf16.gmra.mxu2 %vm723_vm1, %v7830_v12 }
  0x37   : > { %6950 = vmatmul.msk.bf16.gmra.mxu0 %vm723_vm1, %v7847_v16  ;;  %6995 = vmatmul.msk.bf16.gmra.mxu2 %vm723_vm1, %v7847_v16 }
  0x47   : > { %6951 = vmatmul.msk.bf16.gmra.mxu0 %vm723_vm1, %v7862_v18  ;;  %6996 = vmatmul.msk.bf16.gmra.mxu2 %vm723_vm1, %v7862_v18 }
  0x57   : > { %7006 = vmatmul.msk.bf16.vlgmr.msrb.gmra.mxu0 %vm723_vm1, %v7807_v9 }
  0x67   : > { %7007 = vmatmul.msk.bf16.gmra.mxu0 %vm723_vm1, %v7830_v12 }
  0x6a   : > { %v7892_v35 = vpop.permute.xlu2 %675 }
  0x72   : > { %v7903_v44 = vpop.permute.xlu2 %680 }
  0x73   : > { %12616 = vst [vmem:[#allocation2_spill] sm:$0xff] %v7903_v44 }
  0x77   : > { %7008 = vmatmul.msk.bf16.gmra.mxu0 %vm723_vm1, %v7847_v16 }
  0x80   : > { %v7888_v31 = vpop.permute.xlu0 %695  ;;  %v7890_v32 = vpop.permute.xlu1 %685 }
  0x87   : > { %7009 = vmatmul.msk.bf16.gmra.mxu0 %vm723_vm1, %v7862_v18 }
  0x88   : > { %v7894_v37 = vpop.permute.xlu0 %700  ;;  %v7896_v38 = vpop.permute.xlu1 %690 }
  0x90   : > { %v7908_v50 = vpop.permute.xlu0 %665  ;;  %v7910_v51 = vpop.permute.xlu1 %670 }
  0x94   : > { %v749_v21 = vpop.f32.mrf.mxu0 }
  0x95   : > { %v750_v55 = vadd.f32 %v749_v21, %v7908_v50 }
  0x97   : > { %7019 = vmatmul.msk.bf16.vlgmr.msra.gmra.mxu0 %vm723_vm1, %v7807_v9  ;;  %v777_v19 = vmul.f32 0.2, %v750_v55  ;;  %vm769_vm12 = vcmp.gt.f32.partialorder %v750_v55, 0.0 }
  0x9a   : > { %v7880_v22 = vpop.f32.mrf.mxu2 }
  0x9c   : > { %v751_v23 = vpop.f32.mrf.mxu0 }
  0x9d   : > { %v752_v56 = vadd.f32 %v751_v23, %v7910_v51 }
  0x9f   : > { %vm770_vm13 = vcmp.gt.f32.partialorder %v752_v56, 0.0 }
  0xa2   : > { %v7882_v24 = vpop.f32.mrf.mxu2 }
  0xa4   : > { %v754_v25 = vpop.f32.mrf.mxu0 }
  0xa5   : > { %v755_v47 = vadd.f32 %v754_v25, %v7892_v35 }
  0xa7   : > { %7020 = vmatmul.msk.bf16.gmra.mxu0 %vm723_vm1, %v7830_v12  ;;  %v779_v60 = vmul.f32 0.2, %v755_v47  ;;  %vm771_vm6 = vcmp.gt.f32.partialorder %v755_v47, 0.0 }
  0xaa   : > { %v1050_v26 = vpop.f32.mrf.mxu2 }
  0xab   : > { %v1051_v14 = vadd.f32 %v1050_v26, %v7892_v35 }
  0xac   : > { %v756_v27 = vpop.f32.mrf.mxu0 }
  0xad   : > { %v757_v49 = vadd.f32 %v756_v27, %v7903_v44  ;;  %v787_v27 = vsel %vm771_vm6, %v755_v47, %v779_v60  ;;  %vm1067_vm15 = vcmp.gt.f32.partialorder %v1051_v14, 0.0 }
  0xaf   : > { %v780_v1 = vmul.f32 0.2, %v757_v49  ;;  %vm772_vm8 = vcmp.gt.f32.partialorder %v757_v49, 0.0 }
  0xb1   : > { %v788_v26 = vsel %vm772_vm8, %v757_v49, %v780_v1 }
  0xb2   : > { %v1052_v28 = vpop.f32.mrf.mxu2 }
  0xb3   : > { %v1053_v20 = vadd.f32 %v1052_v28, %v7903_v44  ;;  %v1048_v28 = vadd.f32 %v7882_v24, %v7910_v51 }
  0xb4   : > { %v759_v29 = vpop.f32.mrf.mxu0 }
  0xb5   : > { %v760_v40 = vadd.f32 %v759_v29, %v7890_v32  ;;  %v778_v29 = vmul.f32 0.2, %v752_v56  ;;  %vm1068_vm14 = vcmp.gt.f32.partialorder %v1053_v20, 0.0 }
  0xb7   : > { %7021 = vmatmul.msk.bf16.gmra.mxu0 %vm723_vm1, %v7847_v16  ;;  %v781_v48 = vmul.f32 0.2, %v760_v40  ;;  %vm773_vm3 = vcmp.gt.f32.partialorder %v760_v40, 0.0  ;;  %v786_v47 = vsel %vm770_vm13, %v752_v56, %v778_v29  ;;  %v7719_v56 = vmov 1  }
  0xb8   : > { %7631 = vset.pattern.permute.xlu0 %v7719_v56  ;;  %7632 = vset.pattern.permute.xlu1 %v7719_v56 }
  0xb9   : > { %v789_v63 = vsel %vm773_vm3, %v760_v40, %v781_v48  ;;  %vm909_vm3 = vcmask 523264   ;;  %802 = vperm.xlu0 %7631, %v7823_v11   ;;  %806 = vperm.xlu1 %7632, %v7839_v13   ;;  %v7948_v13 = vld [vmem:[%s12589_s2 + $0x8] sm:$0xff] }
  0xba   : > { %v1055_v30 = vpop.f32.mrf.mxu2  ;;  %7630 = vset.pattern.permute.xlu2 %v7719_v56  ;;  %v542_v56 = vld [vmem:[%s12591_s4 + $0x40] sm:$0xff] }
  0xbb   : > { %v1056_v4 = vadd.f32 %v1055_v30, %v7890_v32  ;;  %798 = vperm.xlu2 %7630, %v7818_v10  }
  0xbc   : > { %v761_v33 = vpop.f32.mrf.mxu0 }
  0xbd   : > { %v762_v42 = vadd.f32 %v761_v33, %v7896_v38  ;;  %v1077_v30 = vmul.f32 0.2, %v1056_v4  ;;  %vm1069_vm11 = vcmp.gt.f32.partialorder %v1056_v4, 0.0 }
  0xbf   : > { %v782_v52 = vmul.f32 0.2, %v762_v42  ;;  %vm774_vm5 = vcmp.gt.f32.partialorder %v762_v42, 0.0 }
  0xc1   : > { %v790_v8 = vsel %vm774_vm5, %v762_v42, %v782_v52  ;;  %v794_v42 = vpack.c.bf16 %v788_v26, %v787_v27  ;;  %v1074_v52 = vmul.f32 0.2, %v1048_v28  ;;  %822 = vperm.xlu0 %7631, %v7773_v0   ;;  %814 = vperm.xlu1 %7632, %v7778_v2   ;;  %v7959_v2 = vld [vmem:[%s12589_s2 + $0x10] sm:$0xff] }
  0xc2   : > { %v1057_v34 = vpop.f32.mrf.mxu2  ;;  %v795_v25 = vpack.c.bf16 %v790_v8, %v789_v63 }
  0xc3   : > { %v1058_v57 = vadd.f32 %v1057_v34, %v7896_v38  ;;  %810 = vperm.xlu2 %7630, %v7856_v17  }
  0xc4   : > { %v764_v36 = vpop.f32.mrf.mxu0 }
  0xc5   : > { %v765_v39 = vadd.f32 %v764_v36, %v7888_v31  ;;  %v1078_v21 = vmul.f32 0.2, %v1058_v57  ;;  %vm1070_vm10 = vcmp.gt.f32.partialorder %v1058_v57, 0.0 }
  0xc7   : > { %7022 = vmatmul.msk.bf16.gmra.mxu0 %vm723_vm1, %v7862_v18  ;;  %v783_v45 = vmul.f32 0.2, %v765_v39  ;;  %vm775_vm2 = vcmp.gt.f32.partialorder %v765_v39, 0.0  ;;  %v1086_v40 = vsel %vm1070_vm10, %v1058_v57, %v1078_v21 }
  0xc9   : > { %v791_v58 = vsel %vm775_vm2, %v765_v39, %v783_v45  ;;  %v1076_v39 = vmul.f32 0.2, %v1053_v20  ;;  %v1085_v45 = vsel %vm1069_vm11, %v1056_v4, %v1077_v30  ;;  %vm1066_vm2 = vcmp.gt.f32.partialorder %v1048_v28, 0.0  ;;  %826 = vperm.xlu1 %7632, %v7793_v3  }
  0xca   : > { %v1060_v41 = vpop.f32.mrf.mxu2  ;;  %v1091_v49 = vpack.c.bf16 %v1086_v40, %v1085_v45 }
  0xcb   : > { %v1061_v53 = vadd.f32 %v1060_v41, %v7888_v31  ;;  %v1046_v41 = vadd.f32 %v7880_v22, %v7908_v50  ;;  %v7933_v22 = vld [vmem:[%s12589_s2] sm:$0xff]  ;;  %818 = vperm.xlu2 %7630, %v7800_v6  }
  0xcc   : > { %v766_v43 = vpop.f32.mrf.mxu0 }
  0xcd   : > { %v767_v46 = vadd.f32 %v766_v43, %v7894_v37  ;;  %v1079_v5 = vmul.f32 0.2, %v1061_v53  ;;  %vm1071_vm7 = vcmp.gt.f32.partialorder %v1061_v53, 0.0  ;;  %v1075_v43 = vmul.f32 0.2, %v1051_v14 }
  0xcf   : > { %vm776_vm4 = vcmp.gt.f32.partialorder %v767_v46, 0.0  ;;  %v784_v54 = vmul.f32 0.2, %v767_v46  ;;  %v1087_v33 = vsel %vm1071_vm7, %v1061_v53, %v1079_v5  ;;  %v1084_v53 = vsel %vm1068_vm14, %v1053_v20, %v1076_v39 }
  0xd0   : > { %v1083_v57 = vsel %vm1067_vm15, %v1051_v14, %v1075_v43  ;;  %v7973_v14 = vld [vmem:[%s12589_s2 + $0x18] sm:$0xff] }
  0xd1   : > { %v792_v59 = vsel %vm776_vm4, %v767_v46, %v784_v54  ;;  %v785_v46 = vsel %vm769_vm12, %v750_v55, %v777_v19  ;;  %v1073_v54 = vmul.f32 0.2, %v1046_v41  ;;  %v1090_v55 = vpack.c.bf16 %v1084_v53, %v1083_v57 }
  0xd2   : > { %v1062_v61 = vpop.f32.mrf.mxu2  ;;  %v796_v62 = vpack.c.bf16 %v792_v59, %v791_v58  ;;  %v793_v24 = vpack.c.bf16 %v786_v47, %v785_v46  ;;  %vm1065_vm4 = vcmp.gt.f32.partialorder %v1046_v41, 0.0  ;;  %v1082_v58 = vsel %vm1066_vm2, %v1048_v28, %v1074_v52  ;;  %v7031_v52 = vld [vmem:[%s7788_s29 + $0x10] sm:$0x7] }
  0xd3   : > { %v1063_v7 = vadd.f32 %v1062_v61, %v7894_v37  ;;  %v1081_v59 = vsel %vm1065_vm4, %v1046_v41, %v1073_v54  ;;  %v1559_v53 = vsel %vm736_vm0, %v7031_v52, 0  ;;  %v544_v54 = vld [vmem:[%s12591_s4 + $0x50] sm:$0xff]  ;;  %831 = vperm.xlu2 %7630, %v542_v56  }
  0xd4   : > { %938 = vmatpush.bf16.msra.mxu1 %v796_v62  ;;  %v7920_v15 = vpop.f32.mrf.mxu0  ;;  %v1089_v61 = vpack.c.bf16 %v1082_v58, %v1081_v59  ;;  %841 = vperm.xlu1 %7632, %v544_v54   ;;  %v546_v59 = vld [vmem:[%s12591_s4 + $0x60] sm:$0xff] }
  0xd5   : > { %vm1072_vm9 = vcmp.gt.f32.partialorder %v1063_v7, 0.0  ;;  %v1080_v23 = vmul.f32 0.2, %v1063_v7 }
  0xd7   : > { %v1088_v34 = vsel %vm1072_vm9, %v1063_v7, %v1080_v23 }
  0xd8   : > { %939 = vmatpush.bf16.msra.mxu1 %v795_v25  ;;  %v1092_v36 = vpack.c.bf16 %v1088_v34, %v1087_v33  ;;  %v1221_v34 = vadd.f32 %v7920_v15, %v7908_v50 }
  0xda   : > { %1097 = vmatpush.bf16.msra.mxu3 %v1092_v36  ;;  %v1248_v41 = vmul.f32 0.2, %v1221_v34  ;;  %vm1240_vm12 = vcmp.gt.f32.partialorder %v1221_v34, 0.0 }
  0xdc   : > { %940 = vmatpush.bf16.msra.mxu1 %v794_v42  ;;  %v7928_v48 = vpop.f32.mrf.mxu0  ;;  %v1256_v15 = vsel %vm1240_vm12, %v1221_v34, %v1248_v41 }
  0xdd   : > { %v1223_v27 = vadd.f32 %v7928_v48, %v7910_v51  ;;  %v7989_v48 = vld [vmem:[%s12589_s2 + $0x20] sm:$0xff] }
  0xde   : > { %1098 = vmatpush.bf16.msra.mxu3 %v1091_v49  ;;  %v543_v49 = vld [vmem:[%s12591_s4 + $0x48] sm:$0xff] }
  0xdf   : > { %v1249_v39 = vmul.f32 0.2, %v1223_v27  ;;  %vm1241_vm11 = vcmp.gt.f32.partialorder %v1223_v27, 0.0  ;;  %836 = vperm.xlu0 %7631, %v543_v49   ;;  %v548_v49 = vld [vmem:[%s12591_s4 + $0x70] sm:$0xff] }
  0xe0   : > { %941 = vmatpush.bf16.msra.mxu1 %v793_v24 }
  0xe1   : > { %v1257_v45 = vsel %vm1241_vm11, %v1223_v27, %v1249_v39  ;;  %v549_v27 = vld [vmem:[%s12591_s4 + $0x78] sm:$0xff] }
  0xe2   : > { %1099 = vmatpush.bf16.msra.mxu3 %v1090_v55  ;;  %v1264_v47 = vpack.c.bf16 %v1257_v45, %v1256_v15  ;;  %v8008_v55 = vld [vmem:[%s12589_s2 + $0x28] sm:$0xff] }
  0xe3   : > { %6984 = vmatmul.msk.bf16.vlgmr.msra.gmra.mxu1 %vm909_vm3, %v7933_v22 }
  0xe4   : > { %v1225_v60 = vpop.f32.mrf.mxu0 }
  0xe5   : > { %v1226_v19 = vadd.f32 %v1225_v60, %v7892_v35 }
  0xe6   : > { %1100 = vmatpush.bf16.msra.mxu3 %v1089_v61  ;;  %v8025_v61 = vld [vmem:[%s12589_s2 + $0x30] sm:$0xff] }
  0xe7   : > { %v1250_v26 = vmul.f32 0.2, %v1226_v19  ;;  %vm1242_vm10 = vcmp.gt.f32.partialorder %v1226_v19, 0.0  ;;  %851 = vperm.xlu0 %7631, %v546_v59  }
  0xe9   : > { %6997 = vmatmul.msk.bf16.vlgmr.msra.gmra.mxu3 %vm909_vm3, %v7933_v22  ;;  %v1258_v42 = vsel %vm1242_vm10, %v1226_v19, %v1250_v26 }
  0xea   : > { %1568 = vmatpush.bf16.msrb.mxu3 %v1559_v53 }
  0xec   : > { %v1227_v11 = vpop.f32.mrf.mxu0 }
  0xed   : > { %v1228_v5 = vadd.f32 %v1227_v11, %v7903_v44  ;;  %v547_v11 = vld [vmem:[%s12591_s4 + $0x68] sm:$0xff] }
  0xee   : > { %856 = vperm.xlu1 %7632, %v547_v11  }
  0xef   : > { %v1251_v29 = vmul.f32 0.2, %v1228_v5  ;;  %vm1243_vm9 = vcmp.gt.f32.partialorder %v1228_v5, 0.0  ;;  %866 = vperm.xlu0 %7631, %v549_v27  }
  0xf1   : > { %v1259_v40 = vsel %vm1243_vm9, %v1228_v5, %v1251_v29 }
  0xf2   : > { %v1265_v43 = vpack.c.bf16 %v1259_v40, %v1258_v42 }
  0xf3   : > { %6985 = vmatmul.msk.bf16.gmra.mxu1 %vm909_vm3, %v7948_v13 }
  0xf4   : > { %v1230_v10 = vpop.f32.mrf.mxu0 }
  0xf5   : > { %v1231_v63 = vadd.f32 %v1230_v10, %v7890_v32 }
  0xf7   : > { %v1252_v20 = vmul.f32 0.2, %v1231_v63  ;;  %vm1244_vm8 = vcmp.gt.f32.partialorder %v1231_v63, 0.0 }
  0xf9   : > { %6998 = vmatmul.msk.bf16.gmra.mxu3 %vm909_vm3, %v7948_v13  ;;  %v1260_v36 = vsel %vm1244_vm8, %v1231_v63, %v1252_v20 }
  0xfc   : > { %v1232_v0 = vpop.f32.mrf.mxu0 }
  0xfd   : > { %v1233_v6 = vadd.f32 %v1232_v0, %v7896_v38 }
  0xff   : > { %v1253_v7 = vmul.f32 0.2, %v1233_v6  ;;  %vm1245_vm7 = vcmp.gt.f32.partialorder %v1233_v6, 0.0 }
 0x101   : > { %v1261_v30 = vsel %vm1245_vm7, %v1233_v6, %v1253_v7 }
 0x102   : > { %v1266_v28 = vpack.c.bf16 %v1261_v30, %v1260_v36 }
 0x103   : > { %6986 = vmatmul.msk.bf16.gmra.mxu1 %vm909_vm3, %v7959_v2 }
 0x104   : > { %v1235_v17 = vpop.f32.mrf.mxu0 }
 0x105   : > { %v1236_v3 = vadd.f32 %v1235_v17, %v7888_v31  ;;  %v545_v17 = vld [vmem:[%s12591_s4 + $0x58] sm:$0xff] }
 0x106   : > { %846 = vperm.xlu2 %7630, %v545_v17  }
 0x107   : > { %v1254_v1 = vmul.f32 0.2, %v1236_v3  ;;  %vm1246_vm5 = vcmp.gt.f32.partialorder %v1236_v3, 0.0 }
 0x109   : > { %6999 = vmatmul.msk.bf16.gmra.mxu3 %vm909_vm3, %v7959_v2  ;;  %v1262_v21 = vsel %vm1246_vm5, %v1236_v3, %v1254_v1 }
 0x10c   : > { %v1237_v62 = vpop.f32.mrf.mxu0 }
 0x10d   : > { %v1238_v4 = vadd.f32 %v1237_v62, %v7894_v37 }
 0x10e   : > { %861 = vperm.xlu2 %7630, %v548_v49  }
 0x10f   : > { %v1255_v8 = vmul.f32 0.2, %v1238_v4  ;;  %vm1247_vm6 = vcmp.gt.f32.partialorder %v1238_v4, 0.0 }
 0x111   : > { %v1263_v23 = vsel %vm1247_vm6, %v1238_v4, %v1255_v8  ;;  %v8047_v8 = vld [vmem:[%s12589_s2 + $0x38] sm:$0xff] }
 0x112   : > { %v1267_v25 = vpack.c.bf16 %v1263_v23, %v1262_v21 }
 0x113   : > { %6987 = vmatmul.msk.bf16.gmra.mxu1 %vm909_vm3, %v7973_v14 }
 0x114   : > { %1272 = vmatpush.bf16.msrb.mxu2 %v1267_v25  ;;  %v7980_v33 = vpop.f32.mrf.mxu0 }
 0x115   : > { %v1396_v26 = vadd.f32 %v7980_v33, %v7908_v50  ;;  %v8069_v52 = vpop.permute.xlu2 %798 }
 0x117   : > { %v1423_v42 = vmul.f32 0.2, %v1396_v26  ;;  %vm1415_vm7 = vcmp.gt.f32.partialorder %v1396_v26, 0.0 }
 0x118   : > { %1273 = vmatpush.bf16.msrb.mxu2 %v1266_v28 }
 0x119   : > { %7000 = vmatmul.msk.bf16.gmra.mxu3 %vm909_vm3, %v7973_v14  ;;  %v1431_v15 = vsel %vm1415_vm7, %v1396_v26, %v1423_v42 }
 0x11c   : > { %1274 = vmatpush.bf16.msrb.mxu2 %v1265_v43  ;;  %v1397_v46 = vpop.f32.mrf.mxu0 }
 0x11d   : > { %v1398_v29 = vadd.f32 %v1397_v46, %v7910_v51 }
 0x11f   : > { %v1424_v40 = vmul.f32 0.2, %v1398_v29  ;;  %vm1416_vm6 = vcmp.gt.f32.partialorder %v1398_v29, 0.0 }
 0x120   : > { %1275 = vmatpush.bf16.msrb.mxu2 %v1264_v47 }
 0x121   : > { %v1432_v46 = vsel %vm1416_vm6, %v1398_v29, %v1424_v40 }
 0x122   : > { %v1439_v47 = vpack.c.bf16 %v1432_v46, %v1431_v15 }
 0x123   : > { %6988 = vmatmul.msk.bf16.gmra.mxu1 %vm909_vm3, %v7989_v48  ;;  %7010 = vmatmul.msk.bf16.vlgmr.msrb.gmra.mxu2 %vm909_vm3, %v7933_v22 }
 0x124   : > { %v1400_v24 = vpop.f32.mrf.mxu0 }
 0x125   : > { %v1401_v19 = vadd.f32 %v1400_v24, %v7892_v35 }
 0x127   : > { %v1425_v36 = vmul.f32 0.2, %v1401_v19  ;;  %vm1417_vm5 = vcmp.gt.f32.partialorder %v1401_v19, 0.0 }
 0x129   : > { %7001 = vmatmul.msk.bf16.gmra.mxu3 %vm909_vm3, %v7989_v48  ;;  %v1433_v43 = vsel %vm1417_vm5, %v1401_v19, %v1425_v36 }
 0x12c   : > { %v1402_v57 = vpop.f32.mrf.mxu0 }
 0x12d   : > { %v1403_v4 = vadd.f32 %v1402_v57, %v7903_v44 }
 0x12f   : > { %v1426_v30 = vmul.f32 0.2, %v1403_v4  ;;  %vm1418_vm4 = vcmp.gt.f32.partialorder %v1403_v4, 0.0 }
 0x131   : > { %v1434_v41 = vsel %vm1418_vm4, %v1403_v4, %v1426_v30 }
 0x132   : > { %v1440_v45 = vpack.c.bf16 %v1434_v41, %v1433_v43  ;;  %v8125_v43 = vpop.permute.xlu2 %810 }
 0x133   : > { %6989 = vmatmul.msk.bf16.gmra.mxu1 %vm909_vm3, %v8008_v55  ;;  %7011 = vmatmul.msk.bf16.gmra.mxu2 %vm909_vm3, %v7948_v13  ;;  %12618 = vst [vmem:[#allocation4_spill] sm:$0xff] %v8125_v43 }
 0x134   : > { %v1405_v58 = vpop.f32.mrf.mxu0 }
 0x135   : > { %v1406_v62 = vadd.f32 %v1405_v58, %v7890_v32 }
 0x137   : > { %v1427_v20 = vmul.f32 0.2, %v1406_v62  ;;  %vm1419_vm2 = vcmp.gt.f32.partialorder %v1406_v62, 0.0 }
 0x139   : > { %7002 = vmatmul.msk.bf16.gmra.mxu3 %vm909_vm3, %v8008_v55  ;;  %v1435_v28 = vsel %vm1419_vm2, %v1406_v62, %v1427_v20 }
 0x13a   : > { %v8140_v49 = vpop.permute.xlu2 %818 }
 0x13b   : > { %12620 = vst [vmem:[#allocation6_spill] sm:$0xff] %v8140_v49 }
 0x13c   : > { %v1407_v60 = vpop.f32.mrf.mxu0 }
 0x13d   : > { %v1408_v3 = vadd.f32 %v1407_v60, %v7896_v38 }
 0x13f   : > { %v1428_v5 = vmul.f32 0.2, %v1408_v3  ;;  %vm1420_vm15 = vcmp.gt.f32.partialorder %v1408_v3, 0.0 }
 0x141   : > { %v1436_v34 = vsel %vm1420_vm15, %v1408_v3, %v1428_v5  ;;  %v7044_v5 = vld [vmem:[%s7788_s29 + $0x14] sm:$0x7] }
 0x142   : > { %v1441_v39 = vpack.c.bf16 %v1436_v34, %v1435_v28  ;;  %v1734_v19 = vsel %vm736_vm0, %v7044_v5, 0  ;;  %v8116_v34 = vpop.permute.xlu0 %802 }
 0x143   : > { %6990 = vmatmul.msk.bf16.gmra.mxu1 %vm909_vm3, %v8025_v61  ;;  %7012 = vmatmul.msk.bf16.gmra.mxu2 %vm909_vm3, %v7959_v2  ;;  %12617 = vst [vmem:[#allocation3_spill] sm:$0xff] %v8116_v34 }
 0x144   : > { %v1410_v10 = vpop.f32.mrf.mxu0  ;;  %1743 = vmatpush.bf16.msra.mxu2 %v1734_v19 }
 0x145   : > { %v1411_v0 = vadd.f32 %v1410_v10, %v7888_v31 }
 0x147   : > { %v1429_v63 = vmul.f32 0.2, %v1411_v0  ;;  %vm1421_vm13 = vcmp.gt.f32.partialorder %v1411_v0, 0.0 }
 0x149   : > { %7003 = vmatmul.msk.bf16.gmra.mxu3 %vm909_vm3, %v8025_v61  ;;  %v1437_v21 = vsel %vm1421_vm13, %v1411_v0, %v1429_v63  ;;  %v8087_v0 = vpop.permute.xlu1 %806 }
 0x14a   : > { %v8133_v46 = vpop.permute.xlu0 %822 }
 0x14b   : > { %12619 = vst [vmem:[#allocation5_spill] sm:$0xff] %v8133_v46 }
 0x14c   : > { %v1412_v6 = vpop.f32.mrf.mxu0 }
 0x14d   : > { %v1413_v1 = vadd.f32 %v1412_v6, %v7894_v37 }
 0x14f   : > { %v1430_v7 = vmul.f32 0.2, %v1413_v1  ;;  %vm1422_vm14 = vcmp.gt.f32.partialorder %v1413_v1, 0.0 }
 0x151   : > { %v1438_v23 = vsel %vm1422_vm14, %v1413_v1, %v1430_v7 }
 0x152   : > { %v1442_v25 = vpack.c.bf16 %v1438_v23, %v1437_v21 }
 0x153   : > { %6991 = vmatmul.msk.bf16.gmra.mxu1 %vm909_vm3, %v8047_v8  ;;  %7013 = vmatmul.msk.bf16.gmra.mxu2 %vm909_vm3, %v7973_v14 }
 0x154   : > { %1447 = vmatpush.bf16.msrb.mxu1 %v1442_v25  ;;  %v8109_v25 = vpop.permute.xlu1 %814 }
 0x158   : > { %1448 = vmatpush.bf16.msrb.mxu1 %v1441_v39 }
 0x159   : > { %7004 = vmatmul.msk.bf16.gmra.mxu3 %vm909_vm3, %v8047_v8 }
 0x15c   : > { %1449 = vmatpush.bf16.msrb.mxu1 %v1440_v45 }
 0x160   : > { %v943_v33 = vpop.f32.mrf.mxu1  ;;  %1450 = vmatpush.bf16.msrb.mxu1 %v1439_v47 }
 0x161   : > { %v944_v53 = vadd.f32 %v943_v33, %v8069_v52 }
 0x163   : > { %7014 = vmatmul.msk.bf16.gmra.mxu2 %vm909_vm3, %v7989_v48  ;;  %7023 = vmatmul.msk.bf16.vlgmr.msrb.gmra.mxu1 %vm909_vm3, %v7933_v22  ;;  %v999_v54 = vmul.f32 0.2, %v944_v53  ;;  %vm983_vm8 = vcmp.gt.f32.partialorder %v944_v53, 0.0 }
 0x165   : > { %v8077_v58 = vsel %vm983_vm8, %v944_v53, %v999_v54 }
 0x168   : > { %v8072_v24 = vpop.f32.mrf.mxu1 }
 0x169   : > { %7032 = vmatmul.msk.bf16.vlgmr.msrb.gmra.mxu3 %vm723_vm1, %v7807_v9 }
 0x16c   : > { %v1102_v57 = vpop.f32.mrf.mxu3 }
 0x16d   : > { %v1103_v56 = vadd.f32 %v1102_v57, %v8069_v52 }
 0x16f   : > { %vm1142_vm9 = vcmp.gt.f32.partialorder %v1103_v56, 0.0  ;;  %v1158_v59 = vmul.f32 0.2, %v1103_v56 }
 0x170   : > { %v948_v22 = vpop.f32.mrf.mxu1 }
 0x171   : > { %v8079_v60 = vsel %vm1142_vm9, %v1103_v56, %v1158_v59  ;;  %v949_v17 = vadd.f32 %v948_v22, %v8087_v0 }
 0x172   : > { %v1190_v11 = vmax.f32 %v8077_v58, %v8079_v60 }
 0x173   : > { %7015 = vmatmul.msk.bf16.gmra.mxu2 %vm909_vm3, %v8008_v55  ;;  %7024 = vmatmul.msk.bf16.gmra.mxu1 %vm909_vm3, %v7948_v13  ;;  %v1001_v6 = vmul.f32 0.2, %v949_v17  ;;  %vm985_vm10 = vcmp.gt.f32.partialorder %v949_v17, 0.0 }
 0x174   : > { %v1104_v10 = vpop.f32.mrf.mxu3 }
 0x175   : > { %v8095_v1 = vsel %vm985_vm10, %v949_v17, %v1001_v6  ;;  %v8155_v6 = vpop.permute.xlu2 %831 }
 0x176   : > { %12621 = vst [vmem:[#allocation7_spill] sm:$0xff] %v8155_v6 }
 0x178   : > { %v8090_v3 = vpop.f32.mrf.mxu1 }
 0x179   : > { %7033 = vmatmul.msk.bf16.gmra.mxu3 %vm723_vm1, %v7830_v12 }
 0x17c   : > { %v1107_v62 = vpop.f32.mrf.mxu3 }
 0x17d   : > { %v1108_v63 = vadd.f32 %v1107_v62, %v8087_v0  ;;  %v946_v62 = vadd.f32 %v8072_v24, %v8116_v34 }
 0x17f   : > { %vm1144_vm11 = vcmp.gt.f32.partialorder %v1108_v63, 0.0  ;;  %v1160_v4 = vmul.f32 0.2, %v1108_v63  ;;  %vm984_vm4 = vcmp.gt.f32.partialorder %v946_v62, 0.0 }
 0x180   : > { %v953_v7 = vpop.f32.mrf.mxu1 }
 0x181   : > { %v8099_v20 = vsel %vm1144_vm11, %v1108_v63, %v1160_v4  ;;  %v954_v27 = vadd.f32 %v953_v7, %v8109_v25  ;;  %v1105_v63 = vadd.f32 %v1104_v10, %v8116_v34 }
 0x182   : > { %v1192_v21 = vmax.f32 %v8095_v1, %v8099_v20 }
 0x183   : > { %7016 = vmatmul.msk.bf16.gmra.mxu2 %vm909_vm3, %v8025_v61  ;;  %7025 = vmatmul.msk.bf16.gmra.mxu1 %vm909_vm3, %v7959_v2  ;;  %v1003_v30 = vmul.f32 0.2, %v954_v27  ;;  %vm987_vm12 = vcmp.gt.f32.partialorder %v954_v27, 0.0  ;;  %vm1143_vm5 = vcmp.gt.f32.partialorder %v1105_v63, 0.0 }
 0x184   : > { %v8107_v23 = vpop.f32.mrf.mxu3 }
 0x185   : > { %v8119_v28 = vsel %vm987_vm12, %v954_v27, %v1003_v30  ;;  %v1000_v30 = vmul.f32 0.2, %v946_v62 }
 0x188   : > { %v8112_v29 = vpop.f32.mrf.mxu1 }
 0x189   : > { %7034 = vmatmul.msk.bf16.gmra.mxu3 %vm723_vm1, %v7847_v16 }
 0x18c   : > { %v1112_v26 = vpop.f32.mrf.mxu3 }
 0x18d   : > { %v1113_v36 = vadd.f32 %v1112_v26, %v8109_v25 }
 0x18f   : > { %vm1146_vm13 = vcmp.gt.f32.partialorder %v1113_v36, 0.0  ;;  %v1162_v39 = vmul.f32 0.2, %v1113_v36 }
 0x190   : > { %v958_v40 = vpop.f32.mrf.mxu1 }
 0x191   : > { %v8121_v41 = vsel %vm1146_vm13, %v1113_v36, %v1162_v39  ;;  %v959_v15 = vadd.f32 %v958_v40, %v8133_v46  ;;  %v8164_v39 = vpop.permute.xlu1 %826 }
 0x192   : > { %12623 = vst [vmem:[#allocation9_spill] sm:$0xff] %v8164_v39 }
 0x193   : > { %7017 = vmatmul.msk.bf16.gmra.mxu2 %vm909_vm3, %v8047_v8  ;;  %7026 = vmatmul.msk.bf16.gmra.mxu1 %vm909_vm3, %v7973_v14  ;;  %v1005_v33 = vmul.f32 0.2, %v959_v15  ;;  %vm989_vm14 = vcmp.gt.f32.partialorder %v959_v15, 0.0 }
 0x194   : > { %v8131_v45 = vpop.f32.mrf.mxu3 }
 0x195   : > { %v8143_v57 = vsel %vm989_vm14, %v959_v15, %v1005_v33  ;;  %v1016_v15 = vsel %vm984_vm4, %v946_v62, %v1000_v30  ;;  %v951_v30 = vadd.f32 %v8090_v3, %v8125_v43  ;;  %v8197_v3 = vpop.permute.xlu0 %836 }
 0x196   : > { %12628 = vst [vmem:[#allocation14_spill] sm:$0xff] %v8197_v3 }
 0x197   : > { %vm986_vm10 = vcmp.gt.f32.partialorder %v951_v30, 0.0 }
 0x198   : > { %v8136_v47 = vpop.f32.mrf.mxu1 }
 0x199   : > { %7035 = vmatmul.msk.bf16.gmra.mxu3 %vm723_vm1, %v7862_v18 }
 0x19c   : > { %v1117_v53 = vpop.f32.mrf.mxu3 }
 0x19d   : > { %v1118_v54 = vadd.f32 %v1117_v53, %v8133_v46 }
 0x19f   : > { %vm1148_vm15 = vcmp.gt.f32.partialorder %v1118_v54, 0.0  ;;  %v1164_v14 = vmul.f32 0.2, %v1118_v54 }
 0x1a0   : > { %v963_v56 = vpop.f32.mrf.mxu1 }
 0x1a1   : > { %v8145_v59 = vsel %vm1148_vm15, %v1118_v54, %v1164_v14  ;;  %v964_v7 = vadd.f32 %v963_v56, %v8155_v6 }
 0x1a3   : > { %7027 = vmatmul.msk.bf16.gmra.mxu1 %vm909_vm3, %v7989_v48  ;;  %7045 = vmatmul.msk.bf16.vlgmr.msra.gmra.mxu2 %vm723_vm1, %v7807_v9  ;;  %v1159_v9 = vmul.f32 0.2, %v1105_v63  ;;  %v1007_v36 = vmul.f32 0.2, %v964_v7  ;;  %vm991_vm6 = vcmp.gt.f32.partialorder %v964_v7, 0.0 }
 0x1a4   : > { %v8153_v17 = vpop.f32.mrf.mxu3 }
 0x1a5   : > { %v1175_v33 = vsel %vm1143_vm5, %v1105_v63, %v1159_v9  ;;  %v8172_v54 = vsel %vm991_vm6, %v964_v7, %v1007_v36  ;;  %v8187_v7 = vpop.permute.xlu1 %841  ;;  %v1110_v9 = vadd.f32 %v8107_v23, %v8125_v43 }
 0x1a6   : > { %v1277_v4 = vpop.f32.mrf.mxu2  ;;  %v1191_v60 = vmax.f32 %v1016_v15, %v1175_v33  ;;  %12626 = vst [vmem:[#allocation12_spill] sm:$0xff] %v8187_v7  ;;  %v1002_v15 = vmul.f32 0.2, %v951_v30 }
 0x1a7   : > { %v1278_v5 = vadd.f32 %v1277_v4, %v8069_v52  ;;  %v1161_v33 = vmul.f32 0.2, %v1110_v9  ;;  %vm1145_vm11 = vcmp.gt.f32.partialorder %v1110_v9, 0.0 }
 0x1a8   : > { %v8162_v19 = vpop.f32.mrf.mxu1 }
 0x1a9   : > { %12622 = vst [vmem:[#allocation8_spill] sm:$0xff] %v8162_v19  ;;  %vm1317_vm2 = vcmp.gt.f32.partialorder %v1278_v5, 0.0  ;;  %v1333_v27 = vmul.f32 0.2, %v1278_v5 }
 0x1ab   : > { %v1349_v26 = vsel %vm1317_vm2, %v1278_v5, %v1333_v27 }
 0x1ac   : > { %v8169_v24 = vmax.f32 %v1190_v11, %v1349_v26  ;;  %v1122_v10 = vpop.f32.mrf.mxu3 }
 0x1ad   : > { %v1123_v40 = vadd.f32 %v1122_v10, %v8155_v6 }
 0x1ae   : > { %v1279_v53 = vpop.f32.mrf.mxu2 }
 0x1af   : > { %vm1150_vm7 = vcmp.gt.f32.partialorder %v1123_v40, 0.0  ;;  %v1166_v14 = vmul.f32 0.2, %v1123_v40  ;;  %v1280_v56 = vadd.f32 %v1279_v53, %v8116_v34 }
 0x1b0   : > { %v968_v4 = vpop.f32.mrf.mxu1 }
 0x1b1   : > { %v8175_v5 = vsel %vm1150_vm7, %v1123_v40, %v1166_v14  ;;  %vm1318_vm8 = vcmp.gt.f32.partialorder %v1280_v56, 0.0  ;;  %v1334_v58 = vmul.f32 0.2, %v1280_v56  ;;  %v969_v10 = vadd.f32 %v968_v4, %v8187_v7 }
 0x1b3   : > { %v1350_v27 = vsel %vm1318_vm8, %v1280_v56, %v1334_v58  ;;  %7028 = vmatmul.msk.bf16.gmra.mxu1 %vm909_vm3, %v8008_v55  ;;  %7046 = vmatmul.msk.bf16.gmra.mxu2 %vm723_vm1, %v7830_v12  ;;  %v1009_v14 = vmul.f32 0.2, %v969_v10  ;;  %vm993_vm12 = vcmp.gt.f32.partialorder %v969_v10, 0.0  ;;  %v1018_v58 = vsel %vm986_vm10, %v951_v30, %v1002_v15 }
 0x1b4   : > { %v8183_v62 = vmax.f32 %v1191_v60, %v1350_v27  ;;  %v8185_v63 = vpop.f32.mrf.mxu3  ;;  %v1177_v60 = vsel %vm1145_vm11, %v1110_v9, %v1161_v33  ;;  %v1115_v33 = vadd.f32 %v8131_v45, %v8140_v49 }
 0x1b5   : > { %12625 = vst [vmem:[#allocation11_spill] sm:$0xff] %v8185_v63 }
 0x1b6   : > { %12624 = vst [vmem:[#allocation10_spill] sm:$0xff] %v8183_v62  ;;  %v1282_v26 = vpop.f32.mrf.mxu2  ;;  %vm1147_vm4 = vcmp.gt.f32.partialorder %v1115_v33, 0.0 }
 0x1b7   : > { %v1283_v36 = vadd.f32 %v1282_v26, %v8087_v0  ;;  %v8205_v26 = vsel %vm993_vm12, %v969_v10, %v1009_v14 }
 0x1b8   : > { %v8195_v40 = vpop.f32.mrf.mxu1 }
 0x1b9   : > { %12627 = vst [vmem:[#allocation13_spill] sm:$0xff] %v8195_v40  ;;  %vm1319_vm9 = vcmp.gt.f32.partialorder %v1283_v36, 0.0  ;;  %v1335_v12 = vmul.f32 0.2, %v1283_v36 }
 0x1bb   : > { %v1351_v53 = vsel %vm1319_vm9, %v1283_v36, %v1335_v12  ;;  %v7057_v12 = vld [vmem:[%s7788_s29 + $0x18] sm:$0x7] }
 0x1bc   : > { %v8202_v23 = vmax.f32 %v1192_v21, %v1351_v53  ;;  %v1127_v56 = vpop.f32.mrf.mxu3  ;;  %v1909_v42 = vsel %vm736_vm0, %v7057_v12, 0  ;;  %v1193_v21 = vmax.f32 %v1018_v58, %v1177_v60  ;;  %v1163_v60 = vmul.f32 0.2, %v1115_v33  ;;  %v8232_v12 = vpop.permute.xlu2 %846 }
 0x1bd   : > { %v1128_v4 = vadd.f32 %v1127_v56, %v8187_v7  ;;  %1918 = vmatpush.bf16.msrb.mxu2 %v1909_v42  ;;  %v956_v42 = vadd.f32 %v8112_v29, %v8140_v49  ;;  %12633 = vst [vmem:[#allocation19_spill] sm:$0xff] %v8232_v12  ;;  %v12634_v29 = vmax.f32 %v8119_v28, %v8121_v41 }
 0x1be   : > { %v1284_v27 = vpop.f32.mrf.mxu2 }
 0x1bf   : > { %vm1152_vm13 = vcmp.gt.f32.partialorder %v1128_v4, 0.0  ;;  %v1168_v11 = vmul.f32 0.2, %v1128_v4  ;;  %v1285_v36 = vadd.f32 %v1284_v27, %v8125_v43  ;;  %v1004_v58 = vmul.f32 0.2, %v956_v42 }
 0x1c0   : > { %v973_v22 = vpop.f32.mrf.mxu1  ;;  %vm988_vm2 = vcmp.gt.f32.partialorder %v956_v42, 0.0 }
 0x1c1   : > { %v8210_v1 = vsel %vm1152_vm13, %v1128_v4, %v1168_v11  ;;  %vm1320_vm14 = vcmp.gt.f32.partialorder %v1285_v36, 0.0  ;;  %v1336_v20 = vmul.f32 0.2, %v1285_v36  ;;  %v8222_v11 = vpop.permute.xlu0 %851 }
 0x1c2   : > { %12631 = vst [vmem:[#allocation17_spill] sm:$0xff] %v8222_v11  ;;  %v974_v56 = vadd.f32 %v973_v22, %v8222_v11 }
 0x1c3   : > { %v1352_v9 = vsel %vm1320_vm14, %v1285_v36, %v1336_v20  ;;  %7029 = vmatmul.msk.bf16.gmra.mxu1 %vm909_vm3, %v8025_v61  ;;  %7047 = vmatmul.msk.bf16.gmra.mxu2 %vm723_vm1, %v7847_v16 }
 0x1c4   : > { %v8218_v10 = vmax.f32 %v1193_v21, %v1352_v9  ;;  %v8220_v15 = vpop.f32.mrf.mxu3  ;;  %v1011_v36 = vmul.f32 0.2, %v974_v56  ;;  %vm995_vm5 = vcmp.gt.f32.partialorder %v974_v56, 0.0  ;;  %v1020_v21 = vsel %vm988_vm2, %v956_v42, %v1004_v58 }
 0x1c5   : > { %12630 = vst [vmem:[#allocation16_spill] sm:$0xff] %v8220_v15  ;;  %v1179_v9 = vsel %vm1147_vm4, %v1115_v33, %v1163_v60  ;;  %v1120_v58 = vadd.f32 %v8153_v17, %v8164_v39 }
 0x1c6   : > { %12629 = vst [vmem:[#allocation15_spill] sm:$0xff] %v8218_v10  ;;  %v1287_v53 = vpop.f32.mrf.mxu2  ;;  %v8240_v30 = vsel %vm995_vm5, %v974_v56, %v1011_v36  ;;  %v1195_v41 = vmax.f32 %v1020_v21, %v1179_v9  ;;  %v8255_v56 = vpop.permute.xlu2 %861 }
 0x1c7   : > { %v1288_v14 = vadd.f32 %v1287_v53, %v8109_v25  ;;  %12637 = vst [vmem:[#allocation22_spill] sm:$0xff] %v8255_v56  ;;  %v1165_v9 = vmul.f32 0.2, %v1120_v58  ;;  %vm1149_vm10 = vcmp.gt.f32.partialorder %v1120_v58, 0.0 }
 0x1c8   : > { %v8230_v4 = vpop.f32.mrf.mxu1 }
 0x1c9   : > { %12632 = vst [vmem:[#allocation18_spill] sm:$0xff] %v8230_v4  ;;  %vm1321_vm15 = vcmp.gt.f32.partialorder %v1288_v14, 0.0  ;;  %v1337_v16 = vmul.f32 0.2, %v1288_v14 }
 0x1cb   : > { %v1353_v27 = vsel %vm1321_vm15, %v1288_v14, %v1337_v16 }
 0x1cc   : > { %v8237_v45 = vmax.f32 %v12634_v29, %v1353_v27  ;;  %v1132_v20 = vpop.f32.mrf.mxu3 }
 0x1cd   : > { %v1133_v22 = vadd.f32 %v1132_v20, %v8222_v11 }
 0x1ce   : > { %v1289_v53 = vpop.f32.mrf.mxu2 }
 0x1cf   : > { %vm1154_vm6 = vcmp.gt.f32.partialorder %v1133_v22, 0.0  ;;  %v1170_v10 = vmul.f32 0.2, %v1133_v22  ;;  %v1290_v14 = vadd.f32 %v1289_v53, %v8140_v49 }
 0x1d0   : > { %v978_v16 = vpop.f32.mrf.mxu1 }
 0x1d1   : > { %v8243_v62 = vsel %vm1154_vm6, %v1133_v22, %v1170_v10  ;;  %vm1322_vm7 = vcmp.gt.f32.partialorder %v1290_v14, 0.0  ;;  %v1338_v28 = vmul.f32 0.2, %v1290_v14  ;;  %v961_v10 = vadd.f32 %v8136_v47, %v8164_v39 }
 0x1d2   : > { %v979_v20 = vadd.f32 %v978_v16, %v8255_v56  ;;  %v12639_v47 = vmax.f32 %v8143_v57, %v8145_v59 }
 0x1d3   : > { %v1354_v29 = vsel %vm1322_vm7, %v1290_v14, %v1338_v28  ;;  %7030 = vmatmul.msk.bf16.gmra.mxu1 %vm909_vm3, %v8047_v8  ;;  %7048 = vmatmul.msk.bf16.gmra.mxu2 %vm723_vm1, %v7862_v18  ;;  %v1006_v21 = vmul.f32 0.2, %v961_v10  ;;  %vm990_vm9 = vcmp.gt.f32.partialorder %v961_v10, 0.0 }
 0x1d4   : > { %v8251_v42 = vmax.f32 %v1195_v41, %v1354_v29  ;;  %v8253_v33 = vpop.f32.mrf.mxu3  ;;  %v1013_v14 = vmul.f32 0.2, %v979_v20  ;;  %vm997_vm11 = vcmp.gt.f32.partialorder %v979_v20, 0.0  ;;  %v1181_v29 = vsel %vm1149_vm10, %v1120_v58, %v1165_v9 }
 0x1d5   : > { %12636 = vst [vmem:[#allocation21_spill] sm:$0xff] %v8253_v33  ;;  %v1022_v16 = vsel %vm990_vm9, %v961_v10, %v1006_v21 }
 0x1d6   : > { %12635 = vst [vmem:[#allocation20_spill] sm:$0xff] %v8251_v42  ;;  %v1292_v60 = vpop.f32.mrf.mxu2  ;;  %v8271_v27 = vsel %vm997_vm11, %v979_v20, %v1013_v14  ;;  %v8282_v20 = vld [vmem:[%s12588_s1] sm:$0xff] }
 0x1d7   : > { %v1293_v36 = vadd.f32 %v1292_v60, %v8133_v46 }
 0x1d8   : > { %v8263_v22 = vpop.f32.mrf.mxu1 }
 0x1d9   : > { %12638 = vst [vmem:[#allocation23_spill] sm:$0xff] %v8263_v22  ;;  %vm1323_vm8 = vcmp.gt.f32.partialorder %v1293_v36, 0.0  ;;  %v1339_v18 = vmul.f32 0.2, %v1293_v36 }
 0x1db   : > { %v1355_v53 = vsel %vm1323_vm8, %v1293_v36, %v1339_v18 }
 0x1dc   : > { %v8268_v28 = vmax.f32 %v12639_v47, %v1355_v53  ;;  %v1137_v17 = vpop.f32.mrf.mxu3  ;;  %v1197_v53 = vmax.f32 %v1022_v16, %v1181_v29  ;;  %v12646_v47 = vmax.f32 %v8205_v26, %v8210_v1 }
 0x1dd   : > { %v1138_v41 = vadd.f32 %v1137_v17, %v8255_v56 }
 0x1de   : > { %v1294_v60 = vpop.f32.mrf.mxu2 }
 0x1df   : > { %vm1156_vm12 = vcmp.gt.f32.partialorder %v1138_v41, 0.0  ;;  %v1172_v42 = vmul.f32 0.2, %v1138_v41  ;;  %v1295_v49 = vadd.f32 %v1294_v60, %v8164_v39  ;;  %v12643_v60 = vmax.f32 %v8172_v54, %v8175_v5 }
 0x1e0   : > { %v1452_v36 = vpop.f32.mrf.mxu1 }
 0x1e1   : > { %v8274_v18 = vsel %vm1156_vm12, %v1138_v41, %v1172_v42  ;;  %vm1324_vm13 = vcmp.gt.f32.partialorder %v1295_v49, 0.0  ;;  %v1340_v57 = vmul.f32 0.2, %v1295_v49  ;;  %v1453_v59 = vadd.f32 %v1452_v36, %v8069_v52 }
 0x1e3   : > { %v1356_v10 = vsel %vm1324_vm13, %v1295_v49, %v1340_v57  ;;  %vm1492_vm14 = vcmp.gt.f32.partialorder %v1453_v59, 0.0  ;;  %v1508_v58 = vmul.f32 0.2, %v1453_v59  ;;  %7058 = vmatmul.msk.bf16.vlgmr.msrb.gmra.mxu2 %vm723_vm1, %v8282_v20 }
 0x1e4   : > { %v8286_v42 = vmax.f32 %v1197_v53, %v1356_v10  ;;  %v8288_v21 = vpop.f32.mrf.mxu3 }
 0x1e5   : > { %12641 = vst [vmem:[#allocation25_spill] sm:$0xff] %v8288_v21  ;;  %v8290_v9 = vsel %vm1492_vm14, %v1453_v59, %v1508_v58 }
 0x1e6   : > { %12640 = vst [vmem:[#allocation24_spill] sm:$0xff] %v8286_v42  ;;  %v1297_v49 = vpop.f32.mrf.mxu2 }
 0x1e7   : > { %v1298_v17 = vadd.f32 %v1297_v49, %v8155_v6  ;;  %v8310_v49 = vld [vmem:[%s12588_s1 + $0x8] sm:$0xff] }
 0x1e8   : > { %v8295_v41 = vpop.f32.mrf.mxu1 }
 0x1e9   : > { %12642 = vst [vmem:[#allocation26_spill] sm:$0xff] %v8295_v41  ;;  %vm1325_vm15 = vcmp.gt.f32.partialorder %v1298_v17, 0.0  ;;  %v1341_v16 = vmul.f32 0.2, %v1298_v17 }
 0x1eb   : > { %v1357_v29 = vsel %vm1325_vm15, %v1298_v17, %v1341_v16 }
 0x1ec   : > { %v8300_v36 = vmax.f32 %v12643_v60, %v1357_v29  ;;  %v8302_v57 = vpop.f32.mrf.mxu3 }
 0x1ee   : > { %v8304_v59 = vpop.f32.mrf.mxu2 }
 0x1ef   : > { %12644 = vst [vmem:[#allocation27_spill] sm:$0xff] %v8304_v59 }
 0x1f0   : > { %v1457_v53 = vpop.f32.mrf.mxu1 }
 0x1f1   : > { %v1458_v10 = vadd.f32 %v1457_v53, %v8087_v0 }
 0x1f3   : > { %vm1494_vm2 = vcmp.gt.f32.partialorder %v1458_v10, 0.0  ;;  %v1510_v58 = vmul.f32 0.2, %v1458_v10  ;;  %7059 = vmatmul.msk.bf16.gmra.mxu2 %vm723_vm1, %v8310_v49 }
 0x1f4   : > { %v8314_v54 = vpop.f32.mrf.mxu3 }
 0x1f5   : > { %v8316_v5 = vsel %vm1494_vm2, %v1458_v10, %v1510_v58 }
 0x1f6   : > { %v1302_v16 = vpop.f32.mrf.mxu2 }
 0x1f7   : > { %v1303_v29 = vadd.f32 %v1302_v16, %v8187_v7  ;;  %v8334_v16 = vld [vmem:[%s12588_s1 + $0x10] sm:$0xff] }
 0x1f8   : > { %v8321_v60 = vpop.f32.mrf.mxu1 }
 0x1f9   : > { %12645 = vst [vmem:[#allocation28_spill] sm:$0xff] %v8321_v60  ;;  %vm1327_vm4 = vcmp.gt.f32.partialorder %v1303_v29, 0.0  ;;  %v1343_v53 = vmul.f32 0.2, %v1303_v29  ;;  %v12649_v60 = vmax.f32 %v8240_v30, %v8243_v62 }
 0x1fb   : > { %v1359_v14 = vsel %vm1327_vm4, %v1303_v29, %v1343_v53 }
 0x1fc   : > { %v8326_v42 = vmax.f32 %v12646_v47, %v1359_v14  ;;  %v1575_v39 = vpop.f32.mrf.mxu3 }
 0x1fe   : > { %v8328_v43 = vpop.f32.mrf.mxu2 }
 0x1ff   : > { %12647 = vst [vmem:[#allocation29_spill] sm:$0xff] %v8328_v43 }
 0x200   : > { %v1462_v10 = vpop.f32.mrf.mxu1 }
 0x201   : > { %v1463_v58 = vadd.f32 %v1462_v10, %v8109_v25 }
 0x203   : > { %vm1496_vm5 = vcmp.gt.f32.partialorder %v1463_v58, 0.0  ;;  %v1512_v17 = vmul.f32 0.2, %v1463_v58  ;;  %7060 = vmatmul.msk.bf16.gmra.mxu2 %vm723_vm1, %v8334_v16 }
 0x204   : > { %v1577_v29 = vpop.f32.mrf.mxu3 }
 0x205   : > { %v8338_v26 = vsel %vm1496_vm5, %v1463_v58, %v1512_v17 }
 0x206   : > { %v1307_v47 = vpop.f32.mrf.mxu2 }
 0x207   : > { %v1308_v14 = vadd.f32 %v1307_v47, %v8222_v11  ;;  %v8356_v47 = vld [vmem:[%s12588_s1 + $0x18] sm:$0xff] }
 0x208   : > { %v8343_v53 = vpop.f32.mrf.mxu1 }
 0x209   : > { %12648 = vst [vmem:[#allocation30_spill] sm:$0xff] %v8343_v53  ;;  %vm1329_vm6 = vcmp.gt.f32.partialorder %v1308_v14, 0.0  ;;  %v1345_v10 = vmul.f32 0.2, %v1308_v14  ;;  %v12652_v53 = vmax.f32 %v8271_v27, %v8274_v18  ;;  %v1573_v27 = vadd.f32 %v8314_v54, %v7910_v51 }
 0x20b   : > { %v1361_v43 = vsel %vm1329_vm6, %v1308_v14, %v1345_v10  ;;  %v1599_v3 = vmul.f32 0.2, %v1573_v27  ;;  %vm1591_vm2 = vcmp.gt.f32.partialorder %v1573_v27, 0.0 }
 0x20c   : > { %v8348_v59 = vmax.f32 %v12649_v60, %v1361_v43  ;;  %v1580_v41 = vpop.f32.mrf.mxu3 }
 0x20e   : > { %v8350_v34 = vpop.f32.mrf.mxu2 }
 0x20f   : > { %12650 = vst [vmem:[#allocation31_spill] sm:$0xff] %v8350_v34 }
 0x210   : > { %v1467_v17 = vpop.f32.mrf.mxu1 }
 0x211   : > { %v1468_v58 = vadd.f32 %v1467_v17, %v8133_v46 }
 0x213   : > { %vm1498_vm7 = vcmp.gt.f32.partialorder %v1468_v58, 0.0  ;;  %v1514_v1 = vmul.f32 0.2, %v1468_v58  ;;  %7061 = vmatmul.msk.bf16.gmra.mxu2 %vm723_vm1, %v8356_v47 }
 0x214   : > { %v1582_v14 = vpop.f32.mrf.mxu3 }
 0x215   : > { %v8360_v62 = vsel %vm1498_vm7, %v1468_v58, %v1514_v1 }
 0x216   : > { %v1312_v30 = vpop.f32.mrf.mxu2 }
 0x217   : > { %v1313_v60 = vadd.f32 %v1312_v30, %v8255_v56  ;;  %v1583_v30 = vadd.f32 %v1582_v14, %v7896_v38 }
 0x218   : > { %v8365_v10 = vpop.f32.mrf.mxu1 }
 0x219   : > { %12651 = vst [vmem:[#allocation32_spill] sm:$0xff] %v8365_v10  ;;  %vm1331_vm8 = vcmp.gt.f32.partialorder %v1313_v60, 0.0  ;;  %v1347_v17 = vmul.f32 0.2, %v1313_v60  ;;  %vm1595_vm12 = vcmp.gt.f32.partialorder %v1583_v30, 0.0 }
 0x21b   : > { %v1363_v34 = vsel %vm1331_vm8, %v1313_v60, %v1347_v17  ;;  %v1581_v60 = vadd.f32 %v1580_v41, %v7890_v32  ;;  %v1576_v41 = vadd.f32 %v1575_v39, %v7892_v35 }
 0x21c   : > { %v8370_v21 = vmax.f32 %v12652_v53, %v1363_v34  ;;  %v1585_v22 = vpop.f32.mrf.mxu3  ;;  %v1603_v53 = vmul.f32 0.2, %v1583_v30 }
 0x21d   : > { %v1586_v58 = vadd.f32 %v1585_v22, %v7888_v31  ;;  %v1578_v22 = vadd.f32 %v1577_v29, %v7903_v44  ;;  %vm1594_vm13 = vcmp.gt.f32.partialorder %v1581_v60, 0.0  ;;  %v1571_v29 = vadd.f32 %v8302_v57, %v7908_v50 }
 0x21e   : > { %v8372_v33 = vpop.f32.mrf.mxu2  ;;  %v1611_v12 = vsel %vm1595_vm12, %v1583_v30, %v1603_v53  ;;  %v1600_v63 = vmul.f32 0.2, %v1576_v41  ;;  %vm1592_vm15 = vcmp.gt.f32.partialorder %v1576_v41, 0.0 }
 0x21f   : > { %12653 = vst [vmem:[#allocation33_spill] sm:$0xff] %v8372_v33  ;;  %v1604_v17 = vmul.f32 0.2, %v1586_v58  ;;  %vm1596_vm10 = vcmp.gt.f32.partialorder %v1586_v58, 0.0  ;;  %v1601_v40 = vmul.f32 0.2, %v1578_v22 }
 0x220   : > { %v1472_v1 = vpop.f32.mrf.mxu1  ;;  %vm1593_vm14 = vcmp.gt.f32.partialorder %v1578_v22, 0.0  ;;  %vm1590_vm4 = vcmp.gt.f32.partialorder %v1571_v29, 0.0 }
 0x221   : > { %v1473_v43 = vadd.f32 %v1472_v1, %v8155_v6 }
 0x223   : > { %vm1500_vm9 = vcmp.gt.f32.partialorder %v1473_v43, 0.0  ;;  %v1516_v10 = vmul.f32 0.2, %v1473_v43 }
 0x224   : > { %v1587_v4 = vpop.f32.mrf.mxu3 }
 0x225   : > { %v8378_v15 = vsel %vm1500_vm9, %v1473_v43, %v1516_v10  ;;  %v1588_v34 = vadd.f32 %v1587_v4, %v7894_v37  ;;  %v1602_v43 = vmul.f32 0.2, %v1581_v60  ;;  %v1612_v10 = vsel %vm1596_vm10, %v1586_v58, %v1604_v17 }
 0x226   : > { %v8383_v18 = vpop.f32.mrf.mxu2  ;;  %v1609_v58 = vsel %vm1593_vm14, %v1578_v22, %v1601_v40 }
 0x227   : > { %vm1597_vm11 = vcmp.gt.f32.partialorder %v1588_v34, 0.0  ;;  %v1605_v14 = vmul.f32 0.2, %v1588_v34  ;;  %v1610_v19 = vsel %vm1594_vm13, %v1581_v60, %v1602_v43 }
 0x228   : > { %v8386_v1 = vpop.f32.mrf.mxu1  ;;  %v1616_v39 = vpack.c.bf16 %v1611_v12, %v1610_v19 }
 0x229   : > { %12654 = vst [vmem:[#allocation34_spill] sm:$0xff] %v8386_v1  ;;  %v1613_v33 = vsel %vm1597_vm11, %v1588_v34, %v1605_v14  ;;  %v1608_v34 = vsel %vm1592_vm15, %v1576_v41, %v1600_v63  ;;  %v1607_v14 = vsel %vm1591_vm2, %v1573_v27, %v1599_v3  ;;  %v8403_v63 = vld [vmem:[%s12589_s2] sm:$0xff] }
 0x22a   : > { %v1617_v4 = vpack.c.bf16 %v1613_v33, %v1612_v10  ;;  %v1598_v33 = vmul.f32 0.2, %v1571_v29  ;;  %v1615_v30 = vpack.c.bf16 %v1609_v58, %v1608_v34 }
 0x22c   : > { %1622 = vmatpush.bf16.msrb.mxu0 %v1617_v4  ;;  %v1606_v60 = vsel %vm1590_vm4, %v1571_v29, %v1598_v33 }
 0x22d   : > { %v1614_v12 = vpack.c.bf16 %v1607_v14, %v1606_v60 }
 0x22e   : > { %v1747_v1 = vpop.f32.mrf.mxu2 }
 0x22f   : > { %v1748_v4 = vadd.f32 %v1747_v1, %v7910_v51  ;;  %v8435_v1 = vld [vmem:[%s12589_s2 + $0x18] sm:$0xff] }
 0x230   : > { %v1477_v17 = vpop.f32.mrf.mxu1  ;;  %1623 = vmatpush.bf16.msrb.mxu0 %v1616_v39 }
 0x231   : > { %v1478_v54 = vadd.f32 %v1477_v17, %v8187_v7  ;;  %vm1766_vm14 = vcmp.gt.f32.partialorder %v1748_v4, 0.0 }
 0x233   : > { %vm1502_vm5 = vcmp.gt.f32.partialorder %v1478_v54, 0.0  ;;  %v1518_v53 = vmul.f32 0.2, %v1478_v54 }
 0x234   : > { %1624 = vmatpush.bf16.msrb.mxu0 %v1615_v30 }
 0x235   : > { %v8394_v57 = vsel %vm1502_vm5, %v1478_v54, %v1518_v53 }
 0x236   : > { %v1750_v40 = vpop.f32.mrf.mxu2 }
 0x238   : > { %v8398_v22 = vpop.f32.mrf.mxu1  ;;  %1625 = vmatpush.bf16.msrb.mxu0 %v1614_v12 }
 0x239   : > { %12655 = vst [vmem:[#allocation35_spill] sm:$0xff] %v8398_v22 }
 0x23b   : > { %7036 = vmatmul.msk.bf16.vlgmr.msrb.gmra.mxu0 %vm909_vm3, %v8403_v63 }
 0x23e   : > { %v1752_v3 = vpop.f32.mrf.mxu2 }
 0x240   : > { %v1482_v27 = vpop.f32.mrf.mxu1 }
 0x241   : > { %v1483_v41 = vadd.f32 %v1482_v27, %v8222_v11 }
 0x243   : > { %vm1504_vm6 = vcmp.gt.f32.partialorder %v1483_v41, 0.0  ;;  %v1520_v43 = vmul.f32 0.2, %v1483_v41 }
 0x245   : > { %v8408_v10 = vsel %vm1504_vm6, %v1483_v41, %v1520_v43  ;;  %v1753_v43 = vadd.f32 %v1752_v3, %v7903_v44  ;;  %v1746_v3 = vadd.f32 %v8383_v18, %v7908_v50 }
 0x246   : > { %v1755_v29 = vpop.f32.mrf.mxu2 }
 0x247   : > { %v1756_v12 = vadd.f32 %v1755_v29, %v7890_v32  ;;  %v1776_v29 = vmul.f32 0.2, %v1753_v43  ;;  %vm1768_vm12 = vcmp.gt.f32.partialorder %v1753_v43, 0.0  ;;  %vm1765_vm15 = vcmp.gt.f32.partialorder %v1746_v3, 0.0 }
 0x248   : > { %v8412_v39 = vpop.f32.mrf.mxu1 }
 0x249   : > { %12656 = vst [vmem:[#allocation36_spill] sm:$0xff] %v8412_v39  ;;  %vm1769_vm11 = vcmp.gt.f32.partialorder %v1756_v12, 0.0 }
 0x24b   : > { %7037 = vmatmul.msk.bf16.gmra.mxu0 %vm909_vm3, %v7948_v13 }
 0x24e   : > { %v1757_v58 = vpop.f32.mrf.mxu2 }
 0x24f   : > { %v1758_v60 = vadd.f32 %v1757_v58, %v7896_v38 }
 0x250   : > { %v1487_v17 = vpop.f32.mrf.mxu1 }
 0x251   : > { %v1488_v33 = vadd.f32 %v1487_v17, %v8255_v56  ;;  %v1778_v17 = vmul.f32 0.2, %v1758_v60  ;;  %vm1770_vm10 = vcmp.gt.f32.partialorder %v1758_v60, 0.0 }
 0x253   : > { %vm1506_vm7 = vcmp.gt.f32.partialorder %v1488_v33, 0.0  ;;  %v1522_v54 = vmul.f32 0.2, %v1488_v33  ;;  %v1786_v19 = vsel %vm1770_vm10, %v1758_v60, %v1778_v17 }
 0x255   : > { %v8417_v34 = vsel %vm1506_vm7, %v1488_v33, %v1522_v54  ;;  %v1751_v54 = vadd.f32 %v1750_v40, %v7892_v35  ;;  %v1774_v40 = vmul.f32 0.2, %v1748_v4 }
 0x256   : > { %12657 = vst [vmem:[#allocation37_spill] sm:$0xff] %v8417_v34  ;;  %v1760_v53 = vpop.f32.mrf.mxu2 }
 0x257   : > { %v1761_v14 = vadd.f32 %v1760_v53, %v7888_v31  ;;  %v1777_v53 = vmul.f32 0.2, %v1756_v12  ;;  %v1775_v39 = vmul.f32 0.2, %v1751_v54  ;;  %vm1767_vm13 = vcmp.gt.f32.partialorder %v1751_v54, 0.0 }
 0x259   : > { %v1779_v27 = vmul.f32 0.2, %v1761_v14  ;;  %vm1771_vm8 = vcmp.gt.f32.partialorder %v1761_v14, 0.0  ;;  %v1785_v22 = vsel %vm1769_vm11, %v1756_v12, %v1777_v53  ;;  %v1783_v60 = vsel %vm1767_vm13, %v1751_v54, %v1775_v39  ;;  %v8457_v54 = vld [vmem:[%s12589_s2 + $0x10] sm:$0xff] }
 0x25a   : > { %v1791_v34 = vpack.c.bf16 %v1786_v19, %v1785_v22  ;;  %v1782_v12 = vsel %vm1766_vm14, %v1748_v4, %v1774_v40  ;;  %v8448_v4 = vld [vmem:[%s12589_s2 + $0x8] sm:$0xff] }
 0x25b   : > { %7038 = vmatmul.msk.bf16.gmra.mxu0 %vm909_vm3, %v7959_v2  ;;  %v1787_v30 = vsel %vm1771_vm8, %v1761_v14, %v1779_v27  ;;  %v1784_v14 = vsel %vm1768_vm12, %v1753_v43, %v1776_v29 }
 0x25c   : > { %v1790_v18 = vpack.c.bf16 %v1784_v14, %v1783_v60 }
 0x25e   : > { %v1762_v13 = vpop.f32.mrf.mxu2 }
 0x25f   : > { %v1763_v41 = vadd.f32 %v1762_v13, %v7894_v37 }
 0x261   : > { %vm1772_vm9 = vcmp.gt.f32.partialorder %v1763_v41, 0.0  ;;  %v1780_v33 = vmul.f32 0.2, %v1763_v41 }
 0x263   : > { %v1788_v2 = vsel %vm1772_vm9, %v1763_v41, %v1780_v33  ;;  %v7070_v41 = vld [vmem:[%s7788_s29 + $0x1c] sm:$0x7] }
 0x264   : > { %v1792_v58 = vpack.c.bf16 %v1788_v2, %v1787_v30  ;;  %v1773_v30 = vmul.f32 0.2, %v1746_v3 }
 0x266   : > { %1797 = vmatpush.bf16.msra.mxu3 %v1792_v58  ;;  %v1920_v13 = vpop.f32.mrf.mxu2  ;;  %v1781_v22 = vsel %vm1765_vm15, %v1746_v3, %v1773_v30 }
 0x267   : > { %v1789_v27 = vpack.c.bf16 %v1782_v12, %v1781_v22 }
 0x26a   : > { %1798 = vmatpush.bf16.msra.mxu3 %v1791_v34  ;;  %v2084_v34 = vsel %vm736_vm0, %v7070_v41, 0 }
 0x26b   : > { %7039 = vmatmul.msk.bf16.gmra.mxu0 %vm909_vm3, %v8435_v1 }
 0x26c   : > { %2093 = vmatpush.bf16.msra.mxu0 %v2084_v34 }
 0x26e   : > { %1799 = vmatpush.bf16.msra.mxu3 %v1790_v18  ;;  %v1922_v19 = vpop.f32.mrf.mxu2 }
 0x272   : > { %1800 = vmatpush.bf16.msra.mxu3 %v1789_v27  ;;  %v1923_v27 = vadd.f32 %v1922_v19, %v7910_v51 }
 0x274   : > { %vm1941_vm9 = vcmp.gt.f32.partialorder %v1923_v27, 0.0 }
 0x275   : > { %7049 = vmatmul.msk.bf16.vlgmr.msra.gmra.mxu3 %vm909_vm3, %v8403_v63 }
 0x276   : > { %v1925_v43 = vpop.f32.mrf.mxu2 }
 0x277   : > { %v1926_v60 = vadd.f32 %v1925_v43, %v7892_v35 }
 0x279   : > { %vm1942_vm8 = vcmp.gt.f32.partialorder %v1926_v60, 0.0 }
 0x27b   : > { %7040 = vmatmul.msk.bf16.gmra.mxu0 %vm909_vm3, %v7989_v48 }
 0x27e   : > { %v1927_v39 = vpop.f32.mrf.mxu2 }
 0x27f   : > { %v1928_v40 = vadd.f32 %v1927_v39, %v7903_v44  ;;  %v1921_v39 = vadd.f32 %v1920_v13, %v7908_v50  ;;  %v8478_v13 = vld [vmem:[%s12589_s2 + $0x20] sm:$0xff] }
 0x281   : > { %v1951_v41 = vmul.f32 0.2, %v1928_v40  ;;  %vm1943_vm7 = vcmp.gt.f32.partialorder %v1928_v40, 0.0  ;;  %vm1940_vm10 = vcmp.gt.f32.partialorder %v1921_v39, 0.0 }
 0x285   : > { %7050 = vmatmul.msk.bf16.gmra.mxu3 %vm909_vm3, %v8448_v4 }
 0x286   : > { %v1930_v17 = vpop.f32.mrf.mxu2 }
 0x28b   : > { %7041 = vmatmul.msk.bf16.gmra.mxu0 %vm909_vm3, %v8008_v55  ;;  %v1931_v55 = vadd.f32 %v1930_v17, %v7890_v32  ;;  %v1950_v17 = vmul.f32 0.2, %v1926_v60 }
 0x28d   : > { %v1952_v18 = vmul.f32 0.2, %v1931_v55  ;;  %vm1944_vm6 = vcmp.gt.f32.partialorder %v1931_v55, 0.0  ;;  %v1958_v19 = vsel %vm1942_vm8, %v1926_v60, %v1950_v17  ;;  %v12658_v60 = vmax.f32 %v8169_v24, %v8290_v9  ;;  %v7083_v17 = vld [vmem:[%s7788_s29 + $0x20] sm:$0x7] }
 0x28e   : > { %v1932_v33 = vpop.f32.mrf.mxu2 }
 0x28f   : > { %v1933_v2 = vadd.f32 %v1932_v33, %v7896_v38  ;;  %v1960_v33 = vsel %vm1944_vm6, %v1931_v55, %v1952_v18 }
 0x291   : > { %v1953_v14 = vmul.f32 0.2, %v1933_v2  ;;  %vm1945_vm5 = vcmp.gt.f32.partialorder %v1933_v2, 0.0 }
 0x293   : > { %v1961_v34 = vsel %vm1945_vm5, %v1933_v2, %v1953_v14 }
 0x294   : > { %v1966_v43 = vpack.c.bf16 %v1961_v34, %v1960_v33  ;;  %v2259_v33 = vsel %vm736_vm0, %v7083_v17, 0 }
 0x295   : > { %7051 = vmatmul.msk.bf16.gmra.mxu3 %vm909_vm3, %v8457_v54 }
 0x296   : > { %v1935_v48 = vpop.f32.mrf.mxu2  ;;  %2268 = vmatpush.bf16.msrb.mxu3 %v2259_v33 }
 0x297   : > { %v1936_v53 = vadd.f32 %v1935_v48, %v7888_v31  ;;  %v1949_v48 = vmul.f32 0.2, %v1923_v27 }
 0x299   : > { %v1954_v29 = vmul.f32 0.2, %v1936_v53  ;;  %vm1946_vm2 = vcmp.gt.f32.partialorder %v1936_v53, 0.0  ;;  %v1957_v2 = vsel %vm1941_vm9, %v1923_v27, %v1949_v48 }
 0x29b   : > { %7042 = vmatmul.msk.bf16.gmra.mxu0 %vm909_vm3, %v8025_v61  ;;  %v1962_v12 = vsel %vm1946_vm2, %v1936_v53, %v1954_v29  ;;  %v1959_v53 = vsel %vm1943_vm7, %v1928_v40, %v1951_v41  ;;  %v12660_v41 = vmax.f32 %v8202_v23, %v8316_v5 }
 0x29c   : > { %v1965_v29 = vpack.c.bf16 %v1959_v53, %v1958_v19 }
 0x29e   : > { %v1937_v58 = vpop.f32.mrf.mxu2 }
 0x29f   : > { %v1938_v3 = vadd.f32 %v1937_v58, %v7894_v37  ;;  %v1948_v58 = vmul.f32 0.2, %v1921_v39 }
 0x2a1   : > { %vm1947_vm4 = vcmp.gt.f32.partialorder %v1938_v3, 0.0  ;;  %v1955_v30 = vmul.f32 0.2, %v1938_v3 }
 0x2a3   : > { %v1963_v61 = vsel %vm1947_vm4, %v1938_v3, %v1955_v30  ;;  %v1956_v3 = vsel %vm1940_vm10, %v1921_v39, %v1948_v58  ;;  %v12662_v58 = vmax.f32 %v8237_v45, %v8338_v26 }
 0x2a4   : > { %v1967_v22 = vpack.c.bf16 %v1963_v61, %v1962_v12  ;;  %v1964_v14 = vpack.c.bf16 %v1957_v2, %v1956_v3  ;;  %v8497_v61 = vld [vmem:[%s12589_s2 + $0x28] sm:$0xff]  ;;  %v8537_v2 = vld [vmem:[%s12589_s2 + $0x38] sm:$0xff] }
 0x2a5   : > { %7052 = vmatmul.msk.bf16.gmra.mxu3 %vm909_vm3, %v8435_v1 }
 0x2a6   : > { %1972 = vmatpush.bf16.msra.mxu1 %v1967_v22 }
 0x2aa   : > { %1973 = vmatpush.bf16.msra.mxu1 %v1966_v43  ;;  %v8518_v43 = vld [vmem:[%s12589_s2 + $0x30] sm:$0xff] }
 0x2ab   : > { %7043 = vmatmul.msk.bf16.gmra.mxu0 %vm909_vm3, %v8047_v8 }
 0x2ae   : > { %1974 = vmatpush.bf16.msra.mxu1 %v1965_v29 }
 0x2b2   : > { %1975 = vmatpush.bf16.msra.mxu1 %v1964_v14 }
 0x2b5   : > { %7053 = vmatmul.msk.bf16.gmra.mxu3 %vm909_vm3, %v8478_v13  ;;  %7062 = vmatmul.msk.bf16.vlgmr.msra.gmra.mxu1 %vm909_vm3, %v8403_v63 }
 0x2b8   : > { %v1627_v8 = vpop.f32.mrf.mxu0 }
 0x2b9   : > { %v1628_v55 = vadd.f32 %v1627_v8, %v8069_v52  ;;  %v12664_v8 = vmax.f32 %v8268_v28, %v8360_v62 }
 0x2bb   : > { %vm1667_vm11 = vcmp.gt.f32.partialorder %v1628_v55, 0.0  ;;  %v1683_v40 = vmul.f32 0.2, %v1628_v55  ;;  %7071 = vmatmul.msk.bf16.vlgmr.msra.gmra.mxu0 %vm723_vm1, %v8282_v20 }
 0x2bd   : > { %v1699_v30 = vsel %vm1667_vm11, %v1628_v55, %v1683_v40 }
 0x2be   : > { %v8490_v18 = vmax.f32 %v12658_v60, %v1699_v30 }
 0x2c0   : > { %v8492_v12 = vpop.f32.mrf.mxu0 }
 0x2c1   : > { %12659 = vst [vmem:[#allocation38_spill] sm:$0xff] %v8492_v12 }
 0x2c5   : > { %7054 = vmatmul.msk.bf16.gmra.mxu3 %vm909_vm3, %v8497_v61  ;;  %7063 = vmatmul.msk.bf16.gmra.mxu1 %vm909_vm3, %v8448_v4 }
 0x2c8   : > { %v1632_v22 = vpop.f32.mrf.mxu0 }
 0x2c9   : > { %v1633_v27 = vadd.f32 %v1632_v22, %v8087_v0 }
 0x2cb   : > { %vm1669_vm12 = vcmp.gt.f32.partialorder %v1633_v27, 0.0  ;;  %v1685_v24 = vmul.f32 0.2, %v1633_v27  ;;  %7072 = vmatmul.msk.bf16.gmra.mxu0 %vm723_vm1, %v8310_v49 }
 0x2cd   : > { %v1701_v9 = vsel %vm1669_vm12, %v1633_v27, %v1685_v24 }
 0x2ce   : > { %v8509_v34 = vmax.f32 %v12660_v41, %v1701_v9  ;;  %v12666_v41 = vmax.f32 %v8300_v36, %v8378_v15 }
 0x2d0   : > { %v8511_v39 = vpop.f32.mrf.mxu0 }
 0x2d1   : > { %12661 = vst [vmem:[#allocation39_spill] sm:$0xff] %v8511_v39 }
 0x2d5   : > { %7055 = vmatmul.msk.bf16.gmra.mxu3 %vm909_vm3, %v8518_v43  ;;  %7064 = vmatmul.msk.bf16.gmra.mxu1 %vm909_vm3, %v8457_v54 }
 0x2d8   : > { %v1637_v23 = vpop.f32.mrf.mxu0 }
 0x2d9   : > { %v1638_v5 = vadd.f32 %v1637_v23, %v8109_v25 }
 0x2db   : > { %vm1671_vm13 = vcmp.gt.f32.partialorder %v1638_v5, 0.0  ;;  %v1687_v48 = vmul.f32 0.2, %v1638_v5  ;;  %7073 = vmatmul.msk.bf16.gmra.mxu0 %vm723_vm1, %v8334_v16 }
 0x2dd   : > { %v1703_v53 = vsel %vm1671_vm13, %v1638_v5, %v1687_v48 }
 0x2de   : > { %v8530_v19 = vmax.f32 %v12662_v58, %v1703_v53 }
 0x2e0   : > { %v8532_v29 = vpop.f32.mrf.mxu0 }
 0x2e1   : > { %12663 = vst [vmem:[#allocation40_spill] sm:$0xff] %v8532_v29 }
 0x2e5   : > { %7056 = vmatmul.msk.bf16.gmra.mxu3 %vm909_vm3, %v8537_v2  ;;  %7065 = vmatmul.msk.bf16.gmra.mxu1 %vm909_vm3, %v8435_v1 }
 0x2e8   : > { %v1642_v3 = vpop.f32.mrf.mxu0 }
 0x2e9   : > { %v1643_v14 = vadd.f32 %v1642_v3, %v8133_v46 }
 0x2eb   : > { %vm1673_vm14 = vcmp.gt.f32.partialorder %v1643_v14, 0.0  ;;  %v1689_v45 = vmul.f32 0.2, %v1643_v14  ;;  %7074 = vmatmul.msk.bf16.gmra.mxu0 %vm723_vm1, %v8356_v47 }
 0x2ed   : > { %v1705_v26 = vsel %vm1673_vm14, %v1643_v14, %v1689_v45 }
 0x2ee   : > { %v8549_v55 = vmax.f32 %v12664_v8, %v1705_v26  ;;  %v12669_v26 = vmax.f32 %v8326_v42, %v8394_v57 }
 0x2f0   : > { %v8551_v40 = vpop.f32.mrf.mxu0 }
 0x2f1   : > { %12665 = vst [vmem:[#allocation41_spill] sm:$0xff] %v8551_v40 }
 0x2f5   : > { %7066 = vmatmul.msk.bf16.gmra.mxu1 %vm909_vm3, %v8478_v13  ;;  %7084 = vmatmul.msk.bf16.vlgmr.msrb.gmra.mxu3 %vm723_vm1, %v8282_v20 }
 0x2f8   : > { %v1647_v30 = vpop.f32.mrf.mxu0  ;;  %v1802_v60 = vpop.f32.mrf.mxu3 }
 0x2f9   : > { %v1648_v22 = vadd.f32 %v1647_v30, %v8155_v6  ;;  %v1803_v27 = vadd.f32 %v1802_v60, %v8069_v52 }
 0x2fb   : > { %vm1675_vm15 = vcmp.gt.f32.partialorder %v1648_v22, 0.0  ;;  %v1691_v24 = vmul.f32 0.2, %v1648_v22  ;;  %vm1842_vm2 = vcmp.gt.f32.partialorder %v1803_v27, 0.0  ;;  %v1858_v28 = vmul.f32 0.2, %v1803_v27 }
 0x2fd   : > { %v1707_v62 = vsel %vm1675_vm15, %v1648_v22, %v1691_v24  ;;  %v8559_v9 = vsel %vm1842_vm2, %v1803_v27, %v1858_v28  ;;  %v7096_v27 = vld [vmem:[%s7788_s29 + $0x24] sm:$0x7] }
 0x2fe   : > { %v8564_v17 = vmax.f32 %v12666_v41, %v1707_v62  ;;  %v1890_v33 = vmax.f32 %v8490_v18, %v8559_v9  ;;  %v2434_v24 = vsel %vm736_vm0, %v7096_v27, 0 }
 0x2ff   : > { %2443 = vmatpush.bf16.msrb.mxu1 %v2434_v24 }
 0x300   : > { %v8568_v23 = vpop.f32.mrf.mxu0  ;;  %v8570_v5 = vpop.f32.mrf.mxu3 }
 0x301   : > { %12667 = vst [vmem:[#allocation42_spill] sm:$0xff] %v8568_v23 }
 0x302   : > { %12668 = vst [vmem:[#allocation43_spill] sm:$0xff] %v8570_v5 }
 0x305   : > { %7067 = vmatmul.msk.bf16.gmra.mxu1 %vm909_vm3, %v8497_v61  ;;  %7085 = vmatmul.msk.bf16.gmra.mxu3 %vm723_vm1, %v8310_v49 }
 0x308   : > { %v1652_v48 = vpop.f32.mrf.mxu0  ;;  %v1807_v53 = vpop.f32.mrf.mxu3 }
 0x309   : > { %v1653_v15 = vadd.f32 %v1652_v48, %v8187_v7  ;;  %v1808_v36 = vadd.f32 %v1807_v53, %v8087_v0 }
 0x30b   : > { %vm1677_vm4 = vcmp.gt.f32.partialorder %v1653_v15, 0.0  ;;  %v1693_v58 = vmul.f32 0.2, %v1653_v15  ;;  %vm1844_vm5 = vcmp.gt.f32.partialorder %v1808_v36, 0.0  ;;  %v1860_v3 = vmul.f32 0.2, %v1808_v36 }
 0x30d   : > { %v1709_v14 = vsel %vm1677_vm4, %v1653_v15, %v1693_v58  ;;  %v8578_v45 = vsel %vm1844_vm5, %v1808_v36, %v1860_v3  ;;  %v12672_v36 = vmax.f32 %v8348_v59, %v8408_v10  ;;  %v8618_v10 = vpop.f32.mrf.mxu1 }
 0x30e   : > { %v8583_v8 = vmax.f32 %v12669_v26, %v1709_v14  ;;  %12675 = vst [vmem:[#allocation48_spill] sm:$0xff] %v8618_v10 }
 0x310   : > { %v8587_v60 = vpop.f32.mrf.mxu0  ;;  %v8589_v22 = vpop.f32.mrf.mxu3 }
 0x311   : > { %12670 = vst [vmem:[#allocation44_spill] sm:$0xff] %v8587_v60 }
 0x312   : > { %12671 = vst [vmem:[#allocation45_spill] sm:$0xff] %v8589_v22 }
 0x315   : > { %7068 = vmatmul.msk.bf16.gmra.mxu1 %vm909_vm3, %v8518_v43  ;;  %7086 = vmatmul.msk.bf16.gmra.mxu3 %vm723_vm1, %v8334_v16 }
 0x318   : > { %v1657_v42 = vpop.f32.mrf.mxu0  ;;  %v1812_v57 = vpop.f32.mrf.mxu3 }
 0x319   : > { %v1658_v28 = vadd.f32 %v1657_v42, %v8222_v11  ;;  %v1813_v62 = vadd.f32 %v1812_v57, %v8109_v25 }
 0x31b   : > { %vm1679_vm6 = vcmp.gt.f32.partialorder %v1658_v28, 0.0  ;;  %v1695_v41 = vmul.f32 0.2, %v1658_v28  ;;  %vm1846_vm7 = vcmp.gt.f32.partialorder %v1813_v62, 0.0  ;;  %v1862_v48 = vmul.f32 0.2, %v1813_v62 }
 0x31d   : > { %v1711_v53 = vsel %vm1679_vm6, %v1658_v28, %v1695_v41  ;;  %v8599_v15 = vsel %vm1846_vm7, %v1813_v62, %v1862_v48  ;;  %v12676_v41 = vld [vmem:[#allocation37_spill] sm:$0xff] }
 0x31e   : > { %v8604_v58 = vmax.f32 %v12672_v36, %v1711_v53  ;;  %v1894_v3 = vmax.f32 %v8530_v19, %v8599_v15  ;;  %v12677_v48 = vmax.f32 %v8370_v21, %v12676_v41 }
 0x320   : > { %v8608_v14 = vpop.f32.mrf.mxu0  ;;  %v8610_v26 = vpop.f32.mrf.mxu3 }
 0x321   : > { %12673 = vst [vmem:[#allocation46_spill] sm:$0xff] %v8608_v14 }
 0x322   : > { %12674 = vst [vmem:[#allocation47_spill] sm:$0xff] %v8610_v26 }
 0x325   : > { %7069 = vmatmul.msk.bf16.gmra.mxu1 %vm909_vm3, %v8537_v2  ;;  %7087 = vmatmul.msk.bf16.gmra.mxu3 %vm723_vm1, %v8356_v47 }
 0x328   : > { %v1662_v27 = vpop.f32.mrf.mxu0  ;;  %v1817_v24 = vpop.f32.mrf.mxu3 }
 0x329   : > { %v1663_v42 = vadd.f32 %v1662_v27, %v8255_v56  ;;  %v1818_v59 = vadd.f32 %v1817_v24, %v8133_v46 }
 0x32b   : > { %vm1681_vm8 = vcmp.gt.f32.partialorder %v1663_v42, 0.0  ;;  %v1697_v19 = vmul.f32 0.2, %v1663_v42  ;;  %vm1848_vm9 = vcmp.gt.f32.partialorder %v1818_v59, 0.0  ;;  %v1864_v57 = vmul.f32 0.2, %v1818_v59 }
 0x32d   : > { %v1713_v28 = vsel %vm1681_vm8, %v1663_v42, %v1697_v19  ;;  %v8620_v62 = vsel %vm1848_vm9, %v1818_v59, %v1864_v57 }
 0x32e   : > { %v8625_v53 = vmax.f32 %v12677_v48, %v1713_v28  ;;  %v1896_v15 = vmax.f32 %v8549_v55, %v8620_v62 }
 0x330   : > { %v8629_v36 = vpop.f32.mrf.mxu0  ;;  %v8631_v27 = vpop.f32.mrf.mxu3 }
 0x331   : > { %12678 = vst [vmem:[#allocation37_spill] sm:$0xff] %v8629_v36 }
 0x332   : > { %12679 = vst [vmem:[#allocation49_spill] sm:$0xff] %v8631_v27  ;;  %v1977_v24 = vpop.f32.mrf.mxu1 }
 0x333   : > { %v1978_v30 = vadd.f32 %v1977_v24, %v8069_v52 }
 0x335   : > { %7097 = vmatmul.msk.bf16.vlgmr.msrb.gmra.mxu1 %vm723_vm1, %v8282_v20  ;;  %vm2017_vm10 = vcmp.gt.f32.partialorder %v1978_v30, 0.0  ;;  %v2033_v42 = vmul.f32 0.2, %v1978_v30 }
 0x337   : > { %v2049_v59 = vsel %vm2017_vm10, %v1978_v30, %v2033_v42 }
 0x338   : > { %v1822_v19 = vpop.f32.mrf.mxu3  ;;  %v8636_v21 = vpop.f32.mrf.mxu0  ;;  %v8641_v55 = vmax.f32 %v1890_v33, %v2049_v59 }
 0x339   : > { %v1823_v57 = vadd.f32 %v1822_v19, %v8155_v6  ;;  %v12682_v19 = vmax.f32 %v8509_v34, %v8578_v45 }
 0x33a   : > { %v8644_v28 = vpop.f32.mrf.mxu1 }
 0x33b   : > { %12680 = vst [vmem:[#allocation50_spill] sm:$0xff] %v8644_v28  ;;  %vm1850_vm11 = vcmp.gt.f32.partialorder %v1823_v57, 0.0  ;;  %v1866_v62 = vmul.f32 0.2, %v1823_v57 }
 0x33d   : > { %v8646_v41 = vsel %vm1850_vm11, %v1823_v57, %v1866_v62 }
 0x340   : > { %v8650_v30 = vpop.f32.mrf.mxu3  ;;  %v8652_v48 = vpop.f32.mrf.mxu0 }
 0x341   : > { %12681 = vst [vmem:[#allocation51_spill] sm:$0xff] %v8650_v30 }
 0x342   : > { %v1982_v24 = vpop.f32.mrf.mxu1 }
 0x343   : > { %v1983_v18 = vadd.f32 %v1982_v24, %v8087_v0 }
 0x345   : > { %7098 = vmatmul.msk.bf16.gmra.mxu1 %vm723_vm1, %v8310_v49  ;;  %vm2019_vm12 = vcmp.gt.f32.partialorder %v1983_v18, 0.0  ;;  %v2035_v9 = vmul.f32 0.2, %v1983_v18 }
 0x347   : > { %v2051_v33 = vsel %vm2019_vm12, %v1983_v18, %v2035_v9 }
 0x348   : > { %v1827_v42 = vpop.f32.mrf.mxu3  ;;  %v2100_v59 = vpop.f32.mrf.mxu0  ;;  %v8660_v57 = vmax.f32 %v12682_v19, %v2051_v33 }
 0x349   : > { %v1828_v62 = vadd.f32 %v1827_v42, %v8187_v7 }
 0x34a   : > { %v8663_v20 = vpop.f32.mrf.mxu1 }
 0x34b   : > { %12683 = vst [vmem:[#allocation52_spill] sm:$0xff] %v8663_v20  ;;  %vm1852_vm13 = vcmp.gt.f32.partialorder %v1828_v62, 0.0  ;;  %v1868_v30 = vmul.f32 0.2, %v1828_v62 }
 0x34d   : > { %v8665_v24 = vsel %vm1852_vm13, %v1828_v62, %v1868_v30 }
 0x350   : > { %v8669_v28 = vpop.f32.mrf.mxu3  ;;  %v2102_v18 = vpop.f32.mrf.mxu0 }
 0x351   : > { %12684 = vst [vmem:[#allocation53_spill] sm:$0xff] %v8669_v28 }
 0x352   : > { %v1987_v9 = vpop.f32.mrf.mxu1 }
 0x353   : > { %v1988_v27 = vadd.f32 %v1987_v9, %v8109_v25 }
 0x355   : > { %7099 = vmatmul.msk.bf16.gmra.mxu1 %vm723_vm1, %v8334_v16  ;;  %vm2021_vm14 = vcmp.gt.f32.partialorder %v1988_v27, 0.0  ;;  %v2037_v34 = vmul.f32 0.2, %v1988_v27 }
 0x357   : > { %v2053_v45 = vsel %vm2021_vm14, %v1988_v27, %v2037_v34 }
 0x358   : > { %v1832_v33 = vpop.f32.mrf.mxu3  ;;  %v2105_v42 = vpop.f32.mrf.mxu0  ;;  %v8674_v19 = vmax.f32 %v1894_v3, %v2053_v45 }
 0x359   : > { %v1833_v30 = vadd.f32 %v1832_v33, %v8222_v11 }
 0x35a   : > { %v8677_v62 = vpop.f32.mrf.mxu1 }
 0x35b   : > { %12685 = vst [vmem:[#allocation54_spill] sm:$0xff] %v8677_v62  ;;  %vm1854_vm15 = vcmp.gt.f32.partialorder %v1833_v30, 0.0  ;;  %v1870_v49 = vmul.f32 0.2, %v1833_v30 }
 0x35d   : > { %v8679_v28 = vsel %vm1854_vm15, %v1833_v30, %v1870_v49 }
 0x360   : > { %v8683_v20 = vpop.f32.mrf.mxu3  ;;  %v2107_v16 = vpop.f32.mrf.mxu0 }
 0x361   : > { %12686 = vst [vmem:[#allocation55_spill] sm:$0xff] %v8683_v20  ;;  %v2108_v26 = vadd.f32 %v2107_v16, %v7896_v38  ;;  %v2101_v16 = vadd.f32 %v2100_v59, %v7892_v35  ;;  %v2096_v59 = vadd.f32 %v8636_v21, %v7908_v50 }
 0x362   : > { %v1992_v36 = vpop.f32.mrf.mxu1 }
 0x363   : > { %v1993_v27 = vadd.f32 %v1992_v36, %v8133_v46  ;;  %vm2120_vm7 = vcmp.gt.f32.partialorder %v2108_v26, 0.0  ;;  %vm2117_vm11 = vcmp.gt.f32.partialorder %v2101_v16, 0.0  ;;  %vm2115_vm13 = vcmp.gt.f32.partialorder %v2096_v59, 0.0 }
 0x365   : > { %7100 = vmatmul.msk.bf16.gmra.mxu1 %vm723_vm1, %v8356_v47  ;;  %vm2023_vm2 = vcmp.gt.f32.partialorder %v1993_v27, 0.0  ;;  %v2039_v3 = vmul.f32 0.2, %v1993_v27 }
 0x367   : > { %v2055_v34 = vsel %vm2023_vm2, %v1993_v27, %v2039_v3 }
 0x368   : > { %v1837_v45 = vpop.f32.mrf.mxu3  ;;  %v2110_v33 = vpop.f32.mrf.mxu0  ;;  %v8688_v62 = vmax.f32 %v1896_v15, %v2055_v34  ;;  %v2106_v15 = vadd.f32 %v2105_v42, %v7890_v32 }
 0x369   : > { %v1838_v49 = vadd.f32 %v1837_v45, %v8255_v56  ;;  %v2111_v36 = vadd.f32 %v2110_v33, %v7888_v31 }
 0x36a   : > { %v8691_v30 = vpop.f32.mrf.mxu1  ;;  %v2127_v14 = vmul.f32 0.2, %v2106_v15  ;;  %vm2119_vm8 = vcmp.gt.f32.partialorder %v2106_v15, 0.0 }
 0x36b   : > { %12687 = vst [vmem:[#allocation56_spill] sm:$0xff] %v8691_v30  ;;  %vm1856_vm4 = vcmp.gt.f32.partialorder %v1838_v49, 0.0  ;;  %v1872_v9 = vmul.f32 0.2, %v1838_v49  ;;  %v2129_v34 = vmul.f32 0.2, %v2111_v36 }
 0x36c   : > { %vm2121_vm5 = vcmp.gt.f32.partialorder %v2111_v36, 0.0 }
 0x36d   : > { %v8693_v20 = vsel %vm1856_vm4, %v1838_v49, %v1872_v9  ;;  %v2103_v9 = vadd.f32 %v2102_v18, %v7903_v44  ;;  %v2128_v49 = vmul.f32 0.2, %v2108_v26 }
 0x36f   : > { %v2126_v5 = vmul.f32 0.2, %v2103_v9  ;;  %v2136_v18 = vsel %vm2120_vm7, %v2108_v26, %v2128_v49  ;;  %vm2118_vm10 = vcmp.gt.f32.partialorder %v2103_v9, 0.0 }
 0x370   : > { %v8699_v27 = vpop.f32.mrf.mxu3  ;;  %v2112_v3 = vpop.f32.mrf.mxu0 }
 0x371   : > { %12688 = vst [vmem:[#allocation57_spill] sm:$0xff] %v8699_v27  ;;  %v2113_v45 = vadd.f32 %v2112_v3, %v7894_v37  ;;  %v2137_v27 = vsel %vm2121_vm5, %v2111_v36, %v2129_v34  ;;  %v2098_v3 = vadd.f32 %v8652_v48, %v7910_v51  ;;  %v12689_v36 = vmax.f32 %v8564_v17, %v8646_v41 }
 0x372   : > { %v1997_v30 = vpop.f32.mrf.mxu1 }
 0x373   : > { %vm2122_vm6 = vcmp.gt.f32.partialorder %v2113_v45, 0.0  ;;  %v2130_v33 = vmul.f32 0.2, %v2113_v45  ;;  %v1998_v47 = vadd.f32 %v1997_v30, %v8155_v6  ;;  %v2125_v30 = vmul.f32 0.2, %v2101_v16 }
 0x374   : > { %v2124_v26 = vmul.f32 0.2, %v2098_v3  ;;  %vm2116_vm12 = vcmp.gt.f32.partialorder %v2098_v3, 0.0 }
 0x375   : > { %v2138_v22 = vsel %vm2122_vm6, %v2113_v45, %v2130_v33  ;;  %vm2025_vm9 = vcmp.gt.f32.partialorder %v1998_v47, 0.0  ;;  %v2041_v60 = vmul.f32 0.2, %v1998_v47  ;;  %v2134_v45 = vsel %vm2118_vm10, %v2103_v9, %v2126_v5 }
 0x376   : > { %v2142_v42 = vpack.c.bf16 %v2138_v22, %v2137_v27  ;;  %v2135_v27 = vsel %vm2119_vm8, %v2106_v15, %v2127_v14  ;;  %v2132_v21 = vsel %vm2116_vm12, %v2098_v3, %v2124_v26  ;;  %v12691_v5 = vmax.f32 %v8583_v8, %v8665_v24 }
 0x377   : > { %v2057_v23 = vsel %vm2025_vm9, %v1998_v47, %v2041_v60  ;;  %v2141_v48 = vpack.c.bf16 %v2136_v18, %v2135_v27  ;;  %v2123_v60 = vmul.f32 0.2, %v2096_v59  ;;  %v2133_v47 = vsel %vm2117_vm11, %v2101_v16, %v2125_v30 }
 0x378   : > { %2147 = vmatpush.bf16.msra.mxu2 %v2142_v42  ;;  %v8708_v40 = vpop.f32.mrf.mxu3  ;;  %v8715_v22 = vmax.f32 %v12689_v36, %v2057_v23  ;;  %v2140_v49 = vpack.c.bf16 %v2134_v45, %v2133_v47 }
 0x379   : > { %v2131_v42 = vsel %vm2115_vm13, %v2096_v59, %v2123_v60 }
 0x37a   : > { %v8717_v34 = vpop.f32.mrf.mxu1  ;;  %v2139_v23 = vpack.c.bf16 %v2132_v21, %v2131_v42  ;;  %v12695_v42 = vmax.f32 %v8625_v53, %v8693_v20 }
 0x37b   : > { %12690 = vst [vmem:[#allocation58_spill] sm:$0xff] %v8717_v34 }
 0x37c   : > { %2148 = vmatpush.bf16.msra.mxu2 %v2141_v48  ;;  %v12693_v48 = vmax.f32 %v8604_v58, %v8679_v28 }
 0x380   : > { %2149 = vmatpush.bf16.msra.mxu2 %v2140_v49  ;;  %v2272_v33 = vpop.f32.mrf.mxu3 }
 0x382   : > { %v2002_v17 = vpop.f32.mrf.mxu1 }
 0x383   : > { %v2003_v14 = vadd.f32 %v2002_v17, %v8187_v7 }
 0x384   : > { %2150 = vmatpush.bf16.msra.mxu2 %v2139_v23 }
 0x385   : > { %vm2027_vm14 = vcmp.gt.f32.partialorder %v2003_v14, 0.0  ;;  %v2043_v41 = vmul.f32 0.2, %v2003_v14 }
 0x387   : > { %v2059_v15 = vsel %vm2027_vm14, %v2003_v14, %v2043_v41  ;;  %7075 = vmatmul.msk.bf16.vlgmr.msra.gmra.mxu2 %vm909_vm3, %v8403_v63 }
 0x388   : > { %v8725_v9 = vmax.f32 %v12691_v5, %v2059_v15  ;;  %v2275_v16 = vpop.f32.mrf.mxu3 }
 0x38a   : > { %v8727_v3 = vpop.f32.mrf.mxu1 }
 0x38b   : > { %12692 = vst [vmem:[#allocation59_spill] sm:$0xff] %v8727_v3 }
 0x390   : > { %v2277_v18 = vpop.f32.mrf.mxu3 }
 0x391   : > { %v2278_v53 = vadd.f32 %v2277_v18, %v7903_v44  ;;  %v2271_v18 = vadd.f32 %v8708_v40, %v7908_v50 }
 0x392   : > { %v2007_v59 = vpop.f32.mrf.mxu1 }
 0x393   : > { %v2008_v30 = vadd.f32 %v2007_v59, %v8222_v11  ;;  %vm2293_vm8 = vcmp.gt.f32.partialorder %v2278_v53, 0.0  ;;  %vm2290_vm11 = vcmp.gt.f32.partialorder %v2271_v18, 0.0 }
 0x395   : > { %vm2029_vm15 = vcmp.gt.f32.partialorder %v2008_v30, 0.0  ;;  %v2045_v36 = vmul.f32 0.2, %v2008_v30 }
 0x397   : > { %v2061_v27 = vsel %vm2029_vm15, %v2008_v30, %v2045_v36  ;;  %7076 = vmatmul.msk.bf16.gmra.mxu2 %vm909_vm3, %v8448_v4 }
 0x398   : > { %v8735_v26 = vmax.f32 %v12693_v48, %v2061_v27  ;;  %v2280_v8 = vpop.f32.mrf.mxu3  ;;  %v2276_v27 = vadd.f32 %v2275_v16, %v7892_v35 }
 0x399   : > { %v2281_v15 = vadd.f32 %v2280_v8, %v7890_v32  ;;  %v2273_v8 = vadd.f32 %v2272_v33, %v7910_v51  ;;  %v2298_v33 = vmul.f32 0.2, %v2271_v18 }
 0x39a   : > { %v8737_v24 = vpop.f32.mrf.mxu1  ;;  %vm2292_vm9 = vcmp.gt.f32.partialorder %v2276_v27, 0.0 }
 0x39b   : > { %12694 = vst [vmem:[#allocation60_spill] sm:$0xff] %v8737_v24  ;;  %v2302_v48 = vmul.f32 0.2, %v2281_v15  ;;  %vm2294_vm7 = vcmp.gt.f32.partialorder %v2281_v15, 0.0  ;;  %vm2291_vm10 = vcmp.gt.f32.partialorder %v2273_v8, 0.0  ;;  %v2306_v40 = vsel %vm2290_vm11, %v2271_v18, %v2298_v33 }
 0x39d   : > { %v2310_v16 = vsel %vm2294_vm7, %v2281_v15, %v2302_v48 }
 0x3a0   : > { %v2282_v45 = vpop.f32.mrf.mxu3 }
 0x3a1   : > { %v2283_v14 = vadd.f32 %v2282_v45, %v7896_v38 }
 0x3a2   : > { %v2012_v60 = vpop.f32.mrf.mxu1 }
 0x3a3   : > { %v2013_v47 = vadd.f32 %v2012_v60, %v8255_v56  ;;  %v2303_v20 = vmul.f32 0.2, %v2283_v14  ;;  %vm2295_vm6 = vcmp.gt.f32.partialorder %v2283_v14, 0.0 }
 0x3a5   : > { %vm2031_vm2 = vcmp.gt.f32.partialorder %v2013_v47, 0.0  ;;  %v2047_v49 = vmul.f32 0.2, %v2013_v47 }
 0x3a7   : > { %v2063_v21 = vsel %vm2031_vm2, %v2013_v47, %v2047_v49  ;;  %7077 = vmatmul.msk.bf16.gmra.mxu2 %vm909_vm3, %v8457_v54  ;;  %v2301_v49 = vmul.f32 0.2, %v2278_v53 }
 0x3a8   : > { %v8745_v17 = vmax.f32 %v12695_v42, %v2063_v21  ;;  %v2285_v58 = vpop.f32.mrf.mxu3  ;;  %v2311_v21 = vsel %vm2295_vm6, %v2283_v14, %v2303_v20  ;;  %v2300_v42 = vmul.f32 0.2, %v2276_v27 }
 0x3a9   : > { %v2286_v23 = vadd.f32 %v2285_v58, %v7888_v31 }
 0x3aa   : > { %v8747_v28 = vpop.f32.mrf.mxu1 }
 0x3ab   : > { %12696 = vst [vmem:[#allocation61_spill] sm:$0xff] %v8747_v28  ;;  %v2304_v5 = vmul.f32 0.2, %v2286_v23  ;;  %vm2296_vm4 = vcmp.gt.f32.partialorder %v2286_v23, 0.0 }
 0x3ad   : > { %v2312_v60 = vsel %vm2296_vm4, %v2286_v23, %v2304_v5  ;;  %v2316_v23 = vpack.c.bf16 %v2311_v21, %v2310_v16  ;;  %v2309_v5 = vsel %vm2293_vm8, %v2278_v53, %v2301_v49 }
 0x3b0   : > { %v2287_v41 = vpop.f32.mrf.mxu3 }
 0x3b1   : > { %v2288_v59 = vadd.f32 %v2287_v41, %v7894_v37  ;;  %v2299_v41 = vmul.f32 0.2, %v2273_v8 }
 0x3b2   : > { %v8753_v30 = vpop.f32.mrf.mxu1 }
 0x3b3   : > { %vm2297_vm5 = vcmp.gt.f32.partialorder %v2288_v59, 0.0  ;;  %v2305_v36 = vmul.f32 0.2, %v2288_v59  ;;  %v2307_v20 = vsel %vm2291_vm10, %v2273_v8, %v2299_v41 }
 0x3b4   : > { %v2314_v15 = vpack.c.bf16 %v2307_v20, %v2306_v40 }
 0x3b5   : > { %v2313_v45 = vsel %vm2297_vm5, %v2288_v59, %v2305_v36  ;;  %v2308_v59 = vsel %vm2292_vm9, %v2276_v27, %v2300_v42  ;;  %v7109_v36 = vld [vmem:[%s7788_s29 + $0x28] sm:$0x7] }
 0x3b6   : > { %v2317_v47 = vpack.c.bf16 %v2313_v45, %v2312_v60  ;;  %v2315_v60 = vpack.c.bf16 %v2309_v5, %v2308_v59  ;;  %v2609_v14 = vsel %vm736_vm0, %v7109_v36, 0 }
 0x3b7   : > { %7078 = vmatmul.msk.bf16.gmra.mxu2 %vm909_vm3, %v8435_v1 }
 0x3b8   : > { %2322 = vmatpush.bf16.msrb.mxu0 %v2317_v47  ;;  %2618 = vmatpush.bf16.msrb.mxu2 %v2609_v14 }
 0x3ba   : > { %v2447_v58 = vpop.f32.mrf.mxu1 }
 0x3bb   : > { %v2448_v20 = vadd.f32 %v2447_v58, %v7910_v51 }
 0x3bc   : > { %2323 = vmatpush.bf16.msrb.mxu0 %v2316_v23 }
 0x3bd   : > { %vm2466_vm5 = vcmp.gt.f32.partialorder %v2448_v20, 0.0 }
 0x3c0   : > { %2324 = vmatpush.bf16.msrb.mxu0 %v2315_v60 }
 0x3c2   : > { %v2450_v45 = vpop.f32.mrf.mxu1 }
 0x3c3   : > { %v2451_v33 = vadd.f32 %v2450_v45, %v7892_v35 }
 0x3c4   : > { %2325 = vmatpush.bf16.msrb.mxu0 %v2314_v15 }
 0x3c5   : > { %vm2467_vm4 = vcmp.gt.f32.partialorder %v2451_v33, 0.0 }
 0x3c7   : > { %7079 = vmatmul.msk.bf16.gmra.mxu2 %vm909_vm3, %v8478_v13  ;;  %7088 = vmatmul.msk.bf16.vlgmr.msrb.gmra.mxu0 %vm909_vm3, %v8403_v63 }
 0x3ca   : > { %v2452_v53 = vpop.f32.mrf.mxu1 }
 0x3cb   : > { %v2453_v23 = vadd.f32 %v2452_v53, %v7903_v44  ;;  %v2446_v53 = vadd.f32 %v8753_v30, %v7908_v50 }
 0x3cd   : > { %v2476_v40 = vmul.f32 0.2, %v2453_v23  ;;  %vm2468_vm2 = vcmp.gt.f32.partialorder %v2453_v23, 0.0  ;;  %vm2465_vm6 = vcmp.gt.f32.partialorder %v2446_v53, 0.0 }
 0x3cf   : > { %v2484_v45 = vsel %vm2468_vm2, %v2453_v23, %v2476_v40 }
 0x3d2   : > { %v2455_v27 = vpop.f32.mrf.mxu1 }
 0x3d3   : > { %v2456_v18 = vadd.f32 %v2455_v27, %v7890_v32  ;;  %v2475_v27 = vmul.f32 0.2, %v2451_v33 }
 0x3d5   : > { %v2477_v59 = vmul.f32 0.2, %v2456_v18  ;;  %vm2469_vm15 = vcmp.gt.f32.partialorder %v2456_v18, 0.0  ;;  %v2483_v58 = vsel %vm2467_vm4, %v2451_v33, %v2475_v27  ;;  %v8828_v27 = vld [vmem:[%s12588_s1 + $0x10] sm:$0xff] }
 0x3d7   : > { %7080 = vmatmul.msk.bf16.gmra.mxu2 %vm909_vm3, %v8497_v61  ;;  %7089 = vmatmul.msk.bf16.gmra.mxu0 %vm909_vm3, %v8448_v4 }
 0x3da   : > { %v2457_v48 = vpop.f32.mrf.mxu1 }
 0x3db   : > { %v2458_v49 = vadd.f32 %v2457_v48, %v7896_v38  ;;  %v2485_v48 = vsel %vm2469_vm15, %v2456_v18, %v2477_v59 }
 0x3dd   : > { %v2478_v41 = vmul.f32 0.2, %v2458_v49  ;;  %vm2470_vm14 = vcmp.gt.f32.partialorder %v2458_v49, 0.0 }
 0x3df   : > { %v2486_v15 = vsel %vm2470_vm14, %v2458_v49, %v2478_v41  ;;  %v2490_v49 = vpack.c.bf16 %v2484_v45, %v2483_v58 }
 0x3e2   : > { %v2460_v47 = vpop.f32.mrf.mxu1 }
 0x3e3   : > { %v2461_v8 = vadd.f32 %v2460_v47, %v7888_v31  ;;  %v2491_v47 = vpack.c.bf16 %v2486_v15, %v2485_v48  ;;  %v7122_v15 = vld [vmem:[%s7788_s29 + $0x2c] sm:$0x7] }
 0x3e5   : > { %v2479_v42 = vmul.f32 0.2, %v2461_v8  ;;  %vm2471_vm12 = vcmp.gt.f32.partialorder %v2461_v8, 0.0 }
 0x3e7   : > { %7081 = vmatmul.msk.bf16.gmra.mxu2 %vm909_vm3, %v8518_v43  ;;  %7090 = vmatmul.msk.bf16.gmra.mxu0 %vm909_vm3, %v8457_v54  ;;  %v2487_v36 = vsel %vm2471_vm12, %v2461_v8, %v2479_v42  ;;  %v2473_v8 = vmul.f32 0.2, %v2446_v53 }
 0x3e9   : > { %v2481_v30 = vsel %vm2465_vm6, %v2446_v53, %v2473_v8  ;;  %v2784_v53 = vsel %vm736_vm0, %v7122_v15, 0  ;;  %v8843_v8 = vld [vmem:[%s12588_s1 + $0x18] sm:$0xff] }
 0x3ea   : > { %v2462_v21 = vpop.f32.mrf.mxu1  ;;  %2793 = vmatpush.bf16.msra.mxu0 %v2784_v53 }
 0x3eb   : > { %v2463_v16 = vadd.f32 %v2462_v21, %v7894_v37  ;;  %v2474_v21 = vmul.f32 0.2, %v2448_v20 }
 0x3ed   : > { %vm2472_vm13 = vcmp.gt.f32.partialorder %v2463_v16, 0.0  ;;  %v2480_v5 = vmul.f32 0.2, %v2463_v16  ;;  %v2482_v42 = vsel %vm2466_vm5, %v2448_v20, %v2474_v21 }
 0x3ee   : > { %v2489_v18 = vpack.c.bf16 %v2482_v42, %v2481_v30 }
 0x3ef   : > { %v2488_v60 = vsel %vm2472_vm13, %v2463_v16, %v2480_v5  ;;  %v8796_v16 = vld [vmem:[%s12588_s1] sm:$0xff] }
 0x3f0   : > { %v2492_v14 = vpack.c.bf16 %v2488_v60, %v2487_v36  ;;  %v8811_v36 = vld [vmem:[%s12588_s1 + $0x8] sm:$0xff] }
 0x3f2   : > { %2497 = vmatpush.bf16.msra.mxu3 %v2492_v14 }
 0x3f6   : > { %2498 = vmatpush.bf16.msra.mxu3 %v2491_v47 }
 0x3f7   : > { %7082 = vmatmul.msk.bf16.gmra.mxu2 %vm909_vm3, %v8537_v2  ;;  %7091 = vmatmul.msk.bf16.gmra.mxu0 %vm909_vm3, %v8435_v1 }
 0x3fa   : > { %2499 = vmatpush.bf16.msra.mxu3 %v2490_v49 }
 0x3fe   : > { %2500 = vmatpush.bf16.msra.mxu3 %v2489_v18 }
 0x401   : > { %7101 = vmatmul.msk.bf16.vlgmr.msra.gmra.mxu3 %vm909_vm3, %v8403_v63 }
 0x407   : > { %7092 = vmatmul.msk.bf16.gmra.mxu0 %vm909_vm3, %v8478_v13  ;;  %7110 = vmatmul.msk.bf16.vlgmr.msrb.gmra.mxu2 %vm723_vm1, %v8796_v16 }
 0x40a   : > { %v2152_v23 = vpop.f32.mrf.mxu2 }
 0x40b   : > { %v2153_v41 = vadd.f32 %v2152_v23, %v8069_v52 }
 0x40d   : > { %vm2192_vm7 = vcmp.gt.f32.partialorder %v2153_v41, 0.0  ;;  %v2208_v5 = vmul.f32 0.2, %v2153_v41 }
 0x40f   : > { %v2224_v33 = vsel %vm2192_vm7, %v2153_v41, %v2208_v5 }
 0x410   : > { %v2240_v63 = vmax.f32 %v8641_v55, %v2224_v33 }
 0x411   : > { %7102 = vmatmul.msk.bf16.gmra.mxu3 %vm909_vm3, %v8448_v4 }
 0x412   : > { %v8804_v59 = vpop.f32.mrf.mxu2 }
 0x413   : > { %12697 = vst [vmem:[#allocation62_spill] sm:$0xff] %v8804_v59 }
 0x417   : > { %7093 = vmatmul.msk.bf16.gmra.mxu0 %vm909_vm3, %v8497_v61  ;;  %7111 = vmatmul.msk.bf16.gmra.mxu2 %vm723_vm1, %v8811_v36 }
 0x41a   : > { %v2157_v60 = vpop.f32.mrf.mxu2 }
 0x41b   : > { %v2158_v14 = vadd.f32 %v2157_v60, %v8087_v0 }
 0x41d   : > { %vm2194_vm8 = vcmp.gt.f32.partialorder %v2158_v14, 0.0  ;;  %v2210_v55 = vmul.f32 0.2, %v2158_v14 }
 0x41f   : > { %v2226_v20 = vsel %vm2194_vm8, %v2158_v14, %v2210_v55 }
 0x420   : > { %v2242_v4 = vmax.f32 %v8660_v57, %v2226_v20 }
 0x421   : > { %7103 = vmatmul.msk.bf16.gmra.mxu3 %vm909_vm3, %v8457_v54 }
 0x422   : > { %v8819_v40 = vpop.f32.mrf.mxu2 }
 0x423   : > { %12698 = vst [vmem:[#allocation63_spill] sm:$0xff] %v8819_v40 }
 0x427   : > { %7094 = vmatmul.msk.bf16.gmra.mxu0 %vm909_vm3, %v8518_v43  ;;  %7112 = vmatmul.msk.bf16.gmra.mxu2 %vm723_vm1, %v8828_v27 }
 0x42a   : > { %v2162_v57 = vpop.f32.mrf.mxu2 }
 0x42b   : > { %v2163_v54 = vadd.f32 %v2162_v57, %v8109_v25 }
 0x42d   : > { %vm2196_vm9 = vcmp.gt.f32.partialorder %v2163_v54, 0.0  ;;  %v2212_v48 = vmul.f32 0.2, %v2163_v54 }
 0x42f   : > { %v2228_v47 = vsel %vm2196_vm9, %v2163_v54, %v2212_v48 }
 0x430   : > { %v2244_v21 = vmax.f32 %v8674_v19, %v2228_v47 }
 0x431   : > { %7104 = vmatmul.msk.bf16.gmra.mxu3 %vm909_vm3, %v8435_v1 }
 0x432   : > { %v8836_v45 = vpop.f32.mrf.mxu2 }
 0x433   : > { %12699 = vst [vmem:[#allocation64_spill] sm:$0xff] %v8836_v45 }
 0x437   : > { %7095 = vmatmul.msk.bf16.gmra.mxu0 %vm909_vm3, %v8537_v2  ;;  %7113 = vmatmul.msk.bf16.gmra.mxu2 %vm723_vm1, %v8843_v8 }
 0x43a   : > { %v2167_v58 = vpop.f32.mrf.mxu2 }
 0x43b   : > { %v2168_v49 = vadd.f32 %v2167_v58, %v8133_v46 }
 0x43d   : > { %vm2198_vm10 = vcmp.gt.f32.partialorder %v2168_v49, 0.0  ;;  %v2214_v19 = vmul.f32 0.2, %v2168_v49 }
 0x43f   : > { %v2230_v42 = vsel %vm2198_vm10, %v2168_v49, %v2214_v19  ;;  %v7135_v19 = vld [vmem:[%s7788_s29 + $0x30] sm:$0x7] }
 0x440   : > { %v2246_v1 = vmax.f32 %v8688_v62, %v2230_v42  ;;  %v2959_v42 = vsel %vm736_vm0, %v7135_v19, 0 }
 0x441   : > { %7105 = vmatmul.msk.bf16.gmra.mxu3 %vm909_vm3, %v8478_v13 }
 0x442   : > { %v8851_v30 = vpop.f32.mrf.mxu2  ;;  %2968 = vmatpush.bf16.msrb.mxu3 %v2959_v42 }
 0x443   : > { %12700 = vst [vmem:[#allocation65_spill] sm:$0xff] %v8851_v30 }
 0x444   : > { %v2327_v18 = vpop.f32.mrf.mxu0 }
 0x445   : > { %v2328_v23 = vadd.f32 %v2327_v18, %v8069_v52 }
 0x447   : > { %vm2367_vm11 = vcmp.gt.f32.partialorder %v2328_v23, 0.0  ;;  %v2383_v41 = vmul.f32 0.2, %v2328_v23  ;;  %7123 = vmatmul.msk.bf16.vlgmr.msra.gmra.mxu0 %vm723_vm1, %v8796_v16 }
 0x449   : > { %v2399_v5 = vsel %vm2367_vm11, %v2328_v23, %v2383_v41 }
 0x44a   : > { %v8856_v33 = vmax.f32 %v2240_v63, %v2399_v5  ;;  %v2172_v60 = vpop.f32.mrf.mxu2 }
 0x44b   : > { %v2173_v14 = vadd.f32 %v2172_v60, %v8155_v6 }
 0x44c   : > { %v8859_v62 = vpop.f32.mrf.mxu0 }
 0x44d   : > { %12701 = vst [vmem:[#allocation66_spill] sm:$0xff] %v8859_v62  ;;  %vm2200_vm12 = vcmp.gt.f32.partialorder %v2173_v14, 0.0  ;;  %v2216_v13 = vmul.f32 0.2, %v2173_v14 }
 0x44f   : > { %v8861_v55 = vsel %vm2200_vm12, %v2173_v14, %v2216_v13 }
 0x450   : > { %v2248_v20 = vmax.f32 %v8715_v22, %v8861_v55 }
 0x451   : > { %7106 = vmatmul.msk.bf16.gmra.mxu3 %vm909_vm3, %v8497_v61 }
 0x452   : > { %v8867_v15 = vpop.f32.mrf.mxu2 }
 0x453   : > { %12702 = vst [vmem:[#allocation67_spill] sm:$0xff] %v8867_v15 }
 0x454   : > { %v2332_v63 = vpop.f32.mrf.mxu0 }
 0x455   : > { %v2333_v53 = vadd.f32 %v2332_v63, %v8087_v0 }
 0x457   : > { %vm2369_vm13 = vcmp.gt.f32.partialorder %v2333_v53, 0.0  ;;  %v2385_v57 = vmul.f32 0.2, %v2333_v53  ;;  %7124 = vmatmul.msk.bf16.gmra.mxu0 %vm723_vm1, %v8811_v36 }
 0x459   : > { %v2401_v54 = vsel %vm2369_vm13, %v2333_v53, %v2385_v57 }
 0x45a   : > { %v8872_v48 = vmax.f32 %v2242_v4, %v2401_v54  ;;  %v2177_v47 = vpop.f32.mrf.mxu2 }
 0x45b   : > { %v2178_v58 = vadd.f32 %v2177_v47, %v8187_v7 }
 0x45c   : > { %v8875_v49 = vpop.f32.mrf.mxu0 }
 0x45d   : > { %12703 = vst [vmem:[#allocation68_spill] sm:$0xff] %v8875_v49  ;;  %vm2202_vm14 = vcmp.gt.f32.partialorder %v2178_v58, 0.0  ;;  %v2218_v61 = vmul.f32 0.2, %v2178_v58 }
 0x45f   : > { %v8879_v18 = vsel %vm2202_vm14, %v2178_v58, %v2218_v61 }
 0x461   : > { %7107 = vmatmul.msk.bf16.gmra.mxu3 %vm909_vm3, %v8518_v43 }
 0x462   : > { %v8885_v4 = vpop.f32.mrf.mxu2 }
 0x463   : > { %12704 = vst [vmem:[#allocation69_spill] sm:$0xff] %v8885_v4 }
 0x464   : > { %v2337_v41 = vpop.f32.mrf.mxu0 }
 0x465   : > { %v2338_v5 = vadd.f32 %v2337_v41, %v8109_v25 }
 0x467   : > { %vm2371_vm15 = vcmp.gt.f32.partialorder %v2338_v5, 0.0  ;;  %v2387_v60 = vmul.f32 0.2, %v2338_v5  ;;  %7125 = vmatmul.msk.bf16.gmra.mxu0 %vm723_vm1, %v8828_v27 }
 0x469   : > { %v2403_v14 = vsel %vm2371_vm15, %v2338_v5, %v2387_v60 }
 0x46a   : > { %v8890_v13 = vmax.f32 %v2244_v21, %v2403_v14  ;;  %v2182_v63 = vpop.f32.mrf.mxu2 }
 0x46b   : > { %v2183_v53 = vadd.f32 %v2182_v63, %v8222_v11 }
 0x46c   : > { %v8893_v57 = vpop.f32.mrf.mxu0 }
 0x46d   : > { %12705 = vst [vmem:[#allocation70_spill] sm:$0xff] %v8893_v57  ;;  %vm2204_vm2 = vcmp.gt.f32.partialorder %v2183_v53, 0.0  ;;  %v2220_v43 = vmul.f32 0.2, %v2183_v53 }
 0x46f   : > { %v8895_v54 = vsel %vm2204_vm2, %v2183_v53, %v2220_v43 }
 0x471   : > { %7108 = vmatmul.msk.bf16.gmra.mxu3 %vm909_vm3, %v8537_v2 }
 0x472   : > { %v8901_v58 = vpop.f32.mrf.mxu2 }
 0x473   : > { %12706 = vst [vmem:[#allocation71_spill] sm:$0xff] %v8901_v58  ;;  %v12714_v58 = vmax.f32 %v8735_v26, %v8895_v54 }
 0x474   : > { %v2342_v61 = vpop.f32.mrf.mxu0 }
 0x475   : > { %v2343_v21 = vadd.f32 %v2342_v61, %v8133_v46 }
 0x477   : > { %vm2373_vm4 = vcmp.gt.f32.partialorder %v2343_v21, 0.0  ;;  %v2389_v19 = vmul.f32 0.2, %v2343_v21  ;;  %7126 = vmatmul.msk.bf16.gmra.mxu0 %vm723_vm1, %v8843_v8 }
 0x479   : > { %v2405_v42 = vsel %vm2373_vm4, %v2343_v21, %v2389_v19 }
 0x47a   : > { %v8906_v41 = vmax.f32 %v2246_v1, %v2405_v42  ;;  %v2187_v5 = vpop.f32.mrf.mxu2 }
 0x47b   : > { %v2188_v60 = vadd.f32 %v2187_v5, %v8255_v56 }
 0x47c   : > { %v8909_v14 = vpop.f32.mrf.mxu0 }
 0x47d   : > { %12707 = vst [vmem:[#allocation72_spill] sm:$0xff] %v8909_v14  ;;  %vm2206_vm5 = vcmp.gt.f32.partialorder %v2188_v60, 0.0  ;;  %v2222_v2 = vmul.f32 0.2, %v2188_v60 }
 0x47f   : > { %v8911_v63 = vsel %vm2206_vm5, %v2188_v60, %v2222_v2 }
 0x480   : > { %v12717_v14 = vmax.f32 %v8745_v17, %v8911_v63 }
 0x481   : > { %7136 = vmatmul.msk.bf16.vlgmr.msrb.gmra.mxu3 %vm723_vm1, %v8796_v16 }
 0x482   : > { %v8917_v43 = vpop.f32.mrf.mxu2 }
 0x483   : > { %12708 = vst [vmem:[#allocation73_spill] sm:$0xff] %v8917_v43 }
 0x484   : > { %v2347_v61 = vpop.f32.mrf.mxu0  ;;  %v2502_v1 = vpop.f32.mrf.mxu3 }
 0x485   : > { %v2348_v21 = vadd.f32 %v2347_v61, %v8155_v6  ;;  %v2503_v19 = vadd.f32 %v2502_v1, %v8069_v52 }
 0x487   : > { %vm2375_vm6 = vcmp.gt.f32.partialorder %v2348_v21, 0.0  ;;  %v2391_v42 = vmul.f32 0.2, %v2348_v21  ;;  %vm2542_vm7 = vcmp.gt.f32.partialorder %v2503_v19, 0.0  ;;  %v2558_v5 = vmul.f32 0.2, %v2503_v19 }
 0x489   : > { %v2407_v60 = vsel %vm2375_vm6, %v2348_v21, %v2391_v42  ;;  %v8926_v53 = vsel %vm2542_vm7, %v2503_v19, %v2558_v5 }
 0x48a   : > { %v8924_v2 = vmax.f32 %v2248_v20, %v2407_v60  ;;  %v8928_v47 = vpop.f32.mrf.mxu2 }
 0x48c   : > { %v8932_v61 = vpop.f32.mrf.mxu0  ;;  %v8934_v1 = vpop.f32.mrf.mxu3 }
 0x48d   : > { %12709 = vst [vmem:[#allocation74_spill] sm:$0xff] %v8932_v61  ;;  %v12711_v61 = vmax.f32 %v8725_v9, %v8879_v18 }
 0x48e   : > { %12710 = vst [vmem:[#allocation75_spill] sm:$0xff] %v8934_v1 }
 0x491   : > { %7137 = vmatmul.msk.bf16.gmra.mxu3 %vm723_vm1, %v8811_v36 }
 0x492   : > { %v8938_v21 = vpop.f32.mrf.mxu2 }
 0x494   : > { %v2352_v42 = vpop.f32.mrf.mxu0  ;;  %v2507_v22 = vpop.f32.mrf.mxu3 }
 0x495   : > { %v2353_v55 = vadd.f32 %v2352_v42, %v8187_v7  ;;  %v2508_v20 = vadd.f32 %v2507_v22, %v8087_v0 }
 0x497   : > { %vm2377_vm8 = vcmp.gt.f32.partialorder %v2353_v55, 0.0  ;;  %v2393_v19 = vmul.f32 0.2, %v2353_v55  ;;  %vm2544_vm9 = vcmp.gt.f32.partialorder %v2508_v20, 0.0  ;;  %v2560_v5 = vmul.f32 0.2, %v2508_v20 }
 0x499   : > { %v2409_v60 = vsel %vm2377_vm8, %v2353_v55, %v2393_v19  ;;  %v8942_v23 = vsel %vm2544_vm9, %v2508_v20, %v2560_v5 }
 0x49a   : > { %v8947_v43 = vmax.f32 %v12711_v61, %v2409_v60  ;;  %v2625_v4 = vpop.f32.mrf.mxu2 }
 0x49c   : > { %v8951_v15 = vpop.f32.mrf.mxu0  ;;  %v8953_v42 = vpop.f32.mrf.mxu3 }
 0x49d   : > { %12712 = vst [vmem:[#allocation76_spill] sm:$0xff] %v8951_v15 }
 0x49e   : > { %12713 = vst [vmem:[#allocation77_spill] sm:$0xff] %v8953_v42 }
 0x4a1   : > { %7138 = vmatmul.msk.bf16.gmra.mxu3 %vm723_vm1, %v8828_v27 }
 0x4a2   : > { %v2627_v22 = vpop.f32.mrf.mxu2 }
 0x4a4   : > { %v2357_v55 = vpop.f32.mrf.mxu0  ;;  %v2512_v20 = vpop.f32.mrf.mxu3 }
 0x4a5   : > { %v2358_v19 = vadd.f32 %v2357_v55, %v8222_v11  ;;  %v2513_v9 = vadd.f32 %v2512_v20, %v8109_v25 }
 0x4a7   : > { %vm2379_vm10 = vcmp.gt.f32.partialorder %v2358_v19, 0.0  ;;  %v2395_v18 = vmul.f32 0.2, %v2358_v19  ;;  %vm2546_vm11 = vcmp.gt.f32.partialorder %v2513_v9, 0.0  ;;  %v2562_v61 = vmul.f32 0.2, %v2513_v9 }
 0x4a9   : > { %v2411_v5 = vsel %vm2379_vm10, %v2358_v19, %v2395_v18  ;;  %v8959_v60 = vsel %vm2546_vm11, %v2513_v9, %v2562_v61 }
 0x4aa   : > { %v8964_v15 = vmax.f32 %v12714_v58, %v2411_v5  ;;  %v2630_v42 = vpop.f32.mrf.mxu2 }
 0x4ac   : > { %v8968_v57 = vpop.f32.mrf.mxu0  ;;  %v8970_v55 = vpop.f32.mrf.mxu3 }
 0x4ad   : > { %12715 = vst [vmem:[#allocation78_spill] sm:$0xff] %v8968_v57 }
 0x4ae   : > { %12716 = vst [vmem:[#allocation79_spill] sm:$0xff] %v8970_v55 }
 0x4b1   : > { %7139 = vmatmul.msk.bf16.gmra.mxu3 %vm723_vm1, %v8843_v8 }
 0x4b2   : > { %v2632_v20 = vpop.f32.mrf.mxu2 }
 0x4b3   : > { %v2633_v1 = vadd.f32 %v2632_v20, %v7896_v38 }
 0x4b4   : > { %v2362_v19 = vpop.f32.mrf.mxu0  ;;  %v2517_v9 = vpop.f32.mrf.mxu3 }
 0x4b5   : > { %v2363_v18 = vadd.f32 %v2362_v19, %v8255_v56  ;;  %v2518_v26 = vadd.f32 %v2517_v9, %v8133_v46  ;;  %vm2645_vm2 = vcmp.gt.f32.partialorder %v2633_v1, 0.0 }
 0x4b7   : > { %vm2381_vm12 = vcmp.gt.f32.partialorder %v2363_v18, 0.0  ;;  %v2397_v54 = vmul.f32 0.2, %v2363_v18  ;;  %vm2548_vm13 = vcmp.gt.f32.partialorder %v2518_v26, 0.0  ;;  %v2564_v58 = vmul.f32 0.2, %v2518_v26 }
 0x4b9   : > { %v2413_v61 = vsel %vm2381_vm12, %v2363_v18, %v2397_v54  ;;  %v8976_v5 = vsel %vm2548_vm13, %v2518_v26, %v2564_v58  ;;  %v2631_v18 = vadd.f32 %v2630_v42, %v7890_v32 }
 0x4ba   : > { %v8981_v57 = vmax.f32 %v12717_v14, %v2413_v61  ;;  %v2635_v49 = vpop.f32.mrf.mxu2  ;;  %v2628_v14 = vadd.f32 %v2627_v22, %v7903_v44  ;;  %v2653_v61 = vmul.f32 0.2, %v2633_v1  ;;  %v2623_v22 = vadd.f32 %v8938_v21, %v7910_v51 }
 0x4bb   : > { %v2636_v9 = vadd.f32 %v2635_v49, %v7888_v31  ;;  %v2626_v49 = vadd.f32 %v2625_v4, %v7892_v35  ;;  %v2652_v20 = vmul.f32 0.2, %v2631_v18  ;;  %vm2644_vm5 = vcmp.gt.f32.partialorder %v2631_v18, 0.0 }
 0x4bc   : > { %v8985_v30 = vpop.f32.mrf.mxu0  ;;  %v8987_v19 = vpop.f32.mrf.mxu3  ;;  %v2651_v62 = vmul.f32 0.2, %v2628_v14  ;;  %v2661_v59 = vsel %vm2645_vm2, %v2633_v1, %v2653_v61  ;;  %vm2643_vm6 = vcmp.gt.f32.partialorder %v2628_v14, 0.0  ;;  %v2621_v4 = vadd.f32 %v8928_v47, %v7908_v50 }
 0x4bd   : > { %12718 = vst [vmem:[#allocation80_spill] sm:$0xff] %v8985_v30  ;;  %v2654_v54 = vmul.f32 0.2, %v2636_v9  ;;  %vm2646_vm14 = vcmp.gt.f32.partialorder %v2636_v9, 0.0  ;;  %vm2642_vm7 = vcmp.gt.f32.partialorder %v2626_v49, 0.0  ;;  %vm2641_vm8 = vcmp.gt.f32.partialorder %v2623_v22, 0.0 }
 0x4be   : > { %12719 = vst [vmem:[#allocation81_spill] sm:$0xff] %v8987_v19  ;;  %vm2640_vm9 = vcmp.gt.f32.partialorder %v2621_v4, 0.0 }
 0x4bf   : > { %v2662_v42 = vsel %vm2646_vm14, %v2636_v9, %v2654_v54  ;;  %v2660_v9 = vsel %vm2644_vm5, %v2631_v18, %v2652_v20 }
 0x4c0   : > { %v2666_v21 = vpack.c.bf16 %v2661_v59, %v2660_v9 }
 0x4c2   : > { %v2637_v26 = vpop.f32.mrf.mxu2 }
 0x4c3   : > { %v2638_v17 = vadd.f32 %v2637_v26, %v7894_v37 }
 0x4c4   : > { %v2522_v63 = vpop.f32.mrf.mxu3  ;;  %v8994_v58 = vpop.f32.mrf.mxu0 }
 0x4c5   : > { %vm2647_vm15 = vcmp.gt.f32.partialorder %v2638_v17, 0.0  ;;  %v2655_v55 = vmul.f32 0.2, %v2638_v17  ;;  %v2523_v30 = vadd.f32 %v2522_v63, %v8155_v6 }
 0x4c7   : > { %v2663_v19 = vsel %vm2647_vm15, %v2638_v17, %v2655_v55  ;;  %vm2550_vm4 = vcmp.gt.f32.partialorder %v2523_v30, 0.0  ;;  %v2566_v45 = vmul.f32 0.2, %v2523_v30  ;;  %v2650_v55 = vmul.f32 0.2, %v2626_v49 }
 0x4c8   : > { %v2667_v26 = vpack.c.bf16 %v2663_v19, %v2662_v42  ;;  %v2649_v17 = vmul.f32 0.2, %v2623_v22 }
 0x4c9   : > { %v9000_v40 = vsel %vm2550_vm4, %v2523_v30, %v2566_v45  ;;  %v2659_v45 = vsel %vm2643_vm6, %v2628_v14, %v2651_v62  ;;  %v2648_v30 = vmul.f32 0.2, %v2621_v4  ;;  %v2658_v1 = vsel %vm2642_vm7, %v2626_v49, %v2650_v55  ;;  %v9016_v62 = vld [vmem:[%s12589_s2] sm:$0xff] }
 0x4ca   : > { %2672 = vmatpush.bf16.msra.mxu1 %v2667_v26  ;;  %v2665_v61 = vpack.c.bf16 %v2659_v45, %v2658_v1  ;;  %v2657_v42 = vsel %vm2641_vm8, %v2623_v22, %v2649_v17  ;;  %v9030_v17 = vld [vmem:[%s12589_s2 + $0x8] sm:$0xff] }
 0x4cb   : > { %v2656_v26 = vsel %vm2640_vm9, %v2621_v4, %v2648_v30 }
 0x4cc   : > { %v9006_v54 = vpop.f32.mrf.mxu3  ;;  %v9008_v19 = vpop.f32.mrf.mxu0  ;;  %v2664_v18 = vpack.c.bf16 %v2657_v42, %v2656_v26 }
 0x4cd   : > { %12720 = vst [vmem:[#allocation82_spill] sm:$0xff] %v9006_v54 }
 0x4ce   : > { %2673 = vmatpush.bf16.msra.mxu1 %v2666_v21 }
 0x4d2   : > { %2674 = vmatpush.bf16.msra.mxu1 %v2665_v61 }
 0x4d4   : > { %v2527_v47 = vpop.f32.mrf.mxu3  ;;  %v2800_v63 = vpop.f32.mrf.mxu0 }
 0x4d5   : > { %v2528_v20 = vadd.f32 %v2527_v47, %v8187_v7  ;;  %v2801_v28 = vadd.f32 %v2800_v63, %v7892_v35 }
 0x4d6   : > { %2675 = vmatpush.bf16.msra.mxu1 %v2664_v18 }
 0x4d7   : > { %vm2552_vm10 = vcmp.gt.f32.partialorder %v2528_v20, 0.0  ;;  %v2568_v54 = vmul.f32 0.2, %v2528_v20  ;;  %v2825_v29 = vmul.f32 0.2, %v2801_v28  ;;  %vm2817_vm5 = vcmp.gt.f32.partialorder %v2801_v28, 0.0 }
 0x4d9   : > { %v9011_v59 = vsel %vm2552_vm10, %v2528_v20, %v2568_v54  ;;  %7114 = vmatmul.msk.bf16.vlgmr.msra.gmra.mxu1 %vm909_vm3, %v9016_v62 }
 0x4dc   : > { %v9022_v49 = vpop.f32.mrf.mxu3  ;;  %v2802_v22 = vpop.f32.mrf.mxu0 }
 0x4dd   : > { %12721 = vst [vmem:[#allocation83_spill] sm:$0xff] %v9022_v49  ;;  %v2803_v14 = vadd.f32 %v2802_v22, %v7903_v44  ;;  %v2796_v22 = vadd.f32 %v8994_v58, %v7908_v50 }
 0x4df   : > { %v2826_v3 = vmul.f32 0.2, %v2803_v14  ;;  %vm2818_vm4 = vcmp.gt.f32.partialorder %v2803_v14, 0.0  ;;  %vm2815_vm7 = vcmp.gt.f32.partialorder %v2796_v22, 0.0 }
 0x4e4   : > { %v2532_v4 = vpop.f32.mrf.mxu3  ;;  %v2805_v55 = vpop.f32.mrf.mxu0 }
 0x4e5   : > { %v2533_v9 = vadd.f32 %v2532_v4, %v8222_v11  ;;  %v9045_v4 = vld [vmem:[%s12589_s2 + $0x10] sm:$0xff] }
 0x4e7   : > { %vm2554_vm11 = vcmp.gt.f32.partialorder %v2533_v9, 0.0  ;;  %v2570_v54 = vmul.f32 0.2, %v2533_v9 }
 0x4e9   : > { %v9025_v21 = vsel %vm2554_vm11, %v2533_v9, %v2570_v54  ;;  %7115 = vmatmul.msk.bf16.gmra.mxu1 %vm909_vm3, %v9030_v17 }
 0x4ec   : > { %v9036_v30 = vpop.f32.mrf.mxu3  ;;  %v2807_v1 = vpop.f32.mrf.mxu0 }
 0x4ed   : > { %12722 = vst [vmem:[#allocation84_spill] sm:$0xff] %v9036_v30  ;;  %v2808_v54 = vadd.f32 %v2807_v1, %v7896_v38 }
 0x4ef   : > { %v2828_v30 = vmul.f32 0.2, %v2808_v54  ;;  %vm2820_vm15 = vcmp.gt.f32.partialorder %v2808_v54, 0.0 }
 0x4f1   : > { %v2836_v34 = vsel %vm2820_vm15, %v2808_v54, %v2828_v30  ;;  %v2833_v30 = vsel %vm2817_vm5, %v2801_v28, %v2825_v29  ;;  %v9078_v29 = vld [vmem:[%s12589_s2 + $0x20] sm:$0xff] }
 0x4f4   : > { %v2537_v61 = vpop.f32.mrf.mxu3  ;;  %v2810_v42 = vpop.f32.mrf.mxu0 }
 0x4f5   : > { %v2538_v26 = vadd.f32 %v2537_v61, %v8255_v56  ;;  %v2811_v20 = vadd.f32 %v2810_v42, %v7888_v31 }
 0x4f7   : > { %vm2556_vm12 = vcmp.gt.f32.partialorder %v2538_v26, 0.0  ;;  %v2572_v47 = vmul.f32 0.2, %v2538_v26  ;;  %vm2821_vm13 = vcmp.gt.f32.partialorder %v2811_v20, 0.0 }
 0x4f9   : > { %v9039_v18 = vsel %vm2556_vm12, %v2538_v26, %v2572_v47  ;;  %7116 = vmatmul.msk.bf16.gmra.mxu1 %vm909_vm3, %v9045_v4  ;;  %v2806_v26 = vadd.f32 %v2805_v55, %v7890_v32  ;;  %v2829_v47 = vmul.f32 0.2, %v2811_v20  ;;  %v2798_v55 = vadd.f32 %v9008_v19, %v7910_v51  ;;  %v9067_v19 = vld [vmem:[%s12589_s2 + $0x18] sm:$0xff] }
 0x4fb   : > { %v2827_v9 = vmul.f32 0.2, %v2806_v26  ;;  %v2837_v24 = vsel %vm2821_vm13, %v2811_v20, %v2829_v47  ;;  %vm2819_vm2 = vcmp.gt.f32.partialorder %v2806_v26, 0.0  ;;  %v2834_v20 = vsel %vm2818_vm4, %v2803_v14, %v2826_v3  ;;  %v7148_v3 = vld [vmem:[%s7788_s29 + $0x34] sm:$0x7]  ;;  %v9087_v47 = vld [vmem:[%s12589_s2 + $0x28] sm:$0xff] }
 0x4fc   : > { %v9052_v61 = vpop.f32.mrf.mxu3  ;;  %v2812_v45 = vpop.f32.mrf.mxu0  ;;  %vm2816_vm6 = vcmp.gt.f32.partialorder %v2798_v55, 0.0  ;;  %v2840_v58 = vpack.c.bf16 %v2834_v20, %v2833_v30  ;;  %v3134_v14 = vsel %vm736_vm0, %v7148_v3, 0 }
 0x4fd   : > { %12723 = vst [vmem:[#allocation85_spill] sm:$0xff] %v9052_v61  ;;  %v2813_v42 = vadd.f32 %v2812_v45, %v7894_v37  ;;  %v2835_v39 = vsel %vm2819_vm2, %v2806_v26, %v2827_v9  ;;  %3143 = vmatpush.bf16.msrb.mxu1 %v3134_v14 }
 0x4fe   : > { %v2841_v63 = vpack.c.bf16 %v2836_v34, %v2835_v39 }
 0x4ff   : > { %vm2822_vm14 = vcmp.gt.f32.partialorder %v2813_v42, 0.0  ;;  %v2830_v49 = vmul.f32 0.2, %v2813_v42 }
 0x501   : > { %v2838_v1 = vsel %vm2822_vm14, %v2813_v42, %v2830_v49  ;;  %v2824_v49 = vmul.f32 0.2, %v2798_v55 }
 0x502   : > { %v2842_v61 = vpack.c.bf16 %v2838_v1, %v2837_v24  ;;  %v2823_v24 = vmul.f32 0.2, %v2796_v22 }
 0x503   : > { %v2832_v9 = vsel %vm2816_vm6, %v2798_v55, %v2824_v49 }
 0x504   : > { %2847 = vmatpush.bf16.msra.mxu2 %v2842_v61  ;;  %v9060_v45 = vpop.f32.mrf.mxu3  ;;  %v2831_v34 = vsel %vm2815_vm7, %v2796_v22, %v2823_v24  ;;  %v9097_v22 = vld [vmem:[%s12589_s2 + $0x30] sm:$0xff] }
 0x505   : > { %v2839_v54 = vpack.c.bf16 %v2832_v9, %v2831_v34 }
 0x508   : > { %2848 = vmatpush.bf16.msra.mxu2 %v2841_v63 }
 0x509   : > { %7117 = vmatmul.msk.bf16.gmra.mxu1 %vm909_vm3, %v9067_v19 }
 0x50c   : > { %2849 = vmatpush.bf16.msra.mxu2 %v2840_v58  ;;  %v2972_v39 = vpop.f32.mrf.mxu3 }
 0x50d   : > { %v2973_v12 = vadd.f32 %v2972_v39, %v7910_v51  ;;  %v9114_v39 = vld [vmem:[%s12589_s2 + $0x38] sm:$0xff] }
 0x50f   : > { %vm2991_vm14 = vcmp.gt.f32.partialorder %v2973_v12, 0.0 }
 0x510   : > { %2850 = vmatpush.bf16.msra.mxu2 %v2839_v54 }
 0x513   : > { %7127 = vmatmul.msk.bf16.vlgmr.msra.gmra.mxu2 %vm909_vm3, %v9016_v62 }
 0x514   : > { %v2975_v61 = vpop.f32.mrf.mxu3 }
 0x515   : > { %v2976_v54 = vadd.f32 %v2975_v61, %v7892_v35 }
 0x517   : > { %v3000_v10 = vmul.f32 0.2, %v2976_v54  ;;  %vm2992_vm13 = vcmp.gt.f32.partialorder %v2976_v54, 0.0 }
 0x519   : > { %7118 = vmatmul.msk.bf16.gmra.mxu1 %vm909_vm3, %v9078_v29 }
 0x51c   : > { %v2977_v28 = vpop.f32.mrf.mxu3 }
 0x51d   : > { %v2978_v58 = vadd.f32 %v2977_v28, %v7903_v44  ;;  %v2971_v28 = vadd.f32 %v9060_v45, %v7908_v50 }
 0x51f   : > { %vm2993_vm12 = vcmp.gt.f32.partialorder %v2978_v58, 0.0  ;;  %vm2990_vm15 = vcmp.gt.f32.partialorder %v2971_v28, 0.0 }
 0x523   : > { %7128 = vmatmul.msk.bf16.gmra.mxu2 %vm909_vm3, %v9030_v17 }
 0x524   : > { %v2980_v26 = vpop.f32.mrf.mxu3 }
 0x525   : > { %v2981_v20 = vadd.f32 %v2980_v26, %v7890_v32  ;;  %v3001_v26 = vmul.f32 0.2, %v2978_v58 }
 0x527   : > { %v3002_v3 = vmul.f32 0.2, %v2981_v20  ;;  %vm2994_vm11 = vcmp.gt.f32.partialorder %v2981_v20, 0.0 }
 0x529   : > { %7119 = vmatmul.msk.bf16.gmra.mxu1 %vm909_vm3, %v9087_v47  ;;  %v3010_v44 = vsel %vm2994_vm11, %v2981_v20, %v3002_v3 }
 0x52c   : > { %v2982_v42 = vpop.f32.mrf.mxu3 }
 0x52d   : > { %v2983_v63 = vadd.f32 %v2982_v42, %v7896_v38 }
 0x52f   : > { %v3003_v9 = vmul.f32 0.2, %v2983_v63  ;;  %vm2995_vm10 = vcmp.gt.f32.partialorder %v2983_v63, 0.0 }
 0x533   : > { %7129 = vmatmul.msk.bf16.gmra.mxu2 %vm909_vm3, %v9045_v4 }
 0x534   : > { %v2985_v1 = vpop.f32.mrf.mxu3 }
 0x535   : > { %v2986_v55 = vadd.f32 %v2985_v1, %v7888_v31 }
 0x537   : > { %v3004_v24 = vmul.f32 0.2, %v2986_v55  ;;  %vm2996_vm8 = vcmp.gt.f32.partialorder %v2986_v55, 0.0 }
 0x539   : > { %7120 = vmatmul.msk.bf16.gmra.mxu1 %vm909_vm3, %v9097_v22  ;;  %v3012_v14 = vsel %vm2996_vm8, %v2986_v55, %v3004_v24  ;;  %v2999_v55 = vmul.f32 0.2, %v2973_v12  ;;  %v3009_v24 = vsel %vm2993_vm12, %v2978_v58, %v3001_v26 }
 0x53c   : > { %v2987_v49 = vpop.f32.mrf.mxu3 }
 0x53d   : > { %v2988_v30 = vadd.f32 %v2987_v49, %v7894_v37  ;;  %v3011_v49 = vsel %vm2995_vm10, %v2983_v63, %v3003_v9  ;;  %v3008_v63 = vsel %vm2992_vm13, %v2976_v54, %v3000_v10  ;;  %v3007_v9 = vsel %vm2991_vm14, %v2973_v12, %v2999_v55 }
 0x53e   : > { %v3016_v61 = vpack.c.bf16 %v3011_v49, %v3010_v44  ;;  %v3015_v45 = vpack.c.bf16 %v3009_v24, %v3008_v63  ;;  %v12724_v10 = vmax.f32 %v8856_v33, %v8926_v53  ;;  %v12726_v33 = vmax.f32 %v8872_v48, %v8942_v23 }
 0x53f   : > { %vm2997_vm9 = vcmp.gt.f32.partialorder %v2988_v30, 0.0  ;;  %v3005_v34 = vmul.f32 0.2, %v2988_v30  ;;  %v12728_v23 = vmax.f32 %v8890_v13, %v8959_v60  ;;  %v12730_v13 = vmax.f32 %v8906_v41, %v8976_v5 }
 0x541   : > { %v3013_v1 = vsel %vm2997_vm9, %v2988_v30, %v3005_v34  ;;  %v2998_v30 = vmul.f32 0.2, %v2971_v28 }
 0x542   : > { %v3017_v42 = vpack.c.bf16 %v3013_v1, %v3012_v14 }
 0x543   : > { %7130 = vmatmul.msk.bf16.gmra.mxu2 %vm909_vm3, %v9067_v19  ;;  %v3006_v20 = vsel %vm2990_vm15, %v2971_v28, %v2998_v30 }
 0x544   : > { %3022 = vmatpush.bf16.msrb.mxu0 %v3017_v42  ;;  %v3014_v44 = vpack.c.bf16 %v3007_v9, %v3006_v20 }
 0x548   : > { %3023 = vmatpush.bf16.msrb.mxu0 %v3016_v61  ;;  %v7161_v61 = vld [vmem:[%s7788_s29 + $0x38] sm:$0x7] }
 0x549   : > { %7121 = vmatmul.msk.bf16.gmra.mxu1 %vm909_vm3, %v9114_v39  ;;  %v3309_v55 = vsel %vm736_vm0, %v7161_v61, 0 }
 0x54a   : > { %3318 = vmatpush.bf16.msrb.mxu2 %v3309_v55 }
 0x54c   : > { %3024 = vmatpush.bf16.msrb.mxu0 %v3015_v45 }
 0x550   : > { %3025 = vmatpush.bf16.msrb.mxu0 %v3014_v44 }
 0x553   : > { %7131 = vmatmul.msk.bf16.gmra.mxu2 %vm909_vm3, %v9078_v29  ;;  %7140 = vmatmul.msk.bf16.vlgmr.msrb.gmra.mxu0 %vm909_vm3, %v9016_v62 }
 0x556   : > { %v2677_v58 = vpop.f32.mrf.mxu1 }
 0x557   : > { %v2678_v34 = vadd.f32 %v2677_v58, %v8069_v52 }
 0x559   : > { %vm2717_vm2 = vcmp.gt.f32.partialorder %v2678_v34, 0.0  ;;  %v2733_v3 = vmul.f32 0.2, %v2678_v34  ;;  %7149 = vmatmul.msk.bf16.vlgmr.msrb.gmra.mxu1 %vm723_vm1, %v8796_v16 }
 0x55b   : > { %v2749_v12 = vsel %vm2717_vm2, %v2678_v34, %v2733_v3 }
 0x55c   : > { %v9128_v54 = vmax.f32 %v12724_v10, %v2749_v12 }
 0x55e   : > { %v9130_v14 = vpop.f32.mrf.mxu1 }
 0x55f   : > { %12725 = vst [vmem:[#allocation86_spill] sm:$0xff] %v9130_v14 }
 0x563   : > { %7132 = vmatmul.msk.bf16.gmra.mxu2 %vm909_vm3, %v9087_v47  ;;  %7141 = vmatmul.msk.bf16.gmra.mxu0 %vm909_vm3, %v9030_v17 }
 0x566   : > { %v2682_v1 = vpop.f32.mrf.mxu1 }
 0x567   : > { %v2683_v42 = vadd.f32 %v2682_v1, %v8087_v0 }
 0x569   : > { %vm2719_vm4 = vcmp.gt.f32.partialorder %v2683_v42, 0.0  ;;  %v2735_v26 = vmul.f32 0.2, %v2683_v42  ;;  %7150 = vmatmul.msk.bf16.gmra.mxu1 %vm723_vm1, %v8811_v36 }
 0x56b   : > { %v2751_v49 = vsel %vm2719_vm4, %v2683_v42, %v2735_v26 }
 0x56c   : > { %v9142_v53 = vmax.f32 %v12726_v33, %v2751_v49  ;;  %v12732_v33 = vmax.f32 %v8924_v2, %v9000_v40 }
 0x56e   : > { %v9144_v28 = vpop.f32.mrf.mxu1 }
 0x56f   : > { %12727 = vst [vmem:[#allocation87_spill] sm:$0xff] %v9144_v28 }
 0x573   : > { %7133 = vmatmul.msk.bf16.gmra.mxu2 %vm909_vm3, %v9097_v22  ;;  %7142 = vmatmul.msk.bf16.gmra.mxu0 %vm909_vm3, %v9045_v4 }
 0x576   : > { %v2687_v24 = vpop.f32.mrf.mxu1 }
 0x577   : > { %v2688_v30 = vadd.f32 %v2687_v24, %v8109_v25 }
 0x579   : > { %vm2721_vm5 = vcmp.gt.f32.partialorder %v2688_v30, 0.0  ;;  %v2737_v63 = vmul.f32 0.2, %v2688_v30  ;;  %7151 = vmatmul.msk.bf16.gmra.mxu1 %vm723_vm1, %v8828_v27 }
 0x57b   : > { %v2753_v48 = vsel %vm2721_vm5, %v2688_v30, %v2737_v63 }
 0x57c   : > { %v9158_v45 = vmax.f32 %v12728_v23, %v2753_v48 }
 0x57e   : > { %v9160_v9 = vpop.f32.mrf.mxu1 }
 0x57f   : > { %12729 = vst [vmem:[#allocation88_spill] sm:$0xff] %v9160_v9 }
 0x583   : > { %7134 = vmatmul.msk.bf16.gmra.mxu2 %vm909_vm3, %v9114_v39  ;;  %7143 = vmatmul.msk.bf16.gmra.mxu0 %vm909_vm3, %v9067_v19 }
 0x586   : > { %v2692_v20 = vpop.f32.mrf.mxu1 }
 0x587   : > { %v2693_v44 = vadd.f32 %v2692_v20, %v8133_v46 }
 0x589   : > { %vm2723_vm6 = vcmp.gt.f32.partialorder %v2693_v44, 0.0  ;;  %v2739_v58 = vmul.f32 0.2, %v2693_v44  ;;  %7152 = vmatmul.msk.bf16.gmra.mxu1 %vm723_vm1, %v8843_v8 }
 0x58b   : > { %v2755_v34 = vsel %vm2723_vm6, %v2693_v44, %v2739_v58  ;;  %v12735_v58 = vmax.f32 %v8947_v43, %v9011_v59 }
 0x58c   : > { %v9172_v60 = vmax.f32 %v12730_v13, %v2755_v34 }
 0x58e   : > { %v9174_v3 = vpop.f32.mrf.mxu1 }
 0x58f   : > { %12731 = vst [vmem:[#allocation89_spill] sm:$0xff] %v9174_v3 }
 0x593   : > { %7144 = vmatmul.msk.bf16.gmra.mxu0 %vm909_vm3, %v9078_v29  ;;  %7162 = vmatmul.msk.bf16.vlgmr.msrb.gmra.mxu2 %vm723_vm1, %v8796_v16 }
 0x596   : > { %v2697_v12 = vpop.f32.mrf.mxu1  ;;  %v2852_v10 = vpop.f32.mrf.mxu2 }
 0x597   : > { %v2698_v1 = vadd.f32 %v2697_v12, %v8155_v6  ;;  %v2853_v42 = vadd.f32 %v2852_v10, %v8069_v52 }
 0x599   : > { %vm2725_vm7 = vcmp.gt.f32.partialorder %v2698_v1, 0.0  ;;  %v2741_v26 = vmul.f32 0.2, %v2698_v1  ;;  %vm2892_vm8 = vcmp.gt.f32.partialorder %v2853_v42, 0.0  ;;  %v2908_v41 = vmul.f32 0.2, %v2853_v42 }
 0x59b   : > { %v2757_v5 = vsel %vm2725_vm7, %v2698_v1, %v2741_v26  ;;  %v9182_v49 = vsel %vm2892_vm8, %v2853_v42, %v2908_v41  ;;  %v7174_v1 = vld [vmem:[%s7788_s29 + $0x3c] sm:$0x7] }
 0x59c   : > { %v9187_v61 = vmax.f32 %v12732_v33, %v2757_v5  ;;  %v2940_v55 = vmax.f32 %v9128_v54, %v9182_v49  ;;  %v3484_v42 = vsel %vm736_vm0, %v7174_v1, 0 }
 0x59d   : > { %3493 = vmatpush.bf16.msra.mxu0 %v3484_v42 }
 0x59e   : > { %v9191_v24 = vpop.f32.mrf.mxu1  ;;  %v9193_v30 = vpop.f32.mrf.mxu2 }
 0x59f   : > { %12733 = vst [vmem:[#allocation90_spill] sm:$0xff] %v9191_v24 }
 0x5a0   : > { %12734 = vst [vmem:[#allocation91_spill] sm:$0xff] %v9193_v30 }
 0x5a3   : > { %7145 = vmatmul.msk.bf16.gmra.mxu0 %vm909_vm3, %v9087_v47  ;;  %7163 = vmatmul.msk.bf16.gmra.mxu2 %vm723_vm1, %v8811_v36 }
 0x5a6   : > { %v2702_v63 = vpop.f32.mrf.mxu1  ;;  %v2857_v48 = vpop.f32.mrf.mxu2 }
 0x5a7   : > { %v2703_v40 = vadd.f32 %v2702_v63, %v8187_v7  ;;  %v2858_v2 = vadd.f32 %v2857_v48, %v8087_v0  ;;  %v12738_v48 = vmax.f32 %v8964_v15, %v9025_v21 }
 0x5a9   : > { %vm2727_vm9 = vcmp.gt.f32.partialorder %v2703_v40, 0.0  ;;  %v2743_v23 = vmul.f32 0.2, %v2703_v40  ;;  %vm2894_vm10 = vcmp.gt.f32.partialorder %v2858_v2, 0.0  ;;  %v2910_v54 = vmul.f32 0.2, %v2858_v2 }
 0x5ab   : > { %v2759_v20 = vsel %vm2727_vm9, %v2703_v40, %v2743_v23  ;;  %v9201_v44 = vsel %vm2894_vm10, %v2858_v2, %v2910_v54 }
 0x5ac   : > { %v9206_v34 = vmax.f32 %v12735_v58, %v2759_v20  ;;  %v2942_v13 = vmax.f32 %v9142_v53, %v9201_v44 }
 0x5ae   : > { %v9210_v12 = vpop.f32.mrf.mxu1  ;;  %v9212_v10 = vpop.f32.mrf.mxu2 }
 0x5af   : > { %12736 = vst [vmem:[#allocation92_spill] sm:$0xff] %v9210_v12 }
 0x5b0   : > { %12737 = vst [vmem:[#allocation93_spill] sm:$0xff] %v9212_v10 }
 0x5b3   : > { %7146 = vmatmul.msk.bf16.gmra.mxu0 %vm909_vm3, %v9097_v22  ;;  %7164 = vmatmul.msk.bf16.gmra.mxu2 %vm723_vm1, %v8828_v27 }
 0x5b6   : > { %v2707_v43 = vpop.f32.mrf.mxu1  ;;  %v2862_v59 = vpop.f32.mrf.mxu2 }
 0x5b7   : > { %v2708_v26 = vadd.f32 %v2707_v43, %v8222_v11  ;;  %v2863_v41 = vadd.f32 %v2862_v59, %v8109_v25  ;;  %v12741_v59 = vmax.f32 %v8981_v57, %v9039_v18 }
 0x5b9   : > { %vm2729_vm11 = vcmp.gt.f32.partialorder %v2708_v26, 0.0  ;;  %v2745_v5 = vmul.f32 0.2, %v2708_v26  ;;  %vm2896_vm12 = vcmp.gt.f32.partialorder %v2863_v41, 0.0  ;;  %v2912_v49 = vmul.f32 0.2, %v2863_v41 }
 0x5bb   : > { %v2761_v33 = vsel %vm2729_vm11, %v2708_v26, %v2745_v5  ;;  %v9222_v63 = vsel %vm2896_vm12, %v2863_v41, %v2912_v49 }
 0x5bc   : > { %v9227_v40 = vmax.f32 %v12738_v48, %v2761_v33  ;;  %v2944_v2 = vmax.f32 %v9158_v45, %v9222_v63 }
 0x5be   : > { %v9231_v23 = vpop.f32.mrf.mxu1  ;;  %v9233_v54 = vpop.f32.mrf.mxu2 }
 0x5bf   : > { %12739 = vst [vmem:[#allocation94_spill] sm:$0xff] %v9231_v23 }
 0x5c0   : > { %12740 = vst [vmem:[#allocation95_spill] sm:$0xff] %v9233_v54 }
 0x5c3   : > { %7147 = vmatmul.msk.bf16.gmra.mxu0 %vm909_vm3, %v9114_v39  ;;  %7165 = vmatmul.msk.bf16.gmra.mxu2 %vm723_vm1, %v8843_v8 }
 0x5c6   : > { %v2712_v20 = vpop.f32.mrf.mxu1  ;;  %v2867_v58 = vpop.f32.mrf.mxu2 }
 0x5c7   : > { %v2713_v1 = vadd.f32 %v2712_v20, %v8255_v56  ;;  %v2868_v15 = vadd.f32 %v2867_v58, %v8133_v46 }
 0x5c9   : > { %vm2731_vm13 = vcmp.gt.f32.partialorder %v2713_v1, 0.0  ;;  %v2747_v21 = vmul.f32 0.2, %v2713_v1  ;;  %vm2898_vm14 = vcmp.gt.f32.partialorder %v2868_v15, 0.0  ;;  %v2914_v45 = vmul.f32 0.2, %v2868_v15 }
 0x5cb   : > { %v2763_v42 = vsel %vm2731_vm13, %v2713_v1, %v2747_v21  ;;  %v9241_v43 = vsel %vm2898_vm14, %v2868_v15, %v2914_v45 }
 0x5cc   : > { %v9246_v26 = vmax.f32 %v12741_v59, %v2763_v42  ;;  %v2946_v41 = vmax.f32 %v9172_v60, %v9241_v43 }
 0x5ce   : > { %v9250_v5 = vpop.f32.mrf.mxu1  ;;  %v9252_v49 = vpop.f32.mrf.mxu2 }
 0x5cf   : > { %12742 = vst [vmem:[#allocation96_spill] sm:$0xff] %v9250_v5 }
 0x5d0   : > { %12743 = vst [vmem:[#allocation97_spill] sm:$0xff] %v9252_v49  ;;  %v3027_v33 = vpop.f32.mrf.mxu0  ;;  %v12752_v49 = vld [vmem:[#allocation2_spill] sm:$0xff] }
 0x5d1   : > { %v3028_v63 = vadd.f32 %v3027_v33, %v8069_v52 }
 0x5d3   : > { %7175 = vmatmul.msk.bf16.vlgmr.msra.gmra.mxu0 %vm723_vm1, %v8796_v16  ;;  %vm3067_vm15 = vcmp.gt.f32.partialorder %v3028_v63, 0.0  ;;  %v3083_v48 = vmul.f32 0.2, %v3028_v63 }
 0x5d5   : > { %v3099_v20 = vsel %vm3067_vm15, %v3028_v63, %v3083_v48 }
 0x5d6   : > { %v2872_v58 = vpop.f32.mrf.mxu2  ;;  %v9257_v57 = vpop.f32.mrf.mxu1  ;;  %v9259_v18 = vmax.f32 %v2940_v55, %v3099_v20 }
 0x5d7   : > { %v2873_v60 = vadd.f32 %v2872_v58, %v8155_v6 }
 0x5d8   : > { %v9262_v1 = vpop.f32.mrf.mxu0 }
 0x5d9   : > { %12744 = vst [vmem:[#allocation98_spill] sm:$0xff] %v9262_v1  ;;  %vm2900_vm2 = vcmp.gt.f32.partialorder %v2873_v60, 0.0  ;;  %v2916_v15 = vmul.f32 0.2, %v2873_v60 }
 0x5db   : > { %v9264_v21 = vsel %vm2900_vm2, %v2873_v60, %v2916_v15 }
 0x5de   : > { %v9268_v16 = vpop.f32.mrf.mxu2  ;;  %v9270_v42 = vpop.f32.mrf.mxu1 }
 0x5df   : > { %12745 = vst [vmem:[#allocation99_spill] sm:$0xff] %v9268_v16 }
 0x5e0   : > { %v3032_v43 = vpop.f32.mrf.mxu0 }
 0x5e1   : > { %v3033_v59 = vadd.f32 %v3032_v43, %v8087_v0 }
 0x5e3   : > { %7176 = vmatmul.msk.bf16.gmra.mxu0 %vm723_vm1, %v8811_v36  ;;  %vm3069_vm4 = vcmp.gt.f32.partialorder %v3033_v59, 0.0  ;;  %v3085_v55 = vmul.f32 0.2, %v3033_v59 }
 0x5e5   : > { %v3101_v33 = vsel %vm3069_vm4, %v3033_v59, %v3085_v55 }
 0x5e6   : > { %v2877_v63 = vpop.f32.mrf.mxu2  ;;  %v3150_v48 = vpop.f32.mrf.mxu1  ;;  %v9278_v20 = vmax.f32 %v2942_v13, %v3101_v33 }
 0x5e7   : > { %v2878_v58 = vadd.f32 %v2877_v63, %v8187_v7 }
 0x5e8   : > { %v9281_v60 = vpop.f32.mrf.mxu0 }
 0x5e9   : > { %12746 = vst [vmem:[#allocation100_spill] sm:$0xff] %v9281_v60  ;;  %vm2902_vm5 = vcmp.gt.f32.partialorder %v2878_v58, 0.0  ;;  %v2918_v15 = vmul.f32 0.2, %v2878_v58 }
 0x5eb   : > { %v9283_v43 = vsel %vm2902_vm5, %v2878_v58, %v2918_v15 }
 0x5ee   : > { %v9287_v45 = vpop.f32.mrf.mxu2  ;;  %v3152_v59 = vpop.f32.mrf.mxu1 }
 0x5ef   : > { %12747 = vst [vmem:[#allocation101_spill] sm:$0xff] %v9287_v45 }
 0x5f0   : > { %v3037_v55 = vpop.f32.mrf.mxu0 }
 0x5f1   : > { %v3038_v16 = vadd.f32 %v3037_v55, %v8109_v25 }
 0x5f3   : > { %7177 = vmatmul.msk.bf16.gmra.mxu0 %vm723_vm1, %v8828_v27  ;;  %vm3071_vm6 = vcmp.gt.f32.partialorder %v3038_v16, 0.0  ;;  %v3087_v53 = vmul.f32 0.2, %v3038_v16 }
 0x5f5   : > { %v3103_v44 = vsel %vm3071_vm6, %v3038_v16, %v3087_v53 }
 0x5f6   : > { %v2882_v13 = vpop.f32.mrf.mxu2  ;;  %v3155_v33 = vpop.f32.mrf.mxu1  ;;  %v9292_v63 = vmax.f32 %v2944_v2, %v3103_v44 }
 0x5f7   : > { %v2883_v58 = vadd.f32 %v2882_v13, %v8222_v11 }
 0x5f8   : > { %v9295_v15 = vpop.f32.mrf.mxu0 }
 0x5f9   : > { %12748 = vst [vmem:[#allocation102_spill] sm:$0xff] %v9295_v15  ;;  %vm2904_vm7 = vcmp.gt.f32.partialorder %v2883_v58, 0.0  ;;  %v2920_v36 = vmul.f32 0.2, %v2883_v58 }
 0x5fb   : > { %v9297_v45 = vsel %vm2904_vm7, %v2883_v58, %v2920_v36 }
 0x5fe   : > { %v9301_v5 = vpop.f32.mrf.mxu2  ;;  %v3157_v27 = vpop.f32.mrf.mxu1 }
 0x5ff   : > { %12749 = vst [vmem:[#allocation103_spill] sm:$0xff] %v9301_v5  ;;  %v3158_v24 = vadd.f32 %v3157_v27, %v7896_v38  ;;  %v3151_v27 = vadd.f32 %v3150_v48, %v7892_v35  ;;  %v3146_v48 = vadd.f32 %v9257_v57, %v7908_v50 }
 0x600   : > { %v3042_v23 = vpop.f32.mrf.mxu0 }
 0x601   : > { %v3043_v16 = vadd.f32 %v3042_v23, %v8133_v46  ;;  %vm3170_vm12 = vcmp.gt.f32.partialorder %v3158_v24, 0.0  ;;  %vm3167_vm2 = vcmp.gt.f32.partialorder %v3151_v27, 0.0  ;;  %vm3165_vm5 = vcmp.gt.f32.partialorder %v3146_v48, 0.0 }
 0x603   : > { %7178 = vmatmul.msk.bf16.gmra.mxu0 %vm723_vm1, %v8843_v8  ;;  %vm3073_vm8 = vcmp.gt.f32.partialorder %v3043_v16, 0.0  ;;  %v3089_v2 = vmul.f32 0.2, %v3043_v16 }
 0x605   : > { %v3105_v53 = vsel %vm3073_vm8, %v3043_v16, %v3089_v2 }
 0x606   : > { %v2887_v44 = vpop.f32.mrf.mxu2  ;;  %v3160_v13 = vpop.f32.mrf.mxu1  ;;  %v9306_v12 = vmax.f32 %v2946_v41, %v3105_v53  ;;  %v3156_v41 = vadd.f32 %v3155_v33, %v7890_v32 }
 0x607   : > { %v2888_v36 = vadd.f32 %v2887_v44, %v8255_v56  ;;  %v3161_v23 = vadd.f32 %v3160_v13, %v7888_v31 }
 0x608   : > { %v9309_v58 = vpop.f32.mrf.mxu0  ;;  %v3177_v3 = vmul.f32 0.2, %v3156_v41  ;;  %vm3169_vm13 = vcmp.gt.f32.partialorder %v3156_v41, 0.0 }
 0x609   : > { %12750 = vst [vmem:[#allocation104_spill] sm:$0xff] %v9309_v58  ;;  %vm2906_vm9 = vcmp.gt.f32.partialorder %v2888_v36, 0.0  ;;  %v2922_v55 = vmul.f32 0.2, %v2888_v36  ;;  %v3179_v53 = vmul.f32 0.2, %v3161_v23 }
 0x60a   : > { %vm3171_vm10 = vcmp.gt.f32.partialorder %v3161_v23, 0.0 }
 0x60b   : > { %v9311_v5 = vsel %vm2906_vm9, %v2888_v36, %v2922_v55  ;;  %v3153_v55 = vadd.f32 %v3152_v59, %v12752_v49  ;;  %v3178_v36 = vmul.f32 0.2, %v3158_v24 }
 0x60d   : > { %v3176_v9 = vmul.f32 0.2, %v3153_v55  ;;  %v3186_v59 = vsel %vm3170_vm12, %v3158_v24, %v3178_v36  ;;  %vm3168_vm15 = vcmp.gt.f32.partialorder %v3153_v55, 0.0 }
 0x60e   : > { %v9317_v16 = vpop.f32.mrf.mxu2  ;;  %v3162_v2 = vpop.f32.mrf.mxu1 }
 0x60f   : > { %12751 = vst [vmem:[#allocation105_spill] sm:$0xff] %v9317_v16  ;;  %v3163_v44 = vadd.f32 %v3162_v2, %v7894_v37  ;;  %v3187_v16 = vsel %vm3171_vm10, %v3161_v23, %v3179_v53  ;;  %v3148_v2 = vadd.f32 %v9270_v42, %v7910_v51  ;;  %v12753_v23 = vmax.f32 %v9187_v61, %v9264_v21 }
 0x610   : > { %v3047_v58 = vpop.f32.mrf.mxu0 }
 0x611   : > { %vm3172_vm11 = vcmp.gt.f32.partialorder %v3163_v44, 0.0  ;;  %v3180_v13 = vmul.f32 0.2, %v3163_v44  ;;  %v3048_v8 = vadd.f32 %v3047_v58, %v8155_v6  ;;  %v3175_v58 = vmul.f32 0.2, %v3151_v27 }
 0x612   : > { %v3174_v24 = vmul.f32 0.2, %v3148_v2  ;;  %vm3166_vm4 = vcmp.gt.f32.partialorder %v3148_v2, 0.0 }
 0x613   : > { %v3188_v15 = vsel %vm3172_vm11, %v3163_v44, %v3180_v13  ;;  %vm3075_vm14 = vcmp.gt.f32.partialorder %v3048_v8, 0.0  ;;  %v3091_v54 = vmul.f32 0.2, %v3048_v8  ;;  %v3184_v44 = vsel %vm3168_vm15, %v3153_v55, %v3176_v9 }
 0x614   : > { %v3192_v33 = vpack.c.bf16 %v3188_v15, %v3187_v16  ;;  %v3185_v16 = vsel %vm3169_vm13, %v3156_v41, %v3177_v3  ;;  %v3182_v57 = vsel %vm3166_vm4, %v3148_v2, %v3174_v24  ;;  %v12755_v9 = vmax.f32 %v9206_v34, %v9283_v43 }
 0x615   : > { %v3107_v60 = vsel %vm3075_vm14, %v3048_v8, %v3091_v54  ;;  %v3191_v42 = vpack.c.bf16 %v3186_v59, %v3185_v16  ;;  %v3173_v54 = vmul.f32 0.2, %v3146_v48  ;;  %v3183_v8 = vsel %vm3167_vm2, %v3151_v27, %v3175_v58 }
 0x616   : > { %3197 = vmatpush.bf16.msra.mxu3 %v3192_v33  ;;  %v9326_v10 = vpop.f32.mrf.mxu2  ;;  %v9333_v15 = vmax.f32 %v12753_v23, %v3107_v60  ;;  %v3190_v36 = vpack.c.bf16 %v3184_v44, %v3183_v8 }
 0x617   : > { %v3181_v33 = vsel %vm3165_vm5, %v3146_v48, %v3173_v54 }
 0x618   : > { %v9335_v53 = vpop.f32.mrf.mxu0  ;;  %v3189_v21 = vpack.c.bf16 %v3182_v57, %v3181_v33  ;;  %v12759_v33 = vmax.f32 %v9246_v26, %v9311_v5 }
 0x619   : > { %12754 = vst [vmem:[#allocation2_spill] sm:$0xff] %v9335_v53 }
 0x61a   : > { %3198 = vmatpush.bf16.msra.mxu3 %v3191_v42  ;;  %v12757_v42 = vmax.f32 %v9227_v40, %v9297_v45 }
 0x61e   : > { %3199 = vmatpush.bf16.msra.mxu3 %v3190_v36  ;;  %v3322_v13 = vpop.f32.mrf.mxu2 }
 0x620   : > { %v3052_v61 = vpop.f32.mrf.mxu0 }
 0x621   : > { %v3053_v3 = vadd.f32 %v3052_v61, %v8187_v7 }
 0x622   : > { %3200 = vmatpush.bf16.msra.mxu3 %v3189_v21 }
 0x623   : > { %vm3077_vm6 = vcmp.gt.f32.partialorder %v3053_v3, 0.0  ;;  %v3093_v60 = vmul.f32 0.2, %v3053_v3 }
 0x625   : > { %v3109_v41 = vsel %vm3077_vm6, %v3053_v3, %v3093_v60  ;;  %7153 = vmatmul.msk.bf16.vlgmr.msra.gmra.mxu3 %vm909_vm3, %v9016_v62 }
 0x626   : > { %v9343_v55 = vmax.f32 %v12755_v9, %v3109_v41  ;;  %v3325_v27 = vpop.f32.mrf.mxu2 }
 0x628   : > { %v9345_v2 = vpop.f32.mrf.mxu0 }
 0x629   : > { %12756 = vst [vmem:[#allocation106_spill] sm:$0xff] %v9345_v2 }
 0x62e   : > { %v3327_v59 = vpop.f32.mrf.mxu2 }
 0x62f   : > { %v3328_v26 = vadd.f32 %v3327_v59, %v12752_v49  ;;  %v3321_v59 = vadd.f32 %v9326_v10, %v7908_v50 }
 0x630   : > { %v3057_v48 = vpop.f32.mrf.mxu0 }
 0x631   : > { %v3058_v58 = vadd.f32 %v3057_v48, %v8222_v11  ;;  %vm3343_vm13 = vcmp.gt.f32.partialorder %v3328_v26, 0.0  ;;  %vm3340_vm2 = vcmp.gt.f32.partialorder %v3321_v59, 0.0 }
 0x633   : > { %vm3079_vm7 = vcmp.gt.f32.partialorder %v3058_v58, 0.0  ;;  %v3095_v23 = vmul.f32 0.2, %v3058_v58 }
 0x635   : > { %v3111_v16 = vsel %vm3079_vm7, %v3058_v58, %v3095_v23  ;;  %7154 = vmatmul.msk.bf16.gmra.mxu3 %vm909_vm3, %v9030_v17 }
 0x636   : > { %v9353_v24 = vmax.f32 %v12757_v42, %v3111_v16  ;;  %v3330_v34 = vpop.f32.mrf.mxu2  ;;  %v3326_v16 = vadd.f32 %v3325_v27, %v7892_v35 }
 0x637   : > { %v3331_v41 = vadd.f32 %v3330_v34, %v7890_v32  ;;  %v3323_v34 = vadd.f32 %v3322_v13, %v7910_v51  ;;  %v3348_v13 = vmul.f32 0.2, %v3321_v59 }
 0x638   : > { %v9355_v43 = vpop.f32.mrf.mxu0  ;;  %vm3342_vm14 = vcmp.gt.f32.partialorder %v3326_v16, 0.0 }
 0x639   : > { %12758 = vst [vmem:[#allocation107_spill] sm:$0xff] %v9355_v43  ;;  %v3352_v42 = vmul.f32 0.2, %v3331_v41  ;;  %vm3344_vm12 = vcmp.gt.f32.partialorder %v3331_v41, 0.0  ;;  %vm3341_vm15 = vcmp.gt.f32.partialorder %v3323_v34, 0.0  ;;  %v3356_v10 = vsel %vm3340_vm2, %v3321_v59, %v3348_v13 }
 0x63b   : > { %v3360_v27 = vsel %vm3344_vm12, %v3331_v41, %v3352_v42 }
 0x63e   : > { %v3332_v44 = vpop.f32.mrf.mxu2 }
 0x63f   : > { %v3333_v3 = vadd.f32 %v3332_v44, %v7896_v38 }
 0x640   : > { %v3062_v54 = vpop.f32.mrf.mxu0 }
 0x641   : > { %v3063_v8 = vadd.f32 %v3062_v54, %v8255_v56  ;;  %v3353_v5 = vmul.f32 0.2, %v3333_v3  ;;  %vm3345_vm11 = vcmp.gt.f32.partialorder %v3333_v3, 0.0 }
 0x643   : > { %vm3081_vm8 = vcmp.gt.f32.partialorder %v3063_v8, 0.0  ;;  %v3097_v36 = vmul.f32 0.2, %v3063_v8 }
 0x645   : > { %v3113_v57 = vsel %vm3081_vm8, %v3063_v8, %v3097_v36  ;;  %7155 = vmatmul.msk.bf16.gmra.mxu3 %vm909_vm3, %v9045_v4  ;;  %v3351_v36 = vmul.f32 0.2, %v3328_v26 }
 0x646   : > { %v9363_v61 = vmax.f32 %v12759_v33, %v3113_v57  ;;  %v3335_v40 = vpop.f32.mrf.mxu2  ;;  %v3361_v57 = vsel %vm3345_vm11, %v3333_v3, %v3353_v5  ;;  %v3350_v33 = vmul.f32 0.2, %v3326_v16 }
 0x647   : > { %v3336_v21 = vadd.f32 %v3335_v40, %v7888_v31 }
 0x648   : > { %v9365_v45 = vpop.f32.mrf.mxu0 }
 0x649   : > { %12760 = vst [vmem:[#allocation108_spill] sm:$0xff] %v9365_v45  ;;  %v3354_v9 = vmul.f32 0.2, %v3336_v21  ;;  %vm3346_vm9 = vcmp.gt.f32.partialorder %v3336_v21, 0.0 }
 0x64b   : > { %v3362_v54 = vsel %vm3346_vm9, %v3336_v21, %v3354_v9  ;;  %v3366_v21 = vpack.c.bf16 %v3361_v57, %v3360_v27  ;;  %v3359_v9 = vsel %vm3343_vm13, %v3328_v26, %v3351_v36 }
 0x64e   : > { %v3337_v60 = vpop.f32.mrf.mxu2 }
 0x64f   : > { %v3338_v48 = vadd.f32 %v3337_v60, %v7894_v37  ;;  %v3349_v60 = vmul.f32 0.2, %v3323_v34 }
 0x650   : > { %v9371_v58 = vpop.f32.mrf.mxu0 }
 0x651   : > { %vm3347_vm10 = vcmp.gt.f32.partialorder %v3338_v48, 0.0  ;;  %v3355_v23 = vmul.f32 0.2, %v3338_v48  ;;  %v3357_v5 = vsel %vm3341_vm15, %v3323_v34, %v3349_v60 }
 0x652   : > { %v3364_v41 = vpack.c.bf16 %v3357_v5, %v3356_v10 }
 0x653   : > { %v3363_v44 = vsel %vm3347_vm10, %v3338_v48, %v3355_v23  ;;  %v3358_v48 = vsel %vm3342_vm14, %v3326_v16, %v3350_v33  ;;  %v7187_v23 = vld [vmem:[%s7788_s29 + $0x40] sm:$0x7] }
 0x654   : > { %v3367_v8 = vpack.c.bf16 %v3363_v44, %v3362_v54  ;;  %v3365_v54 = vpack.c.bf16 %v3359_v9, %v3358_v48  ;;  %v3659_v3 = vsel %vm736_vm0, %v7187_v23, 0 }
 0x655   : > { %7156 = vmatmul.msk.bf16.gmra.mxu3 %vm909_vm3, %v9067_v19 }
 0x656   : > { %3372 = vmatpush.bf16.msra.mxu1 %v3367_v8  ;;  %3668 = vmatpush.bf16.msrb.mxu3 %v3659_v3 }
 0x658   : > { %v3497_v40 = vpop.f32.mrf.mxu0 }
 0x659   : > { %v3498_v5 = vadd.f32 %v3497_v40, %v7910_v51 }
 0x65a   : > { %3373 = vmatpush.bf16.msra.mxu1 %v3366_v21 }
 0x65b   : > { %vm3516_vm10 = vcmp.gt.f32.partialorder %v3498_v5, 0.0 }
 0x65e   : > { %3374 = vmatpush.bf16.msra.mxu1 %v3365_v54 }
 0x660   : > { %v3500_v44 = vpop.f32.mrf.mxu0 }
 0x661   : > { %v3501_v13 = vadd.f32 %v3500_v44, %v7892_v35 }
 0x662   : > { %3375 = vmatpush.bf16.msra.mxu1 %v3364_v41 }
 0x663   : > { %vm3517_vm9 = vcmp.gt.f32.partialorder %v3501_v13, 0.0 }
 0x665   : > { %7157 = vmatmul.msk.bf16.gmra.mxu3 %vm909_vm3, %v9078_v29  ;;  %7166 = vmatmul.msk.bf16.vlgmr.msra.gmra.mxu1 %vm909_vm3, %v9016_v62 }
 0x668   : > { %v3502_v26 = vpop.f32.mrf.mxu0 }
 0x669   : > { %v3503_v21 = vadd.f32 %v3502_v26, %v12752_v49  ;;  %v3496_v26 = vadd.f32 %v9371_v58, %v7908_v50 }
 0x66b   : > { %v3526_v10 = vmul.f32 0.2, %v3503_v21  ;;  %vm3518_vm8 = vcmp.gt.f32.partialorder %v3503_v21, 0.0  ;;  %vm3515_vm11 = vcmp.gt.f32.partialorder %v3496_v26, 0.0 }
 0x66d   : > { %v3534_v44 = vsel %vm3518_vm8, %v3503_v21, %v3526_v10 }
 0x670   : > { %v3505_v16 = vpop.f32.mrf.mxu0 }
 0x671   : > { %v3506_v59 = vadd.f32 %v3505_v16, %v7890_v32  ;;  %v3525_v16 = vmul.f32 0.2, %v3501_v13 }
 0x673   : > { %v3527_v48 = vmul.f32 0.2, %v3506_v59  ;;  %vm3519_vm7 = vcmp.gt.f32.partialorder %v3506_v59, 0.0  ;;  %v3533_v40 = vsel %vm3517_vm9, %v3501_v13, %v3525_v16  ;;  %v9446_v16 = vld [vmem:[%s12588_s1 + $0x10] sm:$0xff] }
 0x675   : > { %7158 = vmatmul.msk.bf16.gmra.mxu3 %vm909_vm3, %v9087_v47  ;;  %7167 = vmatmul.msk.bf16.gmra.mxu1 %vm909_vm3, %v9030_v17 }
 0x678   : > { %v3507_v42 = vpop.f32.mrf.mxu0 }
 0x679   : > { %v3508_v36 = vadd.f32 %v3507_v42, %v7896_v38  ;;  %v3535_v42 = vsel %vm3519_vm7, %v3506_v59, %v3527_v48 }
 0x67b   : > { %v3528_v60 = vmul.f32 0.2, %v3508_v36  ;;  %vm3520_vm6 = vcmp.gt.f32.partialorder %v3508_v36, 0.0 }
 0x67d   : > { %v3536_v41 = vsel %vm3520_vm6, %v3508_v36, %v3528_v60  ;;  %v3540_v36 = vpack.c.bf16 %v3534_v44, %v3533_v40 }
 0x680   : > { %v3510_v8 = vpop.f32.mrf.mxu0 }
 0x681   : > { %v3511_v34 = vadd.f32 %v3510_v8, %v7888_v31  ;;  %v3541_v8 = vpack.c.bf16 %v3536_v41, %v3535_v42  ;;  %v7200_v41 = vld [vmem:[%s7788_s29 + $0x44] sm:$0x7] }
 0x683   : > { %v3529_v33 = vmul.f32 0.2, %v3511_v34  ;;  %vm3521_vm4 = vcmp.gt.f32.partialorder %v3511_v34, 0.0 }
 0x685   : > { %7159 = vmatmul.msk.bf16.gmra.mxu3 %vm909_vm3, %v9097_v22  ;;  %7168 = vmatmul.msk.bf16.gmra.mxu1 %vm909_vm3, %v9045_v4  ;;  %v3537_v23 = vsel %vm3521_vm4, %v3511_v34, %v3529_v33  ;;  %v3523_v34 = vmul.f32 0.2, %v3496_v26 }
 0x687   : > { %v3531_v58 = vsel %vm3515_vm11, %v3496_v26, %v3523_v34  ;;  %v3834_v26 = vsel %vm736_vm0, %v7200_v41, 0  ;;  %v9461_v34 = vld [vmem:[%s12588_s1 + $0x18] sm:$0xff] }
 0x688   : > { %v3512_v57 = vpop.f32.mrf.mxu0  ;;  %3843 = vmatpush.bf16.msrb.mxu1 %v3834_v26 }
 0x689   : > { %v3513_v27 = vadd.f32 %v3512_v57, %v7894_v37  ;;  %v3524_v57 = vmul.f32 0.2, %v3498_v5 }
 0x68b   : > { %vm3522_vm5 = vcmp.gt.f32.partialorder %v3513_v27, 0.0  ;;  %v3530_v9 = vmul.f32 0.2, %v3513_v27  ;;  %v3532_v33 = vsel %vm3516_vm10, %v3498_v5, %v3524_v57 }
 0x68c   : > { %v3539_v59 = vpack.c.bf16 %v3532_v33, %v3531_v58 }
 0x68d   : > { %v3538_v54 = vsel %vm3522_vm5, %v3513_v27, %v3530_v9  ;;  %v9414_v27 = vld [vmem:[%s12588_s1] sm:$0xff] }
 0x68e   : > { %v3542_v3 = vpack.c.bf16 %v3538_v54, %v3537_v23  ;;  %v9429_v23 = vld [vmem:[%s12588_s1 + $0x8] sm:$0xff] }
 0x690   : > { %3547 = vmatpush.bf16.msra.mxu2 %v3542_v3 }
 0x694   : > { %3548 = vmatpush.bf16.msra.mxu2 %v3541_v8 }
 0x695   : > { %7160 = vmatmul.msk.bf16.gmra.mxu3 %vm909_vm3, %v9114_v39  ;;  %7169 = vmatmul.msk.bf16.gmra.mxu1 %vm909_vm3, %v9067_v19 }
 0x698   : > { %3549 = vmatpush.bf16.msra.mxu2 %v3540_v36 }
 0x69c   : > { %3550 = vmatpush.bf16.msra.mxu2 %v3539_v59 }
 0x69f   : > { %7179 = vmatmul.msk.bf16.vlgmr.msra.gmra.mxu2 %vm909_vm3, %v9016_v62 }
 0x6a5   : > { %7170 = vmatmul.msk.bf16.gmra.mxu1 %vm909_vm3, %v9078_v29  ;;  %7188 = vmatmul.msk.bf16.vlgmr.msrb.gmra.mxu3 %vm723_vm1, %v9414_v27 }
 0x6a8   : > { %v3202_v21 = vpop.f32.mrf.mxu3 }
 0x6a9   : > { %v3203_v60 = vadd.f32 %v3202_v21, %v8069_v52 }
 0x6ab   : > { %vm3242_vm12 = vcmp.gt.f32.partialorder %v3203_v60, 0.0  ;;  %v3258_v9 = vmul.f32 0.2, %v3203_v60 }
 0x6ad   : > { %v3274_v13 = vsel %vm3242_vm12, %v3203_v60, %v3258_v9 }
 0x6ae   : > { %v3290_v62 = vmax.f32 %v9259_v18, %v3274_v13 }
 0x6af   : > { %7180 = vmatmul.msk.bf16.gmra.mxu2 %vm909_vm3, %v9030_v17 }
 0x6b0   : > { %v9422_v48 = vpop.f32.mrf.mxu3 }
 0x6b1   : > { %12761 = vst [vmem:[#allocation109_spill] sm:$0xff] %v9422_v48 }
 0x6b5   : > { %7171 = vmatmul.msk.bf16.gmra.mxu1 %vm909_vm3, %v9087_v47  ;;  %7189 = vmatmul.msk.bf16.gmra.mxu3 %vm723_vm1, %v9429_v23 }
 0x6b8   : > { %v3207_v54 = vpop.f32.mrf.mxu3 }
 0x6b9   : > { %v3208_v3 = vadd.f32 %v3207_v54, %v8087_v0 }
 0x6bb   : > { %vm3244_vm13 = vcmp.gt.f32.partialorder %v3208_v3, 0.0  ;;  %v3260_v18 = vmul.f32 0.2, %v3208_v3 }
 0x6bd   : > { %v3276_v5 = vsel %vm3244_vm13, %v3208_v3, %v3260_v18 }
 0x6be   : > { %v3292_v17 = vmax.f32 %v9278_v20, %v3276_v5 }
 0x6bf   : > { %7181 = vmatmul.msk.bf16.gmra.mxu2 %vm909_vm3, %v9045_v4 }
 0x6c0   : > { %v9437_v10 = vpop.f32.mrf.mxu3 }
 0x6c1   : > { %12762 = vst [vmem:[#allocation110_spill] sm:$0xff] %v9437_v10 }
 0x6c5   : > { %7172 = vmatmul.msk.bf16.gmra.mxu1 %vm909_vm3, %v9097_v22  ;;  %7190 = vmatmul.msk.bf16.gmra.mxu3 %vm723_vm1, %v9446_v16 }
 0x6c8   : > { %v3212_v20 = vpop.f32.mrf.mxu3 }
 0x6c9   : > { %v3213_v4 = vadd.f32 %v3212_v20, %v8109_v25 }
 0x6cb   : > { %vm3246_vm14 = vcmp.gt.f32.partialorder %v3213_v4, 0.0  ;;  %v3262_v42 = vmul.f32 0.2, %v3213_v4 }
 0x6cd   : > { %v3278_v8 = vsel %vm3246_vm14, %v3213_v4, %v3262_v42 }
 0x6ce   : > { %v3294_v57 = vmax.f32 %v9292_v63, %v3278_v8 }
 0x6cf   : > { %7182 = vmatmul.msk.bf16.gmra.mxu2 %vm909_vm3, %v9067_v19 }
 0x6d0   : > { %v9454_v44 = vpop.f32.mrf.mxu3 }
 0x6d1   : > { %12763 = vst [vmem:[#allocation111_spill] sm:$0xff] %v9454_v44 }
 0x6d5   : > { %7173 = vmatmul.msk.bf16.gmra.mxu1 %vm909_vm3, %v9114_v39  ;;  %7191 = vmatmul.msk.bf16.gmra.mxu3 %vm723_vm1, %v9461_v34 }
 0x6d8   : > { %v3217_v40 = vpop.f32.mrf.mxu3 }
 0x6d9   : > { %v3218_v36 = vadd.f32 %v3217_v40, %v8133_v46 }
 0x6db   : > { %vm3248_vm15 = vcmp.gt.f32.partialorder %v3218_v36, 0.0  ;;  %v3264_v63 = vmul.f32 0.2, %v3218_v36 }
 0x6dd   : > { %v3280_v33 = vsel %vm3248_vm15, %v3218_v36, %v3264_v63  ;;  %v7213_v63 = vld [vmem:[%s7788_s29 + $0x48] sm:$0x7] }
 0x6de   : > { %v3296_v19 = vmax.f32 %v9306_v12, %v3280_v33  ;;  %v4009_v33 = vsel %vm736_vm0, %v7213_v63, 0 }
 0x6df   : > { %7183 = vmatmul.msk.bf16.gmra.mxu2 %vm909_vm3, %v9078_v29 }
 0x6e0   : > { %v9469_v58 = vpop.f32.mrf.mxu3  ;;  %4018 = vmatpush.bf16.msrb.mxu2 %v4009_v33 }
 0x6e1   : > { %12764 = vst [vmem:[#allocation112_spill] sm:$0xff] %v9469_v58 }
 0x6e2   : > { %v3377_v59 = vpop.f32.mrf.mxu1 }
 0x6e3   : > { %v3378_v21 = vadd.f32 %v3377_v59, %v8069_v52 }
 0x6e5   : > { %vm3417_vm2 = vcmp.gt.f32.partialorder %v3378_v21, 0.0  ;;  %v3433_v60 = vmul.f32 0.2, %v3378_v21  ;;  %7201 = vmatmul.msk.bf16.vlgmr.msrb.gmra.mxu1 %vm723_vm1, %v9414_v27 }
 0x6e7   : > { %v3449_v9 = vsel %vm3417_vm2, %v3378_v21, %v3433_v60 }
 0x6e8   : > { %v9474_v13 = vmax.f32 %v3290_v62, %v3449_v9  ;;  %v3222_v54 = vpop.f32.mrf.mxu3 }
 0x6e9   : > { %v3223_v3 = vadd.f32 %v3222_v54, %v8155_v6 }
 0x6ea   : > { %v9477_v12 = vpop.f32.mrf.mxu1 }
 0x6eb   : > { %12765 = vst [vmem:[#allocation113_spill] sm:$0xff] %v9477_v12  ;;  %vm3250_vm4 = vcmp.gt.f32.partialorder %v3223_v3, 0.0  ;;  %v3266_v29 = vmul.f32 0.2, %v3223_v3 }
 0x6ed   : > { %v9479_v18 = vsel %vm3250_vm4, %v3223_v3, %v3266_v29 }
 0x6ee   : > { %v3298_v5 = vmax.f32 %v9333_v15, %v9479_v18 }
 0x6ef   : > { %7184 = vmatmul.msk.bf16.gmra.mxu2 %vm909_vm3, %v9087_v47 }
 0x6f0   : > { %v9485_v41 = vpop.f32.mrf.mxu3 }
 0x6f1   : > { %12766 = vst [vmem:[#allocation114_spill] sm:$0xff] %v9485_v41 }
 0x6f2   : > { %v3382_v62 = vpop.f32.mrf.mxu1 }
 0x6f3   : > { %v3383_v26 = vadd.f32 %v3382_v62, %v8087_v0 }
 0x6f5   : > { %vm3419_vm5 = vcmp.gt.f32.partialorder %v3383_v26, 0.0  ;;  %v3435_v20 = vmul.f32 0.2, %v3383_v26  ;;  %7202 = vmatmul.msk.bf16.gmra.mxu1 %vm723_vm1, %v9429_v23 }
 0x6f7   : > { %v3451_v4 = vsel %vm3419_vm5, %v3383_v26, %v3435_v20 }
 0x6f8   : > { %v9490_v42 = vmax.f32 %v3292_v17, %v3451_v4  ;;  %v3227_v8 = vpop.f32.mrf.mxu3 }
 0x6f9   : > { %v3228_v40 = vadd.f32 %v3227_v8, %v8187_v7 }
 0x6fa   : > { %v9493_v36 = vpop.f32.mrf.mxu1 }
 0x6fb   : > { %12767 = vst [vmem:[#allocation115_spill] sm:$0xff] %v9493_v36  ;;  %vm3252_vm6 = vcmp.gt.f32.partialorder %v3228_v40, 0.0  ;;  %v3268_v47 = vmul.f32 0.2, %v3228_v40 }
 0x6fd   : > { %v9497_v59 = vsel %vm3252_vm6, %v3228_v40, %v3268_v47 }
 0x6ff   : > { %7185 = vmatmul.msk.bf16.gmra.mxu2 %vm909_vm3, %v9097_v22 }
 0x700   : > { %v9503_v17 = vpop.f32.mrf.mxu3 }
 0x701   : > { %12768 = vst [vmem:[#allocation116_spill] sm:$0xff] %v9503_v17 }
 0x702   : > { %v3387_v60 = vpop.f32.mrf.mxu1 }
 0x703   : > { %v3388_v9 = vadd.f32 %v3387_v60, %v8109_v25 }
 0x705   : > { %vm3421_vm7 = vcmp.gt.f32.partialorder %v3388_v9, 0.0  ;;  %v3437_v54 = vmul.f32 0.2, %v3388_v9  ;;  %7203 = vmatmul.msk.bf16.gmra.mxu1 %vm723_vm1, %v9446_v16 }
 0x707   : > { %v3453_v3 = vsel %vm3421_vm7, %v3388_v9, %v3437_v54 }
 0x708   : > { %v9508_v29 = vmax.f32 %v3294_v57, %v3453_v3  ;;  %v3232_v62 = vpop.f32.mrf.mxu3 }
 0x709   : > { %v3233_v26 = vadd.f32 %v3232_v62, %v8222_v11 }
 0x70a   : > { %v9511_v20 = vpop.f32.mrf.mxu1 }
 0x70b   : > { %12769 = vst [vmem:[#allocation117_spill] sm:$0xff] %v9511_v20  ;;  %vm3254_vm8 = vcmp.gt.f32.partialorder %v3233_v26, 0.0  ;;  %v3270_v22 = vmul.f32 0.2, %v3233_v26 }
 0x70d   : > { %v9513_v4 = vsel %vm3254_vm8, %v3233_v26, %v3270_v22 }
 0x70f   : > { %7186 = vmatmul.msk.bf16.gmra.mxu2 %vm909_vm3, %v9114_v39 }
 0x710   : > { %v9519_v40 = vpop.f32.mrf.mxu3 }
 0x711   : > { %12770 = vst [vmem:[#allocation118_spill] sm:$0xff] %v9519_v40  ;;  %v12778_v40 = vmax.f32 %v9353_v24, %v9513_v4 }
 0x712   : > { %v3392_v47 = vpop.f32.mrf.mxu1 }
 0x713   : > { %v3393_v57 = vadd.f32 %v3392_v47, %v8133_v46 }
 0x715   : > { %vm3423_vm9 = vcmp.gt.f32.partialorder %v3393_v57, 0.0  ;;  %v3439_v63 = vmul.f32 0.2, %v3393_v57  ;;  %7204 = vmatmul.msk.bf16.gmra.mxu1 %vm723_vm1, %v9461_v34 }
 0x717   : > { %v3455_v33 = vsel %vm3423_vm9, %v3393_v57, %v3439_v63 }
 0x718   : > { %v9524_v60 = vmax.f32 %v3296_v19, %v3455_v33  ;;  %v3237_v9 = vpop.f32.mrf.mxu3 }
 0x719   : > { %v3238_v54 = vadd.f32 %v3237_v9, %v8255_v56 }
 0x71a   : > { %v9527_v3 = vpop.f32.mrf.mxu1 }
 0x71b   : > { %12771 = vst [vmem:[#allocation119_spill] sm:$0xff] %v9527_v3  ;;  %vm3256_vm10 = vcmp.gt.f32.partialorder %v3238_v54, 0.0  ;;  %v3272_v39 = vmul.f32 0.2, %v3238_v54 }
 0x71d   : > { %v9529_v62 = vsel %vm3256_vm10, %v3238_v54, %v3272_v39 }
 0x71e   : > { %v12781_v45 = vmax.f32 %v9363_v61, %v9529_v62 }
 0x71f   : > { %7214 = vmatmul.msk.bf16.vlgmr.msrb.gmra.mxu2 %vm723_vm1, %v9414_v27 }
 0x720   : > { %v9535_v22 = vpop.f32.mrf.mxu3 }
 0x721   : > { %12772 = vst [vmem:[#allocation120_spill] sm:$0xff] %v9535_v22 }
 0x722   : > { %v3397_v47 = vpop.f32.mrf.mxu1  ;;  %v3552_v19 = vpop.f32.mrf.mxu2 }
 0x723   : > { %v3398_v57 = vadd.f32 %v3397_v47, %v8155_v6  ;;  %v3553_v63 = vadd.f32 %v3552_v19, %v8069_v52 }
 0x725   : > { %vm3425_vm11 = vcmp.gt.f32.partialorder %v3398_v57, 0.0  ;;  %v3441_v33 = vmul.f32 0.2, %v3398_v57  ;;  %vm3592_vm12 = vcmp.gt.f32.partialorder %v3553_v63, 0.0  ;;  %v3608_v9 = vmul.f32 0.2, %v3553_v63 }
 0x727   : > { %v3457_v54 = vsel %vm3425_vm11, %v3398_v57, %v3441_v33  ;;  %v9544_v26 = vsel %vm3592_vm12, %v3553_v63, %v3608_v9 }
 0x728   : > { %v9542_v39 = vmax.f32 %v3298_v5, %v3457_v54  ;;  %v9546_v8 = vpop.f32.mrf.mxu3 }
 0x72a   : > { %v9550_v47 = vpop.f32.mrf.mxu1  ;;  %v9552_v19 = vpop.f32.mrf.mxu2 }
 0x72b   : > { %12773 = vst [vmem:[#allocation121_spill] sm:$0xff] %v9550_v47  ;;  %v12775_v47 = vmax.f32 %v9343_v55, %v9497_v59 }
 0x72c   : > { %12774 = vst [vmem:[#allocation122_spill] sm:$0xff] %v9552_v19 }
 0x72f   : > { %7215 = vmatmul.msk.bf16.gmra.mxu2 %vm723_vm1, %v9429_v23 }
 0x730   : > { %v9556_v57 = vpop.f32.mrf.mxu3 }
 0x732   : > { %v3402_v33 = vpop.f32.mrf.mxu1  ;;  %v3557_v15 = vpop.f32.mrf.mxu2 }
 0x733   : > { %v3403_v18 = vadd.f32 %v3402_v33, %v8187_v7  ;;  %v3558_v5 = vadd.f32 %v3557_v15, %v8087_v0 }
 0x735   : > { %vm3427_vm13 = vcmp.gt.f32.partialorder %v3403_v18, 0.0  ;;  %v3443_v63 = vmul.f32 0.2, %v3403_v18  ;;  %vm3594_vm14 = vcmp.gt.f32.partialorder %v3558_v5, 0.0  ;;  %v3610_v9 = vmul.f32 0.2, %v3558_v5 }
 0x737   : > { %v3459_v54 = vsel %vm3427_vm13, %v3403_v18, %v3443_v63  ;;  %v9560_v21 = vsel %vm3594_vm14, %v3558_v5, %v3610_v9 }
 0x738   : > { %v9565_v22 = vmax.f32 %v12775_v47, %v3459_v54  ;;  %v3675_v17 = vpop.f32.mrf.mxu3 }
 0x73a   : > { %v9569_v41 = vpop.f32.mrf.mxu1  ;;  %v9571_v33 = vpop.f32.mrf.mxu2 }
 0x73b   : > { %12776 = vst [vmem:[#allocation123_spill] sm:$0xff] %v9569_v41 }
 0x73c   : > { %12777 = vst [vmem:[#allocation124_spill] sm:$0xff] %v9571_v33 }
 0x73f   : > { %7216 = vmatmul.msk.bf16.gmra.mxu2 %vm723_vm1, %v9446_v16 }
 0x740   : > { %v3677_v15 = vpop.f32.mrf.mxu3 }
 0x742   : > { %v3407_v18 = vpop.f32.mrf.mxu1  ;;  %v3562_v5 = vpop.f32.mrf.mxu2 }
 0x743   : > { %v3408_v63 = vadd.f32 %v3407_v18, %v8222_v11  ;;  %v3563_v55 = vadd.f32 %v3562_v5, %v8109_v25 }
 0x745   : > { %vm3429_vm15 = vcmp.gt.f32.partialorder %v3408_v63, 0.0  ;;  %v3445_v59 = vmul.f32 0.2, %v3408_v63  ;;  %vm3596_vm2 = vcmp.gt.f32.partialorder %v3563_v55, 0.0  ;;  %v3612_v47 = vmul.f32 0.2, %v3563_v55 }
 0x747   : > { %v3461_v9 = vsel %vm3429_vm15, %v3408_v63, %v3445_v59  ;;  %v9577_v54 = vsel %vm3596_vm2, %v3563_v55, %v3612_v47 }
 0x748   : > { %v9582_v41 = vmax.f32 %v12778_v40, %v3461_v9  ;;  %v3680_v43 = vpop.f32.mrf.mxu3 }
 0x74a   : > { %v9586_v2 = vpop.f32.mrf.mxu1  ;;  %v9588_v18 = vpop.f32.mrf.mxu2 }
 0x74b   : > { %12779 = vst [vmem:[#allocation125_spill] sm:$0xff] %v9586_v2 }
 0x74c   : > { %12780 = vst [vmem:[#allocation126_spill] sm:$0xff] %v9588_v18 }
 0x74f   : > { %7217 = vmatmul.msk.bf16.gmra.mxu2 %vm723_vm1, %v9461_v34 }
 0x750   : > { %v3682_v5 = vpop.f32.mrf.mxu3 }
 0x751   : > { %v3683_v18 = vadd.f32 %v3682_v5, %v7896_v38 }
 0x752   : > { %v3412_v63 = vpop.f32.mrf.mxu1  ;;  %v3567_v55 = vpop.f32.mrf.mxu2 }
 0x753   : > { %v3413_v59 = vadd.f32 %v3412_v63, %v8255_v56  ;;  %v3568_v24 = vadd.f32 %v3567_v55, %v8133_v46  ;;  %vm3695_vm8 = vcmp.gt.f32.partialorder %v3683_v18, 0.0 }
 0x755   : > { %vm3431_vm4 = vcmp.gt.f32.partialorder %v3413_v59, 0.0  ;;  %v3447_v4 = vmul.f32 0.2, %v3413_v59  ;;  %vm3598_vm5 = vcmp.gt.f32.partialorder %v3568_v24, 0.0  ;;  %v3614_v40 = vmul.f32 0.2, %v3568_v24 }
 0x757   : > { %v3463_v47 = vsel %vm3431_vm4, %v3413_v59, %v3447_v4  ;;  %v9594_v9 = vsel %vm3598_vm5, %v3568_v24, %v3614_v40  ;;  %v3681_v59 = vadd.f32 %v3680_v43, %v7890_v32 }
 0x758   : > { %v9599_v2 = vmax.f32 %v12781_v45, %v3463_v47  ;;  %v3685_v3 = vpop.f32.mrf.mxu3  ;;  %v3678_v45 = vadd.f32 %v3677_v15, %v12752_v49  ;;  %v3703_v47 = vmul.f32 0.2, %v3683_v18  ;;  %v3673_v15 = vadd.f32 %v9556_v57, %v7910_v51 }
 0x759   : > { %v3686_v55 = vadd.f32 %v3685_v3, %v7888_v31  ;;  %v3676_v3 = vadd.f32 %v3675_v17, %v7892_v35  ;;  %v3702_v5 = vmul.f32 0.2, %v3681_v59  ;;  %vm3694_vm10 = vcmp.gt.f32.partialorder %v3681_v59, 0.0 }
 0x75a   : > { %v9603_v58 = vpop.f32.mrf.mxu1  ;;  %v9605_v63 = vpop.f32.mrf.mxu2  ;;  %v3701_v44 = vmul.f32 0.2, %v3678_v45  ;;  %v3711_v36 = vsel %vm3695_vm8, %v3683_v18, %v3703_v47  ;;  %vm3693_vm11 = vcmp.gt.f32.partialorder %v3678_v45, 0.0  ;;  %v3671_v17 = vadd.f32 %v9546_v8, %v7908_v50 }
 0x75b   : > { %12782 = vst [vmem:[#allocation127_spill] sm:$0xff] %v9603_v58  ;;  %v3704_v4 = vmul.f32 0.2, %v3686_v55  ;;  %vm3696_vm6 = vcmp.gt.f32.partialorder %v3686_v55, 0.0  ;;  %vm3692_vm12 = vcmp.gt.f32.partialorder %v3676_v3, 0.0  ;;  %vm3691_vm13 = vcmp.gt.f32.partialorder %v3673_v15, 0.0 }
 0x75c   : > { %12783 = vst [vmem:[#allocation128_spill] sm:$0xff] %v9605_v63  ;;  %vm3690_vm14 = vcmp.gt.f32.partialorder %v3671_v17, 0.0 }
 0x75d   : > { %v3712_v43 = vsel %vm3696_vm6, %v3686_v55, %v3704_v4  ;;  %v3710_v55 = vsel %vm3694_vm10, %v3681_v59, %v3702_v5 }
 0x75e   : > { %v3716_v57 = vpack.c.bf16 %v3711_v36, %v3710_v55 }
 0x760   : > { %v3687_v24 = vpop.f32.mrf.mxu3 }
 0x761   : > { %v3688_v61 = vadd.f32 %v3687_v24, %v7894_v37 }
 0x762   : > { %v3572_v62 = vpop.f32.mrf.mxu2  ;;  %v9612_v40 = vpop.f32.mrf.mxu1 }
 0x763   : > { %vm3697_vm7 = vcmp.gt.f32.partialorder %v3688_v61, 0.0  ;;  %v3705_v53 = vmul.f32 0.2, %v3688_v61  ;;  %v3573_v58 = vadd.f32 %v3572_v62, %v8155_v6 }
 0x765   : > { %v3713_v63 = vsel %vm3697_vm7, %v3688_v61, %v3705_v53  ;;  %vm3600_vm9 = vcmp.gt.f32.partialorder %v3573_v58, 0.0  ;;  %v3616_v20 = vmul.f32 0.2, %v3573_v58  ;;  %v3700_v53 = vmul.f32 0.2, %v3676_v3 }
 0x766   : > { %v3717_v24 = vpack.c.bf16 %v3713_v63, %v3712_v43  ;;  %v3699_v61 = vmul.f32 0.2, %v3673_v15 }
 0x767   : > { %v9618_v33 = vsel %vm3600_vm9, %v3573_v58, %v3616_v20  ;;  %v3709_v58 = vsel %vm3693_vm11, %v3678_v45, %v3701_v44  ;;  %v3698_v20 = vmul.f32 0.2, %v3671_v17  ;;  %v3708_v18 = vsel %vm3692_vm12, %v3676_v3, %v3700_v53  ;;  %v9636_v44 = vld [vmem:[%s12589_s2] sm:$0xff] }
 0x768   : > { %3722 = vmatpush.bf16.msrb.mxu0 %v3717_v24  ;;  %v3715_v47 = vpack.c.bf16 %v3709_v58, %v3708_v18  ;;  %v3707_v43 = vsel %vm3691_vm13, %v3673_v15, %v3699_v61 }
 0x769   : > { %v3706_v24 = vsel %vm3690_vm14, %v3671_v17, %v3698_v20  ;;  %v9650_v20 = vld [vmem:[%s12589_s2 + $0x8] sm:$0xff] }
 0x76a   : > { %v9624_v4 = vpop.f32.mrf.mxu2  ;;  %v9626_v63 = vpop.f32.mrf.mxu1  ;;  %v3714_v59 = vpack.c.bf16 %v3707_v43, %v3706_v24 }
 0x76b   : > { %12784 = vst [vmem:[#allocation129_spill] sm:$0xff] %v9624_v4  ;;  %v3848_v28 = vadd.f32 %v9626_v63, %v7910_v51 }
 0x76c   : > { %3723 = vmatpush.bf16.msrb.mxu0 %v3716_v57 }
 0x76d   : > { %vm3866_vm11 = vcmp.gt.f32.partialorder %v3848_v28, 0.0 }
 0x770   : > { %3724 = vmatpush.bf16.msrb.mxu0 %v3715_v47  ;;  %v7720_v47 = vmov 2  }
 0x771   : > { %7633 = vset.pattern.permute.xlu1 %v7720_v47  ;;  %7634 = vset.pattern.permute.xlu2 %v7720_v47 }
 0x772   : > { %v3577_v8 = vpop.f32.mrf.mxu2  ;;  %v9628_v62 = vpop.f32.mrf.mxu1  ;;  %7635 = vset.pattern.permute.xlu0 %v7720_v47  ;;  %v7671_v47 = vld [vmem:[%s12591_s4 + $0x38] sm:$0xff] }
 0x773   : > { %v3578_v5 = vadd.f32 %v3577_v8, %v8187_v7  ;;  %v7666_v8 = vld [vmem:[%s12591_s4] sm:$0xff] }
 0x774   : > { %3725 = vmatpush.bf16.msrb.mxu0 %v3714_v59  ;;  %4365 = vperm.xlu1 %7633, %v7666_v8   ;;  %v7667_v59 = vld [vmem:[%s12591_s4 + $0x8] sm:$0xff] }
 0x775   : > { %vm3602_vm15 = vcmp.gt.f32.partialorder %v3578_v5, 0.0  ;;  %v3618_v36 = vmul.f32 0.2, %v3578_v5  ;;  %4369 = vperm.xlu2 %7634, %v7667_v59  }
 0x777   : > { %v9631_v55 = vsel %vm3602_vm15, %v3578_v5, %v3618_v36  ;;  %7192 = vmatmul.msk.bf16.vlgmr.msrb.gmra.mxu0 %vm909_vm3, %v9636_v44  ;;  %v7668_v5 = vld [vmem:[%s12591_s4 + $0x10] sm:$0xff] }
 0x778   : > { %4373 = vperm.xlu0 %7635, %v7668_v5  }
 0x77a   : > { %v9642_v3 = vpop.f32.mrf.mxu2  ;;  %v3852_v15 = vpop.f32.mrf.mxu1 }
 0x77b   : > { %12785 = vst [vmem:[#allocation130_spill] sm:$0xff] %v9642_v3 }
 0x780   : > { %4393 = vperm.xlu0 %7635, %v7671_v47  }
 0x782   : > { %v3582_v17 = vpop.f32.mrf.mxu2  ;;  %v3855_v53 = vpop.f32.mrf.mxu1 }
 0x783   : > { %v3583_v57 = vadd.f32 %v3582_v17, %v8222_v11 }
 0x785   : > { %vm3604_vm2 = vcmp.gt.f32.partialorder %v3583_v57, 0.0  ;;  %v3620_v61 = vmul.f32 0.2, %v3583_v57 }
 0x787   : > { %v9645_v58 = vsel %vm3604_vm2, %v3583_v57, %v3620_v61  ;;  %7193 = vmatmul.msk.bf16.gmra.mxu0 %vm909_vm3, %v9650_v20  ;;  %v7669_v57 = vld [vmem:[%s12591_s4 + $0x18] sm:$0xff]  ;;  %v7670_v61 = vld [vmem:[%s12591_s4 + $0x20] sm:$0xff] }
 0x788   : > { %4377 = vperm.xlu1 %7633, %v7669_v57   ;;  %4381 = vperm.xlu2 %7634, %v7670_v61   ;;  %v9683_v57 = vld [vmem:[%s12589_s2 + $0x10] sm:$0xff] }
 0x78a   : > { %v9656_v43 = vpop.f32.mrf.mxu2  ;;  %v3857_v24 = vpop.f32.mrf.mxu1 }
 0x78b   : > { %12786 = vst [vmem:[#allocation131_spill] sm:$0xff] %v9656_v43  ;;  %v3858_v61 = vadd.f32 %v3857_v24, %v7896_v38  ;;  %v7675_v24 = vld [vmem:[%s12591_s4 + $0x50] sm:$0xff] }
 0x78c   : > { %4405 = vperm.xlu0 %7635, %v7675_v24   ;;  %v7676_v24 = vld [vmem:[%s12591_s4 + $0x40] sm:$0xff] }
 0x78d   : > { %v3878_v3 = vmul.f32 0.2, %v3858_v61  ;;  %vm3870_vm7 = vcmp.gt.f32.partialorder %v3858_v61, 0.0 }
 0x78f   : > { %v3886_v12 = vsel %vm3870_vm7, %v3858_v61, %v3878_v3  ;;  %v7678_v3 = vld [vmem:[%s12591_s4 + $0x68] sm:$0xff] }
 0x792   : > { %v3587_v36 = vpop.f32.mrf.mxu2  ;;  %v3860_v17 = vpop.f32.mrf.mxu1 }
 0x793   : > { %v3588_v8 = vadd.f32 %v3587_v36, %v8255_v56  ;;  %v3861_v18 = vadd.f32 %v3860_v17, %v7888_v31  ;;  %v7673_v17 = vld [vmem:[%s12591_s4 + $0x28] sm:$0xff] }
 0x794   : > { %4385 = vperm.xlu1 %7633, %v7673_v17   ;;  %4417 = vperm.xlu0 %7635, %v7678_v3  }
 0x795   : > { %vm3606_vm4 = vcmp.gt.f32.partialorder %v3588_v8, 0.0  ;;  %v3622_v59 = vmul.f32 0.2, %v3588_v8  ;;  %v3879_v43 = vmul.f32 0.2, %v3861_v18  ;;  %vm3871_vm5 = vcmp.gt.f32.partialorder %v3861_v18, 0.0 }
 0x797   : > { %v9677_v5 = vsel %vm3606_vm4, %v3588_v8, %v3622_v59  ;;  %7194 = vmatmul.msk.bf16.gmra.mxu0 %vm909_vm3, %v9683_v57  ;;  %v7674_v8 = vld [vmem:[%s12591_s4 + $0x30] sm:$0xff]  ;;  %v3856_v59 = vadd.f32 %v3855_v53, %v7890_v32  ;;  %v3887_v53 = vsel %vm3871_vm5, %v3861_v18, %v3879_v43 }
 0x798   : > { %4389 = vperm.xlu2 %7634, %v7674_v8   ;;  %v3851_v8 = vadd.f32 %v9628_v62, %v7892_v35  ;;  %v3846_v62 = vadd.f32 %v9612_v40, %v7908_v50 }
 0x799   : > { %v3877_v4 = vmul.f32 0.2, %v3856_v59  ;;  %vm3869_vm8 = vcmp.gt.f32.partialorder %v3856_v59, 0.0 }
 0x79a   : > { %v9690_v47 = vpop.f32.mrf.mxu2  ;;  %v3862_v45 = vpop.f32.mrf.mxu1  ;;  %v3875_v18 = vmul.f32 0.2, %v3851_v8  ;;  %vm3867_vm10 = vcmp.gt.f32.partialorder %v3851_v8, 0.0  ;;  %v3873_v40 = vmul.f32 0.2, %v3846_v62  ;;  %vm3865_vm12 = vcmp.gt.f32.partialorder %v3846_v62, 0.0 }
 0x79b   : > { %12787 = vst [vmem:[#allocation132_spill] sm:$0xff] %v9690_v47  ;;  %v3863_v36 = vadd.f32 %v3862_v45, %v7894_v37  ;;  %v3853_v47 = vadd.f32 %v3852_v15, %v12752_v49  ;;  %v3885_v43 = vsel %vm3869_vm8, %v3856_v59, %v3877_v4  ;;  %v9724_v4 = vld [vmem:[%s12589_s2 + $0x18] sm:$0xff] }
 0x79c   : > { %4397 = vperm.xlu1 %7633, %v7676_v24   ;;  %v3891_v63 = vpack.c.bf16 %v3886_v12, %v3885_v43  ;;  %v3883_v12 = vsel %vm3867_vm10, %v3851_v8, %v3875_v18  ;;  %v7226_v43 = vld [vmem:[%s7788_s29 + $0x4c] sm:$0x7]  ;;  %v7682_v18 = vld [vmem:[%s12591_s4 + $0x70] sm:$0xff] }
 0x79d   : > { %vm3872_vm6 = vcmp.gt.f32.partialorder %v3863_v36, 0.0  ;;  %v3880_v17 = vmul.f32 0.2, %v3863_v36  ;;  %v3876_v19 = vmul.f32 0.2, %v3853_v47  ;;  %vm3868_vm9 = vcmp.gt.f32.partialorder %v3853_v47, 0.0 }
 0x79e   : > { %v4184_v8 = vsel %vm736_vm0, %v7226_v43, 0  ;;  %v560_v43 = vld [vmem:[%s12591_s4 + $0xd0] sm:$0xff] }
 0x79f   : > { %v3888_v10 = vsel %vm3872_vm6, %v3863_v36, %v3880_v17  ;;  %v3874_v36 = vmul.f32 0.2, %v3848_v28  ;;  %v3884_v61 = vsel %vm3868_vm9, %v3853_v47, %v3876_v19  ;;  %v7680_v19 = vld [vmem:[%s12591_s4 + $0x58] sm:$0xff]  ;;  %v3881_v47 = vsel %vm3865_vm12, %v3846_v62, %v3873_v40  ;;  %4193 = vmatpush.bf16.msra.mxu0 %v4184_v8  ;;  %v550_v40 = vld [vmem:[%s12591_s4 + $0x80] sm:$0xff]  ;;  %v556_v8 = vld [vmem:[%s12591_s4 + $0xb0] sm:$0xff] }
 0x7a0   : > { %v3892_v45 = vpack.c.bf16 %v3888_v10, %v3887_v53  ;;  %v7677_v10 = vld [vmem:[%s12591_s4 + $0x48] sm:$0xff]  ;;  %v3890_v59 = vpack.c.bf16 %v3884_v61, %v3883_v12  ;;  %v7683_v62 = vld [vmem:[%s12591_s4 + $0x78] sm:$0xff]  ;;  %v554_v61 = vld [vmem:[%s12591_s4 + $0xa0] sm:$0xff]  ;;  %4430 = vperm.xlu0 %7635, %v550_v40  }
 0x7a1   : > { %4401 = vperm.xlu2 %7634, %v7677_v10   ;;  %v3882_v17 = vsel %vm3866_vm11, %v3848_v28, %v3874_v36  ;;  %v9749_v10 = vld [vmem:[%s12589_s2 + $0x20] sm:$0xff]  ;;  %v552_v36 = vld [vmem:[%s12591_s4 + $0x90] sm:$0xff]  ;;  %v563_v40 = vld [vmem:[%s12591_s4 + $0xe8] sm:$0xff] }
 0x7a2   : > { %3897 = vmatpush.bf16.msra.mxu3 %v3892_v45  ;;  %v9708_v15 = vpop.f32.mrf.mxu2  ;;  %v7681_v45 = vld [vmem:[%s12591_s4 + $0x60] sm:$0xff]  ;;  %v3889_v24 = vpack.c.bf16 %v3882_v17, %v3881_v47  ;;  %v9773_v17 = vld [vmem:[%s12589_s2 + $0x28] sm:$0xff]  ;;  %v553_v47 = vld [vmem:[%s12591_s4 + $0x98] sm:$0xff] }
 0x7a4   : > { %4409 = vperm.xlu1 %7633, %v7680_v19   ;;  %v557_v19 = vld [vmem:[%s12591_s4 + $0xb8] sm:$0xff] }
 0x7a6   : > { %3898 = vmatpush.bf16.msra.mxu3 %v3891_v63  ;;  %v551_v63 = vld [vmem:[%s12591_s4 + $0x88] sm:$0xff] }
 0x7a7   : > { %7195 = vmatmul.msk.bf16.gmra.mxu0 %vm909_vm3, %v9724_v4 }
 0x7a8   : > { %4445 = vperm.xlu0 %7635, %v553_v47   ;;  %v564_v47 = vld [vmem:[%s12591_s4 + $0xf0] sm:$0xff] }
 0x7a9   : > { %4413 = vperm.xlu2 %7634, %v7681_v45  }
 0x7aa   : > { %3899 = vmatpush.bf16.msra.mxu3 %v3890_v59  ;;  %v9728_v53 = vpop.f32.mrf.mxu2  ;;  %v555_v59 = vld [vmem:[%s12591_s4 + $0xa8] sm:$0xff] }
 0x7ac   : > { %4421 = vperm.xlu1 %7633, %v7682_v18  }
 0x7ae   : > { %3900 = vmatpush.bf16.msra.mxu3 %v3889_v24  ;;  %v558_v24 = vld [vmem:[%s12591_s4 + $0xc0] sm:$0xff] }
 0x7b0   : > { %4460 = vperm.xlu0 %7635, %v556_v8  }
 0x7b1   : > { %7205 = vmatmul.msk.bf16.vlgmr.msra.gmra.mxu3 %vm909_vm3, %v9636_v44  ;;  %4425 = vperm.xlu2 %7634, %v7683_v62   ;;  %v561_v62 = vld [vmem:[%s12591_s4 + $0xd8] sm:$0xff] }
 0x7b2   : > { %v4025_v28 = vpop.f32.mrf.mxu2 }
 0x7b4   : > { %4435 = vperm.xlu1 %7633, %v551_v63  }
 0x7b7   : > { %7196 = vmatmul.msk.bf16.gmra.mxu0 %vm909_vm3, %v9749_v10 }
 0x7b9   : > { %4440 = vperm.xlu2 %7634, %v552_v36   ;;  %v9801_v36 = vld [vmem:[%s12589_s2 + $0x30] sm:$0xff] }
 0x7ba   : > { %v4027_v3 = vpop.f32.mrf.mxu2 }
 0x7bb   : > { %v4028_v8 = vadd.f32 %v4027_v3, %v12752_v49  ;;  %v566_v3 = vld [vmem:[%s12591_s4 + $0x100] sm:$0xff] }
 0x7bc   : > { %4450 = vperm.xlu1 %7633, %v554_v61  }
 0x7bd   : > { %v4051_v14 = vmul.f32 0.2, %v4028_v8  ;;  %vm4043_vm2 = vcmp.gt.f32.partialorder %v4028_v8, 0.0 }
 0x7c1   : > { %7206 = vmatmul.msk.bf16.gmra.mxu3 %vm909_vm3, %v9650_v20  ;;  %4455 = vperm.xlu2 %7634, %v555_v59   ;;  %v559_v59 = vld [vmem:[%s12591_s4 + $0xc8] sm:$0xff] }
 0x7c2   : > { %v4030_v12 = vpop.f32.mrf.mxu2  ;;  %4475 = vperm.xlu0 %7635, %v559_v59  }
 0x7c4   : > { %4465 = vperm.xlu1 %7633, %v557_v19  }
 0x7c7   : > { %7197 = vmatmul.msk.bf16.gmra.mxu0 %vm909_vm3, %v9773_v17 }
 0x7c9   : > { %4470 = vperm.xlu2 %7634, %v558_v24   ;;  %v4031_v24 = vadd.f32 %v4030_v12, %v7890_v32  ;;  %v4023_v12 = vadd.f32 %v9728_v53, %v7910_v51 }
 0x7ca   : > { %v4032_v45 = vpop.f32.mrf.mxu2 }
 0x7cb   : > { %v4033_v61 = vadd.f32 %v4032_v45, %v7896_v38  ;;  %v4052_v59 = vmul.f32 0.2, %v4031_v24  ;;  %vm4044_vm15 = vcmp.gt.f32.partialorder %v4031_v24, 0.0  ;;  %vm4041_vm5 = vcmp.gt.f32.partialorder %v4023_v12, 0.0 }
 0x7cc   : > { %4480 = vperm.xlu1 %7633, %v560_v43  }
 0x7cd   : > { %vm4045_vm14 = vcmp.gt.f32.partialorder %v4033_v61, 0.0 }
 0x7d1   : > { %7207 = vmatmul.msk.bf16.gmra.mxu3 %vm909_vm3, %v9683_v57  ;;  %4485 = vperm.xlu2 %7634, %v561_v62  }
 0x7d2   : > { %v4035_v18 = vpop.f32.mrf.mxu2 }
 0x7d3   : > { %v4036_v63 = vadd.f32 %v4035_v18, %v7888_v31  ;;  %v4053_v18 = vmul.f32 0.2, %v4033_v61 }
 0x7d4   : > { %4495 = vperm.xlu1 %7633, %v563_v40   ;;  %v4026_v40 = vadd.f32 %v4025_v28, %v7892_v35  ;;  %v562_v28 = vld [vmem:[%s12591_s4 + $0xe0] sm:$0xff] }
 0x7d5   : > { %v4054_v43 = vmul.f32 0.2, %v4036_v63  ;;  %vm4046_vm0 = vcmp.gt.f32.partialorder %v4036_v63, 0.0  ;;  %4490 = vperm.xlu0 %7635, %v562_v28  }
 0x7d6   : > { %v4050_v53 = vmul.f32 0.2, %v4026_v40  ;;  %vm4042_vm4 = vcmp.gt.f32.partialorder %v4026_v40, 0.0 }
 0x7d7   : > { %7198 = vmatmul.msk.bf16.gmra.mxu0 %vm909_vm3, %v9801_v36  ;;  %v4062_v48 = vsel %vm4046_vm0, %v4036_v63, %v4054_v43  ;;  %v4060_v63 = vsel %vm4044_vm15, %v4031_v24, %v4052_v59  ;;  %v4059_v43 = vsel %vm4043_vm2, %v4028_v8, %v4051_v14  ;;  %v565_v14 = vld [vmem:[%s12591_s4 + $0xf8] sm:$0xff]  ;;  %v570_v8 = vld [vmem:[%s12591_s4 + $0x120] sm:$0xff] }
 0x7d9   : > { %4500 = vperm.xlu2 %7634, %v564_v47   ;;  %v4049_v47 = vmul.f32 0.2, %v4023_v12 }
 0x7da   : > { %v4037_v19 = vpop.f32.mrf.mxu2 }
 0x7db   : > { %v4038_v45 = vadd.f32 %v4037_v19, %v7894_v37  ;;  %v4061_v19 = vsel %vm4045_vm14, %v4033_v61, %v4053_v18  ;;  %v4057_v18 = vsel %vm4041_vm5, %v4023_v12, %v4049_v47  ;;  %v572_v12 = vld [vmem:[%s12591_s4 + $0x130] sm:$0xff] }
 0x7dc   : > { %4510 = vperm.xlu1 %7633, %v566_v3   ;;  %v4066_v61 = vpack.c.bf16 %v4061_v19, %v4060_v63  ;;  %v568_v19 = vld [vmem:[%s12591_s4 + $0x110] sm:$0xff]  ;;  %v573_v3 = vld [vmem:[%s12591_s4 + $0x138] sm:$0xff]  ;;  %v571_v63 = vld [vmem:[%s12591_s4 + $0x128] sm:$0xff] }
 0x7dd   : > { %vm4047_vm13 = vcmp.gt.f32.partialorder %v4038_v45, 0.0  ;;  %v4055_v62 = vmul.f32 0.2, %v4038_v45  ;;  %4505 = vperm.xlu0 %7635, %v565_v14   ;;  %v577_v14 = vld [vmem:[%s12591_s4 + $0x158] sm:$0xff] }
 0x7df   : > { %v4063_v1 = vsel %vm4047_vm13, %v4038_v45, %v4055_v62  ;;  %v569_v62 = vld [vmem:[%s12591_s4 + $0x118] sm:$0xff] }
 0x7e0   : > { %v4067_v30 = vpack.c.bf16 %v4063_v1, %v4062_v48  ;;  %v567_v1 = vld [vmem:[%s12591_s4 + $0x108] sm:$0xff]  ;;  %v4021_v48 = vadd.f32 %v9708_v15, %v7908_v50  ;;  %v4058_v15 = vsel %vm4042_vm4, %v4026_v40, %v4050_v53 }
 0x7e1   : > { %7208 = vmatmul.msk.bf16.gmra.mxu3 %vm909_vm3, %v9724_v4  ;;  %4515 = vperm.xlu2 %7634, %v567_v1   ;;  %v4065_v24 = vpack.c.bf16 %v4059_v43, %v4058_v15  ;;  %v575_v53 = vld [vmem:[%s12591_s4 + $0x148] sm:$0xff]  ;;  %v576_v43 = vld [vmem:[%s12591_s4 + $0x150] sm:$0xff] }
 0x7e2   : > { %4072 = vmatpush.bf16.msra.mxu1 %v4067_v30  ;;  %v4048_v45 = vmul.f32 0.2, %v4021_v48  ;;  %v9837_v30 = vld [vmem:[%s12589_s2 + $0x38] sm:$0xff]  ;;  %vm4040_vm6 = vcmp.gt.f32.partialorder %v4021_v48, 0.0 }
 0x7e4   : > { %4525 = vperm.xlu1 %7633, %v569_v62   ;;  %v4056_v59 = vsel %vm4040_vm6, %v4021_v48, %v4048_v45  ;;  %v579_v45 = vld [vmem:[%s12591_s4 + $0x168] sm:$0xff]  ;;  %v581_v62 = vld [vmem:[%s12591_s4 + $0x178] sm:$0xff] }
 0x7e5   : > { %v4064_v40 = vpack.c.bf16 %v4057_v18, %v4056_v59  ;;  %4520 = vperm.xlu0 %7635, %v568_v19  }
 0x7e6   : > { %4073 = vmatpush.bf16.msra.mxu1 %v4066_v61  ;;  %v12788_v61 = vmax.f32 %v9474_v13, %v9544_v26  ;;  %v578_v13 = vld [vmem:[%s12591_s4 + $0x160] sm:$0xff] }
 0x7e7   : > { %7199 = vmatmul.msk.bf16.gmra.mxu0 %vm909_vm3, %v9837_v30  ;;  %v574_v26 = vld [vmem:[%s12591_s4 + $0x140] sm:$0xff] }
 0x7e9   : > { %4530 = vperm.xlu2 %7634, %v570_v8   ;;  %v12789_v8 = vmax.f32 %v9490_v42, %v9560_v21  ;;  %v584_v42 = vld [vmem:[%s12591_s4 + $0x190] sm:$0xff] }
 0x7ea   : > { %4074 = vmatpush.bf16.msra.mxu1 %v4065_v24  ;;  %v580_v21 = vld [vmem:[%s12591_s4 + $0x170] sm:$0xff] }
 0x7ec   : > { %4540 = vperm.xlu1 %7633, %v572_v12   ;;  %v585_v12 = vld [vmem:[%s12591_s4 + $0x198] sm:$0xff] }
 0x7ed   : > { %4535 = vperm.xlu0 %7635, %v571_v63   ;;  %v588_v63 = vld [vmem:[%s12591_s4 + $0x1b0] sm:$0xff] }
 0x7ee   : > { %4075 = vmatpush.bf16.msra.mxu1 %v4064_v40  ;;  %v582_v40 = vld [vmem:[%s12591_s4 + $0x180] sm:$0xff] }
 0x7f1   : > { %7209 = vmatmul.msk.bf16.gmra.mxu3 %vm909_vm3, %v9749_v10  ;;  %7218 = vmatmul.msk.bf16.vlgmr.msra.gmra.mxu1 %vm909_vm3, %v9636_v44 }
 0x7f2   : > { %4545 = vperm.xlu2 %7634, %v573_v3  }
 0x7f4   : > { %v3727_v28 = vpop.f32.mrf.mxu0  ;;  %4555 = vperm.xlu1 %7633, %v575_v53  }
 0x7f5   : > { %v3728_v1 = vadd.f32 %v3727_v28, %v8069_v52  ;;  %4550 = vperm.xlu0 %7635, %v574_v26  }
 0x7f7   : > { %vm3767_vm7 = vcmp.gt.f32.partialorder %v3728_v1, 0.0  ;;  %v3783_v44 = vmul.f32 0.2, %v3728_v1  ;;  %7227 = vmatmul.msk.bf16.vlgmr.msra.gmra.mxu0 %vm723_vm1, %v9414_v27 }
 0x7f9   : > { %v3799_v48 = vsel %vm3767_vm7, %v3728_v1, %v3783_v44  ;;  %v587_v1 = vld [vmem:[%s12591_s4 + $0x1a8] sm:$0xff] }
 0x7fa   : > { %v9875_v47 = vmax.f32 %v12788_v61, %v3799_v48  ;;  %4560 = vperm.xlu2 %7634, %v576_v43   ;;  %v583_v44 = vld [vmem:[%s12591_s4 + $0x188] sm:$0xff]  ;;  %v12790_v48 = vmax.f32 %v9508_v29, %v9577_v54  ;;  %v590_v29 = vld [vmem:[%s12591_s4 + $0x1c0] sm:$0xff] }
 0x7fb   : > { %v586_v54 = vld [vmem:[%s12591_s4 + $0x1a0] sm:$0xff]  ;;  %v591_v61 = vld [vmem:[%s12591_s4 + $0x1c8] sm:$0xff] }
 0x7fc   : > { %v9880_v27 = vpop.f32.mrf.mxu0  ;;  %4570 = vperm.xlu1 %7633, %v578_v13  }
 0x7fd   : > { %4565 = vperm.xlu0 %7635, %v577_v14   ;;  %v596_v14 = vld [vmem:[%s12591_s4 + $0x1f0] sm:$0xff] }
 0x801   : > { %7210 = vmatmul.msk.bf16.gmra.mxu3 %vm909_vm3, %v9773_v17  ;;  %7219 = vmatmul.msk.bf16.gmra.mxu1 %vm909_vm3, %v9650_v20 }
 0x802   : > { %4575 = vperm.xlu2 %7634, %v579_v45  }
 0x804   : > { %v3732_v15 = vpop.f32.mrf.mxu0  ;;  %4585 = vperm.xlu1 %7633, %v581_v62   ;;  %v594_v62 = vld [vmem:[%s12591_s4 + $0x1e0] sm:$0xff] }
 0x805   : > { %v3733_v24 = vadd.f32 %v3732_v15, %v8087_v0  ;;  %4580 = vperm.xlu0 %7635, %v580_v21   ;;  %v593_v15 = vld [vmem:[%s12591_s4 + $0x1d8] sm:$0xff] }
 0x807   : > { %vm3769_vm8 = vcmp.gt.f32.partialorder %v3733_v24, 0.0  ;;  %v3785_v20 = vmul.f32 0.2, %v3733_v24  ;;  %7228 = vmatmul.msk.bf16.gmra.mxu0 %vm723_vm1, %v9429_v23 }
 0x809   : > { %v3801_v18 = vsel %vm3769_vm8, %v3733_v24, %v3785_v20  ;;  %v589_v24 = vld [vmem:[%s12591_s4 + $0x1b8] sm:$0xff]  ;;  %v12791_v20 = vmax.f32 %v9524_v60, %v9594_v9  ;;  %v592_v60 = vld [vmem:[%s12591_s4 + $0x1d0] sm:$0xff] }
 0x80a   : > { %v9907_v59 = vmax.f32 %v12789_v8, %v3801_v18  ;;  %4590 = vperm.xlu2 %7634, %v582_v40   ;;  %v597_v9 = vld [vmem:[%s12591_s4 + $0x1f8] sm:$0xff] }
 0x80c   : > { %v9912_v23 = vpop.f32.mrf.mxu0  ;;  %4600 = vperm.xlu1 %7633, %v584_v42  }
 0x80d   : > { %4595 = vperm.xlu0 %7635, %v583_v44   ;;  %v12792_v44 = vmax.f32 %v9542_v39, %v9618_v33  ;;  %v602_v39 = vld [vmem:[%s12591_s4 + $0x220] sm:$0xff] }
 0x80e   : > { %v598_v33 = vld [vmem:[%s12591_s4 + $0x200] sm:$0xff] }
 0x811   : > { %7211 = vmatmul.msk.bf16.gmra.mxu3 %vm909_vm3, %v9801_v36  ;;  %7220 = vmatmul.msk.bf16.gmra.mxu1 %vm909_vm3, %v9683_v57 }
 0x812   : > { %4605 = vperm.xlu2 %7634, %v585_v12  }
 0x814   : > { %v3737_v19 = vpop.f32.mrf.mxu0  ;;  %4615 = vperm.xlu1 %7633, %v587_v1   ;;  %v595_v1 = vld [vmem:[%s12591_s4 + $0x1e8] sm:$0xff] }
 0x815   : > { %v3738_v3 = vadd.f32 %v3737_v19, %v8109_v25  ;;  %4610 = vperm.xlu0 %7635, %v586_v54  }
 0x817   : > { %vm3771_vm9 = vcmp.gt.f32.partialorder %v3738_v3, 0.0  ;;  %v3787_v57 = vmul.f32 0.2, %v3738_v3  ;;  %7229 = vmatmul.msk.bf16.gmra.mxu0 %vm723_vm1, %v9446_v16 }
 0x819   : > { %v3803_v28 = vsel %vm3771_vm9, %v3738_v3, %v3787_v57 }
 0x81a   : > { %v9939_v53 = vmax.f32 %v12790_v48, %v3803_v28  ;;  %4620 = vperm.xlu2 %7634, %v588_v63   ;;  %v599_v28 = vld [vmem:[%s12591_s4 + $0x208] sm:$0xff] }
 0x81c   : > { %v9944_v16 = vpop.f32.mrf.mxu0  ;;  %4630 = vperm.xlu1 %7633, %v590_v29   ;;  %v600_v29 = vld [vmem:[%s12591_s4 + $0x210] sm:$0xff] }
 0x81d   : > { %4625 = vperm.xlu0 %7635, %v589_v24  }
 0x821   : > { %7212 = vmatmul.msk.bf16.gmra.mxu3 %vm909_vm3, %v9837_v30  ;;  %7221 = vmatmul.msk.bf16.gmra.mxu1 %vm909_vm3, %v9724_v4 }
 0x822   : > { %4635 = vperm.xlu2 %7634, %v591_v61  }
 0x824   : > { %v3742_v43 = vpop.f32.mrf.mxu0  ;;  %4645 = vperm.xlu1 %7633, %v593_v15  }
 0x825   : > { %v3743_v13 = vadd.f32 %v3742_v43, %v8133_v46  ;;  %4640 = vperm.xlu0 %7635, %v592_v60   ;;  %v603_v43 = vld [vmem:[%s12591_s4 + $0x228] sm:$0xff]  ;;  %v601_v60 = vld [vmem:[%s12591_s4 + $0x218] sm:$0xff] }
 0x827   : > { %vm3773_vm10 = vcmp.gt.f32.partialorder %v3743_v13, 0.0  ;;  %v3789_v26 = vmul.f32 0.2, %v3743_v13  ;;  %7230 = vmatmul.msk.bf16.gmra.mxu0 %vm723_vm1, %v9461_v34 }
 0x829   : > { %v3805_v45 = vsel %vm3773_vm10, %v3743_v13, %v3789_v26 }
 0x82a   : > { %v9971_v18 = vmax.f32 %v12791_v20, %v3805_v45  ;;  %4650 = vperm.xlu2 %7634, %v594_v62  }
 0x82c   : > { %v9976_v34 = vpop.f32.mrf.mxu0  ;;  %4660 = vperm.xlu1 %7633, %v596_v14   ;;  %v605_v14 = vld [vmem:[%s12591_s4 + $0x238] sm:$0xff] }
 0x82d   : > { %4655 = vperm.xlu0 %7635, %v595_v1  }
 0x831   : > { %7222 = vmatmul.msk.bf16.gmra.mxu1 %vm909_vm3, %v9749_v10 }
 0x832   : > { %4665 = vperm.xlu2 %7634, %v597_v9   ;;  %v12794_v9 = vmax.f32 %v9565_v22, %v9631_v55  ;;  %v608_v22 = vld [vmem:[%s12591_s4 + $0x250] sm:$0xff] }
 0x833   : > { %v604_v55 = vld [vmem:[%s12591_s4 + $0x230] sm:$0xff] }
 0x834   : > { %v3747_v8 = vpop.f32.mrf.mxu0  ;;  %v3902_v40 = vpop.f32.mrf.mxu3  ;;  %4675 = vperm.xlu1 %7633, %v599_v28  }
 0x835   : > { %v3748_v42 = vadd.f32 %v3747_v8, %v8155_v6  ;;  %v3903_v21 = vadd.f32 %v3902_v40, %v8069_v52  ;;  %4670 = vperm.xlu0 %7635, %v598_v33  }
 0x837   : > { %vm3775_vm1 = vcmp.gt.f32.partialorder %v3748_v42, 0.0  ;;  %v3791_v12 = vmul.f32 0.2, %v3748_v42  ;;  %vm3942_vm11 = vcmp.gt.f32.partialorder %v3903_v21, 0.0  ;;  %v3958_v19 = vmul.f32 0.2, %v3903_v21 }
 0x839   : > { %v3807_v3 = vsel %vm3775_vm1, %v3748_v42, %v3791_v12  ;;  %v9991_v57 = vsel %vm3942_vm11, %v3903_v21, %v3958_v19  ;;  %v606_v42 = vld [vmem:[%s12591_s4 + $0x240] sm:$0xff]  ;;  %v609_v19 = vld [vmem:[%s12591_s4 + $0x258] sm:$0xff] }
 0x83a   : > { %v10002_v48 = vmax.f32 %v12792_v44, %v3807_v3  ;;  %v3990_v63 = vmax.f32 %v9875_v47, %v9991_v57  ;;  %4680 = vperm.xlu2 %7634, %v600_v29   ;;  %v624_v57 = vld [vmem:[%s12591_s4 + $0x2d0] sm:$0xff] }
 0x83c   : > { %v10009_v54 = vpop.f32.mrf.mxu0  ;;  %v10011_v61 = vpop.f32.mrf.mxu3  ;;  %4690 = vperm.xlu1 %7633, %v602_v39  }
 0x83d   : > { %12793 = vst [vmem:[#allocation133_spill] sm:$0xff] %v10009_v54  ;;  %4685 = vperm.xlu0 %7635, %v601_v60  }
 0x841   : > { %7223 = vmatmul.msk.bf16.gmra.mxu1 %vm909_vm3, %v9773_v17 }
 0x842   : > { %4695 = vperm.xlu2 %7634, %v603_v43   ;;  %v611_v43 = vld [vmem:[%s12591_s4 + $0x268] sm:$0xff] }
 0x844   : > { %v3752_v13 = vpop.f32.mrf.mxu0  ;;  %v3907_v26 = vpop.f32.mrf.mxu3  ;;  %4705 = vperm.xlu1 %7633, %v605_v14   ;;  %v615_v14 = vld [vmem:[%s12591_s4 + $0x288] sm:$0xff] }
 0x845   : > { %v3753_v45 = vadd.f32 %v3752_v13, %v8187_v7  ;;  %v3908_v17 = vadd.f32 %v3907_v26, %v8087_v0  ;;  %4700 = vperm.xlu0 %7635, %v604_v55   ;;  %v607_v13 = vld [vmem:[%s12591_s4 + $0x248] sm:$0xff]  ;;  %v12797_v26 = vmax.f32 %v9582_v41, %v9645_v58  ;;  %v614_v41 = vld [vmem:[%s12591_s4 + $0x280] sm:$0xff] }
 0x846   : > { %v610_v58 = vld [vmem:[%s12591_s4 + $0x260] sm:$0xff] }
 0x847   : > { %vm3777_vm12 = vcmp.gt.f32.partialorder %v3753_v45, 0.0  ;;  %v3793_v15 = vmul.f32 0.2, %v3753_v45  ;;  %vm3944_vm0 = vcmp.gt.f32.partialorder %v3908_v17, 0.0  ;;  %v3960_v24 = vmul.f32 0.2, %v3908_v17 }
 0x849   : > { %v3809_v20 = vsel %vm3777_vm12, %v3753_v45, %v3793_v15  ;;  %v10026_v62 = vsel %vm3944_vm0, %v3908_v17, %v3960_v24  ;;  %v612_v15 = vld [vmem:[%s12591_s4 + $0x270] sm:$0xff] }
 0x84a   : > { %v10037_v8 = vmax.f32 %v12794_v9, %v3809_v20  ;;  %v3992_v40 = vmax.f32 %v9907_v59, %v10026_v62  ;;  %4710 = vperm.xlu2 %7634, %v606_v42  }
 0x84c   : > { %12795 = vst [vmem:[#allocation134_spill] sm:$0xff] %v10037_v8  ;;  %v10044_v21 = vpop.f32.mrf.mxu0  ;;  %v10046_v12 = vpop.f32.mrf.mxu3  ;;  %4720 = vperm.xlu1 %7633, %v608_v22  }
 0x84d   : > { %12796 = vst [vmem:[#allocation135_spill] sm:$0xff] %v10044_v21  ;;  %4715 = vperm.xlu0 %7635, %v607_v13  }
 0x851   : > { %7224 = vmatmul.msk.bf16.gmra.mxu1 %vm909_vm3, %v9801_v36 }
 0x852   : > { %4725 = vperm.xlu2 %7634, %v609_v19  }
 0x854   : > { %v3757_v3 = vpop.f32.mrf.mxu0  ;;  %v3912_v28 = vpop.f32.mrf.mxu3  ;;  %4735 = vperm.xlu1 %7633, %v611_v43  }
 0x855   : > { %v3758_v1 = vadd.f32 %v3757_v3, %v8222_v11  ;;  %v3913_v36 = vadd.f32 %v3912_v28, %v8109_v25  ;;  %4730 = vperm.xlu0 %7635, %v610_v58   ;;  %v617_v28 = vld [vmem:[%s12591_s4 + $0x298] sm:$0xff]  ;;  %v12829_v11 = vld [vmem:[#allocation10_spill] sm:$0xff] }
 0x856   : > { %v621_v58 = vld [vmem:[%s12591_s4 + $0x2b8] sm:$0xff] }
 0x857   : > { %vm3779_vm13 = vcmp.gt.f32.partialorder %v3758_v1, 0.0  ;;  %v3795_v44 = vmul.f32 0.2, %v3758_v1  ;;  %vm3946_vm14 = vcmp.gt.f32.partialorder %v3913_v36, 0.0  ;;  %v3962_v29 = vmul.f32 0.2, %v3913_v36 }
 0x859   : > { %v3811_v39 = vsel %vm3779_vm13, %v3758_v1, %v3795_v44  ;;  %v10061_v33 = vsel %vm3946_vm14, %v3913_v36, %v3962_v29  ;;  %v613_v1 = vld [vmem:[%s12591_s4 + $0x278] sm:$0xff]  ;;  %v12800_v36 = vmax.f32 %v9599_v2, %v9677_v5  ;;  %v620_v2 = vld [vmem:[%s12591_s4 + $0x2b0] sm:$0xff] }
 0x85a   : > { %v10072_v45 = vmax.f32 %v12797_v26, %v3811_v39  ;;  %v3994_v17 = vmax.f32 %v9939_v53, %v10061_v33  ;;  %4740 = vperm.xlu2 %7634, %v612_v15   ;;  %v618_v39 = vld [vmem:[%s12591_s4 + $0x2a0] sm:$0xff]  ;;  %v616_v5 = vld [vmem:[%s12591_s4 + $0x290] sm:$0xff] }
 0x85c   : > { %12798 = vst [vmem:[#allocation136_spill] sm:$0xff] %v10072_v45  ;;  %v10079_v24 = vpop.f32.mrf.mxu0  ;;  %v10081_v20 = vpop.f32.mrf.mxu3  ;;  %4750 = vperm.xlu1 %7633, %v614_v41   ;;  %v12823_v45 = vld [vmem:[#allocation31_spill] sm:$0xff] }
 0x85d   : > { %12799 = vst [vmem:[#allocation137_spill] sm:$0xff] %v10079_v24  ;;  %4745 = vperm.xlu0 %7635, %v613_v1   ;;  %v619_v1 = vld [vmem:[%s12591_s4 + $0x2a8] sm:$0xff] }
 0x861   : > { %7225 = vmatmul.msk.bf16.gmra.mxu1 %vm909_vm3, %v9837_v30 }
 0x862   : > { %4755 = vperm.xlu2 %7634, %v615_v14  }
 0x864   : > { %v3762_v60 = vpop.f32.mrf.mxu0  ;;  %v3917_v9 = vpop.f32.mrf.mxu3  ;;  %4765 = vperm.xlu1 %7633, %v617_v28   ;;  %v623_v28 = vld [vmem:[%s12591_s4 + $0x2c8] sm:$0xff] }
 0x865   : > { %v3763_v42 = vadd.f32 %v3762_v60, %v8255_v56  ;;  %v3918_v30 = vadd.f32 %v3917_v9, %v8133_v46  ;;  %4760 = vperm.xlu0 %7635, %v616_v5   ;;  %v627_v5 = vld [vmem:[%s12591_s4 + $0x2e8] sm:$0xff] }
 0x867   : > { %vm3781_vm15 = vcmp.gt.f32.partialorder %v3763_v42, 0.0  ;;  %v3797_v22 = vmul.f32 0.2, %v3763_v42  ;;  %vm3948_vm2 = vcmp.gt.f32.partialorder %v3918_v30, 0.0  ;;  %v3964_v55 = vmul.f32 0.2, %v3918_v30 }
 0x869   : > { %v3813_v19 = vsel %vm3781_vm15, %v3763_v42, %v3797_v22  ;;  %v10096_v3 = vsel %vm3948_vm2, %v3918_v30, %v3964_v55 }
 0x86a   : > { %v10107_v44 = vmax.f32 %v12800_v36, %v3813_v19  ;;  %v3996_v29 = vmax.f32 %v9971_v18, %v10096_v3  ;;  %4770 = vperm.xlu2 %7634, %v618_v39  }
 0x86c   : > { %12801 = vst [vmem:[#allocation138_spill] sm:$0xff] %v10107_v44  ;;  %v10114_v43 = vpop.f32.mrf.mxu0  ;;  %v10116_v13 = vpop.f32.mrf.mxu3  ;;  %4780 = vperm.xlu1 %7633, %v620_v2  }
 0x86d   : > { %12802 = vst [vmem:[#allocation139_spill] sm:$0xff] %v10114_v43  ;;  %4775 = vperm.xlu0 %7635, %v619_v1   ;;  %v632_v1 = vld [vmem:[%s12591_s4 + $0x310] sm:$0xff] }
 0x86e   : > { %v4077_v26 = vpop.f32.mrf.mxu1 }
 0x86f   : > { %v4078_v15 = vadd.f32 %v4077_v26, %v8069_v52  ;;  %v626_v26 = vld [vmem:[%s12591_s4 + $0x2e0] sm:$0xff] }
 0x871   : > { %vm4117_vm4 = vcmp.gt.f32.partialorder %v4078_v15, 0.0  ;;  %v4133_v41 = vmul.f32 0.2, %v4078_v15 }
 0x872   : > { %4785 = vperm.xlu2 %7634, %v621_v58  }
 0x873   : > { %v4149_v14 = vsel %vm4117_vm4, %v4078_v15, %v4133_v41  ;;  %v622_v15 = vld [vmem:[%s12591_s4 + $0x2c0] sm:$0xff] }
 0x874   : > { %v3922_v60 = vpop.f32.mrf.mxu3  ;;  %v10128_v9 = vpop.f32.mrf.mxu0  ;;  %v10133_v42 = vmax.f32 %v3990_v63, %v4149_v14  ;;  %4795 = vperm.xlu1 %7633, %v623_v28   ;;  %v630_v28 = vld [vmem:[%s12591_s4 + $0x300] sm:$0xff] }
 0x875   : > { %v3923_v30 = vadd.f32 %v3922_v60, %v8155_v6  ;;  %4790 = vperm.xlu0 %7635, %v622_v15  }
 0x876   : > { %v10136_v22 = vpop.f32.mrf.mxu1 }
 0x877   : > { %vm3950_vm5 = vcmp.gt.f32.partialorder %v3923_v30, 0.0  ;;  %v3966_v55 = vmul.f32 0.2, %v3923_v30 }
 0x879   : > { %v10138_v19 = vsel %vm3950_vm5, %v3923_v30, %v3966_v55  ;;  %v629_v30 = vld [vmem:[%s12591_s4 + $0x2f8] sm:$0xff] }
 0x87a   : > { %v3998_v47 = vmax.f32 %v10002_v48, %v10138_v19  ;;  %4800 = vperm.xlu2 %7634, %v624_v57   ;;  %v625_v55 = vld [vmem:[%s12591_s4 + $0x2d8] sm:$0xff]  ;;  %v628_v57 = vld [vmem:[%s12591_s4 + $0x2f0] sm:$0xff]  ;;  %v643_v48 = vld [vmem:[%s12591_s4 + $0x368] sm:$0xff] }
 0x87b   : > { %v648_v19 = vld [vmem:[%s12591_s4 + $0x390] sm:$0xff] }
 0x87c   : > { %v10151_v63 = vpop.f32.mrf.mxu0  ;;  %4810 = vperm.xlu1 %7633, %v626_v26  }
 0x87d   : > { %4805 = vperm.xlu0 %7635, %v625_v55   ;;  %v636_v55 = vld [vmem:[%s12591_s4 + $0x330] sm:$0xff] }
 0x87e   : > { %v4082_v36 = vpop.f32.mrf.mxu1 }
 0x87f   : > { %v4083_v39 = vadd.f32 %v4082_v36, %v8087_v0 }
 0x881   : > { %vm4119_vm6 = vcmp.gt.f32.partialorder %v4083_v39, 0.0  ;;  %v4135_v2 = vmul.f32 0.2, %v4083_v39 }
 0x882   : > { %4815 = vperm.xlu2 %7634, %v627_v5  }
 0x883   : > { %v4151_v41 = vsel %vm4119_vm6, %v4083_v39, %v4135_v2  ;;  %v633_v39 = vld [vmem:[%s12591_s4 + $0x318] sm:$0xff] }
 0x884   : > { %v10163_v58 = vpop.f32.mrf.mxu0  ;;  %v10168_v14 = vmax.f32 %v3992_v40, %v4151_v41  ;;  %4825 = vperm.xlu1 %7633, %v629_v30   ;;  %v635_v41 = vld [vmem:[%s12591_s4 + $0x328] sm:$0xff] }
 0x885   : > { %4820 = vperm.xlu0 %7635, %v628_v57   ;;  %v631_v30 = vld [vmem:[%s12591_s4 + $0x308] sm:$0xff] }
 0x886   : > { %v10170_v60 = vpop.f32.mrf.mxu1 }
 0x88a   : > { %4830 = vperm.xlu2 %7634, %v630_v28   ;;  %v638_v28 = vld [vmem:[%s12591_s4 + $0x340] sm:$0xff] }
 0x88c   : > { %v4202_v59 = vpop.f32.mrf.mxu0  ;;  %4840 = vperm.xlu1 %7633, %v632_v1   ;;  %v639_v1 = vld [vmem:[%s12591_s4 + $0x348] sm:$0xff] }
 0x88d   : > { %4835 = vperm.xlu0 %7635, %v631_v30   ;;  %v641_v30 = vld [vmem:[%s12591_s4 + $0x358] sm:$0xff] }
 0x88e   : > { %v4087_v62 = vpop.f32.mrf.mxu1 }
 0x88f   : > { %v4088_v40 = vadd.f32 %v4087_v62, %v8109_v25  ;;  %v634_v62 = vld [vmem:[%s12591_s4 + $0x320] sm:$0xff] }
 0x891   : > { %vm4121_vm7 = vcmp.gt.f32.partialorder %v4088_v40, 0.0  ;;  %v4137_v36 = vmul.f32 0.2, %v4088_v40 }
 0x892   : > { %4845 = vperm.xlu2 %7634, %v633_v39  }
 0x893   : > { %v4153_v26 = vsel %vm4121_vm7, %v4088_v40, %v4137_v36 }
 0x894   : > { %v4205_v15 = vpop.f32.mrf.mxu0  ;;  %v10194_v2 = vmax.f32 %v3994_v17, %v4153_v26  ;;  %4855 = vperm.xlu1 %7633, %v635_v41  }
 0x895   : > { %4850 = vperm.xlu0 %7635, %v634_v62   ;;  %v4203_v62 = vadd.f32 %v4202_v59, %v12752_v49 }
 0x896   : > { %v10196_v5 = vpop.f32.mrf.mxu1 }
 0x897   : > { %vm4218_vm0 = vcmp.gt.f32.partialorder %v4203_v62, 0.0 }
 0x89a   : > { %4860 = vperm.xlu2 %7634, %v636_v55   ;;  %v637_v55 = vld [vmem:[%s12591_s4 + $0x338] sm:$0xff] }
 0x89c   : > { %v4207_v53 = vpop.f32.mrf.mxu0  ;;  %4870 = vperm.xlu1 %7633, %v638_v28  }
 0x89d   : > { %v4208_v18 = vadd.f32 %v4207_v53, %v7896_v38  ;;  %4865 = vperm.xlu0 %7635, %v637_v55   ;;  %v4201_v38 = vadd.f32 %v10163_v58, %v7892_v35  ;;  %v645_v35 = vld [vmem:[%s12591_s4 + $0x378] sm:$0xff]  ;;  %v4198_v58 = vadd.f32 %v10151_v63, %v7910_v51 }
 0x89e   : > { %v4092_v33 = vpop.f32.mrf.mxu1 }
 0x89f   : > { %v4093_v17 = vadd.f32 %v4092_v33, %v8133_v46  ;;  %v642_v33 = vld [vmem:[%s12591_s4 + $0x360] sm:$0xff]  ;;  %vm4220_vm1 = vcmp.gt.f32.partialorder %v4208_v18, 0.0  ;;  %vm4217_vm13 = vcmp.gt.f32.partialorder %v4201_v38, 0.0  ;;  %v4224_v63 = vmul.f32 0.2, %v4198_v58 }
 0x8a0   : > { %vm4216_vm14 = vcmp.gt.f32.partialorder %v4198_v58, 0.0 }
 0x8a1   : > { %vm4123_vm8 = vcmp.gt.f32.partialorder %v4093_v17, 0.0  ;;  %v4139_v40 = vmul.f32 0.2, %v4093_v17 }
 0x8a2   : > { %4875 = vperm.xlu2 %7634, %v639_v1  }
 0x8a3   : > { %v4155_v57 = vsel %vm4123_vm8, %v4093_v17, %v4139_v40  ;;  %v4228_v40 = vmul.f32 0.2, %v4208_v18 }
 0x8a4   : > { %v4210_v36 = vpop.f32.mrf.mxu0  ;;  %v10220_v39 = vmax.f32 %v3996_v29, %v4155_v57  ;;  %4885 = vperm.xlu1 %7633, %v641_v30  }
 0x8a5   : > { %v4211_v41 = vadd.f32 %v4210_v36, %v7888_v31  ;;  %v4206_v31 = vadd.f32 %v4205_v15, %v7890_v32  ;;  %v644_v32 = vld [vmem:[%s12591_s4 + $0x370] sm:$0xff]  ;;  %v4226_v15 = vmul.f32 0.2, %v4203_v62 }
 0x8a6   : > { %12803 = vst [vmem:[#allocation140_spill] sm:$0xff] %v10220_v39  ;;  %v10222_v26 = vpop.f32.mrf.mxu1 }
 0x8a7   : > { %v4229_v29 = vmul.f32 0.2, %v4211_v41  ;;  %vm4221_vm9 = vcmp.gt.f32.partialorder %v4211_v41, 0.0  ;;  %v4227_v53 = vmul.f32 0.2, %v4206_v31  ;;  %vm4219_vm11 = vcmp.gt.f32.partialorder %v4206_v31, 0.0 }
 0x8a9   : > { %v4237_v36 = vsel %vm4221_vm9, %v4211_v41, %v4229_v29  ;;  %v4236_v41 = vsel %vm4220_vm1, %v4208_v18, %v4228_v40  ;;  %v4234_v18 = vsel %vm4218_vm0, %v4203_v62, %v4226_v15  ;;  %v655_v15 = vld [vmem:[%s12591_s4 + $0x3c8] sm:$0xff] }
 0x8aa   : > { %4890 = vperm.xlu2 %7634, %v642_v33   ;;  %v4196_v33 = vadd.f32 %v10128_v9, %v7908_v50  ;;  %v647_v50 = vld [vmem:[%s12591_s4 + $0x388] sm:$0xff] }
 0x8ac   : > { %v4212_v3 = vpop.f32.mrf.mxu0  ;;  %4900 = vperm.xlu1 %7633, %v644_v32   ;;  %vm4215_vm15 = vcmp.gt.f32.partialorder %v4196_v33, 0.0  ;;  %v654_v32 = vld [vmem:[%s12591_s4 + $0x3c0] sm:$0xff] }
 0x8ad   : > { %v4213_v17 = vadd.f32 %v4212_v3, %v7894_v37  ;;  %v640_v37 = vld [vmem:[%s12591_s4 + $0x350] sm:$0xff]  ;;  %v4225_v3 = vmul.f32 0.2, %v4201_v38 }
 0x8ae   : > { %v4097_v28 = vpop.f32.mrf.mxu1  ;;  %4880 = vperm.xlu0 %7635, %v640_v37   ;;  %v656_v37 = vld [vmem:[%s12591_s4 + $0x3d0] sm:$0xff] }
 0x8af   : > { %vm4222_vm10 = vcmp.gt.f32.partialorder %v4213_v17, 0.0  ;;  %v4230_v1 = vmul.f32 0.2, %v4213_v17  ;;  %v4098_v57 = vadd.f32 %v4097_v28, %v8155_v6  ;;  %v4223_v28 = vmul.f32 0.2, %v4196_v33 }
 0x8b0   : > { %v4233_v40 = vsel %vm4217_vm13, %v4201_v38, %v4225_v3  ;;  %v651_v38 = vld [vmem:[%s12591_s4 + $0x3a8] sm:$0xff]  ;;  %v661_v3 = vld [vmem:[%s12591_s4 + $0x3f8] sm:$0xff] }
 0x8b1   : > { %v4238_v30 = vsel %vm4222_vm10, %v4213_v17, %v4230_v1  ;;  %vm4125_vm12 = vcmp.gt.f32.partialorder %v4098_v57, 0.0  ;;  %v4141_v59 = vmul.f32 0.2, %v4098_v57  ;;  %v4235_v17 = vsel %vm4219_vm11, %v4206_v31, %v4227_v53  ;;  %v650_v1 = vld [vmem:[%s12591_s4 + $0x3a0] sm:$0xff] }
 0x8b2   : > { %v4242_v49 = vpack.c.bf16 %v4238_v30, %v4237_v36  ;;  %4905 = vperm.xlu2 %7634, %v645_v35   ;;  %v4241_v51 = vpack.c.bf16 %v4236_v41, %v4235_v17  ;;  %v4240_v9 = vpack.c.bf16 %v4234_v18, %v4233_v40  ;;  %v4231_v31 = vsel %vm4215_vm15, %v4196_v33, %v4223_v28  ;;  %v7688_v53 = vld [vmem:[%s12589_s2] sm:$0xff]  ;;  %v653_v36 = vld [vmem:[%s12591_s4 + $0x3b8] sm:$0xff]  ;;  %v7689_v35 = vld [vmem:[%s12589_s2 + $0x8] sm:$0xff]  ;;  %v10330_v40 = vpop.permute.xlu1 %856 }
 0x8b3   : > { %v4157_v55 = vsel %vm4125_vm12, %v4098_v57, %v4141_v59  ;;  %v646_v57 = vld [vmem:[%s12591_s4 + $0x380] sm:$0xff]  ;;  %v649_v30 = vld [vmem:[%s12591_s4 + $0x398] sm:$0xff]  ;;  %v660_v41 = vld [vmem:[%s12591_s4 + $0x3f0] sm:$0xff] }
 0x8b4   : > { %4247 = vmatpush.bf16.msra.mxu2 %v4242_v49  ;;  %v10258_v29 = vmax.f32 %v3998_v47, %v4157_v55  ;;  %4915 = vperm.xlu1 %7633, %v647_v50   ;;  %v4232_v47 = vsel %vm4216_vm14, %v4198_v58, %v4224_v63  ;;  %v652_v49 = vld [vmem:[%s12591_s4 + $0x3b0] sm:$0xff]  ;;  %v657_v59 = vld [vmem:[%s12591_s4 + $0x3d8] sm:$0xff]  ;;  %v659_v58 = vld [vmem:[%s12591_s4 + $0x3e8] sm:$0xff] }
 0x8b5   : > { %v4239_v62 = vpack.c.bf16 %v4232_v47, %v4231_v31  ;;  %v658_v55 = vld [vmem:[%s12591_s4 + $0x3e0] sm:$0xff]  ;;  %v7690_v33 = vld [vmem:[%s12589_s2 + $0x10] sm:$0xff]  ;;  %v12807_v18 = vld [vmem:[#allocation11_spill] sm:$0xff] }
 0x8b6   : > { %12804 = vst [vmem:[#allocation141_spill] sm:$0xff] %v10258_v29  ;;  %4895 = vperm.xlu0 %7635, %v643_v48   ;;  %v12805_v17 = vld [vmem:[#allocation14_spill] sm:$0xff]  ;;  %v10332_v48 = vpop.permute.xlu0 %866  ;;  %v12809_v47 = vld [vmem:[#allocation13_spill] sm:$0xff] }
 0x8b7   : > { %v1125_v28 = vadd.f32 %v12807_v18, %v12805_v17 }
 0x8b8   : > { %4248 = vmatpush.bf16.msra.mxu2 %v4241_v51  ;;  %v12806_v51 = vld [vmem:[#allocation8_spill] sm:$0xff] }
 0x8b9   : > { %v966_v63 = vadd.f32 %v12806_v51, %v12805_v17  ;;  %vm1151_vm4 = vcmp.gt.f32.partialorder %v1125_v28, 0.0 }
 0x8ba   : > { %4920 = vperm.xlu2 %7634, %v648_v19   ;;  %v12808_v19 = vld [vmem:[#allocation19_spill] sm:$0xff] }
 0x8bb   : > { %v1008_v50 = vmul.f32 0.2, %v966_v63  ;;  %vm992_vm2 = vcmp.gt.f32.partialorder %v966_v63, 0.0  ;;  %v971_v31 = vadd.f32 %v12809_v47, %v12808_v19  ;;  %v12819_v47 = vld [vmem:[#allocation28_spill] sm:$0xff] }
 0x8bc   : > { %4249 = vmatpush.bf16.msra.mxu2 %v4240_v9  ;;  %4930 = vperm.xlu1 %7633, %v650_v1   ;;  %v1167_v9 = vmul.f32 0.2, %v1125_v28 }
 0x8bd   : > { %vm994_vm5 = vcmp.gt.f32.partialorder %v971_v31, 0.0 }
 0x8be   : > { %4910 = vperm.xlu0 %7635, %v646_v57  }
 0x8c0   : > { %4250 = vmatpush.bf16.msra.mxu2 %v4239_v62  ;;  %v12810_v62 = vld [vmem:[#allocation16_spill] sm:$0xff] }
 0x8c1   : > { %v1130_v1 = vadd.f32 %v12810_v62, %v12808_v19 }
 0x8c2   : > { %4935 = vperm.xlu2 %7634, %v651_v38   ;;  %v12812_v38 = vld [vmem:[#allocation21_spill] sm:$0xff] }
 0x8c3   : > { %7231 = vmatmul.msk.bf16.vlgmr.msra.gmra.mxu2 %vm909_vm3, %v7688_v53  ;;  %v1135_v53 = vadd.f32 %v12812_v38, %v10330_v40  ;;  %vm1153_vm6 = vcmp.gt.f32.partialorder %v1130_v1, 0.0  ;;  %v12821_v38 = vld [vmem:[#allocation6_spill] sm:$0xff] }
 0x8c4   : > { %4945 = vperm.xlu1 %7633, %v653_v36   ;;  %v12813_v36 = vld [vmem:[#allocation23_spill] sm:$0xff] }
 0x8c5   : > { %vm1155_vm8 = vcmp.gt.f32.partialorder %v1135_v53, 0.0 }
 0x8c6   : > { %4925 = vperm.xlu0 %7635, %v649_v30   ;;  %v981_v30 = vadd.f32 %v12813_v36, %v10332_v48  ;;  %v12822_v36 = vld [vmem:[#allocation30_spill] sm:$0xff] }
 0x8c8   : > { %vm998_vm9 = vcmp.gt.f32.partialorder %v981_v30, 0.0  ;;  %v1014_v51 = vmul.f32 0.2, %v981_v30 }
 0x8ca   : > { %4950 = vperm.xlu2 %7634, %v654_v32   ;;  %v12814_v32 = vld [vmem:[#allocation25_spill] sm:$0xff]  ;;  %v10371_v7 = vsel %vm998_vm9, %v981_v30, %v1014_v51 }
 0x8cc   : > { %4960 = vperm.xlu1 %7633, %v656_v37   ;;  %v1140_v37 = vadd.f32 %v12814_v32, %v10332_v48  ;;  %v1465_v32 = vadd.f32 %v12822_v36, %v12821_v38 }
 0x8ce   : > { %4940 = vperm.xlu0 %7635, %v652_v49   ;;  %v10346_v49 = vsel %vm992_vm2, %v966_v63, %v1008_v50  ;;  %v1173_v63 = vmul.f32 0.2, %v1140_v37  ;;  %vm1157_vm10 = vcmp.gt.f32.partialorder %v1140_v37, 0.0  ;;  %v12817_v50 = vld [vmem:[#allocation27_spill] sm:$0xff]  ;;  %vm1497_vm13 = vcmp.gt.f32.partialorder %v1465_v32, 0.0 }
 0x8d2   : > { %4965 = vperm.xlu2 %7634, %v657_v59   ;;  %v12815_v59 = vld [vmem:[#allocation3_spill] sm:$0xff] }
 0x8d3   : > { %7232 = vmatmul.msk.bf16.gmra.mxu2 %vm909_vm3, %v7689_v35  ;;  %v12816_v35 = vld [vmem:[#allocation26_spill] sm:$0xff] }
 0x8d4   : > { %4975 = vperm.xlu1 %7633, %v659_v58   ;;  %v1455_v58 = vadd.f32 %v12816_v35, %v12815_v59 }
 0x8d6   : > { %4955 = vperm.xlu0 %7635, %v655_v15   ;;  %v10350_v15 = vsel %vm1151_vm4, %v1125_v28, %v1167_v9  ;;  %v1509_v18 = vmul.f32 0.2, %v1455_v58  ;;  %v1300_v28 = vadd.f32 %v12817_v50, %v12805_v17  ;;  %v12818_v9 = vld [vmem:[#allocation4_spill] sm:$0xff]  ;;  %vm1493_vm1 = vcmp.gt.f32.partialorder %v1455_v58, 0.0 }
 0x8d7   : > { %v1460_v62 = vadd.f32 %v12819_v47, %v12818_v9  ;;  %v1199_v35 = vmax.f32 %v10346_v49, %v10350_v15  ;;  %v1310_v50 = vadd.f32 %v12823_v45, %v10330_v40 }
 0x8d8   : > { %v10375_v36 = vsel %vm1493_vm1, %v1455_v58, %v1509_v18  ;;  %vm1326_vm11 = vcmp.gt.f32.partialorder %v1300_v28, 0.0  ;;  %v1342_v49 = vmul.f32 0.2, %v1300_v28 }
 0x8d9   : > { %v1511_v15 = vmul.f32 0.2, %v1460_v62  ;;  %vm1495_vm12 = vcmp.gt.f32.partialorder %v1460_v62, 0.0  ;;  %v1346_v45 = vmul.f32 0.2, %v1310_v50  ;;  %vm1330_vm14 = vcmp.gt.f32.partialorder %v1310_v50, 0.0 }
 0x8da   : > { %4980 = vperm.xlu2 %7634, %v660_v41   ;;  %v1010_v41 = vmul.f32 0.2, %v971_v31 }
 0x8dc   : > { %v1026_v8 = vsel %vm994_vm5, %v971_v31, %v1010_v41  ;;  %v12824_v41 = vld [vmem:[#allocation9_spill] sm:$0xff] }
 0x8de   : > { %4970 = vperm.xlu0 %7635, %v658_v55   ;;  %v1169_v55 = vmul.f32 0.2, %v1130_v1 }
 0x8e0   : > { %v1185_v44 = vsel %vm1153_vm6, %v1130_v1, %v1169_v55  ;;  %v1513_v1 = vmul.f32 0.2, %v1465_v32 }
 0x8e3   : > { %7233 = vmatmul.msk.bf16.gmra.mxu2 %vm909_vm3, %v7690_v33 }
 0x8e6   : > { %4985 = vperm.xlu0 %7635, %v661_v3   ;;  %v1171_v3 = vmul.f32 0.2, %v1135_v53 }
 0x8e8   : > { %v1187_v47 = vsel %vm1155_vm8, %v1135_v53, %v1171_v3  ;;  %v12826_v53 = vld [vmem:[#allocation33_spill] sm:$0xff]  ;;  %v12828_v3 = vld [vmem:[#allocation35_spill] sm:$0xff] }
 0x8e9   : > { %v1315_v30 = vadd.f32 %v12826_v53, %v10332_v48  ;;  %v1480_v51 = vadd.f32 %v12828_v3, %v12808_v19  ;;  %v1358_v53 = vsel %vm1326_vm11, %v1300_v28, %v1342_v49  ;;  %v1362_v3 = vsel %vm1330_vm14, %v1310_v50, %v1346_v45  ;;  %v12834_v50 = vld [vmem:[#allocation40_spill] sm:$0xff]  ;;  %v12835_v45 = vld [vmem:[#allocation15_spill] sm:$0xff] }
 0x8eb   : > { %vm1332_vm2 = vcmp.gt.f32.partialorder %v1315_v30, 0.0  ;;  %vm1503_vm5 = vcmp.gt.f32.partialorder %v1480_v51, 0.0 }
 0x8f3   : > { %7234 = vmatmul.msk.bf16.gmra.mxu2 %vm909_vm3, %v9724_v4  ;;  %v12811_v4 = vld [vmem:[#allocation18_spill] sm:$0xff] }
 0x8f4   : > { %v976_v57 = vadd.f32 %v12811_v4, %v10330_v40  ;;  %v12820_v4 = vld [vmem:[#allocation29_spill] sm:$0xff] }
 0x8f6   : > { %vm996_vm7 = vcmp.gt.f32.partialorder %v976_v57, 0.0  ;;  %v1012_v33 = vmul.f32 0.2, %v976_v57 }
 0x8f8   : > { %v1028_v56 = vsel %vm996_vm7, %v976_v57, %v1012_v33  ;;  %v12825_v57 = vld [vmem:[#allocation32_spill] sm:$0xff]  ;;  %v1201_v33 = vmax.f32 %v1026_v8, %v1185_v44  ;;  %v10393_v8 = vsel %vm1495_vm12, %v1460_v62, %v1511_v15  ;;  %v12832_v62 = vld [vmem:[#allocation38_spill] sm:$0xff]  ;;  %v10402_v15 = vmax.f32 %v1199_v35, %v1358_v53 }
 0x8f9   : > { %v1470_v55 = vadd.f32 %v12825_v57, %v12824_v41  ;;  %v12830_v57 = vld [vmem:[#allocation36_spill] sm:$0xff]  ;;  %v1630_v49 = vadd.f32 %v12832_v62, %v12815_v59 }
 0x8fa   : > { %v1485_v24 = vadd.f32 %v12830_v57, %v10330_v40  ;;  %v12831_v57 = vld [vmem:[#allocation48_spill] sm:$0xff] }
 0x8fb   : > { %vm1499_vm15 = vcmp.gt.f32.partialorder %v1470_v55, 0.0  ;;  %v1490_v28 = vadd.f32 %v12831_v57, %v10332_v48  ;;  %v1543_v57 = vmax.f32 %v12835_v45, %v10393_v8  ;;  %v12836_v35 = vld [vmem:[#allocation20_spill] sm:$0xff]  ;;  %v1684_v8 = vmul.f32 0.2, %v1630_v49 }
 0x8fc   : > { %v1521_v43 = vmul.f32 0.2, %v1485_v24  ;;  %vm1505_vm6 = vcmp.gt.f32.partialorder %v1485_v24, 0.0  ;;  %vm1668_vm8 = vcmp.gt.f32.partialorder %v1630_v49, 0.0 }
 0x8fd   : > { %vm1507_vm7 = vcmp.gt.f32.partialorder %v1490_v28, 0.0 }
 0x903   : > { %7235 = vmatmul.msk.bf16.gmra.mxu2 %vm909_vm3, %v9749_v10  ;;  %v1305_v10 = vadd.f32 %v12820_v4, %v12808_v19  ;;  %v10373_v4 = vsel %vm1157_vm10, %v1140_v37, %v1173_v63  ;;  %v12827_v37 = vld [vmem:[#allocation34_spill] sm:$0xff]  ;;  %v1203_v63 = vmax.f32 %v1028_v56, %v1187_v47  ;;  %v1515_v56 = vmul.f32 0.2, %v1470_v55 }
 0x904   : > { %v1475_v58 = vadd.f32 %v12827_v37, %v12805_v17  ;;  %v1205_v18 = vmax.f32 %v10371_v7, %v10373_v4  ;;  %v10396_v37 = vsel %vm1497_vm13, %v1465_v32, %v1513_v1  ;;  %v1348_v47 = vmul.f32 0.2, %v1315_v30  ;;  %v7691_v1 = vld [vmem:[%s12589_s2 + $0x28] sm:$0xff] }
 0x905   : > { %vm1328_vm0 = vcmp.gt.f32.partialorder %v1305_v10, 0.0  ;;  %v1344_v31 = vmul.f32 0.2, %v1305_v10  ;;  %v1519_v4 = vmul.f32 0.2, %v1480_v51  ;;  %v1545_v53 = vmax.f32 %v12836_v35, %v10396_v37 }
 0x906   : > { %vm1501_vm4 = vcmp.gt.f32.partialorder %v1475_v58, 0.0  ;;  %v1517_v7 = vmul.f32 0.2, %v1475_v58  ;;  %v10418_v62 = vmax.f32 %v1203_v63, %v1362_v3  ;;  %v12837_v63 = vld [vmem:[#allocation41_spill] sm:$0xff] }
 0x907   : > { %v1360_v44 = vsel %vm1328_vm0, %v1305_v10, %v1344_v31  ;;  %v12833_v10 = vld [vmem:[#allocation39_spill] sm:$0xff]  ;;  %v1640_v31 = vadd.f32 %v12834_v50, %v12821_v38  ;;  %v1364_v50 = vsel %vm1332_vm2, %v1315_v30, %v1348_v47  ;;  %v10426_v29 = vsel %vm1503_vm5, %v1480_v51, %v1519_v4 }
 0x908   : > { %v1635_v32 = vadd.f32 %v12833_v10, %v12818_v9  ;;  %v10414_v21 = vmax.f32 %v1201_v33, %v1360_v44  ;;  %v10421_v10 = vsel %vm1499_vm15, %v1470_v55, %v1515_v56  ;;  %v1533_v54 = vsel %vm1501_vm4, %v1475_v58, %v1517_v7  ;;  %v12838_v55 = vld [vmem:[#allocation42_spill] sm:$0xff]  ;;  %v12839_v58 = vld [vmem:[#allocation43_spill] sm:$0xff]  ;;  %v12841_v7 = vld [vmem:[#allocation44_spill] sm:$0xff] }
 0x909   : > { %v1523_v33 = vmul.f32 0.2, %v1490_v28  ;;  %v1688_v37 = vmul.f32 0.2, %v1640_v31  ;;  %v1645_v3 = vadd.f32 %v12837_v63, %v12824_v41  ;;  %vm1672_vm10 = vcmp.gt.f32.partialorder %v1640_v31, 0.0 }
 0x90a   : > { %v1686_v44 = vmul.f32 0.2, %v1635_v32  ;;  %vm1670_vm9 = vcmp.gt.f32.partialorder %v1635_v32, 0.0  ;;  %v1650_v30 = vadd.f32 %v12838_v55, %v12805_v17  ;;  %v1805_v51 = vadd.f32 %v12839_v58, %v12815_v59 }
 0x90b   : > { %v10438_v56 = vmax.f32 %v1205_v18, %v1364_v50  ;;  %v1549_v47 = vmax.f32 %v10402_v15, %v1533_v54  ;;  %v1655_v4 = vadd.f32 %v12841_v7, %v12808_v19  ;;  %v1551_v45 = vmax.f32 %v10414_v21, %v10426_v29  ;;  %v12842_v15 = vld [vmem:[#allocation45_spill] sm:$0xff]  ;;  %v12843_v21 = vld [vmem:[#allocation46_spill] sm:$0xff]  ;;  %v12844_v7 = vld [vmem:[#allocation47_spill] sm:$0xff] }
 0x90c   : > { %v10448_v63 = vsel %vm1507_vm7, %v1490_v28, %v1523_v33  ;;  %v1700_v55 = vsel %vm1668_vm8, %v1630_v49, %v1684_v8  ;;  %v1702_v58 = vsel %vm1670_vm9, %v1635_v32, %v1686_v44  ;;  %v1704_v6 = vsel %vm1672_vm10, %v1640_v31, %v1688_v37  ;;  %v12845_v32 = vld [vmem:[#allocation37_spill] sm:$0xff] }
 0x90d   : > { %vm1674_vm1 = vcmp.gt.f32.partialorder %v1645_v3, 0.0  ;;  %v1690_v18 = vmul.f32 0.2, %v1645_v3  ;;  %vm1676_vm11 = vcmp.gt.f32.partialorder %v1650_v30, 0.0  ;;  %v1859_v54 = vmul.f32 0.2, %v1805_v51 }
 0x90e   : > { %v1810_v50 = vadd.f32 %v12842_v15, %v12818_v9  ;;  %vm1843_vm12 = vcmp.gt.f32.partialorder %v1805_v51, 0.0  ;;  %v1660_v29 = vadd.f32 %v12843_v21, %v10330_v40  ;;  %v1815_v28 = vadd.f32 %v12844_v7, %v12821_v38  ;;  %v12846_v33 = vld [vmem:[#allocation49_spill] sm:$0xff] }
 0x90f   : > { %v1555_v49 = vmax.f32 %v10438_v56, %v10448_v63  ;;  %vm1678_vm0 = vcmp.gt.f32.partialorder %v1655_v4, 0.0  ;;  %v1665_v31 = vadd.f32 %v12845_v32, %v10332_v48  ;;  %v1820_v8 = vadd.f32 %v12846_v33, %v12824_v41 }
 0x910   : > { %v12847_v44 = vmax.f32 %v12829_v11, %v10375_v36  ;;  %v10467_v15 = vmax.f32 %v1543_v57, %v1702_v58  ;;  %v10469_v21 = vmax.f32 %v1545_v53, %v1704_v6  ;;  %v1706_v7 = vsel %vm1674_vm1, %v1645_v3, %v1690_v18  ;;  %v12848_v36 = vld [vmem:[#allocation50_spill] sm:$0xff]  ;;  %v12849_v6 = vld [vmem:[#allocation51_spill] sm:$0xff]  ;;  %v12850_v3 = vld [vmem:[#allocation52_spill] sm:$0xff] }
 0x911   : > { %v1875_v63 = vsel %vm1843_vm12, %v1805_v51, %v1859_v54  ;;  %vm1845_vm13 = vcmp.gt.f32.partialorder %v1810_v50, 0.0  ;;  %v1861_v35 = vmul.f32 0.2, %v1810_v50  ;;  %vm1680_vm14 = vcmp.gt.f32.partialorder %v1660_v29, 0.0  ;;  %v7692_v51 = vld [vmem:[%s12589_s2 + $0x30] sm:$0xff]  ;;  %v12851_v58 = vld [vmem:[#allocation53_spill] sm:$0xff] }
 0x912   : > { %v10465_v37 = vmax.f32 %v12847_v44, %v1700_v55  ;;  %v1696_v39 = vmul.f32 0.2, %v1660_v29  ;;  %vm1847_vm15 = vcmp.gt.f32.partialorder %v1815_v28, 0.0  ;;  %v1863_v33 = vmul.f32 0.2, %v1815_v28 }
 0x913   : > { %7236 = vmatmul.msk.bf16.gmra.mxu2 %vm909_vm3, %v7691_v1  ;;  %v10428_v1 = vsel %vm1505_vm6, %v1485_v24, %v1521_v43  ;;  %v12840_v24 = vld [vmem:[#allocation24_spill] sm:$0xff]  ;;  %v1698_v46 = vmul.f32 0.2, %v1665_v31  ;;  %v1865_v11 = vmul.f32 0.2, %v1820_v8  ;;  %v1980_v57 = vadd.f32 %v12848_v36, %v12815_v59 }
 0x914   : > { %v1547_v43 = vmax.f32 %v12840_v24, %v10421_v10  ;;  %v1692_v10 = vmul.f32 0.2, %v1650_v30  ;;  %v1694_v24 = vmul.f32 0.2, %v1655_v4  ;;  %vm1682_vm2 = vcmp.gt.f32.partialorder %v1665_v31, 0.0 }
 0x915   : > { %vm1849_vm4 = vcmp.gt.f32.partialorder %v1820_v8, 0.0  ;;  %v1825_v53 = vadd.f32 %v12849_v6, %v12805_v17  ;;  %v1830_v18 = vadd.f32 %v12851_v58, %v12808_v19  ;;  %v1877_v36 = vsel %vm1845_vm13, %v1810_v50, %v1861_v35 }
 0x916   : > { %v1708_v56 = vsel %vm1676_vm11, %v1650_v30, %v1692_v10  ;;  %v1710_v32 = vsel %vm1678_vm0, %v1655_v4, %v1694_v24  ;;  %v1985_v30 = vadd.f32 %v12850_v3, %v12818_v9  ;;  %v10483_v4 = vmax.f32 %v1547_v43, %v1706_v7  ;;  %v12852_v10 = vld [vmem:[#allocation54_spill] sm:$0xff] }
 0x917   : > { %v10485_v55 = vmax.f32 %v1549_v47, %v1708_v56  ;;  %v1990_v54 = vadd.f32 %v12852_v10, %v12821_v38  ;;  %v1891_v24 = vmax.f32 %v10465_v37, %v1875_v63  ;;  %v10492_v44 = vmax.f32 %v1551_v45, %v1710_v32  ;;  %v12853_v45 = vld [vmem:[#allocation55_spill] sm:$0xff]  ;;  %v12857_v63 = vld [vmem:[#allocation58_spill] sm:$0xff] }
 0x918   : > { %v1712_v6 = vsel %vm1680_vm14, %v1660_v29, %v1696_v39  ;;  %v1879_v3 = vsel %vm1847_vm15, %v1815_v28, %v1863_v33  ;;  %v1714_v43 = vsel %vm1682_vm2, %v1665_v31, %v1698_v46  ;;  %v10497_v7 = vsel %vm1849_vm4, %v1820_v8, %v1865_v11  ;;  %v12854_v39 = vld [vmem:[#allocation56_spill] sm:$0xff]  ;;  %v12855_v46 = vld [vmem:[#allocation57_spill] sm:$0xff] }
 0x919   : > { %vm2018_vm5 = vcmp.gt.f32.partialorder %v1980_v57, 0.0  ;;  %v2034_v47 = vmul.f32 0.2, %v1980_v57  ;;  %vm1851_vm6 = vcmp.gt.f32.partialorder %v1825_v53, 0.0  ;;  %v1867_v56 = vmul.f32 0.2, %v1825_v53 }
 0x91a   : > { %vm2020_vm7 = vcmp.gt.f32.partialorder %v1985_v30, 0.0  ;;  %v1869_v58 = vmul.f32 0.2, %v1830_v18  ;;  %v2038_v10 = vmul.f32 0.2, %v1990_v54  ;;  %v1835_v37 = vadd.f32 %v12853_v45, %v10330_v40 }
 0x91b   : > { %vm1853_vm8 = vcmp.gt.f32.partialorder %v1830_v18, 0.0  ;;  %vm2022_vm9 = vcmp.gt.f32.partialorder %v1990_v54, 0.0  ;;  %v1995_v35 = vadd.f32 %v12854_v39, %v12824_v41  ;;  %v1840_v50 = vadd.f32 %v12855_v46, %v10332_v48 }
 0x91c   : > { %v1893_v29 = vmax.f32 %v10467_v15, %v1877_v36  ;;  %v12856_v28 = vmax.f32 %v10418_v62, %v10428_v1  ;;  %v1895_v8 = vmax.f32 %v10469_v21, %v1879_v3  ;;  %v2000_v32 = vadd.f32 %v12857_v63, %v12805_v17 }
 0x91d   : > { %v10514_v33 = vmax.f32 %v1555_v49, %v1714_v43  ;;  %v1897_v11 = vmax.f32 %v10483_v4, %v10497_v7  ;;  %v2050_v45 = vsel %vm2018_vm5, %v1980_v57, %v2034_v47  ;;  %v1883_v39 = vsel %vm1851_vm6, %v1825_v53, %v1867_v56  ;;  %v12858_v49 = vld [vmem:[#allocation59_spill] sm:$0xff]  ;;  %v12859_v4 = vld [vmem:[#allocation60_spill] sm:$0xff]  ;;  %v12860_v53 = vld [vmem:[#allocation61_spill] sm:$0xff] }
 0x91e   : > { %v10509_v31 = vmax.f32 %v12856_v28, %v1712_v6  ;;  %v1885_v36 = vsel %vm1853_vm8, %v1830_v18, %v1869_v58  ;;  %v2054_v62 = vsel %vm2022_vm9, %v1990_v54, %v2038_v10  ;;  %v1871_v1 = vmul.f32 0.2, %v1835_v37  ;;  %v12861_v18 = vld [vmem:[#allocation62_spill] sm:$0xff]  ;;  %v12862_v58 = vld [vmem:[#allocation63_spill] sm:$0xff] }
 0x91f   : > { %vm1855_vm10 = vcmp.gt.f32.partialorder %v1835_v37, 0.0  ;;  %vm2024_vm1 = vcmp.gt.f32.partialorder %v1995_v35, 0.0  ;;  %v2040_v21 = vmul.f32 0.2, %v1995_v35  ;;  %v1873_v6 = vmul.f32 0.2, %v1840_v50 }
 0x920   : > { %vm1857_vm11 = vcmp.gt.f32.partialorder %v1840_v50, 0.0  ;;  %v2042_v3 = vmul.f32 0.2, %v2000_v32  ;;  %v2005_v43 = vadd.f32 %v12858_v49, %v12808_v19  ;;  %v2010_v7 = vadd.f32 %v12859_v4, %v10330_v40 }
 0x921   : > { %v10525_v57 = vmax.f32 %v1891_v24, %v2050_v45  ;;  %vm2026_vm12 = vcmp.gt.f32.partialorder %v2000_v32, 0.0  ;;  %v2155_v54 = vadd.f32 %v12861_v18, %v12815_v59  ;;  %v1899_v47 = vmax.f32 %v10485_v55, %v1883_v39  ;;  %v10541_v45 = vpop.permute.xlu1 %4365 }
 0x922   : > { %v2160_v10 = vadd.f32 %v12862_v58, %v12818_v9  ;;  %v10537_v46 = vmax.f32 %v1895_v8, %v2054_v62  ;;  %v1887_v24 = vsel %vm1855_vm10, %v1835_v37, %v1871_v1  ;;  %v2056_v28 = vsel %vm2024_vm1, %v1995_v35, %v2040_v21  ;;  %v7693_v8 = vld [vmem:[%s12589_s2 + $0x38] sm:$0xff]  ;;  %v12864_v35 = vld [vmem:[#allocation64_spill] sm:$0xff]  ;;  %v12865_v62 = vld [vmem:[#allocation75_spill] sm:$0xff] }
 0x923   : > { %7237 = vmatmul.msk.bf16.gmra.mxu2 %vm909_vm3, %v7692_v51  ;;  %v2036_v51 = vmul.f32 0.2, %v1985_v30  ;;  %v1889_v63 = vsel %vm1857_vm11, %v1840_v50, %v1873_v6  ;;  %v2058_v49 = vsel %vm2026_vm12, %v2000_v32, %v2042_v3  ;;  %vm2028_vm0 = vcmp.gt.f32.partialorder %v2005_v43, 0.0 }
 0x924   : > { %v2044_v4 = vmul.f32 0.2, %v2005_v43  ;;  %v2046_v55 = vmul.f32 0.2, %v2010_v7  ;;  %vm2030_vm13 = vcmp.gt.f32.partialorder %v2010_v7, 0.0  ;;  %vm2193_vm15 = vcmp.gt.f32.partialorder %v2155_v54, 0.0 }
 0x925   : > { %v2052_v15 = vsel %vm2020_vm7, %v1985_v30, %v2036_v51  ;;  %v2015_v30 = vadd.f32 %v12860_v53, %v10332_v48  ;;  %v1901_v51 = vmax.f32 %v10492_v44, %v1885_v36  ;;  %v2209_v39 = vmul.f32 0.2, %v2155_v54  ;;  %v12863_v44 = vld [vmem:[#allocation66_spill] sm:$0xff] }
 0x926   : > { %v10532_v56 = vmax.f32 %v1893_v29, %v2052_v15  ;;  %v2330_v15 = vadd.f32 %v12863_v44, %v12815_v59  ;;  %v2211_v37 = vmul.f32 0.2, %v2160_v10  ;;  %v2165_v50 = vadd.f32 %v12864_v35, %v12821_v38 }
 0x927   : > { %v2048_v29 = vmul.f32 0.2, %v2015_v30  ;;  %vm2032_vm14 = vcmp.gt.f32.partialorder %v2015_v30, 0.0  ;;  %v1903_v32 = vmax.f32 %v10509_v31, %v1887_v24  ;;  %v10552_v36 = vmax.f32 %v1897_v11, %v2056_v28  ;;  %v12867_v28 = vld [vmem:[#allocation65_spill] sm:$0xff] }
 0x928   : > { %vm2195_vm2 = vcmp.gt.f32.partialorder %v2160_v10, 0.0  ;;  %v2505_v1 = vadd.f32 %v12865_v62, %v12815_v59  ;;  %v1905_v21 = vmax.f32 %v10514_v33, %v1889_v63  ;;  %v10557_v6 = vmax.f32 %v1899_v47, %v2058_v49  ;;  %v12868_v33 = vld [vmem:[#allocation68_spill] sm:$0xff] }
 0x929   : > { %v2060_v3 = vsel %vm2028_vm0, %v2005_v43, %v2044_v4  ;;  %v2062_v53 = vsel %vm2030_vm13, %v2010_v7, %v2046_v55  ;;  %v2064_v18 = vsel %vm2032_vm14, %v2015_v30, %v2048_v29  ;;  %v2225_v58 = vsel %vm2193_vm15, %v2155_v54, %v2209_v39  ;;  %v12869_v43 = vld [vmem:[#allocation91_spill] sm:$0xff]  ;;  %v12870_v29 = vld [vmem:[#allocation98_spill] sm:$0xff] }
 0x92a   : > { %v2384_v44 = vmul.f32 0.2, %v2330_v15  ;;  %v2227_v11 = vsel %vm2195_vm2, %v2160_v10, %v2211_v37  ;;  %v2213_v24 = vmul.f32 0.2, %v2165_v50  ;;  %v2170_v35 = vadd.f32 %v12867_v28, %v12824_v41  ;;  %v10578_v37 = vpop.permute.xlu1 %4377 }
 0x92b   : > { %vm2197_vm4 = vcmp.gt.f32.partialorder %v2165_v50, 0.0  ;;  %v2335_v47 = vadd.f32 %v12868_v33, %v12818_v9  ;;  %v2559_v63 = vmul.f32 0.2, %v2505_v1  ;;  %v2855_v7 = vadd.f32 %v12869_v43, %v12815_v59  ;;  %12871 = vst [vmem:[#allocation14_spill] sm:$0xff] %v10578_v37 }
 0x92c   : > { %v10569_v30 = vmax.f32 %v1901_v51, %v2060_v3  ;;  %v10571_v54 = vmax.f32 %v1903_v32, %v2062_v53  ;;  %v10573_v49 = vmax.f32 %v1905_v21, %v2064_v18  ;;  %vm2543_vm5 = vcmp.gt.f32.partialorder %v2505_v1, 0.0  ;;  %v12872_v53 = vld [vmem:[#allocation109_spill] sm:$0xff] }
 0x92d   : > { %v2241_v10 = vmax.f32 %v10525_v57, %v2225_v58  ;;  %v3030_v39 = vadd.f32 %v12870_v29, %v12815_v59  ;;  %v2243_v62 = vmax.f32 %v10532_v56, %v2227_v11  ;;  %v2215_v51 = vmul.f32 0.2, %v2170_v35  ;;  %v12874_v56 = vld [vmem:[#allocation113_spill] sm:$0xff] }
 0x92e   : > { %v2386_v32 = vmul.f32 0.2, %v2335_v47  ;;  %v2575_v3 = vsel %vm2543_vm5, %v2505_v1, %v2559_v63  ;;  %v2909_v21 = vmul.f32 0.2, %v2855_v7  ;;  %v3205_v18 = vadd.f32 %v12872_v53, %v12815_v59 }
 0x92f   : > { %vm2370_vm7 = vcmp.gt.f32.partialorder %v2335_v47, 0.0  ;;  %vm2893_vm8 = vcmp.gt.f32.partialorder %v2855_v7, 0.0  ;;  %vm2199_vm9 = vcmp.gt.f32.partialorder %v2170_v35, 0.0  ;;  %v3084_v28 = vmul.f32 0.2, %v3030_v39 }
 0x930   : > { %vm3068_vm10 = vcmp.gt.f32.partialorder %v3030_v39, 0.0  ;;  %v2402_v63 = vsel %vm2370_vm7, %v2335_v47, %v2386_v32  ;;  %v2925_v43 = vsel %vm2893_vm8, %v2855_v7, %v2909_v21  ;;  %v10595_v53 = vsel %vm2199_vm9, %v2170_v35, %v2215_v51 }
 0x931   : > { %vm3243_vm1 = vcmp.gt.f32.partialorder %v3205_v18, 0.0  ;;  %v3905_v35 = vadd.f32 %v10011_v61, %v12815_v59 }
 0x932   : > { %v10603_v51 = vpop.permute.xlu1 %4385 }
 0x933   : > { %7238 = vmatmul.msk.bf16.gmra.mxu2 %vm909_vm3, %v7693_v8  ;;  %v12866_v8 = vld [vmem:[#allocation86_spill] sm:$0xff]  ;;  %vm2368_vm3 = vcmp.gt.f32.partialorder %v2330_v15, 0.0  ;;  %12877 = vst [vmem:[#allocation8_spill] sm:$0xff] %v10603_v51 }
 0x934   : > { %v2680_v31 = vadd.f32 %v12866_v8, %v12815_v59  ;;  %v2400_v4 = vsel %vm2368_vm3, %v2330_v15, %v2384_v44  ;;  %v10581_v8 = vsel %vm2197_vm4, %v2165_v50, %v2213_v24  ;;  %v12873_v15 = vld [vmem:[#allocation70_spill] sm:$0xff]  ;;  %v3380_v50 = vadd.f32 %v12874_v56, %v12815_v59  ;;  %v12875_v24 = vld [vmem:[#allocation77_spill] sm:$0xff] }
 0x935   : > { %v2416_v57 = vmax.f32 %v2241_v10, %v2400_v4  ;;  %v2340_v58 = vadd.f32 %v12873_v15, %v12821_v38  ;;  %v2245_v11 = vmax.f32 %v10537_v46, %v10581_v8  ;;  %v2510_v33 = vadd.f32 %v12875_v24, %v12818_v9  ;;  %v12876_v4 = vld [vmem:[#allocation122_spill] sm:$0xff] }
 0x936   : > { %v2734_v55 = vmul.f32 0.2, %v2680_v31  ;;  %vm2718_vm6 = vcmp.gt.f32.partialorder %v2680_v31, 0.0  ;;  %v3259_v10 = vmul.f32 0.2, %v3205_v18  ;;  %v3555_v29 = vadd.f32 %v12876_v4, %v12815_v59 }
 0x937   : > { %v2591_v1 = vmax.f32 %v2416_v57, %v2575_v3  ;;  %vm2372_vm11 = vcmp.gt.f32.partialorder %v2340_v58, 0.0  ;;  %v3100_v15 = vsel %vm3068_vm10, %v3030_v39, %v3084_v28  ;;  %v3434_v56 = vmul.f32 0.2, %v3380_v50  ;;  %v12878_v39 = vld [vmem:[#allocation87_spill] sm:$0xff] }
 0x938   : > { %v2750_v44 = vsel %vm2718_vm6, %v2680_v31, %v2734_v55  ;;  %v2388_v31 = vmul.f32 0.2, %v2340_v58  ;;  %v3730_v46 = vadd.f32 %v9880_v27, %v12815_v59  ;;  %v10599_v8 = vmax.f32 %v2243_v62, %v2402_v63  ;;  %v12879_v63 = vld [vmem:[#allocation93_spill] sm:$0xff] }
 0x939   : > { %v2766_v55 = vmax.f32 %v2591_v1, %v2750_v44  ;;  %v2561_v3 = vmul.f32 0.2, %v2510_v33  ;;  %vm3418_vm12 = vcmp.gt.f32.partialorder %v3380_v50, 0.0  ;;  %vm2545_vm0 = vcmp.gt.f32.partialorder %v2510_v33, 0.0 }
 0x93a   : > { %v3275_v7 = vsel %vm3243_vm1, %v3205_v18, %v3259_v10  ;;  %v3609_v32 = vmul.f32 0.2, %v3555_v29  ;;  %v2404_v21 = vsel %vm2372_vm11, %v2340_v58, %v2388_v31  ;;  %v2685_v57 = vadd.f32 %v12878_v39, %v12818_v9 }
 0x93b   : > { %v2941_v47 = vmax.f32 %v2766_v55, %v2925_v43  ;;  %vm3593_vm13 = vcmp.gt.f32.partialorder %v3555_v29, 0.0  ;;  %v3450_v62 = vsel %vm3418_vm12, %v3380_v50, %v3434_v56  ;;  %v3784_v28 = vmul.f32 0.2, %v3730_v46  ;;  %v12880_v50 = vld [vmem:[#allocation100_spill] sm:$0xff] }
 0x93c   : > { %v4080_v1 = vadd.f32 %v10136_v22, %v12815_v59  ;;  %v2577_v24 = vsel %vm2545_vm0, %v2510_v33, %v2561_v3  ;;  %v2860_v61 = vadd.f32 %v12879_v63, %v12818_v9  ;;  %vm3768_vm14 = vcmp.gt.f32.partialorder %v3730_v46, 0.0  ;;  %v12882_v63 = vld [vmem:[#allocation115_spill] sm:$0xff] }
 0x93d   : > { %v3116_v44 = vmax.f32 %v2941_v47, %v3100_v15  ;;  %v3625_v58 = vsel %vm3593_vm13, %v3555_v29, %v3609_v32  ;;  %v3959_v10 = vmul.f32 0.2, %v3905_v35  ;;  %vm2720_vm2 = vcmp.gt.f32.partialorder %v2685_v57, 0.0 }
 0x93e   : > { %v2736_v31 = vmul.f32 0.2, %v2685_v57  ;;  %vm3943_vm3 = vcmp.gt.f32.partialorder %v3905_v35, 0.0  ;;  %v3035_v15 = vadd.f32 %v12880_v50, %v12818_v9  ;;  %v3800_v22 = vsel %vm3768_vm14, %v3730_v46, %v3784_v28  ;;  %v12886_v50 = vld [vmem:[#allocation72_spill] sm:$0xff] }
 0x93f   : > { %v3291_v43 = vmax.f32 %v3116_v44, %v3275_v7  ;;  %v4134_v56 = vmul.f32 0.2, %v4080_v1  ;;  %v2911_v33 = vmul.f32 0.2, %v2860_v61  ;;  %vm4118_vm4 = vcmp.gt.f32.partialorder %v4080_v1, 0.0  ;;  %v12881_v7 = vld [vmem:[#allocation110_spill] sm:$0xff] }
 0x940   : > { %v2247_v29 = vmax.f32 %v10552_v36, %v10595_v53  ;;  %vm2895_vm5 = vcmp.gt.f32.partialorder %v2860_v61, 0.0  ;;  %v3210_v32 = vadd.f32 %v12881_v7, %v12818_v9  ;;  %v3975_v39 = vsel %vm3943_vm3, %v3905_v35, %v3959_v10  ;;  %v12909_v36 = vld [vmem:[#allocation128_spill] sm:$0xff] }
 0x941   : > { %v3466_v55 = vmax.f32 %v3291_v43, %v3450_v62  ;;  %v10619_v44 = vmax.f32 %v2245_v11, %v2404_v21  ;;  %v2752_v46 = vsel %vm2720_vm2, %v2685_v57, %v2736_v31  ;;  %v10625_v43 = vpop.permute.xlu2 %4369  ;;  %v12884_v11 = vld [vmem:[#allocation79_spill] sm:$0xff]  ;;  %v2927_v21 = vsel %vm2895_vm5, %v2860_v61, %v2911_v33 }
 0x942   : > { %v2515_v35 = vadd.f32 %v12884_v11, %v12821_v38  ;;  %vm3070_vm6 = vcmp.gt.f32.partialorder %v3035_v15, 0.0  ;;  %v3261_v57 = vmul.f32 0.2, %v3210_v32  ;;  %vm3245_vm8 = vcmp.gt.f32.partialorder %v3210_v32, 0.0 }
 0x943   : > { %v3641_v3 = vmax.f32 %v3466_v55, %v3625_v58  ;;  %v4150_v58 = vsel %vm4118_vm4, %v4080_v1, %v4134_v56  ;;  %v3735_v61 = vadd.f32 %v9912_v23, %v12818_v9  ;;  %v4085_v11 = vadd.f32 %v10170_v60, %v12818_v9 }
 0x944   : > { %vm2547_vm10 = vcmp.gt.f32.partialorder %v2515_v35, 0.0  ;;  %v3570_v53 = vadd.f32 %v12909_v36, %v12824_v41  ;;  %v10749_v36 = vpop.f32.mrf.mxu1 }
 0x945   : > { %v3816_v62 = vmax.f32 %v3641_v3, %v3800_v22  ;;  %v10636_v22 = vadd.f32 %v12886_v50, %v12824_v41  ;;  %v2563_v3 = vmul.f32 0.2, %v2515_v35  ;;  %vm3770_vm11 = vcmp.gt.f32.partialorder %v3735_v61, 0.0 }
 0x946   : > { %v4252_v27 = vpop.f32.mrf.mxu2  ;;  %vm4120_vm14 = vcmp.gt.f32.partialorder %v4085_v11, 0.0 }
 0x947   : > { %v4253_v18 = vadd.f32 %v4252_v27, %v8069_v52  ;;  %v2593_v27 = vmax.f32 %v10599_v8, %v2577_v24  ;;  %v3991_v8 = vmax.f32 %v3816_v62, %v3975_v39  ;;  %v12885_v24 = vld [vmem:[#allocation124_spill] sm:$0xff]  ;;  %v3277_v62 = vsel %vm3245_vm8, %v3210_v32, %v3261_v57 }
 0x948   : > { %v3560_v10 = vadd.f32 %v12885_v24, %v12818_v9 }
 0x949   : > { %vm4292_vm15 = vcmp.gt.f32.partialorder %v4253_v18, 0.0  ;;  %v4308_v4 = vmul.f32 0.2, %v4253_v18  ;;  %v2768_v1 = vmax.f32 %v2593_v27, %v2752_v46  ;;  %v4166_v56 = vmax.f32 %v3991_v8, %v4150_v58  ;;  %v12887_v27 = vld [vmem:[#allocation88_spill] sm:$0xff] }
 0x94a   : > { %v2690_v46 = vadd.f32 %v12887_v27, %v12821_v38  ;;  %vm3595_vm1 = vcmp.gt.f32.partialorder %v3560_v10, 0.0  ;;  %v2579_v8 = vsel %vm2547_vm10, %v2515_v35, %v2563_v3  ;;  %v2390_v27 = vmul.f32 0.2, %v10636_v22 }
 0x94b   : > { %v4324_v52 = vsel %vm4292_vm15, %v4253_v18, %v4308_v4  ;;  %v3086_v18 = vmul.f32 0.2, %v3035_v15  ;;  %v10627_v4 = vpop.permute.xlu1 %4397  ;;  %v2943_v7 = vmax.f32 %v2768_v1, %v2927_v21  ;;  %v10648_v21 = vpop.permute.xlu0 %4373  ;;  %vm2374_vm15 = vcmp.gt.f32.partialorder %v10636_v22, 0.0 }
 0x94c   : > { %v4340_v47 = vmax.f32 %v10133_v42, %v4324_v52  ;;  %v3385_v42 = vadd.f32 %v12882_v63, %v12818_v9  ;;  %12883 = vst [vmem:[#allocation11_spill] sm:$0xff] %v10627_v4  ;;  %v3910_v63 = vadd.f32 %v10046_v12, %v12818_v9  ;;  %v12888_v12 = vld [vmem:[#allocation95_spill] sm:$0xff]  ;;  %v10653_v1 = vpop.permute.xlu2 %4381  ;;  %vm2722_vm0 = vcmp.gt.f32.partialorder %v2690_v46, 0.0 }
 0x94d   : > { %v2865_v57 = vadd.f32 %v12888_v12, %v12821_v38  ;;  %12889 = vst [vmem:[#allocation19_spill] sm:$0xff] %v10653_v1  ;;  %v2738_v60 = vmul.f32 0.2, %v2690_v46 }
 0x94e   : > { %v4254_v28 = vpop.f32.mrf.mxu2  ;;  %v3436_v52 = vmul.f32 0.2, %v3385_v42  ;;  %vm3420_vm9 = vcmp.gt.f32.partialorder %v3385_v42, 0.0  ;;  %v3961_v50 = vmul.f32 0.2, %v3910_v63  ;;  %vm3945_vm13 = vcmp.gt.f32.partialorder %v3910_v63, 0.0 }
 0x94f   : > { %v4255_v55 = vadd.f32 %v4254_v28, %v12815_v59  ;;  %v3102_v59 = vsel %vm3070_vm6, %v3035_v15, %v3086_v18  ;;  %v3611_v28 = vmul.f32 0.2, %v3560_v10  ;;  %v2913_v3 = vmul.f32 0.2, %v2865_v57 }
 0x950   : > { %v3118_v58 = vmax.f32 %v2943_v7, %v3102_v59  ;;  %v3452_v23 = vsel %vm3420_vm9, %v3385_v42, %v3436_v52  ;;  %v4136_v52 = vmul.f32 0.2, %v4085_v11  ;;  %vm2897_vm2 = vcmp.gt.f32.partialorder %v2865_v57, 0.0 }
 0x951   : > { %vm4293_vm7 = vcmp.gt.f32.partialorder %v4255_v55, 0.0  ;;  %v4309_v31 = vmul.f32 0.2, %v4255_v55 }
 0x952   : > { %v3293_v24 = vmax.f32 %v3118_v58, %v3277_v62  ;;  %v2595_v58 = vmax.f32 %v10619_v44, %v2579_v8  ;;  %v12895_v44 = vld [vmem:[#allocation126_spill] sm:$0xff] }
 0x953   : > { %v4325_v33 = vsel %vm4293_vm7, %v4255_v55, %v4309_v31  ;;  %v3786_v55 = vmul.f32 0.2, %v3735_v61  ;;  %v3627_v31 = vsel %vm3595_vm1, %v3560_v10, %v3611_v28  ;;  %v3977_v28 = vsel %vm3945_vm13, %v3910_v63, %v3961_v50 }
 0x954   : > { %v4341_v39 = vmax.f32 %v4166_v56, %v4325_v33  ;;  %v3468_v56 = vmax.f32 %v3293_v24, %v3452_v23  ;;  %v3565_v8 = vadd.f32 %v12895_v44, %v12821_v38 }
 0x955   : > { %v3802_v59 = vsel %vm3770_vm11, %v3735_v61, %v3786_v55  ;;  %v2754_v61 = vsel %vm2722_vm0, %v2690_v46, %v2738_v60  ;;  %v10673_v46 = vpop.permute.xlu0 %4393 }
 0x956   : > { %v4257_v15 = vpop.f32.mrf.mxu2  ;;  %v10644_v18 = vpack.c.bf16 %v4341_v39, %v4340_v47  ;;  %v10655_v47 = vpop.permute.xlu1 %4409  ;;  %v3643_v7 = vmax.f32 %v3468_v56, %v3627_v31  ;;  %v12892_v39 = vld [vmem:[#allocation111_spill] sm:$0xff]  ;;  %v12894_v31 = vld [vmem:[#allocation81_spill] sm:$0xff]  ;;  %v2929_v56 = vsel %vm2897_vm2, %v2865_v57, %v2913_v3  ;;  %12896 = vst [vmem:[#allocation16_spill] sm:$0xff] %v10673_v46  ;;  %v3740_v57 = vadd.f32 %v9944_v16, %v12821_v38 }
 0x957   : > { %v4258_v32 = vadd.f32 %v4257_v15, %v8087_v0  ;;  %12890 = vst [vmem:[#allocation13_spill] sm:$0xff] %v10655_v47  ;;  %v12891_v0 = vld [vmem:[#allocation102_spill] sm:$0xff]  ;;  %v3215_v62 = vadd.f32 %v12892_v39, %v12821_v38  ;;  %v10681_v3 = vpop.permute.xlu2 %4389  ;;  %v12900_v16 = vld [vmem:[#allocation89_spill] sm:$0xff]  ;;  %vm3597_vm8 = vcmp.gt.f32.partialorder %v3565_v8, 0.0 }
 0x958   : > { %v3040_v35 = vadd.f32 %v12891_v0, %v12821_v38  ;;  %v3818_v15 = vmax.f32 %v3643_v7, %v3802_v59  ;;  %v12897_v0 = vld [vmem:[#allocation67_spill] sm:$0xff]  ;;  %12898 = vst [vmem:[#allocation18_spill] sm:$0xff] %v10681_v3  ;;  %vm3772_vm9 = vcmp.gt.f32.partialorder %v3740_v57, 0.0 }
 0x959   : > { %vm4294_vm12 = vcmp.gt.f32.partialorder %v4258_v32, 0.0  ;;  %v4310_v42 = vmul.f32 0.2, %v4258_v32  ;;  %v3263_v50 = vmul.f32 0.2, %v3215_v62  ;;  %v10677_v59 = vadd.f32 %v12897_v0, %v12805_v17 }
 0x95a   : > { %v3088_v55 = vmul.f32 0.2, %v3040_v35  ;;  %vm3072_vm3 = vcmp.gt.f32.partialorder %v3040_v35, 0.0  ;;  %v3993_v63 = vmax.f32 %v3818_v15, %v3977_v28  ;;  %vm3247_vm5 = vcmp.gt.f32.partialorder %v3215_v62, 0.0 }
 0x95b   : > { %v4326_v33 = vsel %vm4294_vm12, %v4258_v32, %v4310_v42  ;;  %v12893_v32 = vld [vmem:[#allocation117_spill] sm:$0xff]  ;;  %v2520_v42 = vadd.f32 %v12894_v31, %v12824_v41  ;;  %v2406_v28 = vsel %vm2374_vm15, %v10636_v22, %v2390_v27  ;;  %v4090_v22 = vadd.f32 %v10196_v5, %v12821_v38 }
 0x95c   : > { %v4342_v10 = vmax.f32 %v10168_v14, %v4326_v33  ;;  %v3390_v12 = vadd.f32 %v12893_v32, %v12821_v38  ;;  %v4152_v14 = vsel %vm4120_vm14, %v4085_v11, %v4136_v52  ;;  %v2770_v11 = vmax.f32 %v2595_v58, %v2754_v61 }
 0x95d   : > { %v3104_v52 = vsel %vm3072_vm3, %v3040_v35, %v3088_v55  ;;  %vm2549_vm7 = vcmp.gt.f32.partialorder %v2520_v42, 0.0  ;;  %v3279_v58 = vsel %vm3247_vm5, %v3215_v62, %v3263_v50  ;;  %v3613_v61 = vmul.f32 0.2, %v3565_v8 }
 0x95e   : > { %v4259_v23 = vpop.f32.mrf.mxu2  ;;  %v3438_v33 = vmul.f32 0.2, %v3390_v12  ;;  %v10683_v7 = vpop.permute.xlu1 %4421  ;;  %v2945_v15 = vmax.f32 %v2770_v11, %v2929_v56  ;;  %vm3422_vm6 = vcmp.gt.f32.partialorder %v3390_v12, 0.0  ;;  %v3915_v35 = vadd.f32 %v10081_v20, %v12821_v38  ;;  %v12901_v56 = vld [vmem:[#allocation97_spill] sm:$0xff] }
 0x95f   : > { %v4260_v24 = vadd.f32 %v4259_v23, %v12818_v9  ;;  %v4168_v9 = vmax.f32 %v3993_v63, %v4152_v14  ;;  %12899 = vst [vmem:[#allocation21_spill] sm:$0xff] %v10683_v7  ;;  %v2695_v55 = vadd.f32 %v12900_v16, %v12824_v41  ;;  %v3788_v63 = vmul.f32 0.2, %v3740_v57 }
 0x960   : > { %v3120_v32 = vmax.f32 %v2945_v15, %v3104_v52  ;;  %v3454_v31 = vsel %vm3422_vm6, %v3390_v12, %v3438_v33  ;;  %v2565_v62 = vmul.f32 0.2, %v2520_v42  ;;  %v2870_v50 = vadd.f32 %v12901_v56, %v12824_v41  ;;  %v12902_v12 = vld [vmem:[#allocation104_spill] sm:$0xff]  ;;  %v12908_v56 = vld [vmem:[#allocation119_spill] sm:$0xff] }
 0x961   : > { %vm4295_vm4 = vcmp.gt.f32.partialorder %v4260_v24, 0.0  ;;  %v4311_v60 = vmul.f32 0.2, %v4260_v24  ;;  %v3629_v44 = vsel %vm3597_vm8, %v3565_v8, %v3613_v61  ;;  %vm2724_vm1 = vcmp.gt.f32.partialorder %v2695_v55, 0.0 }
 0x962   : > { %v3295_v20 = vmax.f32 %v3120_v32, %v3279_v58  ;;  %vm3947_vm11 = vcmp.gt.f32.partialorder %v3915_v35, 0.0  ;;  %v3804_v5 = vsel %vm3772_vm9, %v3740_v57, %v3788_v63  ;;  %v4138_v52 = vmul.f32 0.2, %v4090_v22  ;;  %v12904_v58 = vld [vmem:[#allocation112_spill] sm:$0xff]  ;;  %v10707_v32 = vpop.permute.xlu2 %4401  ;;  %v12907_v57 = vld [vmem:[#allocation69_spill] sm:$0xff] }
 0x963   : > { %v4327_v39 = vsel %vm4295_vm4, %v4260_v24, %v4311_v60  ;;  %v3963_v60 = vmul.f32 0.2, %v3915_v35  ;;  %vm4122_vm12 = vcmp.gt.f32.partialorder %v4090_v22, 0.0  ;;  %vm2899_vm0 = vcmp.gt.f32.partialorder %v2870_v50, 0.0  ;;  %12905 = vst [vmem:[#allocation25_spill] sm:$0xff] %v10707_v32 }
 0x964   : > { %v4343_v23 = vmax.f32 %v4168_v9, %v4327_v39  ;;  %v3470_v11 = vmax.f32 %v3295_v20, %v3454_v31  ;;  %v3045_v9 = vadd.f32 %v12902_v12, %v12824_v41  ;;  %v2915_v39 = vmul.f32 0.2, %v2870_v50 }
 0x965   : > { %v3220_v61 = vadd.f32 %v12904_v58, %v12824_v41  ;;  %v3979_v16 = vsel %vm3947_vm11, %v3915_v35, %v3963_v60  ;;  %v10713_v31 = vadd.f32 %v12907_v57, %v12808_v19  ;;  %v2422_v63 = vmax.f32 %v2247_v29, %v2406_v28  ;;  %v10725_v29 = vpop.f32.mrf.mxu3 }
 0x966   : > { %v4262_v14 = vpop.f32.mrf.mxu2  ;;  %v10692_v24 = vpack.c.bf16 %v4343_v23, %v4342_v10  ;;  %v2740_v10 = vmul.f32 0.2, %v2695_v55  ;;  %v3645_v15 = vmax.f32 %v3470_v11, %v3629_v44  ;;  %v2581_v23 = vsel %vm2549_vm7, %v2520_v42, %v2565_v62 }
 0x967   : > { %v4263_v27 = vadd.f32 %v4262_v14, %v8109_v25  ;;  %v10701_v25 = vpop.permute.xlu0 %4405  ;;  %v10709_v14 = vpop.permute.xlu1 %4435  ;;  %v3090_v62 = vmul.f32 0.2, %v3045_v9  ;;  %v3395_v35 = vadd.f32 %v12908_v56, %v12824_v41  ;;  %v4154_v20 = vsel %vm4122_vm12, %v4090_v22, %v4138_v52 }
 0x968   : > { %12903 = vst [vmem:[#allocation23_spill] sm:$0xff] %v10701_v25  ;;  %v3820_v42 = vmax.f32 %v3645_v15, %v3804_v5  ;;  %v2597_v60 = vmax.f32 %v2422_v63, %v2581_v23  ;;  %vm3074_vm13 = vcmp.gt.f32.partialorder %v3045_v9, 0.0  ;;  %vm2201_vm14 = vcmp.gt.f32.partialorder %v10677_v59, 0.0 }
 0x969   : > { %vm4296_vm10 = vcmp.gt.f32.partialorder %v4263_v27, 0.0  ;;  %v4312_v0 = vmul.f32 0.2, %v4263_v27  ;;  %12906 = vst [vmem:[#allocation3_spill] sm:$0xff] %v10709_v14  ;;  %v3265_v12 = vmul.f32 0.2, %v3220_v61  ;;  %v3920_v57 = vadd.f32 %v10116_v13, %v12824_v41 }
 0x96a   : > { %v3995_v11 = vmax.f32 %v3820_v42, %v3979_v16  ;;  %vm3249_vm2 = vcmp.gt.f32.partialorder %v3220_v61, 0.0  ;;  %v3440_v5 = vmul.f32 0.2, %v3395_v35  ;;  %vm3424_vm3 = vcmp.gt.f32.partialorder %v3395_v35, 0.0  ;;  %v10740_v56 = vpop.permute.xlu2 %4413 }
 0x96b   : > { %v4328_v33 = vsel %vm4296_vm10, %v4263_v27, %v4312_v0  ;;  %v2931_v0 = vsel %vm2899_vm0, %v2870_v50, %v2915_v39  ;;  %v3745_v50 = vadd.f32 %v9976_v34, %v12824_v41  ;;  %vm2203_vm4 = vcmp.gt.f32.partialorder %v10713_v31, 0.0  ;;  %12912 = vst [vmem:[#allocation27_spill] sm:$0xff] %v10740_v56 }
 0x96c   : > { %v4344_v8 = vmax.f32 %v10194_v2, %v4328_v33  ;;  %v2756_v2 = vsel %vm2724_vm1, %v2695_v55, %v2740_v10  ;;  %v2217_v55 = vmul.f32 0.2, %v10677_v59  ;;  %v4170_v22 = vmax.f32 %v3995_v11, %v4154_v20  ;;  %v12910_v33 = vld [vmem:[#allocation71_spill] sm:$0xff] }
 0x96d   : > { %v2772_v10 = vmax.f32 %v2597_v60, %v2756_v2  ;;  %v2185_v39 = vadd.f32 %v12910_v33, %v10330_v40  ;;  %v3281_v58 = vsel %vm3249_vm2, %v3220_v61, %v3265_v12  ;;  %v3615_v16 = vmul.f32 0.2, %v3570_v53  ;;  %v10755_v33 = vpop.f32.mrf.mxu3 }
 0x96e   : > { %v4264_v27 = vpop.f32.mrf.mxu2  ;;  %vm3599_vm5 = vcmp.gt.f32.partialorder %v3570_v53, 0.0  ;;  %v4095_v61 = vadd.f32 %v10222_v26, %v12824_v41  ;;  %vm3774_vm6 = vcmp.gt.f32.partialorder %v3745_v50, 0.0  ;;  %vm3949_vm9 = vcmp.gt.f32.partialorder %v3920_v57, 0.0 }
 0x96f   : > { %v4265_v44 = vadd.f32 %v4264_v27, %v12821_v38  ;;  %v3106_v38 = vsel %vm3074_vm13, %v3045_v9, %v3090_v62  ;;  %v2947_v15 = vmax.f32 %v2772_v10, %v2931_v0  ;;  %v10735_v63 = vpop.permute.xlu0 %4417  ;;  %v2219_v9 = vmul.f32 0.2, %v10713_v31  ;;  %v10744_v20 = vpop.permute.xlu1 %4450  ;;  %v12915_v0 = vld [vmem:[#allocation73_spill] sm:$0xff]  ;;  %v12916_v10 = vld [vmem:[#allocation74_spill] sm:$0xff] }
 0x970   : > { %12911 = vst [vmem:[#allocation26_spill] sm:$0xff] %v10735_v63  ;;  %v3456_v27 = vsel %vm3424_vm3, %v3395_v35, %v3440_v5  ;;  %v3790_v62 = vmul.f32 0.2, %v3745_v50  ;;  %v2221_v60 = vmul.f32 0.2, %v2185_v39  ;;  %v2190_v11 = vadd.f32 %v12915_v0, %v10332_v48 }
 0x971   : > { %vm4297_vm15 = vcmp.gt.f32.partialorder %v4265_v44, 0.0  ;;  %v4313_v28 = vmul.f32 0.2, %v4265_v44  ;;  %v3122_v2 = vmax.f32 %v2947_v15, %v3106_v38  ;;  %12913 = vst [vmem:[#allocation4_spill] sm:$0xff] %v10744_v20  ;;  %v3965_v35 = vmul.f32 0.2, %v3920_v57 }
 0x972   : > { %vm2205_vm8 = vcmp.gt.f32.partialorder %v2185_v39, 0.0  ;;  %v2350_v26 = vadd.f32 %v12916_v10, %v12805_v17  ;;  %v12917_v38 = vld [vmem:[#allocation76_spill] sm:$0xff]  ;;  %v4140_v15 = vmul.f32 0.2, %v4095_v61  ;;  %vm4124_vm10 = vcmp.gt.f32.partialorder %v4095_v61, 0.0 }
 0x973   : > { %v4329_v52 = vsel %vm4297_vm15, %v4265_v44, %v4313_v28  ;;  %v12914_v44 = vld [vmem:[#allocation5_spill] sm:$0xff]  ;;  %v3297_v12 = vmax.f32 %v3122_v2, %v3281_v58  ;;  %v2355_v5 = vadd.f32 %v12917_v38, %v12808_v19  ;;  %vm2207_vm1 = vcmp.gt.f32.partialorder %v2190_v11, 0.0 }
 0x974   : > { %v4345_v23 = vmax.f32 %v4170_v22, %v4329_v52  ;;  %v3806_v52 = vsel %vm3774_vm6, %v3745_v50, %v3790_v62  ;;  %v3981_v50 = vsel %vm3949_vm9, %v3920_v57, %v3965_v35  ;;  %v2223_v62 = vmul.f32 0.2, %v2190_v11  ;;  %v12922_v57 = vld [vmem:[#allocation82_spill] sm:$0xff] }
 0x975   : > { %v3472_v22 = vmax.f32 %v3297_v12, %v3456_v27  ;;  %v10764_v27 = vsel %vm2205_vm8, %v2185_v39, %v2221_v60  ;;  %vm2376_vm11 = vcmp.gt.f32.partialorder %v2350_v26, 0.0  ;;  %v2394_v12 = vmul.f32 0.2, %v2355_v5 }
 0x976   : > { %v4267_v34 = vpop.f32.mrf.mxu2  ;;  %v10738_v42 = vpack.c.bf16 %v4345_v23, %v4344_v8  ;;  %v3631_v8 = vsel %vm3599_vm5, %v3570_v53, %v3615_v16  ;;  %v2233_v53 = vsel %vm2201_vm14, %v10677_v59, %v2217_v55  ;;  %v12918_v16 = vld [vmem:[#allocation140_spill] sm:$0xff]  ;;  %v12919_v59 = vld [vmem:[#allocation78_spill] sm:$0xff]  ;;  %vm2378_vm12 = vcmp.gt.f32.partialorder %v2355_v5, 0.0 }
 0x977   : > { %v4268_v13 = vadd.f32 %v4267_v34, %v12914_v44  ;;  %v3647_v58 = vmax.f32 %v3472_v22, %v3631_v8  ;;  %v2235_v34 = vsel %vm2203_vm4, %v10713_v31, %v2219_v9  ;;  %v2392_v44 = vmul.f32 0.2, %v2350_v26  ;;  %v12921_v31 = vld [vmem:[#allocation80_spill] sm:$0xff]  ;;  %v12923_v22 = vld [vmem:[#allocation83_spill] sm:$0xff] }
 0x978   : > { %v2360_v55 = vadd.f32 %v12919_v59, %v10330_v40  ;;  %v4156_v8 = vsel %vm4124_vm10, %v4095_v61, %v4140_v15  ;;  %v2365_v39 = vadd.f32 %v12921_v31, %v10332_v48  ;;  %v2525_v9 = vadd.f32 %v12922_v57, %v12805_v17  ;;  %v10780_v61 = vpop.permute.xlu1 %4465 }
 0x979   : > { %vm4298_vm7 = vcmp.gt.f32.partialorder %v4268_v13, 0.0  ;;  %v4314_v28 = vmul.f32 0.2, %v4268_v13  ;;  %v2249_v35 = vmax.f32 %v10557_v6, %v2233_v53  ;;  %v2530_v38 = vadd.f32 %v12923_v22, %v12808_v19  ;;  %12925 = vst [vmem:[#allocation6_spill] sm:$0xff] %v10780_v61 }
 0x97a   : > { %v2408_v6 = vsel %vm2376_vm11, %v2350_v26, %v2392_v44  ;;  %v2410_v53 = vsel %vm2378_vm12, %v2355_v5, %v2394_v12  ;;  %vm2380_vm13 = vcmp.gt.f32.partialorder %v2360_v55, 0.0  ;;  %v2398_v59 = vmul.f32 0.2, %v2365_v39  ;;  %v12928_v5 = vld [vmem:[#allocation90_spill] sm:$0xff] }
 0x97b   : > { %v4330_v23 = vsel %vm4298_vm7, %v4268_v13, %v4314_v28  ;;  %v3822_v13 = vmax.f32 %v3647_v58, %v3806_v52  ;;  %v10768_v28 = vpop.permute.xlu0 %4430  ;;  %v10778_v52 = vpop.permute.xlu2 %4425  ;;  %v2239_v58 = vsel %vm2207_vm1, %v2190_v11, %v2223_v62  ;;  %v2567_v31 = vmul.f32 0.2, %v2525_v9 }
 0x97c   : > { %v4346_v2 = vmax.f32 %v12918_v16, %v4330_v23  ;;  %12920 = vst [vmem:[#allocation28_spill] sm:$0xff] %v10768_v28  ;;  %v2253_v23 = vmax.f32 %v10571_v54, %v10764_v27  ;;  %vm2382_vm14 = vcmp.gt.f32.partialorder %v2365_v39, 0.0  ;;  %vm2551_vm15 = vcmp.gt.f32.partialorder %v2525_v9, 0.0  ;;  %v12926_v54 = vld [vmem:[#allocation84_spill] sm:$0xff]  ;;  %v10792_v11 = vpop.f32.mrf.mxu3  ;;  %v12927_v27 = vld [vmem:[#allocation85_spill] sm:$0xff] }
 0x97d   : > { %v3997_v60 = vmax.f32 %v3822_v13, %v3981_v50  ;;  %12924 = vst [vmem:[#allocation29_spill] sm:$0xff] %v10778_v52  ;;  %v10786_v50 = vpop.f32.mrf.mxu1  ;;  %vm2553_vm2 = vcmp.gt.f32.partialorder %v2530_v38, 0.0  ;;  %v2540_v26 = vadd.f32 %v12927_v27, %v10332_v48  ;;  %v2700_v62 = vadd.f32 %v12928_v5, %v12805_v17 }
 0x97e   : > { %v4269_v0 = vpop.f32.mrf.mxu2  ;;  %v2414_v61 = vsel %vm2382_vm14, %v2365_v39, %v2398_v59  ;;  %v2583_v27 = vsel %vm2551_vm15, %v2525_v9, %v2567_v31  ;;  %v12936_v59 = vld [vmem:[#allocation99_spill] sm:$0xff] }
 0x97f   : > { %v4270_v10 = vadd.f32 %v4269_v0, %v12824_v41  ;;  %v2251_v41 = vmax.f32 %v10569_v30, %v2235_v34  ;;  %v4172_v16 = vmax.f32 %v3997_v60, %v4156_v8  ;;  %v2396_v0 = vmul.f32 0.2, %v2360_v55  ;;  %v12929_v60 = vld [vmem:[#allocation92_spill] sm:$0xff] }
 0x980   : > { %v2569_v30 = vmul.f32 0.2, %v2530_v38  ;;  %v2535_v34 = vadd.f32 %v12926_v54, %v10330_v40  ;;  %v2255_v8 = vmax.f32 %v10573_v49, %v2239_v58  ;;  %v2705_v22 = vadd.f32 %v12929_v60, %v12808_v19  ;;  %v10813_v39 = vpop.permute.xlu1 %4480 }
 0x981   : > { %vm4299_vm0 = vcmp.gt.f32.partialorder %v4270_v10, 0.0  ;;  %v4315_v15 = vmul.f32 0.2, %v4270_v10  ;;  %v2412_v54 = vsel %vm2380_vm13, %v2360_v55, %v2396_v0  ;;  %vm2557_vm5 = vcmp.gt.f32.partialorder %v2540_v26, 0.0  ;;  %12934 = vst [vmem:[#allocation9_spill] sm:$0xff] %v10813_v39  ;;  %v12939_v39 = vld [vmem:[#allocation103_spill] sm:$0xff] }
 0x982   : > { %v2585_v20 = vsel %vm2553_vm2, %v2530_v38, %v2569_v30  ;;  %vm2555_vm3 = vcmp.gt.f32.partialorder %v2535_v34, 0.0  ;;  %v2571_v49 = vmul.f32 0.2, %v2535_v34  ;;  %vm2726_vm6 = vcmp.gt.f32.partialorder %v2700_v62, 0.0  ;;  %v12935_v38 = vld [vmem:[#allocation96_spill] sm:$0xff]  ;;  %v12937_v30 = vld [vmem:[#allocation141_spill] sm:$0xff] }
 0x983   : > { %v4331_v13 = vsel %vm4299_vm0, %v4270_v10, %v4315_v15  ;;  %v2424_v10 = vmax.f32 %v2249_v35, %v2408_v6  ;;  %v12930_v15 = vld [vmem:[#allocation7_spill] sm:$0xff]  ;;  %v10807_v5 = vpop.permute.xlu0 %4445  ;;  %v2573_v35 = vmul.f32 0.2, %v2540_v26  ;;  %v2742_v58 = vmul.f32 0.2, %v2700_v62  ;;  %v10811_v55 = vpop.permute.xlu2 %4440 }
 0x984   : > { %v4347_v57 = vmax.f32 %v4172_v16, %v4331_v13  ;;  %v2426_v13 = vmax.f32 %v2251_v41, %v2410_v53  ;;  %12931 = vst [vmem:[#allocation30_spill] sm:$0xff] %v10807_v5  ;;  %v2744_v6 = vmul.f32 0.2, %v2705_v22  ;;  %v12932_v41 = vld [vmem:[#allocation94_spill] sm:$0xff]  ;;  %vm2728_vm7 = vcmp.gt.f32.partialorder %v2705_v22, 0.0 }
 0x985   : > { %v2710_v53 = vadd.f32 %v12932_v41, %v10330_v40  ;;  %12933 = vst [vmem:[#allocation31_spill] sm:$0xff] %v10811_v55  ;;  %v2715_v0 = vadd.f32 %v12935_v38, %v10332_v48  ;;  %v2875_v31 = vadd.f32 %v12936_v59, %v12805_v17  ;;  %v2428_v60 = vmax.f32 %v2253_v23, %v2412_v54  ;;  %v10834_v23 = vpop.f32.mrf.mxu3 }
 0x986   : > { %v4272_v44 = vpop.f32.mrf.mxu2  ;;  %v10798_v12 = vpack.c.bf16 %v4347_v57, %v4346_v2  ;;  %v10821_v57 = vpop.f32.mrf.mxu1  ;;  %v2599_v5 = vmax.f32 %v2424_v10, %v2583_v27  ;;  %v2601_v55 = vmax.f32 %v2426_v13, %v2585_v20  ;;  %v2587_v38 = vsel %vm2555_vm3, %v2535_v34, %v2571_v49  ;;  %v12940_v20 = vld [vmem:[#allocation105_spill] sm:$0xff]  ;;  %v12943_v49 = vld [vmem:[#allocation107_spill] sm:$0xff] }
 0x987   : > { %v4273_v16 = vadd.f32 %v4272_v44, %v12930_v15  ;;  %v12938_v15 = vld [vmem:[#allocation101_spill] sm:$0xff]  ;;  %v2589_v59 = vsel %vm2557_vm5, %v2540_v26, %v2573_v35  ;;  %v2758_v28 = vsel %vm2726_vm6, %v2700_v62, %v2742_v58  ;;  %v2760_v52 = vsel %vm2728_vm7, %v2705_v22, %v2744_v6  ;;  %v12941_v26 = vld [vmem:[#allocation2_spill] sm:$0xff] }
 0x988   : > { %v2880_v41 = vadd.f32 %v12938_v15, %v12808_v19  ;;  %vm2730_vm8 = vcmp.gt.f32.partialorder %v2710_v53, 0.0  ;;  %v2746_v54 = vmul.f32 0.2, %v2710_v53  ;;  %vm2732_vm9 = vcmp.gt.f32.partialorder %v2715_v0, 0.0  ;;  %v12942_v62 = vld [vmem:[#allocation106_spill] sm:$0xff] }
 0x989   : > { %vm4300_vm4 = vcmp.gt.f32.partialorder %v4273_v16, 0.0  ;;  %v4316_v2 = vmul.f32 0.2, %v4273_v16  ;;  %v2748_v15 = vmul.f32 0.2, %v2715_v0  ;;  %vm2901_vm10 = vcmp.gt.f32.partialorder %v2875_v31, 0.0 }
 0x98a   : > { %v2890_v34 = vadd.f32 %v12940_v20, %v10332_v48  ;;  %vm2903_vm1 = vcmp.gt.f32.partialorder %v2880_v41, 0.0  ;;  %v3050_v10 = vadd.f32 %v12941_v26, %v12805_v17  ;;  %v3055_v22 = vadd.f32 %v12942_v62, %v12808_v19 }
 0x98b   : > { %v10815_v9 = vsel %vm4300_vm4, %v4273_v16, %v4316_v2  ;;  %v2885_v16 = vadd.f32 %v12939_v39, %v10330_v40  ;;  %v2430_v2 = vmax.f32 %v2255_v8, %v2414_v61  ;;  %v2917_v39 = vmul.f32 0.2, %v2875_v31  ;;  %v10844_v58 = vpop.permute.xlu0 %4460  ;;  %v10849_v25 = vpop.permute.xlu2 %4455 }
 0x98c   : > { %v2919_v61 = vmul.f32 0.2, %v2880_v41  ;;  %v2603_v13 = vmax.f32 %v2428_v60, %v2587_v38  ;;  %v3060_v35 = vadd.f32 %v12943_v49, %v10330_v40  ;;  %12944 = vst [vmem:[#allocation32_spill] sm:$0xff] %v10844_v58  ;;  %v2774_v6 = vmax.f32 %v2599_v5, %v2758_v28  ;;  %v10851_v60 = vpop.permute.xlu1 %4495  ;;  %v12947_v5 = vld [vmem:[#allocation108_spill] sm:$0xff] }
 0x98d   : > { %v2921_v8 = vmul.f32 0.2, %v2885_v16  ;;  %vm2905_vm11 = vcmp.gt.f32.partialorder %v2885_v16, 0.0  ;;  %v2605_v27 = vmax.f32 %v2430_v2, %v2589_v59  ;;  %v2776_v44 = vmax.f32 %v2601_v55, %v2760_v52  ;;  %12945 = vst [vmem:[#allocation33_spill] sm:$0xff] %v10849_v25  ;;  %v12948_v55 = vld [vmem:[#allocation114_spill] sm:$0xff]  ;;  %v10865_v62 = vpop.f32.mrf.mxu3 }
 0x98e   : > { %v10830_v14 = vpop.f32.mrf.mxu2  ;;  %v2762_v7 = vsel %vm2730_vm8, %v2710_v53, %v2746_v54  ;;  %v2764_v20 = vsel %vm2732_vm9, %v2715_v0, %v2748_v15  ;;  %v2933_v63 = vsel %vm2901_vm10, %v2875_v31, %v2917_v39  ;;  %v2935_v56 = vsel %vm2903_vm1, %v2880_v41, %v2919_v61  ;;  %12946 = vst [vmem:[#allocation34_spill] sm:$0xff] %v10851_v60  ;;  %v10853_v59 = vpop.f32.mrf.mxu1  ;;  %v12949_v41 = vld [vmem:[#allocation116_spill] sm:$0xff]  ;;  %v12950_v54 = vld [vmem:[#allocation118_spill] sm:$0xff] }
 0x98f   : > { %v2937_v26 = vsel %vm2905_vm11, %v2885_v16, %v2921_v8  ;;  %v2923_v47 = vmul.f32 0.2, %v2890_v34  ;;  %vm2907_vm12 = vcmp.gt.f32.partialorder %v2890_v34, 0.0  ;;  %vm3076_vm0 = vcmp.gt.f32.partialorder %v3050_v10, 0.0 }
 0x990   : > { %v3092_v2 = vmul.f32 0.2, %v3050_v10  ;;  %v3094_v38 = vmul.f32 0.2, %v3055_v22  ;;  %vm3078_vm13 = vcmp.gt.f32.partialorder %v3055_v22, 0.0  ;;  %v3065_v53 = vadd.f32 %v12947_v5, %v10332_v48 }
 0x991   : > { %v3096_v52 = vmul.f32 0.2, %v3060_v35  ;;  %v3225_v0 = vadd.f32 %v12948_v55, %v12805_v17  ;;  %v2778_v31 = vmax.f32 %v2603_v13, %v2762_v7  ;;  %vm3080_vm14 = vcmp.gt.f32.partialorder %v3060_v35, 0.0 }
 0x992   : > { %v3230_v16 = vadd.f32 %v12949_v41, %v12808_v19  ;;  %v3235_v15 = vadd.f32 %v12950_v54, %v10330_v40  ;;  %v2780_v39 = vmax.f32 %v2605_v27, %v2764_v20  ;;  %v2949_v61 = vmax.f32 %v2774_v6, %v2933_v63  ;;  %v12951_v54 = vld [vmem:[#allocation120_spill] sm:$0xff]  ;;  %v12952_v63 = vld [vmem:[#allocation121_spill] sm:$0xff]  ;;  %v12956_v6 = vld [vmem:[#allocation127_spill] sm:$0xff] }
 0x993   : > { %v2951_v8 = vmax.f32 %v2776_v44, %v2935_v56  ;;  %v2953_v49 = vmax.f32 %v2778_v31, %v2937_v26  ;;  %v2939_v60 = vsel %vm2907_vm12, %v2890_v34, %v2923_v47  ;;  %v3108_v5 = vsel %vm3076_vm0, %v3050_v10, %v3092_v2  ;;  %v12953_v47 = vld [vmem:[#allocation123_spill] sm:$0xff]  ;;  %v10875_v34 = vpop.permute.xlu0 %4475 }
 0x994   : > { %v3110_v58 = vsel %vm3078_vm13, %v3055_v22, %v3094_v38  ;;  %v3112_v55 = vsel %vm3080_vm14, %v3060_v35, %v3096_v52  ;;  %vm3082_vm15 = vcmp.gt.f32.partialorder %v3065_v53, 0.0  ;;  %v3098_v7 = vmul.f32 0.2, %v3065_v53  ;;  %12954 = vst [vmem:[#allocation35_spill] sm:$0xff] %v10875_v34  ;;  %v12955_v22 = vld [vmem:[#allocation125_spill] sm:$0xff] }
 0x995   : > { %vm3251_vm2 = vcmp.gt.f32.partialorder %v3225_v0, 0.0  ;;  %v3267_v13 = vmul.f32 0.2, %v3225_v0  ;;  %v3269_v41 = vmul.f32 0.2, %v3230_v16  ;;  %v3240_v27 = vadd.f32 %v12951_v54, %v10332_v48  ;;  %v10884_v54 = vpop.permute.xlu2 %4470 }
 0x996   : > { %v10855_v28 = vpop.f32.mrf.mxu2  ;;  %v3271_v25 = vmul.f32 0.2, %v3235_v15  ;;  %vm3253_vm3 = vcmp.gt.f32.partialorder %v3230_v16, 0.0  ;;  %vm3255_vm4 = vcmp.gt.f32.partialorder %v3235_v15, 0.0  ;;  %v3400_v56 = vadd.f32 %v12952_v63, %v12805_v17  ;;  %12957 = vst [vmem:[#allocation10_spill] sm:$0xff] %v10884_v54 }
 0x997   : > { %v3405_v44 = vadd.f32 %v12953_v47, %v12808_v19  ;;  %v2955_v10 = vmax.f32 %v2780_v39, %v2939_v60  ;;  %v3410_v35 = vadd.f32 %v12955_v22, %v10330_v40  ;;  %v3415_v20 = vadd.f32 %v12956_v6, %v10332_v48  ;;  %v10887_v60 = vpop.permute.xlu1 %4510  ;;  %v10889_v39 = vpop.f32.mrf.mxu1 }
 0x998   : > { %v3124_v2 = vmax.f32 %v2949_v61, %v3108_v5  ;;  %v3126_v38 = vmax.f32 %v2951_v8, %v3110_v58  ;;  %v3128_v52 = vmax.f32 %v2953_v49, %v3112_v55  ;;  %v3114_v31 = vsel %vm3082_vm15, %v3065_v53, %v3098_v7  ;;  %12958 = vst [vmem:[#allocation36_spill] sm:$0xff] %v10887_v60  ;;  %v12959_v53 = vld [vmem:[#allocation129_spill] sm:$0xff]  ;;  %v3937_v5 = vpop.f32.mrf.mxu3 }
 0x999   : > { %v3283_v63 = vsel %vm3251_vm2, %v3225_v0, %v3267_v13  ;;  %v3285_v47 = vsel %vm3253_vm3, %v3230_v16, %v3269_v41  ;;  %v3287_v34 = vsel %vm3255_vm4, %v3235_v15, %v3271_v25  ;;  %vm3257_vm5 = vcmp.gt.f32.partialorder %v3240_v27, 0.0  ;;  %v12960_v0 = vld [vmem:[#allocation130_spill] sm:$0xff]  ;;  %v12961_v16 = vld [vmem:[#allocation131_spill] sm:$0xff]  ;;  %v12962_v13 = vld [vmem:[#allocation132_spill] sm:$0xff] }
 0x99a   : > { %v3273_v22 = vmul.f32 0.2, %v3240_v27  ;;  %vm3426_vm6 = vcmp.gt.f32.partialorder %v3400_v56, 0.0  ;;  %v3442_v6 = vmul.f32 0.2, %v3400_v56  ;;  %vm3428_vm7 = vcmp.gt.f32.partialorder %v3405_v44, 0.0 }
 0x99b   : > { %v3444_v61 = vmul.f32 0.2, %v3405_v44  ;;  %v3446_v58 = vmul.f32 0.2, %v3410_v35  ;;  %v3448_v8 = vmul.f32 0.2, %v3415_v20  ;;  %v3575_v49 = vadd.f32 %v12959_v53, %v12805_v17 }
 0x99c   : > { %vm3430_vm8 = vcmp.gt.f32.partialorder %v3410_v35, 0.0  ;;  %vm3432_vm9 = vcmp.gt.f32.partialorder %v3415_v20, 0.0  ;;  %v3580_v25 = vadd.f32 %v12960_v0, %v12808_v19  ;;  %v3585_v15 = vadd.f32 %v12961_v16, %v10330_v40 }
 0x99d   : > { %v3130_v55 = vmax.f32 %v2955_v10, %v3114_v31  ;;  %v3299_v7 = vmax.f32 %v3124_v2, %v3283_v63  ;;  %v3590_v41 = vadd.f32 %v12962_v13, %v10332_v48  ;;  %v3301_v60 = vmax.f32 %v3126_v38, %v3285_v47  ;;  %v10904_v31 = vpop.permute.xlu0 %4490  ;;  %v12967_v63 = vld [vmem:[#allocation139_spill] sm:$0xff] }
 0x99e   : > { %v10881_v26 = vpop.f32.mrf.mxu2  ;;  %v3303_v54 = vmax.f32 %v3128_v52, %v3287_v34  ;;  %v3289_v32 = vsel %vm3257_vm5, %v3240_v27, %v3273_v22  ;;  %v3458_v53 = vsel %vm3426_vm6, %v3400_v56, %v3442_v6  ;;  %v3460_v4 = vsel %vm3428_vm7, %v3405_v44, %v3444_v61  ;;  %12963 = vst [vmem:[#allocation48_spill] sm:$0xff] %v10904_v31  ;;  %v12964_v34 = vld [vmem:[#allocation133_spill] sm:$0xff]  ;;  %v12965_v56 = vld [vmem:[#allocation135_spill] sm:$0xff]  ;;  %v10914_v22 = vpop.permute.xlu2 %4485 }
 0x99f   : > { %v3462_v46 = vsel %vm3430_vm8, %v3410_v35, %v3446_v58  ;;  %v3464_v3 = vsel %vm3432_vm9, %v3415_v20, %v3448_v8  ;;  %v3617_v0 = vmul.f32 0.2, %v3575_v49  ;;  %vm3601_vm10 = vcmp.gt.f32.partialorder %v3575_v49, 0.0  ;;  %v12966_v35 = vld [vmem:[#allocation137_spill] sm:$0xff]  ;;  %12968 = vst [vmem:[#allocation38_spill] sm:$0xff] %v10914_v22  ;;  %v10916_v8 = vpop.permute.xlu1 %4525  ;;  %v4112_v16 = vpop.f32.mrf.mxu1 }
 0x9a0   : > { %vm3603_vm1 = vcmp.gt.f32.partialorder %v3580_v25, 0.0  ;;  %v3619_v10 = vmul.f32 0.2, %v3580_v25  ;;  %v3621_v2 = vmul.f32 0.2, %v3585_v15  ;;  %vm3605_vm11 = vcmp.gt.f32.partialorder %v3585_v15, 0.0 }
 0x9a1   : > { %v3623_v38 = vmul.f32 0.2, %v3590_v41  ;;  %v3750_v27 = vadd.f32 %v12964_v34, %v12805_v17  ;;  %v3755_v52 = vadd.f32 %v12965_v56, %v12808_v19  ;;  %v3305_v44 = vmax.f32 %v3130_v55, %v3289_v32 }
 0x9a2   : > { %vm3607_vm12 = vcmp.gt.f32.partialorder %v3590_v41, 0.0  ;;  %v3760_v20 = vadd.f32 %v12966_v35, %v10330_v40  ;;  %v3765_v47 = vadd.f32 %v12967_v63, %v10332_v48  ;;  %v3474_v6 = vmax.f32 %v3299_v7, %v3458_v53  ;;  %v12970_v7 = vld [vmem:[#allocation12_spill] sm:$0xff]  ;;  %v12971_v53 = vld [vmem:[#allocation22_spill] sm:$0xff] }
 0x9a3   : > { %v3476_v61 = vmax.f32 %v3301_v60, %v3460_v4  ;;  %v3478_v58 = vmax.f32 %v3303_v54, %v3462_v46  ;;  %v3480_v13 = vmax.f32 %v3305_v44, %v3464_v3  ;;  %v3633_v34 = vsel %vm3601_vm10, %v3575_v49, %v3617_v0  ;;  %v3939_v46 = vpop.f32.mrf.mxu3  ;;  %v12969_v3 = vld [vmem:[#allocation17_spill] sm:$0xff] }
 0x9a4   : > { %v3635_v32 = vsel %vm3603_vm1, %v3580_v25, %v3619_v10  ;;  %v3637_v55 = vsel %vm3605_vm11, %v3585_v15, %v3621_v2  ;;  %v3639_v56 = vsel %vm3607_vm12, %v3590_v41, %v3623_v38  ;;  %vm3776_vm0 = vcmp.gt.f32.partialorder %v3750_v27, 0.0 }
 0x9a5   : > { %v3792_v35 = vmul.f32 0.2, %v3750_v27  ;;  %vm3778_vm13 = vcmp.gt.f32.partialorder %v3755_v52, 0.0  ;;  %v3794_v63 = vmul.f32 0.2, %v3755_v52  ;;  %v3930_v4 = vadd.f32 %v10792_v11, %v12808_v19 }
 0x9a6   : > { %v10902_v51 = vpop.f32.mrf.mxu2  ;;  %v3796_v31 = vmul.f32 0.2, %v3760_v20  ;;  %v3798_v22 = vmul.f32 0.2, %v3765_v47  ;;  %vm3780_vm14 = vcmp.gt.f32.partialorder %v3760_v20, 0.0  ;;  %vm3782_vm15 = vcmp.gt.f32.partialorder %v3765_v47, 0.0 }
 0x9a7   : > { %v3933_v54 = vadd.f32 %v10834_v23, %v12969_v3  ;;  %v3935_v60 = vadd.f32 %v10865_v62, %v10330_v40  ;;  %v3649_v25 = vmax.f32 %v3474_v6, %v3633_v34  ;;  %v3651_v15 = vmax.f32 %v3476_v61, %v3635_v32  ;;  %v10933_v62 = vpop.permute.xlu0 %4505 }
 0x9a8   : > { %v3928_v41 = vadd.f32 %v10755_v33, %v12970_v7  ;;  %v3938_v0 = vadd.f32 %v3937_v5, %v12971_v53  ;;  %v3653_v10 = vmax.f32 %v3478_v58, %v3637_v55  ;;  %v3655_v2 = vmax.f32 %v3480_v13, %v3639_v56  ;;  %12972 = vst [vmem:[#allocation39_spill] sm:$0xff] %v10933_v62  ;;  %v10939_v58 = vpop.permute.xlu2 %4500 }
 0x9a9   : > { %v3808_v11 = vsel %vm3776_vm0, %v3750_v27, %v3792_v35  ;;  %v3940_v38 = vadd.f32 %v3939_v46, %v10332_v48  ;;  %v3810_v44 = vsel %vm3778_vm13, %v3755_v52, %v3794_v63  ;;  %v3812_v23 = vsel %vm3780_vm14, %v3760_v20, %v3796_v31  ;;  %12973 = vst [vmem:[#allocation40_spill] sm:$0xff] %v10939_v58  ;;  %v10943_v52 = vpop.permute.xlu1 %4540  ;;  %v4114_v20 = vpop.f32.mrf.mxu1 }
 0x9aa   : > { %v3814_v1 = vsel %vm3782_vm15, %v3765_v47, %v3798_v22  ;;  %v3969_v37 = vmul.f32 0.2, %v3930_v4  ;;  %v10937_v6 = vadd.f32 %v10725_v29, %v12805_v17  ;;  %vm3953_vm2 = vcmp.gt.f32.partialorder %v3930_v4, 0.0 }
 0x9ab   : > { %v3970_v33 = vmul.f32 0.2, %v3933_v54  ;;  %v3971_v5 = vmul.f32 0.2, %v3935_v60  ;;  %v3968_v61 = vmul.f32 0.2, %v3928_v41  ;;  %v10941_v13 = vmax.f32 %v3649_v25, %v3808_v11 }
 0x9ac   : > { %vm3954_vm3 = vcmp.gt.f32.partialorder %v3933_v54, 0.0  ;;  %vm3955_vm4 = vcmp.gt.f32.partialorder %v3935_v60, 0.0  ;;  %v3972_v27 = vmul.f32 0.2, %v3938_v0  ;;  %vm3952_vm5 = vcmp.gt.f32.partialorder %v3928_v41, 0.0 }
 0x9ad   : > { %vm3956_vm6 = vcmp.gt.f32.partialorder %v3938_v0, 0.0  ;;  %v3973_v31 = vmul.f32 0.2, %v3940_v38  ;;  %v10945_v47 = vmax.f32 %v3651_v15, %v3810_v44  ;;  %v10947_v29 = vmax.f32 %v3653_v10, %v3812_v23 }
 0x9ae   : > { %v4284_v49 = vpop.f32.mrf.mxu2  ;;  %v10950_v22 = vsel %vm3953_vm2, %v3930_v4, %v3969_v37  ;;  %vm3957_vm7 = vcmp.gt.f32.partialorder %v3940_v38, 0.0  ;;  %v3830_v34 = vmax.f32 %v3655_v2, %v3814_v1  ;;  %v10952_v32 = vsel %vm3954_vm3, %v3933_v54, %v3970_v33  ;;  %v12974_v54 = vld [vmem:[#allocation136_spill] sm:$0xff]  ;;  %v12975_v2 = vld [vmem:[#allocation138_spill] sm:$0xff] }
 0x9af   : > { %v3987_v55 = vsel %vm3955_vm4, %v3935_v60, %v3971_v5  ;;  %v4113_v56 = vadd.f32 %v4112_v16, %v12971_v53  ;;  %v10956_v63 = vmul.f32 0.2, %v10937_v6  ;;  %v10958_v46 = vsel %vm3952_vm5, %v3928_v41, %v3968_v61  ;;  %v10982_v23 = vpop.permute.xlu0 %4520 }
 0x9b0   : > { %v3988_v25 = vsel %vm3956_vm6, %v3938_v0, %v3972_v27  ;;  %v4115_v15 = vadd.f32 %v4114_v20, %v10332_v48  ;;  %v4001_v37 = vmax.f32 %v10945_v47, %v10950_v22  ;;  %v3989_v4 = vsel %vm3957_vm7, %v3940_v38, %v3973_v31 }
 0x9b1   : > { %v10965_v1 = vadd.f32 %v10786_v50, %v12970_v7  ;;  %v4110_v16 = vadd.f32 %v10889_v39, %v10330_v40  ;;  %v4002_v60 = vmax.f32 %v12974_v54, %v10952_v32  ;;  %v4003_v41 = vmax.f32 %v10947_v29, %v3987_v55  ;;  %v10994_v27 = vpop.permute.xlu1 %4555 }
 0x9b2   : > { %v4105_v0 = vadd.f32 %v10821_v57, %v12808_v19  ;;  %v4004_v11 = vmax.f32 %v12975_v2, %v3988_v25  ;;  %v10978_v38 = vadd.f32 %v10749_v36, %v12805_v17  ;;  %v4108_v50 = vadd.f32 %v10853_v59, %v12969_v3  ;;  %v10988_v36 = vpop.permute.xlu2 %4515 }
 0x9b3   : > { %v4147_v39 = vmul.f32 0.2, %v4113_v56  ;;  %v4005_v44 = vmax.f32 %v3830_v34, %v3989_v4  ;;  %vm4131_vm8 = vcmp.gt.f32.partialorder %v4113_v56, 0.0  ;;  %v4148_v33 = vmul.f32 0.2, %v4115_v15  ;;  %12976 = vst [vmem:[#allocation15_spill] sm:$0xff] %v10988_v36 }
 0x9b4   : > { %v4285_v5 = vadd.f32 %v4284_v49, %v10330_v40  ;;  %vm3951_vm9 = vcmp.gt.f32.partialorder %v10937_v6, 0.0  ;;  %vm4127_vm10 = vcmp.gt.f32.partialorder %v10965_v1, 0.0  ;;  %v4143_v57 = vmul.f32 0.2, %v10965_v1 }
 0x9b5   : > { %vm4132_vm1 = vcmp.gt.f32.partialorder %v4115_v15, 0.0  ;;  %vm4128_vm11 = vcmp.gt.f32.partialorder %v4105_v0, 0.0  ;;  %vm4130_vm12 = vcmp.gt.f32.partialorder %v4110_v16, 0.0  ;;  %v4283_v59 = vadd.f32 %v10902_v51, %v12969_v3 }
 0x9b6   : > { %v4287_v35 = vpop.f32.mrf.mxu2  ;;  %vm4126_vm0 = vcmp.gt.f32.partialorder %v10978_v38, 0.0  ;;  %vm4129_vm13 = vcmp.gt.f32.partialorder %v4108_v50, 0.0  ;;  %v4145_v40 = vmul.f32 0.2, %v4108_v50  ;;  %v4163_v49 = vsel %vm4131_vm8, %v4113_v56, %v4147_v39 }
 0x9b7   : > { %v4288_v10 = vadd.f32 %v4287_v35, %v12971_v53  ;;  %v4146_v53 = vmul.f32 0.2, %v4110_v16  ;;  %v4164_v20 = vsel %vm4132_vm1, %v4115_v15, %v4148_v33  ;;  %v4280_v29 = vadd.f32 %v10881_v26, %v12808_v19  ;;  %v11006_v33 = vpop.permute.xlu0 %4535 }
 0x9b8   : > { %v4321_v34 = vmul.f32 0.2, %v4285_v5  ;;  %v4144_v55 = vmul.f32 0.2, %v4105_v0  ;;  %v4278_v3 = vadd.f32 %v10855_v28, %v12970_v7  ;;  %vm4305_vm15 = vcmp.gt.f32.partialorder %v4285_v5, 0.0 }
 0x9b9   : > { %v4322_v61 = vmul.f32 0.2, %v4288_v10  ;;  %vm4306_vm14 = vcmp.gt.f32.partialorder %v4288_v10, 0.0  ;;  %v4162_v51 = vsel %vm4130_vm12, %v4110_v16, %v4146_v53  ;;  %v4320_v35 = vmul.f32 0.2, %v4283_v59 }
 0x9ba   : > { %v4161_v4 = vsel %vm4129_vm13, %v4108_v50, %v4145_v40  ;;  %v4179_v54 = vmax.f32 %v4004_v11, %v4163_v49  ;;  %v4180_v15 = vmax.f32 %v4005_v44, %v4164_v20  ;;  %vm4304_vm3 = vcmp.gt.f32.partialorder %v4283_v59, 0.0  ;;  %v11017_v49 = vpop.permute.xlu2 %4530 }
 0x9bb   : > { %v4338_v25 = vsel %vm4306_vm14, %v4288_v10, %v4322_v61  ;;  %v4275_v19 = vadd.f32 %v10830_v14, %v12805_v17  ;;  %v4319_v26 = vmul.f32 0.2, %v4280_v29  ;;  %v4178_v16 = vmax.f32 %v4003_v41, %v4162_v51 }
 0x9bc   : > { %vm4303_vm4 = vcmp.gt.f32.partialorder %v4280_v29, 0.0  ;;  %v4354_v39 = vmax.f32 %v4179_v54, %v4338_v25  ;;  %v4142_v7 = vmul.f32 0.2, %v10978_v38  ;;  %v4160_v10 = vsel %vm4128_vm11, %v4105_v0, %v4144_v55  ;;  %v12977_v0 = vld [vmem:[#allocation134_spill] sm:$0xff] }
 0x9bd   : > { %v4318_v50 = vmul.f32 0.2, %v4278_v3  ;;  %v4336_v11 = vsel %vm4304_vm3, %v4283_v59, %v4320_v35  ;;  %v4177_v44 = vmax.f32 %v4002_v60, %v4161_v4  ;;  %vm4302_vm5 = vcmp.gt.f32.partialorder %v4278_v3, 0.0  ;;  %v11022_v59 = vpop.permute.xlu1 %4570 }
 0x9be   : > { %v4289_v31 = vpop.f32.mrf.mxu2  ;;  %v3983_v17 = vsel %vm3951_vm9, %v10937_v6, %v10956_v63  ;;  %v4159_v14 = vsel %vm4127_vm10, %v10965_v1, %v4143_v57  ;;  %v4317_v41 = vmul.f32 0.2, %v4275_v19  ;;  %v4000_v40 = vmax.f32 %v12977_v0, %v10958_v46  ;;  %v7530_v0 = vld [vmem:[%s12590_s3 + $0xa0] sm:$0xff] }
 0x9bf   : > { %v4290_v32 = vadd.f32 %v4289_v31, %v10332_v48  ;;  %v4337_v48 = vsel %vm4305_vm15, %v4285_v5, %v4321_v34  ;;  %v4335_v5 = vsel %vm4303_vm4, %v4280_v29, %v4319_v26  ;;  %v4176_v60 = vmax.f32 %v4001_v37, %v4160_v10  ;;  %v7511_v26 = vld [vmem:[%s12590_s3 + $0x8] sm:$0xff]  ;;  %v7512_v10 = vld [vmem:[%s12590_s3 + $0x10] sm:$0xff] }
 0x9c0   : > { %v4353_v53 = vmax.f32 %v4178_v16, %v4337_v48  ;;  %vm4301_vm6 = vcmp.gt.f32.partialorder %v4275_v19, 0.0  ;;  %v4352_v31 = vmax.f32 %v4177_v44, %v4336_v11  ;;  %v4158_v6 = vsel %vm4126_vm0, %v10978_v38, %v4142_v7  ;;  %v7544_v48 = vld [vmem:[%s12590_s3 + $0x110] sm:$0xff] }
 0x9c1   : > { %vm4307_vm2 = vcmp.gt.f32.partialorder %v4290_v32, 0.0  ;;  %v4323_v56 = vmul.f32 0.2, %v4290_v32  ;;  %v4334_v63 = vsel %vm4302_vm5, %v4278_v3, %v4318_v50  ;;  %v3999_v46 = vmax.f32 %v10941_v13, %v3983_v17  ;;  %v7529_v50 = vld [vmem:[%s12590_s3 + $0x98] sm:$0xff] }
 0x9c2   : > { %v4175_v1 = vmax.f32 %v4000_v40, %v4159_v14  ;;  %v4351_v57 = vmax.f32 %v4176_v60, %v4335_v5  ;;  %v4362_v47 = vpack.c.bf16 %v4353_v53, %v4352_v31  ;;  %v4333_v22 = vsel %vm4301_vm6, %v4275_v19, %v4317_v41  ;;  %v11031_v38 = vpop.permute.xlu2 %4545  ;;  %v7545_v53 = vld [vmem:[%s12590_s3 + $0x118] sm:$0xff]  ;;  %v7546_v40 = vld [vmem:[%s12590_s3 + $0x120] sm:$0xff] }
 0x9c3   : > { %v4339_v2 = vsel %vm4307_vm2, %v4290_v32, %v4323_v56  ;;  %v4174_v37 = vmax.f32 %v3999_v46, %v4158_v6  ;;  %v11029_v32 = vpop.permute.xlu0 %4550  ;;  %v12978_v55 = vmax.f32 %v12937_v30, %v10815_v9  ;;  %v7510_v9 = vld [vmem:[%s12590_s3] sm:$0xff]  ;;  %v7527_v30 = vld [vmem:[%s12590_s3 + $0x88] sm:$0xff]  ;;  %v7513_v5 = vld [vmem:[%s12590_s3 + $0x18] sm:$0xff]  ;;  %vm6085_vm8 = vcmask 130048  }
 0x9c4   : > { %v4355_v28 = vmax.f32 %v4180_v15, %v4339_v2  ;;  %v4350_v20 = vmax.f32 %v4175_v1, %v4334_v63  ;;  %v7555_v2 = vld [vmem:[%s12590_s3 + $0x168] sm:$0xff]  ;;  %v7557_v60 = vld [vmem:[%s12590_s3 + $0x178] sm:$0xff] }
 0x9c5   : > { %v4349_v29 = vmax.f32 %v4174_v37, %v4333_v22  ;;  %v11033_v13 = vpop.permute.xlu1 %4585  ;;  %v7531_v22 = vld [vmem:[%s12590_s3 + $0xa8] sm:$0xff] }
 0x9c6   : > { %v4363_v61 = vpack.c.bf16 %v4355_v28, %v4354_v39  ;;  %v4361_v34 = vpack.c.bf16 %v4351_v57, %v4350_v20  ;;  %v7547_v37 = vld [vmem:[%s12590_s3 + $0x128] sm:$0xff]  ;;  %v7558_v20 = vld [vmem:[%s12590_s3 + $0x180] sm:$0xff] }
 0x9c7   : > { %v4360_v51 = vpack.c.bf16 %v4349_v29, %v12978_v55 }
 0x9c8   : > { %5372 = vmatpush.bf16.msrb.mxu0 %v4363_v61  ;;  %7574 = vmatpush.bf16.msrb.mxu1 %v4363_v61 }
 0x9c9   : > { %7575 = vmatpush.bf16.msrb.mxu2 %v4363_v61  ;;  %7576 = vmatpush.bf16.msrb.mxu3 %v4363_v61  ;;  %v7556_v61 = vld [vmem:[%s12590_s3 + $0x170] sm:$0xff] }
 0x9ca   : > { %v11044_v35 = vpop.permute.xlu2 %4560 }
 0x9cb   : > { %v11040_v3 = vpop.permute.xlu0 %4565 }
 0x9cc   : > { %5373 = vmatpush.bf16.msrb.mxu0 %v4362_v47  ;;  %7577 = vmatpush.bf16.msrb.mxu1 %v4362_v47 }
 0x9cd   : > { %7578 = vmatpush.bf16.msrb.mxu2 %v4362_v47  ;;  %7579 = vmatpush.bf16.msrb.mxu3 %v4362_v47  ;;  %v11046_v25 = vpop.permute.xlu1 %4600  ;;  %v7514_v47 = vld [vmem:[%s12590_s3 + $0x20] sm:$0xff] }
 0x9d0   : > { %5374 = vmatpush.bf16.msrb.mxu0 %v4361_v34  ;;  %7580 = vmatpush.bf16.msrb.mxu1 %v4361_v34 }
 0x9d1   : > { %7581 = vmatpush.bf16.msrb.mxu2 %v4361_v34  ;;  %7582 = vmatpush.bf16.msrb.mxu3 %v4361_v34 }
 0x9d2   : > { %v11074_v56 = vpop.permute.xlu2 %4575 }
 0x9d4   : > { %5375 = vmatpush.bf16.msrb.mxu0 %v4360_v51  ;;  %7583 = vmatpush.bf16.msrb.mxu1 %v4360_v51 }
 0x9d5   : > { %7584 = vmatpush.bf16.msrb.mxu2 %v4360_v51  ;;  %7585 = vmatpush.bf16.msrb.mxu3 %v4360_v51  ;;  %v11076_v4 = vpop.permute.xlu1 %4615 }
 0x9d8   : > { %5376 = vmatpush.bf16.msrb.mxu0 %v10798_v12  ;;  %7586 = vmatpush.bf16.msrb.mxu1 %v10798_v12 }
 0x9d9   : > { %7587 = vmatpush.bf16.msrb.mxu2 %v10798_v12  ;;  %7588 = vmatpush.bf16.msrb.mxu3 %v10798_v12  ;;  %v11056_v12 = vpop.permute.xlu0 %4580 }
 0x9da   : > { %v11080_v15 = vpop.permute.xlu2 %4590 }
 0x9dc   : > { %5377 = vmatpush.bf16.msrb.mxu0 %v10738_v42  ;;  %7589 = vmatpush.bf16.msrb.mxu1 %v10738_v42 }
 0x9dd   : > { %7590 = vmatpush.bf16.msrb.mxu2 %v10738_v42  ;;  %7591 = vmatpush.bf16.msrb.mxu3 %v10738_v42  ;;  %v7543_v42 = vld [vmem:[%s12590_s3 + $0x108] sm:$0xff]  ;;  %v11082_v19 = vpop.permute.xlu1 %4630 }
 0x9de   : > { %12979 = vst [vmem:[#allocation20_spill] sm:$0xff] %v11082_v19 }
 0x9e0   : > { %5378 = vmatpush.bf16.msrb.mxu0 %v10692_v24  ;;  %7592 = vmatpush.bf16.msrb.mxu1 %v10692_v24 }
 0x9e1   : > { %7593 = vmatpush.bf16.msrb.mxu2 %v10692_v24  ;;  %7594 = vmatpush.bf16.msrb.mxu3 %v10692_v24  ;;  %v7554_v24 = vld [vmem:[%s12590_s3 + $0x160] sm:$0xff]  ;;  %v11078_v54 = vpop.permute.xlu0 %4595 }
 0x9e2   : > { %v11098_v39 = vpop.permute.xlu2 %4605 }
 0x9e4   : > { %5379 = vmatpush.bf16.msrb.mxu0 %v10644_v18  ;;  %7595 = vmatpush.bf16.msrb.mxu1 %v10644_v18 }
 0x9e5   : > { %7596 = vmatpush.bf16.msrb.mxu2 %v10644_v18  ;;  %7597 = vmatpush.bf16.msrb.mxu3 %v10644_v18  ;;  %v7528_v18 = vld [vmem:[%s12590_s3 + $0x90] sm:$0xff]  ;;  %v11100_v28 = vpop.permute.xlu1 %4645 }
 0x9e6   : > { %12980 = vst [vmem:[#allocation41_spill] sm:$0xff] %v11100_v28 }
 0x9e7   : > { %5380 = vmatmul.bf16.vlgmr.msrb.gmra.mxu0 %v7510_v9  ;;  %5465 = vmatmul.bf16.vlgmr.msrb.gmra.mxu1 %v7527_v30  ;;  %v7515_v9 = vld [vmem:[%s12590_s3 + $0x28] sm:$0xff]  ;;  %v7532_v30 = vld [vmem:[%s12590_s3 + $0xb0] sm:$0xff] }
 0x9e8   : > { %5545 = vmatmul.bf16.vlgmr.msrb.gmra.mxu2 %v7543_v42  ;;  %5600 = vmatmul.bf16.vlgmr.msrb.gmra.mxu3 %v7554_v24  ;;  %v7548_v42 = vld [vmem:[%s12590_s3 + $0x130] sm:$0xff]  ;;  %v7559_v24 = vld [vmem:[%s12590_s3 + $0x188] sm:$0xff] }
 0x9e9   : > { %v11096_v16 = vpop.permute.xlu0 %4610 }
 0x9ea   : > { %v11110_v11 = vpop.permute.xlu2 %4620 }
 0x9eb   : > { %12982 = vst [vmem:[#allocation43_spill] sm:$0xff] %v11110_v11 }
 0x9ed   : > { %v11112_v44 = vpop.permute.xlu1 %4660 }
 0x9ee   : > { %12983 = vst [vmem:[#allocation24_spill] sm:$0xff] %v11112_v44 }
 0x9f1   : > { %v11102_v7 = vpop.permute.xlu0 %4625 }
 0x9f2   : > { %12981 = vst [vmem:[#allocation42_spill] sm:$0xff] %v11102_v7  ;;  %v11122_v14 = vpop.permute.xlu2 %4635 }
 0x9f3   : > { %12985 = vst [vmem:[#allocation45_spill] sm:$0xff] %v11122_v14 }
 0x9f5   : > { %v11124_v41 = vpop.permute.xlu1 %4675 }
 0x9f6   : > { %12986 = vst [vmem:[#allocation46_spill] sm:$0xff] %v11124_v41 }
 0x9f7   : > { %5385 = vmatmul.bf16.gmra.mxu0 %v7511_v26  ;;  %5470 = vmatmul.bf16.gmra.mxu1 %v7528_v18 }
 0x9f8   : > { %5550 = vmatmul.bf16.gmra.mxu2 %v7544_v48  ;;  %5605 = vmatmul.bf16.gmra.mxu3 %v7555_v2 }
 0x9f9   : > { %v11120_v17 = vpop.permute.xlu0 %4640 }
 0x9fa   : > { %12984 = vst [vmem:[#allocation44_spill] sm:$0xff] %v11120_v17  ;;  %v11140_v6 = vpop.permute.xlu2 %4650 }
 0x9fb   : > { %12988 = vst [vmem:[#allocation37_spill] sm:$0xff] %v11140_v6 }
 0x9fd   : > { %v11142_v63 = vpop.permute.xlu1 %4690 }
 0xa01   : > { %v11138_v31 = vpop.permute.xlu0 %4655 }
 0xa02   : > { %12987 = vst [vmem:[#allocation47_spill] sm:$0xff] %v11138_v31  ;;  %v11146_v1 = vpop.permute.xlu2 %4665 }
 0xa03   : > { %12990 = vst [vmem:[#allocation50_spill] sm:$0xff] %v11146_v1 }
 0xa05   : > { %v11148_v57 = vpop.permute.xlu1 %4705 }
 0xa07   : > { %5390 = vmatmul.bf16.gmra.mxu0 %v7512_v10  ;;  %5475 = vmatmul.bf16.gmra.mxu1 %v7529_v50  ;;  %v7516_v50 = vld [vmem:[%s12590_s3 + $0x30] sm:$0xff] }
 0xa08   : > { %5555 = vmatmul.bf16.gmra.mxu2 %v7545_v53  ;;  %5610 = vmatmul.bf16.gmra.mxu3 %v7556_v61  ;;  %v7533_v53 = vld [vmem:[%s12590_s3 + $0xb8] sm:$0xff] }
 0xa09   : > { %v11144_v46 = vpop.permute.xlu0 %4670  ;;  %v7549_v61 = vld [vmem:[%s12590_s3 + $0x138] sm:$0xff] }
 0xa0a   : > { %12989 = vst [vmem:[#allocation49_spill] sm:$0xff] %v11144_v46  ;;  %v11164_v34 = vpop.permute.xlu2 %4680 }
 0xa0d   : > { %v11166_v55 = vpop.permute.xlu1 %4720 }
 0xa11   : > { %v11162_v29 = vpop.permute.xlu0 %4685 }
 0xa12   : > { %v11182_v26 = vpop.permute.xlu2 %4695 }
 0xa15   : > { %v11184_v18 = vpop.permute.xlu1 %4735 }
 0xa17   : > { %5395 = vmatmul.bf16.gmra.mxu0 %v7513_v5  ;;  %5480 = vmatmul.bf16.gmra.mxu1 %v7530_v0  ;;  %v7560_v5 = vld [vmem:[%s12590_s3 + $0x190] sm:$0xff] }
 0xa18   : > { %5560 = vmatmul.bf16.gmra.mxu2 %v7546_v40  ;;  %5615 = vmatmul.bf16.gmra.mxu3 %v7557_v60 }
 0xa19   : > { %v11168_v51 = vpop.permute.xlu0 %4700 }
 0xa1a   : > { %v11188_v2 = vpop.permute.xlu2 %4710 }
 0xa1d   : > { %v11190_v10 = vpop.permute.xlu1 %4750 }
 0xa21   : > { %v11186_v48 = vpop.permute.xlu0 %4715 }
 0xa22   : > { %v11206_v40 = vpop.permute.xlu2 %4725 }
 0xa25   : > { %v11208_v60 = vpop.permute.xlu1 %4765 }
 0xa27   : > { %5400 = vmatmul.bf16.gmra.mxu0 %v7514_v47  ;;  %5485 = vmatmul.bf16.gmra.mxu1 %v7531_v22  ;;  %v7517_v22 = vld [vmem:[%s12590_s3 + $0x38] sm:$0xff] }
 0xa28   : > { %5565 = vmatmul.bf16.gmra.mxu2 %v7547_v37  ;;  %5620 = vmatmul.bf16.gmra.mxu3 %v7558_v20  ;;  %v7534_v37 = vld [vmem:[%s12590_s3 + $0xc0] sm:$0xff] }
 0xa29   : > { %v11204_v0 = vpop.permute.xlu0 %4730 }
 0xa2a   : > { %v11218_v20 = vpop.permute.xlu2 %4740 }
 0xa31   : > { %v11210_v47 = vpop.permute.xlu0 %4745 }
 0xa37   : > { %5405 = vmatmul.bf16.gmra.mxu0 %v7515_v9  ;;  %5490 = vmatmul.bf16.gmra.mxu1 %v7532_v30  ;;  %v11220_v9 = vpop.permute.xlu1 %4780  ;;  %v7550_v30 = vld [vmem:[%s12590_s3 + $0x140] sm:$0xff] }
 0xa38   : > { %5570 = vmatmul.bf16.gmra.mxu2 %v7548_v42  ;;  %5625 = vmatmul.bf16.gmra.mxu3 %v7559_v24  ;;  %12991 = vst [vmem:[#allocation51_spill] sm:$0xff] %v11220_v9  ;;  %v7561_v42 = vld [vmem:[%s12590_s3 + $0x198] sm:$0xff] }
 0xa39   : > { %v11228_v24 = vpop.permute.xlu0 %4760 }
 0xa47   : > { %5410 = vmatmul.bf16.gmra.mxu0 %v7516_v50  ;;  %5495 = vmatmul.bf16.gmra.mxu1 %v7533_v53  ;;  %v11230_v50 = vpop.permute.xlu2 %4755  ;;  %v11232_v53 = vpop.permute.xlu1 %4795 }
 0xa48   : > { %5575 = vmatmul.bf16.gmra.mxu2 %v7549_v61  ;;  %5630 = vmatmul.bf16.gmra.mxu3 %v7560_v5  ;;  %v7518_v61 = vld [vmem:[%s12590_s3 + $0x40] sm:$0xff]  ;;  %v7535_v5 = vld [vmem:[%s12590_s3 + $0xc8] sm:$0xff] }
 0xa4f   : > { %v11250_v46 = vpop.permute.xlu2 %4770  ;;  %v11252_v1 = vpop.permute.xlu1 %4810 }
 0xa57   : > { %5415 = vmatmul.bf16.gmra.mxu0 %v7517_v22  ;;  %5500 = vmatmul.bf16.gmra.mxu1 %v7534_v37  ;;  %v7551_v22 = vld [vmem:[%s12590_s3 + $0x148] sm:$0xff]  ;;  %v7562_v37 = vld [vmem:[%s12590_s3 + $0x1a0] sm:$0xff]  ;;  %v11259_v19 = vpop.permute.xlu2 %4785 }
 0xa58   : > { %5580 = vmatmul.bf16.gmra.mxu2 %v7550_v30  ;;  %5635 = vmatmul.bf16.gmra.mxu3 %v7561_v42  ;;  %v11246_v30 = vpop.permute.xlu0 %4775  ;;  %12993 = vst [vmem:[#allocation53_spill] sm:$0xff] %v11259_v19 }
 0xa59   : > { %12992 = vst [vmem:[#allocation52_spill] sm:$0xff] %v11246_v30 }
 0xa64   : > { %v5381_v36 = vpop.f32.mrf.mxu0  ;;  %v5466_v62 = vpop.f32.mrf.mxu1 }
 0xa65   : > { %v5382_v42 = vadd.f32 %v5381_v36, %v10541_v45  ;;  %v5467_v58 = vadd.f32 %v5466_v62, %v10982_v23 }
 0xa67   : > { %v5829_v41 = vmul.f32 0.2, %v5382_v42  ;;  %5420 = vmatmul.bf16.gmra.mxu0 %v7518_v61  ;;  %5505 = vmatmul.bf16.gmra.mxu1 %v7535_v5  ;;  %vm5701_vm7 = vcmp.gt.f32.partialorder %v5382_v42, 0.0  ;;  %v5863_v6 = vmul.f32 0.2, %v5467_v58  ;;  %vm5735_vm9 = vcmp.gt.f32.partialorder %v5467_v58, 0.0 }
 0xa68   : > { %5585 = vmatmul.bf16.gmra.mxu2 %v7551_v22  ;;  %5640 = vmatmul.bf16.gmra.mxu3 %v7562_v37  ;;  %v4791_v22 = vpop.permute.xlu0 %4790 }
 0xa69   : > { %v5957_v44 = vsel %vm5701_vm7, %v5382_v42, %v5829_v41  ;;  %v5991_v41 = vsel %vm5735_vm9, %v5467_v58, %v5863_v6  ;;  %v7519_v58 = vld [vmem:[%s12590_s3 + $0x48] sm:$0xff] }
 0xa6a   : > { %v6086_v31 = vsel %vm6085_vm8, %v5957_v44, -inf }
 0xa6b   : > { %v5546_v28 = vpop.f32.mrf.mxu2  ;;  %v5601_v17 = vpop.f32.mrf.mxu3  ;;  %6087 = vmax.xlane.f32.xlu1 %v6086_v31 }
 0xa6c   : > { %v5547_v45 = vadd.f32 %v5546_v28, %v11164_v34  ;;  %v5383_v62 = vpop.f32.mrf.mxu0  ;;  %v5468_v23 = vpop.f32.mrf.mxu1  ;;  %v5602_v44 = vadd.f32 %v5601_v17, %v4791_v22  ;;  %v7536_v17 = vld [vmem:[%s12590_s3 + $0xd0] sm:$0xff] }
 0xa6d   : > { %v5384_v36 = vadd.f32 %v5383_v62, %v10625_v43  ;;  %v5469_v5 = vadd.f32 %v5468_v23, %v10916_v8  ;;  %v11261_v28 = vpop.permute.xlu1 %4825  ;;  %v6188_v8 = vsel %vm6085_vm8, %v5991_v41, -inf }
 0xa6e   : > { %v5895_v61 = vmul.f32 0.2, %v5547_v45  ;;  %vm5767_vm10 = vcmp.gt.f32.partialorder %v5547_v45, 0.0  ;;  %v5917_v6 = vmul.f32 0.2, %v5602_v44  ;;  %vm5789_vm12 = vcmp.gt.f32.partialorder %v5602_v44, 0.0 }
 0xa6f   : > { %v5830_v37 = vmul.f32 0.2, %v5384_v36  ;;  %vm5702_vm1 = vcmp.gt.f32.partialorder %v5384_v36, 0.0  ;;  %v5864_v34 = vmul.f32 0.2, %v5469_v5  ;;  %vm5736_vm11 = vcmp.gt.f32.partialorder %v5469_v5, 0.0 }
 0xa70   : > { %v6023_v42 = vsel %vm5767_vm10, %v5547_v45, %v5895_v61  ;;  %v7563_v61 = vld [vmem:[%s12590_s3 + $0x1a8] sm:$0xff] }
 0xa71   : > { %v6284_v14 = vsel %vm6085_vm8, %v6023_v42, -inf  ;;  %v5958_v31 = vsel %vm5702_vm1, %v5384_v36, %v5830_v37  ;;  %v7552_v36 = vld [vmem:[%s12590_s3 + $0x150] sm:$0xff]  ;;  %v5992_v37 = vsel %vm5736_vm11, %v5469_v5, %v5864_v34 }
 0xa72   : > { %6285 = vmax.xlane.f32.xlu0 %v6284_v14  ;;  %v6089_v43 = vsel %vm6085_vm8, %v5958_v31, -inf }
 0xa73   : > { %v5548_v62 = vpop.f32.mrf.mxu2  ;;  %v5603_v23 = vpop.f32.mrf.mxu3  ;;  %6090 = vmax.xlane.f32.xlu2 %v6089_v43  ;;  %6189 = vmax.xlane.f32.xlu1 %v6188_v8  ;;  %v6045_v8 = vsel %vm5789_vm12, %v5602_v44, %v5917_v6 }
 0xa74   : > { %v5386_v45 = vpop.f32.mrf.mxu0  ;;  %v5471_v14 = vpop.f32.mrf.mxu1  ;;  %v5604_v41 = vadd.f32 %v5603_v23, %v11232_v53  ;;  %v5549_v43 = vadd.f32 %v5548_v62, %v11162_v29 }
 0xa75   : > { %v5387_v22 = vadd.f32 %v5386_v45, %v10648_v21  ;;  %v5472_v31 = vadd.f32 %v5471_v14, %v11017_v49  ;;  %v6191_v21 = vsel %vm6085_vm8, %v5992_v37, -inf  ;;  %v6350_v49 = vsel %vm6085_vm8, %v6045_v8, -inf  ;;  %v11284_v23 = vpop.permute.xlu1 %4840  ;;  %v4801_v44 = vpop.permute.xlu2 %4800  ;;  %v7520_v37 = vld [vmem:[%s12590_s3 + $0x50] sm:$0xff] }
 0xa76   : > { %v5918_v45 = vmul.f32 0.2, %v5604_v41  ;;  %vm5790_vm14 = vcmp.gt.f32.partialorder %v5604_v41, 0.0  ;;  %vm5768_vm15 = vcmp.gt.f32.partialorder %v5549_v43, 0.0 }
 0xa77   : > { %v5831_v42 = vmul.f32 0.2, %v5387_v22  ;;  %5425 = vmatmul.bf16.gmra.mxu0 %v7519_v58  ;;  %5510 = vmatmul.bf16.gmra.mxu1 %v7536_v17  ;;  %vm5703_vm0 = vcmp.gt.f32.partialorder %v5387_v22, 0.0  ;;  %v5865_v5 = vmul.f32 0.2, %v5472_v31  ;;  %vm5737_vm13 = vcmp.gt.f32.partialorder %v5472_v31, 0.0 }
 0xa78   : > { %5590 = vmatmul.bf16.gmra.mxu2 %v7552_v36  ;;  %5645 = vmatmul.bf16.gmra.mxu3 %v7563_v61  ;;  %v5896_v58 = vmul.f32 0.2, %v5549_v43  ;;  %v6046_v14 = vsel %vm5790_vm14, %v5604_v41, %v5918_v45  ;;  %v7553_v45 = vld [vmem:[%s12590_s3 + $0x158] sm:$0xff] }
 0xa79   : > { %v5959_v19 = vsel %vm5703_vm0, %v5387_v22, %v5831_v42  ;;  %v5993_v6 = vsel %vm5737_vm13, %v5472_v31, %v5865_v5  ;;  %v6353_v22 = vsel %vm6085_vm8, %v6046_v14, -inf  ;;  %v7564_v5 = vld [vmem:[%s12590_s3 + $0x1b0] sm:$0xff] }
 0xa7a   : > { %v6092_v9 = vsel %vm6085_vm8, %v5959_v19, -inf  ;;  %v6024_v36 = vsel %vm5768_vm15, %v5549_v43, %v5896_v58  ;;  %v6194_v61 = vsel %vm6085_vm8, %v5993_v6, -inf  ;;  %v4806_v58 = vpop.permute.xlu0 %4805 }
 0xa7b   : > { %v5551_v34 = vpop.f32.mrf.mxu2  ;;  %v5606_v53 = vpop.f32.mrf.mxu3  ;;  %6093 = vmax.xlane.f32.xlu0 %v6092_v9  ;;  %6192 = vmax.xlane.f32.xlu2 %v6191_v21 }
 0xa7c   : > { %6351 = vmax.xlane.f32.xlu1 %v6350_v49  ;;  %v5473_v29 = vpop.f32.mrf.mxu1  ;;  %v5388_v19 = vpop.f32.mrf.mxu0  ;;  %v5552_v62 = vadd.f32 %v5551_v34, %v11142_v63  ;;  %v5607_v17 = vadd.f32 %v5606_v53, %v4801_v44  ;;  %v6287_v63 = vsel %vm6085_vm8, %v6024_v36, -inf  ;;  %v12994_v53 = vld [vmem:[#allocation14_spill] sm:$0xff] }
 0xa7d   : > { %v5474_v9 = vadd.f32 %v5473_v29, %v11006_v33  ;;  %v7537_v33 = vld [vmem:[%s12590_s3 + $0xd8] sm:$0xff]  ;;  %v11303_v34 = vpop.permute.xlu1 %4855  ;;  %v5389_v49 = vadd.f32 %v5388_v19, %v12994_v53 }
 0xa7e   : > { %v5897_v42 = vmul.f32 0.2, %v5552_v62  ;;  %v5919_v8 = vmul.f32 0.2, %v5607_v17  ;;  %vm5791_vm2 = vcmp.gt.f32.partialorder %v5607_v17, 0.0  ;;  %vm5769_vm3 = vcmp.gt.f32.partialorder %v5552_v62, 0.0 }
 0xa7f   : > { %v5866_v41 = vmul.f32 0.2, %v5474_v9  ;;  %vm5738_vm4 = vcmp.gt.f32.partialorder %v5474_v9, 0.0  ;;  %v5832_v7 = vmul.f32 0.2, %v5389_v49  ;;  %vm5704_vm6 = vcmp.gt.f32.partialorder %v5389_v49, 0.0 }
 0xa80   : > { %v6047_v44 = vsel %vm5791_vm2, %v5607_v17, %v5919_v8  ;;  %v6025_v6 = vsel %vm5769_vm3, %v5552_v62, %v5897_v42 }
 0xa81   : > { %v5960_v42 = vsel %vm5704_vm6, %v5389_v49, %v5832_v7  ;;  %v7538_v7 = vld [vmem:[%s12590_s3 + $0xe0] sm:$0xff]  ;;  %v7565_v49 = vld [vmem:[%s12590_s3 + $0x1b8] sm:$0xff] }
 0xa83   : > { %v5608_v21 = vpop.f32.mrf.mxu3  ;;  %6195 = vmax.xlane.f32.xlu0 %v6194_v61  ;;  %6354 = vmax.xlane.f32.xlu2 %v6353_v22  ;;  %v5553_v31 = vpop.f32.mrf.mxu2  ;;  %v5994_v61 = vsel %vm5738_vm4, %v5474_v9, %v5866_v41  ;;  %v6356_v22 = vsel %vm6085_vm8, %v6047_v44, -inf }
 0xa84   : > { %6288 = vmax.xlane.f32.xlu1 %v6287_v63  ;;  %v5476_v43 = vpop.f32.mrf.mxu1  ;;  %v5554_v29 = vadd.f32 %v5553_v31, %v11182_v26  ;;  %v5609_v14 = vadd.f32 %v5608_v21, %v4806_v58  ;;  %v5391_v36 = vpop.f32.mrf.mxu0  ;;  %v6290_v63 = vsel %vm6085_vm8, %v6025_v6, -inf  ;;  %v6197_v26 = vsel %vm6085_vm8, %v5994_v61, -inf  ;;  %v12995_v21 = vld [vmem:[#allocation19_spill] sm:$0xff] }
 0xa85   : > { %v5477_v62 = vadd.f32 %v5476_v43, %v10943_v52  ;;  %v11312_v8 = vpop.permute.xlu1 %4870  ;;  %v6095_v58 = vsel %vm6085_vm8, %v5960_v42, -inf }
 0xa86   : > { %v5898_v30 = vmul.f32 0.2, %v5554_v29  ;;  %v5920_v19 = vmul.f32 0.2, %v5609_v14  ;;  %vm5770_vm5 = vcmp.gt.f32.partialorder %v5554_v29, 0.0  ;;  %vm5792_vm7 = vcmp.gt.f32.partialorder %v5609_v14, 0.0 }
 0xa87   : > { %5430 = vmatmul.bf16.gmra.mxu0 %v7520_v37  ;;  %5515 = vmatmul.bf16.gmra.mxu1 %v7537_v33  ;;  %v5392_v33 = vadd.f32 %v5391_v36, %v12995_v21  ;;  %vm5739_vm9 = vcmp.gt.f32.partialorder %v5477_v62, 0.0 }
 0xa88   : > { %5595 = vmatmul.bf16.gmra.mxu2 %v7553_v45  ;;  %5650 = vmatmul.bf16.gmra.mxu3 %v7564_v5  ;;  %v6026_v37 = vsel %vm5770_vm5, %v5554_v29, %v5898_v30  ;;  %v6048_v31 = vsel %vm5792_vm7, %v5609_v14, %v5920_v19  ;;  %v5867_v45 = vmul.f32 0.2, %v5477_v62  ;;  %v4816_v29 = vpop.permute.xlu2 %4815 }
 0xa89   : > { %v6293_v53 = vsel %vm6085_vm8, %v6026_v37, -inf  ;;  %v6359_v52 = vsel %vm6085_vm8, %v6048_v31, -inf  ;;  %v5833_v30 = vmul.f32 0.2, %v5392_v33  ;;  %vm5705_vm1 = vcmp.gt.f32.partialorder %v5392_v33, 0.0 }
 0xa8a   : > { %v5995_v6 = vsel %vm5739_vm9, %v5477_v62, %v5867_v45  ;;  %vm253_vm9 = vcmask 7168  }
 0xa8b   : > { %v5611_v11 = vpop.f32.mrf.mxu3  ;;  %6357 = vmax.xlane.f32.xlu0 %v6356_v22  ;;  %6291 = vmax.xlane.f32.xlu2 %v6290_v63  ;;  %v5556_v41 = vpop.f32.mrf.mxu2  ;;  %v6200_v42 = vsel %vm6085_vm8, %v5995_v6, -inf  ;;  %v7522_v6 = vld [vmem:[%s12590_s3 + $0x60] sm:$0xff] }
 0xa8c   : > { %6198 = vmax.xlane.f32.xlu1 %v6197_v26  ;;  %v5478_v17 = vpop.f32.mrf.mxu1  ;;  %v5393_v5 = vpop.f32.mrf.mxu0  ;;  %v5612_v14 = vadd.f32 %v5611_v11, %v11252_v1  ;;  %v5557_v22 = vadd.f32 %v5556_v41, %v11168_v51  ;;  %v5961_v26 = vsel %vm5705_vm1, %v5392_v33, %v5833_v30  ;;  %v12996_v51 = vld [vmem:[#allocation8_spill] sm:$0xff]  ;;  %v12997_v41 = vld [vmem:[#allocation18_spill] sm:$0xff] }
 0xa8d   : > { %v5479_v9 = vadd.f32 %v5478_v17, %v11031_v38  ;;  %v7521_v38 = vld [vmem:[%s12590_s3 + $0x58] sm:$0xff]  ;;  %v11329_v19 = vpop.permute.xlu1 %4885  ;;  %v6098_v11 = vsel %vm6085_vm8, %v5961_v26, -inf  ;;  %v5394_v33 = vadd.f32 %v5393_v5, %v12996_v51 }
 0xa8e   : > { %v5921_v21 = vmul.f32 0.2, %v5612_v14  ;;  %v5899_v1 = vmul.f32 0.2, %v5557_v22  ;;  %vm5793_vm12 = vcmp.gt.f32.partialorder %v5612_v14, 0.0  ;;  %vm5771_vm0 = vcmp.gt.f32.partialorder %v5557_v22, 0.0 }
 0xa8f   : > { %v5868_v44 = vmul.f32 0.2, %v5479_v9  ;;  %vm5740_vm10 = vcmp.gt.f32.partialorder %v5479_v9, 0.0  ;;  %vm5706_vm13 = vcmp.gt.f32.partialorder %v5394_v33, 0.0 }
 0xa91   : > { %v5996_v61 = vsel %vm5740_vm10, %v5479_v9, %v5868_v44 }
 0xa92   : > { %v6203_v37 = vsel %vm6085_vm8, %v5996_v61, -inf }
 0xa93   : > { %6294 = vmax.xlane.f32.xlu0 %v6293_v53  ;;  %6096 = vmax.xlane.f32.xlu2 %v6095_v58  ;;  %v5613_v43 = vpop.f32.mrf.mxu3  ;;  %v5558_v17 = vpop.f32.mrf.mxu2  ;;  %v6049_v53 = vsel %vm5793_vm12, %v5612_v14, %v5921_v21 }
 0xa94   : > { %6360 = vmax.xlane.f32.xlu1 %v6359_v52  ;;  %v5614_v36 = vadd.f32 %v5613_v43, %v4816_v29  ;;  %v5481_v63 = vpop.f32.mrf.mxu1  ;;  %v5396_v9 = vpop.f32.mrf.mxu0  ;;  %v5559_v26 = vadd.f32 %v5558_v17, %v11148_v57 }
 0xa95   : > { %v5397_v31 = vadd.f32 %v5396_v9, %v12997_v41  ;;  %v4821_v58 = vpop.permute.xlu0 %4820  ;;  %v5482_v44 = vadd.f32 %v5481_v63, %v11029_v32  ;;  %v7539_v32 = vld [vmem:[%s12590_s3 + $0xe8] sm:$0xff]  ;;  %v11346_v14 = vpop.permute.xlu1 %4900 }
 0xa96   : > { %v5922_v62 = vmul.f32 0.2, %v5614_v36  ;;  %vm5794_vm11 = vcmp.gt.f32.partialorder %v5614_v36, 0.0  ;;  %vm5772_vm3 = vcmp.gt.f32.partialorder %v5559_v26, 0.0 }
 0xa97   : > { %5435 = vmatmul.bf16.gmra.mxu0 %v7521_v38  ;;  %5520 = vmatmul.bf16.gmra.mxu1 %v7538_v7  ;;  %v6027_v38 = vsel %vm5771_vm0, %v5557_v22, %v5899_v1  ;;  %v5834_v7 = vmul.f32 0.2, %v5394_v33  ;;  %v5835_v29 = vmul.f32 0.2, %v5397_v31  ;;  %v7566_v22 = vld [vmem:[%s12590_s3 + $0x1c0] sm:$0xff]  ;;  %vm5707_vm14 = vcmp.gt.f32.partialorder %v5397_v31, 0.0 }
 0xa98   : > { %5655 = vmatmul.bf16.gmra.mxu3 %v7565_v49  ;;  %v6050_v45 = vsel %vm5794_vm11, %v5614_v36, %v5922_v62  ;;  %v6362_v49 = vsel %vm6085_vm8, %v6049_v53, -inf  ;;  %v6296_v5 = vsel %vm6085_vm8, %v6027_v38, -inf  ;;  %v5869_v36 = vmul.f32 0.2, %v5482_v44 }
 0xa99   : > { %v6365_v43 = vsel %vm6085_vm8, %v6050_v45, -inf  ;;  %vm5741_vm15 = vcmp.gt.f32.partialorder %v5482_v44, 0.0  ;;  %v5962_v63 = vsel %vm5706_vm13, %v5394_v33, %v5834_v7  ;;  %v5900_v45 = vmul.f32 0.2, %v5559_v26  ;;  %v12998_v7 = vld [vmem:[#allocation16_spill] sm:$0xff] }
 0xa9a   : > { %v6101_v41 = vsel %vm6085_vm8, %v5962_v63, -inf }
 0xa9b   : > { %6204 = vmax.xlane.f32.xlu0 %v6203_v37  ;;  %6201 = vmax.xlane.f32.xlu2 %v6200_v42  ;;  %v5616_v52 = vpop.f32.mrf.mxu3  ;;  %v5561_v61 = vpop.f32.mrf.mxu2  ;;  %v5963_v42 = vsel %vm5707_vm14, %v5397_v31, %v5835_v29  ;;  %v6028_v38 = vsel %vm5772_vm3, %v5559_v26, %v5900_v45 }
 0xa9c   : > { %6099 = vmax.xlane.f32.xlu1 %v6098_v11  ;;  %v5483_v30 = vpop.f32.mrf.mxu1  ;;  %v5562_v37 = vadd.f32 %v5561_v61, %v11188_v2  ;;  %v5617_v21 = vadd.f32 %v5616_v52, %v4821_v58  ;;  %v5398_v62 = vpop.f32.mrf.mxu0  ;;  %v5997_v11 = vsel %vm5741_vm15, %v5482_v44, %v5869_v36  ;;  %v6104_v51 = vsel %vm6085_vm8, %v5963_v42, -inf }
 0xa9d   : > { %v11353_v1 = vpop.permute.xlu0 %4835  ;;  %v6206_v57 = vsel %vm6085_vm8, %v5997_v11, -inf  ;;  %v11358_v31 = vpop.permute.xlu1 %4915  ;;  %v5484_v53 = vadd.f32 %v5483_v30, %v10994_v27  ;;  %v6299_v36 = vsel %vm6085_vm8, %v6028_v38, -inf  ;;  %v7540_v30 = vld [vmem:[%s12590_s3 + $0xf0] sm:$0xff] }
 0xa9e   : > { %v5901_v33 = vmul.f32 0.2, %v5562_v37  ;;  %v5923_v2 = vmul.f32 0.2, %v5617_v21  ;;  %vm5773_vm2 = vcmp.gt.f32.partialorder %v5562_v37, 0.0  ;;  %vm5795_vm4 = vcmp.gt.f32.partialorder %v5617_v21, 0.0  ;;  %v4831_v58 = vpop.permute.xlu2 %4830 }
 0xa9f   : > { %vm5742_vm5 = vcmp.gt.f32.partialorder %v5484_v53, 0.0 }
 0xaa0   : > { %v6029_v52 = vsel %vm5773_vm2, %v5562_v37, %v5901_v33  ;;  %v6051_v29 = vsel %vm5795_vm4, %v5617_v21, %v5923_v2  ;;  %v7567_v37 = vld [vmem:[%s12590_s3 + $0x1c8] sm:$0xff] }
 0xaa1   : > { %v6368_v27 = vsel %vm6085_vm8, %v6051_v29, -inf }
 0xaa3   : > { %6366 = vmax.xlane.f32.xlu0 %v6365_v43  ;;  %6363 = vmax.xlane.f32.xlu2 %v6362_v49  ;;  %v5618_v9 = vpop.f32.mrf.mxu3  ;;  %v5399_v43 = vadd.f32 %v5398_v62, %v12998_v7  ;;  %v5563_v49 = vpop.f32.mrf.mxu2  ;;  %v12999_v7 = vld [vmem:[#allocation11_spill] sm:$0xff] }
 0xaa4   : > { %6297 = vmax.xlane.f32.xlu1 %v6296_v5  ;;  %v5486_v17 = vpop.f32.mrf.mxu1  ;;  %v5870_v5 = vmul.f32 0.2, %v5484_v53  ;;  %v5619_v21 = vadd.f32 %v5618_v9, %v11261_v28 }
 0xaa5   : > { %v5487_v44 = vadd.f32 %v5486_v17, %v11044_v35  ;;  %v7523_v35 = vld [vmem:[%s12590_s3 + $0x68] sm:$0xff]  ;;  %v5836_v63 = vmul.f32 0.2, %v5399_v43  ;;  %vm5708_vm7 = vcmp.gt.f32.partialorder %v5399_v43, 0.0 }
 0xaa6   : > { %v5998_v42 = vsel %vm5742_vm5, %v5484_v53, %v5870_v5  ;;  %v5924_v17 = vmul.f32 0.2, %v5619_v21  ;;  %vm5796_vm1 = vcmp.gt.f32.partialorder %v5619_v21, 0.0 }
 0xaa7   : > { %5440 = vmatmul.bf16.gmra.mxu0 %v7522_v6  ;;  %5525 = vmatmul.bf16.gmra.mxu1 %v7539_v32  ;;  %v5401_v6 = vpop.f32.mrf.mxu0  ;;  %v6302_v32 = vsel %vm6085_vm8, %v6029_v52, -inf  ;;  %v5871_v61 = vmul.f32 0.2, %v5487_v44  ;;  %vm5743_vm6 = vcmp.gt.f32.partialorder %v5487_v44, 0.0  ;;  %v5964_v33 = vsel %vm5708_vm7, %v5399_v43, %v5836_v63 }
 0xaa8   : > { %5660 = vmatmul.bf16.gmra.mxu3 %v7566_v22  ;;  %v11372_v22 = vpop.permute.xlu0 %4850  ;;  %v6209_v2 = vsel %vm6085_vm8, %v5998_v42, -inf  ;;  %v5402_v43 = vadd.f32 %v5401_v6, %v12999_v7 }
 0xaa9   : > { %v5999_v11 = vsel %vm5743_vm6, %v5487_v44, %v5871_v61 }
 0xaaa   : > { %v6212_v9 = vsel %vm6085_vm8, %v5999_v11, -inf  ;;  %vm5709_vm12 = vcmp.gt.f32.partialorder %v5402_v43, 0.0 }
 0xaab   : > { %6105 = vmax.xlane.f32.xlu0 %v6104_v51  ;;  %6102 = vmax.xlane.f32.xlu2 %v6101_v41  ;;  %v5621_v26 = vpop.f32.mrf.mxu3  ;;  %v11384_v51 = vpop.permute.xlu1 %4930  ;;  %v5564_v41 = vadd.f32 %v5563_v49, %v11186_v48  ;;  %v6107_v48 = vsel %vm6085_vm8, %v5964_v33, -inf  ;;  %v13000_v49 = vld [vmem:[#allocation25_spill] sm:$0xff] }
 0xaac   : > { %6207 = vmax.xlane.f32.xlu1 %v6206_v57  ;;  %v5622_v62 = vadd.f32 %v5621_v26, %v4831_v58  ;;  %v5488_v45 = vpop.f32.mrf.mxu1  ;;  %v11387_v57 = vpop.permute.xlu2 %4845  ;;  %v7721_v58 = vmov -inf  }
 0xaad   : > { %v5566_v28 = vpop.f32.mrf.mxu2  ;;  %254 = vst.msk [vmem:[%s11382_s9] sm:$0xff] %vm253_vm9, %v7721_v58  ;;  %v5902_v44 = vmul.f32 0.2, %v5564_v41  ;;  %vm5774_vm11 = vcmp.gt.f32.partialorder %v5564_v41, 0.0 }
 0xaae   : > { %v5925_v53 = vmul.f32 0.2, %v5622_v62  ;;  %vm5797_vm10 = vcmp.gt.f32.partialorder %v5622_v62, 0.0  ;;  %255 = vst.msk [vmem:[%s11382_s9 + $0x8] sm:$0xff] %vm253_vm9, %v7721_v58 }
 0xaaf   : > { %v5403_v52 = vpop.f32.mrf.mxu0  ;;  %256 = vst.msk [vmem:[%s11382_s9 + $0x10] sm:$0xff] %vm253_vm9, %v7721_v58 }
 0xab0   : > { %v11401_v38 = vpop.permute.xlu0 %4865  ;;  %257 = vst.msk [vmem:[%s11382_s9 + $0x18] sm:$0xff] %vm253_vm9, %v7721_v58  ;;  %v5404_v29 = vadd.f32 %v5403_v52, %v13000_v49  ;;  %v6053_v5 = vsel %vm5797_vm10, %v5622_v62, %v5925_v53  ;;  %v7541_v62 = vld [vmem:[%s12590_s3 + $0xf8] sm:$0xff] }
 0xab1   : > { %258 = vst.msk [vmem:[%s11382_s9 + $0x20] sm:$0xff] %vm253_vm9, %v7721_v58  ;;  %v6374_v63 = vsel %vm6085_vm8, %v6053_v5, -inf }
 0xab2   : > { %259 = vst.msk [vmem:[%s11382_s9 + $0x28] sm:$0xff] %vm253_vm9, %v7721_v58  ;;  %v5838_v42 = vmul.f32 0.2, %v5404_v29  ;;  %vm5710_vm0 = vcmp.gt.f32.partialorder %v5404_v29, 0.0 }
 0xab3   : > { %6303 = vmax.xlane.f32.xlu0 %v6302_v32  ;;  %6300 = vmax.xlane.f32.xlu2 %v6299_v36  ;;  %v6052_v32 = vsel %vm5796_vm1, %v5619_v21, %v5924_v17  ;;  %v5489_v36 = vadd.f32 %v5488_v45, %v11040_v3  ;;  %v5623_v61 = vpop.f32.mrf.mxu3  ;;  %260 = vst.msk [vmem:[%s11382_s9 + $0x30] sm:$0xff] %vm253_vm9, %v7721_v58  ;;  %v11418_v6 = vpop.permute.xlu1 %4945  ;;  %v7524_v3 = vld [vmem:[%s12590_s3 + $0x70] sm:$0xff] }
 0xab4   : > { %6369 = vmax.xlane.f32.xlu1 %v6368_v27  ;;  %v6030_v27 = vsel %vm5774_vm11, %v5564_v41, %v5902_v44  ;;  %v6371_v26 = vsel %vm6085_vm8, %v6052_v32, -inf  ;;  %261 = vst.msk [vmem:[%s11382_s9 + $0x38] sm:$0xff] %vm253_vm9, %v7721_v58  ;;  %v7568_v45 = vld [vmem:[%s12590_s3 + $0x1d0] sm:$0xff]  ;;  %v5966_v17 = vsel %vm5710_vm0, %v5404_v29, %v5838_v42 }
 0xab5   : > { %v6305_v21 = vsel %vm6085_vm8, %v6030_v27, -inf  ;;  %262 = vst.msk [vmem:[%s11382_s9 + $0x40] sm:$0xff] %vm253_vm9, %v7721_v58  ;;  %v5872_v11 = vmul.f32 0.2, %v5489_v36  ;;  %v5568_v41 = vpop.f32.mrf.mxu2  ;;  %vm5744_vm13 = vcmp.gt.f32.partialorder %v5489_v36, 0.0 }
 0xab6   : > { %263 = vst.msk [vmem:[%s11382_s9 + $0x48] sm:$0xff] %vm253_vm9, %v7721_v58 }
 0xab7   : > { %5445 = vmatmul.bf16.gmra.mxu0 %v7523_v35  ;;  %5530 = vmatmul.bf16.gmra.mxu1 %v7540_v30  ;;  %v5837_v35 = vmul.f32 0.2, %v5402_v43  ;;  %v5491_v30 = vpop.f32.mrf.mxu1  ;;  %264 = vst.msk [vmem:[%s11382_s9 + $0x50] sm:$0xff] %vm253_vm9, %v7721_v58  ;;  %v6000_v44 = vsel %vm5744_vm13, %v5489_v36, %v5872_v11  ;;  %v5406_v32 = vpop.f32.mrf.mxu0 }
 0xab8   : > { %5665 = vmatmul.bf16.gmra.mxu3 %v7567_v37  ;;  %v11428_v37 = vpop.permute.xlu2 %4860  ;;  %265 = vst.msk [vmem:[%s11382_s9 + $0x58] sm:$0xff] %vm253_vm9, %v7721_v58  ;;  %v11454_v53 = vpop.permute.xlu0 %4880  ;;  %v6215_v7 = vsel %vm6085_vm8, %v6000_v44, -inf  ;;  %v5492_v36 = vadd.f32 %v5491_v30, %v11022_v59 }
 0xab9   : > { %v5965_v33 = vsel %vm5709_vm12, %v5402_v43, %v5837_v35  ;;  %266 = vst.msk [vmem:[%s11382_s9 + $0x60] sm:$0xff] %vm253_vm9, %v7721_v58 }
 0xaba   : > { %267 = vst.msk [vmem:[%s11382_s9 + $0x68] sm:$0xff] %vm253_vm9, %v7721_v58  ;;  %v5873_v30 = vmul.f32 0.2, %v5492_v36  ;;  %vm5745_vm3 = vcmp.gt.f32.partialorder %v5492_v36, 0.0 }
 0xabb   : > { %6213 = vmax.xlane.f32.xlu0 %v6212_v9  ;;  %6210 = vmax.xlane.f32.xlu2 %v6209_v2  ;;  %v5567_v9 = vadd.f32 %v5566_v28, %v11166_v55  ;;  %v5569_v2 = vadd.f32 %v5568_v41, %v11206_v40  ;;  %268 = vst.msk [vmem:[%s11382_s9 + $0x70] sm:$0xff] %vm253_vm9, %v7721_v58  ;;  %v5626_v55 = vpop.f32.mrf.mxu3  ;;  %v6113_v40 = vsel %vm6085_vm8, %v5966_v17, -inf  ;;  %v6110_v28 = vsel %vm6085_vm8, %v5965_v33, -inf  ;;  %v11472_v43 = vpop.permute.xlu1 %4960  ;;  %v7542_v41 = vld [vmem:[%s12590_s3 + $0x100] sm:$0xff] }
 0xabc   : > { %6108 = vmax.xlane.f32.xlu1 %v6107_v48  ;;  %v5624_v48 = vadd.f32 %v5623_v61, %v11353_v1  ;;  %269 = vst.msk [vmem:[%s11382_s9 + $0x78] sm:$0xff] %vm253_vm9, %v7721_v58 }
 0xabd   : > { %v5903_v52 = vmul.f32 0.2, %v5567_v9  ;;  %v5904_v1 = vmul.f32 0.2, %v5569_v2  ;;  %270 = vst.msk [vmem:[%s11382_s9 + $0x80] sm:$0xff] %vm253_vm9, %v7721_v58  ;;  %vm5776_vm14 = vcmp.gt.f32.partialorder %v5569_v2, 0.0 }
 0xabe   : > { %v5926_v49 = vmul.f32 0.2, %v5624_v48  ;;  %vm5775_vm15 = vcmp.gt.f32.partialorder %v5567_v9, 0.0  ;;  %271 = vst.msk [vmem:[%s11382_s9 + $0x88] sm:$0xff] %vm253_vm9, %v7721_v58  ;;  %vm5798_vm2 = vcmp.gt.f32.partialorder %v5624_v48, 0.0 }
 0xabf   : > { %v5493_v29 = vpop.f32.mrf.mxu1  ;;  %272 = vst.msk [vmem:[%s11382_s9 + $0x90] sm:$0xff] %vm253_vm9, %v7721_v58  ;;  %v6032_v27 = vsel %vm5776_vm14, %v5569_v2, %v5904_v1  ;;  %v6031_v35 = vsel %vm5775_vm15, %v5567_v9, %v5903_v52  ;;  %v7569_v9 = vld [vmem:[%s12590_s3 + $0x1d8] sm:$0xff]  ;;  %v5571_v2 = vpop.f32.mrf.mxu2 }
 0xac0   : > { %v11477_v5 = vpop.permute.xlu2 %4875  ;;  %273 = vst.msk [vmem:[%s11382_s9 + $0x98] sm:$0xff] %vm253_vm9, %v7721_v58  ;;  %v5494_v61 = vadd.f32 %v5493_v29, %v11074_v56  ;;  %v11497_v59 = vpop.permute.xlu0 %4895  ;;  %v6311_v56 = vsel %vm6085_vm8, %v6032_v27, -inf  ;;  %v6308_v42 = vsel %vm6085_vm8, %v6031_v35, -inf  ;;  %v5572_v1 = vadd.f32 %v5571_v2, %v11204_v0 }
 0xac1   : > { %274 = vst.msk [vmem:[%s11382_s9 + $0xa0] sm:$0xff] %vm253_vm9, %v7721_v58 }
 0xac2   : > { %275 = vst.msk [vmem:[%s11382_s9 + $0xa8] sm:$0xff] %vm253_vm9, %v7721_v58  ;;  %vm5746_vm4 = vcmp.gt.f32.partialorder %v5494_v61, 0.0  ;;  %vm5777_vm10 = vcmp.gt.f32.partialorder %v5572_v1, 0.0 }
 0xac3   : > { %6375 = vmax.xlane.f32.xlu0 %v6374_v63  ;;  %6372 = vmax.xlane.f32.xlu2 %v6371_v26  ;;  %v13001_v63 = vld [vmem:[#allocation23_spill] sm:$0xff]  ;;  %276 = vst.msk [vmem:[%s11382_s9 + $0xb0] sm:$0xff] %vm253_vm9, %v7721_v58  ;;  %v5628_v33 = vpop.f32.mrf.mxu3  ;;  %v11523_v17 = vpop.permute.xlu1 %4975 }
 0xac4   : > { %6306 = vmax.xlane.f32.xlu1 %v6305_v21  ;;  %v5407_v26 = vadd.f32 %v5406_v32, %v13001_v63  ;;  %v7525_v21 = vld [vmem:[%s12590_s3 + $0x78] sm:$0xff]  ;;  %277 = vst.msk [vmem:[%s11382_s9 + $0xb8] sm:$0xff] %vm253_vm9, %v7721_v58  ;;  %v5905_v32 = vmul.f32 0.2, %v5572_v1 }
 0xac5   : > { %278 = vst.msk [vmem:[%s11382_s9 + $0xc0] sm:$0xff] %vm253_vm9, %v7721_v58 }
 0xac6   : > { %279 = vst.msk [vmem:[%s11382_s9 + $0xc8] sm:$0xff] %vm253_vm9, %v7721_v58  ;;  %vm5711_vm5 = vcmp.gt.f32.partialorder %v5407_v26, 0.0 }
 0xac7   : > { %5450 = vmatmul.bf16.gmra.mxu0 %v7524_v3  ;;  %5535 = vmatmul.bf16.gmra.mxu1 %v7541_v62  ;;  %v6054_v3 = vsel %vm5798_vm2, %v5624_v48, %v5926_v49  ;;  %v5874_v62 = vmul.f32 0.2, %v5494_v61  ;;  %280 = vst.msk [vmem:[%s11382_s9 + $0xd0] sm:$0xff] %vm253_vm9, %v7721_v58  ;;  %v6001_v48 = vsel %vm5745_vm3, %v5492_v36, %v5873_v30  ;;  %v6470_v36 = vld [vmem:[%s11382_s9] sm:$0xff] }
 0xac8   : > { %5670 = vmatmul.bf16.gmra.mxu3 %v7568_v45  ;;  %v6377_v11 = vsel %vm6085_vm8, %v6054_v3, -inf  ;;  %v5839_v45 = vmul.f32 0.2, %v5407_v26  ;;  %281 = vst.msk [vmem:[%s11382_s9 + $0xd8] sm:$0xff] %vm253_vm9, %v7721_v58  ;;  %v11528_v44 = vpop.permute.xlu2 %4890  ;;  %v11551_v29 = vpop.permute.xlu0 %4910 }
 0xac9   : > { %v6002_v52 = vsel %vm5746_vm4, %v5494_v61, %v5874_v62  ;;  %282 = vst.msk [vmem:[%s11382_s9 + $0xe0] sm:$0xff] %vm253_vm9, %v7721_v58  ;;  %v5408_v62 = vpop.f32.mrf.mxu0 }
 0xaca   : > { %283 = vst.msk [vmem:[%s11382_s9 + $0xe8] sm:$0xff] %vm253_vm9, %v7721_v58 }
 0xacb   : > { %6114 = vmax.xlane.f32.xlu0 %v6113_v40  ;;  %6111 = vmax.xlane.f32.xlu2 %v6110_v28  ;;  %v5627_v40 = vadd.f32 %v5626_v55, %v11284_v23  ;;  %v5629_v28 = vadd.f32 %v5628_v33, %v11387_v57  ;;  %284 = vst.msk [vmem:[%s11382_s9 + $0xf0] sm:$0xff] %vm253_vm9, %v7721_v58  ;;  %v6221_v23 = vsel %vm6085_vm8, %v6002_v52, -inf  ;;  %v6218_v57 = vsel %vm6085_vm8, %v6001_v48, -inf  ;;  %v5573_v33 = vpop.f32.mrf.mxu2 }
 0xacc   : > { %6216 = vmax.xlane.f32.xlu1 %v6215_v7  ;;  %v5967_v7 = vsel %vm5711_vm5, %v5407_v26, %v5839_v45  ;;  %285 = vst.msk [vmem:[%s11382_s9 + $0xf8] sm:$0xff] %vm253_vm9, %v7721_v58  ;;  %v6033_v26 = vsel %vm5777_vm10, %v5572_v1, %v5905_v32  ;;  %v5574_v52 = vadd.f32 %v5573_v33, %v11184_v18  ;;  %v5631_v1 = vpop.f32.mrf.mxu3 }
 0xacd   : > { %v5927_v55 = vmul.f32 0.2, %v5627_v40  ;;  %v5928_v0 = vmul.f32 0.2, %v5629_v28  ;;  %v6116_v49 = vsel %vm6085_vm8, %v5967_v7, -inf  ;;  %286 = vst.msk [vmem:[%s11382_s9 + $0x100] sm:$0xff] %vm253_vm9, %v7721_v58 }
 0xace   : > { %287 = vst.msk [vmem:[%s11382_s9 + $0x108] sm:$0xff] %vm253_vm9, %v7721_v58  ;;  %vm5800_vm6 = vcmp.gt.f32.partialorder %v5629_v28, 0.0  ;;  %vm5799_vm7 = vcmp.gt.f32.partialorder %v5627_v40, 0.0  ;;  %v13003_v7 = vld [vmem:[#allocation27_spill] sm:$0xff]  ;;  %v5906_v18 = vmul.f32 0.2, %v5574_v52 }
 0xacf   : > { %288 = vst.msk [vmem:[%s11382_s9 + $0x110] sm:$0xff] %vm253_vm9, %v7721_v58  ;;  %v6056_v35 = vsel %vm5800_vm6, %v5629_v28, %v5928_v0  ;;  %v6055_v63 = vsel %vm5799_vm7, %v5627_v40, %v5927_v55  ;;  %vm5778_vm11 = vcmp.gt.f32.partialorder %v5574_v52, 0.0 }
 0xad0   : > { %289 = vst.msk [vmem:[%s11382_s9 + $0x118] sm:$0xff] %vm253_vm9, %v7721_v58  ;;  %v11569_v3 = vpop.permute.xlu2 %4905  ;;  %v6383_v30 = vsel %vm6085_vm8, %v6056_v35, -inf }
 0xad1   : > { %290 = vst.msk [vmem:[%s11382_s9 + $0x120] sm:$0xff] %vm253_vm9, %v7721_v58  ;;  %v5411_v48 = vpop.f32.mrf.mxu0 }
 0xad2   : > { %291 = vst.msk [vmem:[%s11382_s9 + $0x128] sm:$0xff] %vm253_vm9, %v7721_v58 }
 0xad3   : > { %6312 = vmax.xlane.f32.xlu0 %v6311_v56  ;;  %6309 = vmax.xlane.f32.xlu2 %v6308_v42  ;;  %292 = vst.msk [vmem:[%s11382_s9 + $0x130] sm:$0xff] %vm253_vm9, %v7721_v58  ;;  %v6380_v56 = vsel %vm6085_vm8, %v6055_v63, -inf  ;;  %v6314_v42 = vsel %vm6085_vm8, %v6033_v26, -inf  ;;  %v5632_v63 = vadd.f32 %v5631_v1, %v11372_v22  ;;  %v6034_v26 = vsel %vm5778_vm11, %v5574_v52, %v5906_v18  ;;  %v13004_v52 = vld [vmem:[#allocation26_spill] sm:$0xff] }
 0xad4   : > { %6378 = vmax.xlane.f32.xlu1 %v6377_v11  ;;  %293 = vst.msk [vmem:[%s11382_s9 + $0x138] sm:$0xff] %vm253_vm9, %v7721_v58 }
 0xad5   : > { %294 = vst.msk [vmem:[%s11382_s9 + $0x140] sm:$0xff] %vm253_vm9, %v7721_v58  ;;  %v5929_v33 = vmul.f32 0.2, %v5632_v63  ;;  %vm5801_vm14 = vcmp.gt.f32.partialorder %v5632_v63, 0.0 }
 0xad6   : > { %295 = vst.msk [vmem:[%s11382_s9 + $0x148] sm:$0xff] %vm253_vm9, %v7721_v58 }
 0xad7   : > { %5455 = vmatmul.bf16.gmra.mxu0 %v7525_v21  ;;  %5540 = vmatmul.bf16.gmra.mxu1 %v7542_v41  ;;  %v11588_v21 = vpop.permute.xlu0 %4925  ;;  %296 = vst.msk [vmem:[%s11382_s9 + $0x150] sm:$0xff] %vm253_vm9, %v7721_v58  ;;  %v13002_v41 = vld [vmem:[#allocation13_spill] sm:$0xff] }
 0xad8   : > { %5675 = vmatmul.bf16.gmra.mxu3 %v7569_v9  ;;  %297 = vst.msk [vmem:[%s11382_s9 + $0x158] sm:$0xff] %vm253_vm9, %v7721_v58  ;;  %v11605_v11 = vpop.permute.xlu2 %4920  ;;  %v5409_v45 = vadd.f32 %v5408_v62, %v13002_v41  ;;  %v5496_v9 = vpop.f32.mrf.mxu1 }
 0xad9   : > { %298 = vst.msk [vmem:[%s11382_s9 + $0x160] sm:$0xff] %vm253_vm9, %v7721_v58 }
 0xada   : > { %299 = vst.msk [vmem:[%s11382_s9 + $0x168] sm:$0xff] %vm253_vm9, %v7721_v58  ;;  %v5840_v40 = vmul.f32 0.2, %v5409_v45  ;;  %vm5712_vm1 = vcmp.gt.f32.partialorder %v5409_v45, 0.0 }
 0xadb   : > { %6222 = vmax.xlane.f32.xlu0 %v6221_v23  ;;  %6219 = vmax.xlane.f32.xlu2 %v6218_v57  ;;  %300 = vst.msk [vmem:[%s11382_s9 + $0x170] sm:$0xff] %vm253_vm9, %v7721_v58  ;;  %v5412_v23 = vadd.f32 %v5411_v48, %v13003_v7  ;;  %v5497_v57 = vadd.f32 %v5496_v9, %v11056_v12 }
 0xadc   : > { %6117 = vmax.xlane.f32.xlu1 %v6116_v49  ;;  %301 = vst.msk [vmem:[%s11382_s9 + $0x178] sm:$0xff] %vm253_vm9, %v7721_v58  ;;  %v5968_v55 = vsel %vm5712_vm1, %v5409_v45, %v5840_v40  ;;  %v5576_v49 = vpop.f32.mrf.mxu2 }
 0xadd   : > { %302 = vst.msk [vmem:[%s11382_s9 + $0x180] sm:$0xff] %vm253_vm9, %v7721_v58  ;;  %v6119_v0 = vsel %vm6085_vm8, %v5968_v55, -inf  ;;  %v5577_v35 = vadd.f32 %v5576_v49, %v11218_v20  ;;  %vm5713_vm12 = vcmp.gt.f32.partialorder %v5412_v23, 0.0  ;;  %vm5747_vm0 = vcmp.gt.f32.partialorder %v5497_v57, 0.0 }
 0xade   : > { %v6088_v61 = vpop.xlane.xlu1 %6087  ;;  %303 = vst.msk [vmem:[%s11382_s9 + $0x188] sm:$0xff] %vm253_vm9, %v7721_v58 }
 0xadf   : > { %v6598_v27 = vmax.f32 %v6470_v36, %v6088_v61  ;;  %304 = vst.msk [vmem:[%s11382_s9 + $0x190] sm:$0xff] %vm253_vm9, %v7721_v58  ;;  %v11623_v2 = vpop.permute.xlu0 %4940  ;;  %v5841_v36 = vmul.f32 0.2, %v5412_v23  ;;  %v5875_v61 = vmul.f32 0.2, %v5497_v57  ;;  %vm5779_vm13 = vcmp.gt.f32.partialorder %v5577_v35, 0.0 }
 0xae0   : > { %305 = vst.msk [vmem:[%s11382_s9 + $0x198] sm:$0xff] %vm253_vm9, %v7721_v58  ;;  %v11640_v28 = vpop.permute.xlu2 %4935  ;;  %v5498_v32 = vpop.f32.mrf.mxu1  ;;  %v5907_v45 = vmul.f32 0.2, %v5577_v35 }
 0xae1   : > { %6727 = vst.msk [vmem:[%s11382_s9] sm:$0xff] %vm253_vm9, %v6598_v27  ;;  %v5413_v27 = vpop.f32.mrf.mxu0  ;;  %v6003_v20 = vsel %vm5747_vm0, %v5497_v57, %v5875_v61  ;;  %v6057_v57 = vsel %vm5801_vm14, %v5632_v63, %v5929_v33 }
 0xae2   : > { %306 = vst.msk [vmem:[%s11382_s9 + $0x1a0] sm:$0xff] %vm253_vm9, %v7721_v58  ;;  %v6224_v41 = vsel %vm6085_vm8, %v6003_v20, -inf  ;;  %v5414_v1 = vadd.f32 %v5413_v27, %v13004_v52  ;;  %v13005_v20 = vld [vmem:[#allocation21_spill] sm:$0xff] }
 0xae3   : > { %6384 = vmax.xlane.f32.xlu0 %v6383_v30  ;;  %6381 = vmax.xlane.f32.xlu2 %v6380_v56  ;;  %307 = vst.msk [vmem:[%s11382_s9 + $0x1a8] sm:$0xff] %vm253_vm9, %v7721_v58  ;;  %v5499_v30 = vadd.f32 %v5498_v32, %v11033_v13  ;;  %v5969_v56 = vsel %vm5713_vm12, %v5412_v23, %v5841_v36  ;;  %v6317_v13 = vsel %vm6085_vm8, %v6034_v26, -inf }
 0xae4   : > { %6315 = vmax.xlane.f32.xlu1 %v6314_v42  ;;  %308 = vst.msk [vmem:[%s11382_s9 + $0x1b0] sm:$0xff] %vm253_vm9, %v7721_v58  ;;  %v5633_v42 = vpop.f32.mrf.mxu3  ;;  %v6122_v62 = vsel %vm6085_vm8, %v5969_v56, -inf  ;;  %v5578_v7 = vpop.f32.mrf.mxu2  ;;  %v6035_v23 = vsel %vm5779_vm13, %v5577_v35, %v5907_v45  ;;  %v5842_v36 = vmul.f32 0.2, %v5414_v1  ;;  %vm5714_vm2 = vcmp.gt.f32.partialorder %v5414_v1, 0.0 }
 0xae5   : > { %309 = vst.msk [vmem:[%s11382_s9 + $0x1b8] sm:$0xff] %vm253_vm9, %v7721_v58  ;;  %v5876_v9 = vmul.f32 0.2, %v5499_v30  ;;  %vm5748_vm15 = vcmp.gt.f32.partialorder %v5499_v30, 0.0  ;;  %v5634_v55 = vadd.f32 %v5633_v42, %v11303_v34  ;;  %v6320_v32 = vsel %vm6085_vm8, %v6035_v23, -inf }
 0xae6   : > { %310 = vst.msk [vmem:[%s11382_s9 + $0x1c0] sm:$0xff] %vm253_vm9, %v7721_v58  ;;  %v6386_v34 = vsel %vm6085_vm8, %v6057_v57, -inf  ;;  %v5579_v26 = vadd.f32 %v5578_v7, %v11210_v47  ;;  %v5970_v56 = vsel %vm5714_vm2, %v5414_v1, %v5842_v36  ;;  %v13006_v57 = vld [vmem:[#allocation29_spill] sm:$0xff] }
 0xae7   : > { %311 = vst.msk [vmem:[%s11382_s9 + $0x1c8] sm:$0xff] %vm253_vm9, %v7721_v58  ;;  %v11661_v12 = vpop.permute.xlu0 %4955  ;;  %v6004_v49 = vsel %vm5748_vm15, %v5499_v30, %v5876_v9  ;;  %v5930_v27 = vmul.f32 0.2, %v5634_v55  ;;  %vm5802_vm3 = vcmp.gt.f32.partialorder %v5634_v55, 0.0  ;;  %v6125_v9 = vsel %vm6085_vm8, %v5970_v56, -inf }
 0xae8   : > { %312 = vst.msk [vmem:[%s11382_s9 + $0x1d0] sm:$0xff] %vm253_vm9, %v7721_v58  ;;  %v11681_v22 = vpop.permute.xlu2 %4950  ;;  %v5501_v48 = vpop.f32.mrf.mxu1  ;;  %vm5780_vm5 = vcmp.gt.f32.partialorder %v5579_v26, 0.0 }
 0xae9   : > { %313 = vst.msk [vmem:[%s11382_s9 + $0x1d8] sm:$0xff] %vm253_vm9, %v7721_v58  ;;  %v5502_v18 = vadd.f32 %v5501_v48, %v11080_v15  ;;  %v6227_v15 = vsel %vm6085_vm8, %v6004_v49, -inf  ;;  %v5908_v48 = vmul.f32 0.2, %v5579_v26 }
 0xaea   : > { %314 = vst.msk [vmem:[%s11382_s9 + $0x1e0] sm:$0xff] %vm253_vm9, %v7721_v58 }
 0xaeb   : > { %6120 = vmax.xlane.f32.xlu2 %v6119_v0  ;;  %315 = vst.msk [vmem:[%s11382_s9 + $0x1e8] sm:$0xff] %vm253_vm9, %v7721_v58  ;;  %6123 = vmax.xlane.f32.xlu0 %v6122_v62  ;;  %v5416_v0 = vpop.f32.mrf.mxu0  ;;  %v5877_v63 = vmul.f32 0.2, %v5502_v18  ;;  %vm5749_vm4 = vcmp.gt.f32.partialorder %v5502_v18, 0.0  ;;  %v6058_v62 = vsel %vm5802_vm3, %v5634_v55, %v5930_v27 }
 0xaec   : > { %316 = vst.msk [vmem:[%s11382_s9 + $0x1f0] sm:$0xff] %vm253_vm9, %v7721_v58  ;;  %6225 = vmax.xlane.f32.xlu1 %v6224_v41  ;;  %v5636_v35 = vpop.f32.mrf.mxu3  ;;  %v5417_v42 = vadd.f32 %v5416_v0, %v13005_v20  ;;  %v5581_v45 = vpop.f32.mrf.mxu2  ;;  %v6389_v1 = vsel %vm6085_vm8, %v6058_v62, -inf  ;;  %v7570_v62 = vld [vmem:[%s12590_s3 + $0x1e0] sm:$0xff] }
 0xaed   : > { %317 = vst.msk [vmem:[%s11382_s9 + $0x1f8] sm:$0xff] %vm253_vm9, %v7721_v58  ;;  %v5637_v30 = vadd.f32 %v5636_v35, %v11428_v37  ;;  %v6005_v47 = vsel %vm5749_vm4, %v5502_v18, %v5877_v63  ;;  %5680 = vmatmul.bf16.gmra.mxu3 %v7570_v62 }
 0xaee   : > { %318 = vst.msk [vmem:[%s11382_s9 + $0x200] sm:$0xff] %vm253_vm9, %v7721_v58  ;;  %v5843_v7 = vmul.f32 0.2, %v5417_v42  ;;  %vm5715_vm7 = vcmp.gt.f32.partialorder %v5417_v42, 0.0 }
 0xaef   : > { %319 = vst.msk [vmem:[%s11382_s9 + $0x208] sm:$0xff] %vm253_vm9, %v7721_v58  ;;  %v11701_v40 = vpop.permute.xlu0 %4970  ;;  %v5931_v52 = vmul.f32 0.2, %v5637_v30  ;;  %vm5803_vm6 = vcmp.gt.f32.partialorder %v5637_v30, 0.0 }
 0xaf0   : > { %320 = vst.msk [vmem:[%s11382_s9 + $0x210] sm:$0xff] %vm253_vm9, %v7721_v58  ;;  %v11724_v61 = vpop.permute.xlu2 %4965  ;;  %v5503_v33 = vpop.f32.mrf.mxu1  ;;  %v5971_v36 = vsel %vm5715_vm7, %v5417_v42, %v5843_v7  ;;  %v7526_v42 = vld [vmem:[%s12590_s3 + $0x80] sm:$0xff] }
 0xaf1   : > { %321 = vst.msk [vmem:[%s11382_s9 + $0x218] sm:$0xff] %vm253_vm9, %v7721_v58  ;;  %v5504_v0 = vadd.f32 %v5503_v33, %v11078_v54  ;;  %v6059_v49 = vsel %vm5803_vm6, %v5637_v30, %v5931_v52  ;;  %5460 = vmatmul.bf16.gmra.mxu0 %v7526_v42 }
 0xaf2   : > { %322 = vst.msk [vmem:[%s11382_s9 + $0x220] sm:$0xff] %vm253_vm9, %v7721_v58 }
 0xaf3   : > { %323 = vst.msk [vmem:[%s11382_s9 + $0x228] sm:$0xff] %vm253_vm9, %v7721_v58  ;;  %6318 = vmax.xlane.f32.xlu2 %v6317_v13  ;;  %6321 = vmax.xlane.f32.xlu0 %v6320_v32  ;;  %v5418_v37 = vpop.f32.mrf.mxu0  ;;  %v6230_v13 = vsel %vm6085_vm8, %v6005_v47, -inf  ;;  %v6036_v32 = vsel %vm5780_vm5, %v5579_v26, %v5908_v48  ;;  %v6128_v26 = vsel %vm6085_vm8, %v5971_v36, -inf  ;;  %vm5750_vm1 = vcmp.gt.f32.partialorder %v5504_v0, 0.0 }
 0xaf4   : > { %324 = vst.msk [vmem:[%s11382_s9 + $0x230] sm:$0xff] %vm253_vm9, %v7721_v58  ;;  %6387 = vmax.xlane.f32.xlu1 %v6386_v34  ;;  %v5419_v55 = vadd.f32 %v5418_v37, %v13006_v57  ;;  %v5638_v18 = vpop.f32.mrf.mxu3  ;;  %v5582_v34 = vadd.f32 %v5581_v45, %v11190_v10  ;;  %v6323_v27 = vsel %vm6085_vm8, %v6036_v32, -inf  ;;  %v5878_v10 = vmul.f32 0.2, %v5504_v0  ;;  %v5583_v63 = vpop.f32.mrf.mxu2  ;;  %v13007_v32 = vld [vmem:[#allocation28_spill] sm:$0xff] }
 0xaf5   : > { %325 = vst.msk [vmem:[%s11382_s9 + $0x238] sm:$0xff] %vm253_vm9, %v7721_v58  ;;  %v5584_v45 = vadd.f32 %v5583_v63, %v11230_v50  ;;  %v11810_v37 = vpop.xlane.xlu1 %6189  ;;  %v5639_v33 = vadd.f32 %v5638_v18, %v11401_v38 }
 0xaf6   : > { %326 = vst.msk [vmem:[%s11382_s9 + $0x240] sm:$0xff] %vm253_vm9, %v7721_v58  ;;  %v5844_v35 = vmul.f32 0.2, %v5419_v55  ;;  %v5909_v30 = vmul.f32 0.2, %v5582_v34  ;;  %vm5716_vm10 = vcmp.gt.f32.partialorder %v5419_v55, 0.0 }
 0xaf7   : > { %327 = vst.msk [vmem:[%s11382_s9 + $0x248] sm:$0xff] %vm253_vm9, %v7721_v58  ;;  %v11744_v41 = vpop.permute.xlu0 %4985  ;;  %vm5781_vm11 = vcmp.gt.f32.partialorder %v5582_v34, 0.0  ;;  %v5932_v57 = vmul.f32 0.2, %v5639_v33  ;;  %vm5782_vm12 = vcmp.gt.f32.partialorder %v5584_v45, 0.0  ;;  %vm5804_vm0 = vcmp.gt.f32.partialorder %v5639_v33, 0.0 }
 0xaf8   : > { %328 = vst.msk [vmem:[%s11382_s9 + $0x250] sm:$0xff] %vm253_vm9, %v7721_v58  ;;  %v11764_v23 = vpop.permute.xlu2 %4980  ;;  %v5506_v20 = vpop.f32.mrf.mxu1  ;;  %v6037_v48 = vsel %vm5781_vm11, %v5582_v34, %v5909_v30 }
 0xaf9   : > { %329 = vst.msk [vmem:[%s11382_s9 + $0x258] sm:$0xff] %vm253_vm9, %v7721_v58  ;;  %v5507_v50 = vadd.f32 %v5506_v20, %v11046_v25  ;;  %v5910_v25 = vmul.f32 0.2, %v5584_v45  ;;  %v6060_v63 = vsel %vm5804_vm0, %v5639_v33, %v5932_v57 }
 0xafa   : > { %330 = vst.msk [vmem:[%s11382_s9 + $0x260] sm:$0xff] %vm253_vm9, %v7721_v58  ;;  %v6395_v62 = vsel %vm6085_vm8, %v6060_v63, -inf }
 0xafb   : > { %331 = vst.msk [vmem:[%s11382_s9 + $0x268] sm:$0xff] %vm253_vm9, %v7721_v58  ;;  %6228 = vmax.xlane.f32.xlu2 %v6227_v15  ;;  %6231 = vmax.xlane.f32.xlu0 %v6230_v13  ;;  %v6392_v15 = vsel %vm6085_vm8, %v6059_v49, -inf  ;;  %v5421_v56 = vpop.f32.mrf.mxu0  ;;  %v5972_v13 = vsel %vm5716_vm10, %v5419_v55, %v5844_v35  ;;  %v6326_v55 = vsel %vm6085_vm8, %v6037_v48, -inf  ;;  %vm5751_vm13 = vcmp.gt.f32.partialorder %v5507_v50, 0.0 }
 0xafc   : > { %332 = vst.msk [vmem:[%s11382_s9 + $0x270] sm:$0xff] %vm253_vm9, %v7721_v58  ;;  %6126 = vmax.xlane.f32.xlu1 %v6125_v9  ;;  %v6006_v9 = vsel %vm5750_vm1, %v5504_v0, %v5878_v10  ;;  %v5641_v52 = vpop.f32.mrf.mxu3  ;;  %v6131_v38 = vsel %vm6085_vm8, %v5972_v13, -inf  ;;  %v5879_v0 = vmul.f32 0.2, %v5507_v50  ;;  %v5422_v34 = vadd.f32 %v5421_v56, %v13007_v32 }
 0xafd   : > { %333 = vst.msk [vmem:[%s11382_s9 + $0x278] sm:$0xff] %vm253_vm9, %v7721_v58  ;;  %v6233_v7 = vsel %vm6085_vm8, %v6006_v9, -inf  ;;  %v6038_v10 = vsel %vm5782_vm12, %v5584_v45, %v5910_v25  ;;  %v7571_v45 = vld [vmem:[%s12590_s3 + $0x1e8] sm:$0xff] }
 0xafe   : > { %334 = vst.msk [vmem:[%s11382_s9 + $0x280] sm:$0xff] %vm253_vm9, %v7721_v58  ;;  %v6007_v30 = vsel %vm5751_vm13, %v5507_v50, %v5879_v0  ;;  %v5845_v20 = vmul.f32 0.2, %v5422_v34  ;;  %vm5717_vm14 = vcmp.gt.f32.partialorder %v5422_v34, 0.0  ;;  %5685 = vmatmul.bf16.gmra.mxu3 %v7571_v45 }
 0xaff   : > { %335 = vst.msk [vmem:[%s11382_s9 + $0x288] sm:$0xff] %vm253_vm9, %v7721_v58  ;;  %v11784_v54 = vpop.xlane.xlu0 %6285  ;;  %v6236_v33 = vsel %vm6085_vm8, %v6007_v30, -inf }
 0xb00   : > { %336 = vst.msk [vmem:[%s11382_s9 + $0x290] sm:$0xff] %vm253_vm9, %v7721_v58  ;;  %v11808_v47 = vpop.xlane.xlu2 %6090  ;;  %v5508_v49 = vpop.f32.mrf.mxu1 }
 0xb01   : > { %337 = vst.msk [vmem:[%s11382_s9 + $0x298] sm:$0xff] %vm253_vm9, %v7721_v58  ;;  %v5509_v35 = vadd.f32 %v5508_v49, %v11098_v39  ;;  %v6329_v39 = vsel %vm6085_vm8, %v6038_v10, -inf }
 0xb02   : > { %338 = vst.msk [vmem:[%s11382_s9 + $0x2a0] sm:$0xff] %vm253_vm9, %v7721_v58 }
 0xb03   : > { %339 = vst.msk [vmem:[%s11382_s9 + $0x2a8] sm:$0xff] %vm253_vm9, %v7721_v58  ;;  %6390 = vmax.xlane.f32.xlu2 %v6389_v1  ;;  %6393 = vmax.xlane.f32.xlu0 %v6392_v15  ;;  %v5423_v18 = vpop.f32.mrf.mxu0  ;;  %v11846_v15 = vpop.xlane.xlu1 %6351  ;;  %vm5752_vm15 = vcmp.gt.f32.partialorder %v5509_v35, 0.0 }
 0xb04   : > { %340 = vst.msk [vmem:[%s11382_s9 + $0x2b0] sm:$0xff] %vm253_vm9, %v7721_v58  ;;  %6324 = vmax.xlane.f32.xlu1 %v6323_v27  ;;  %v5586_v27 = vpop.f32.mrf.mxu2  ;;  %v5643_v56 = vpop.f32.mrf.mxu3 }
 0xb05   : > { %341 = vst.msk [vmem:[%s11382_s9 + $0x2b8] sm:$0xff] %vm253_vm9, %v7721_v58  ;;  %v5644_v25 = vadd.f32 %v5643_v56, %v11477_v5  ;;  %v13009_v56 = vld [vmem:[#allocation31_spill] sm:$0xff] }
 0xb06   : > { %342 = vst.msk [vmem:[%s11382_s9 + $0x2c0] sm:$0xff] %vm253_vm9, %v7721_v58 }
 0xb07   : > { %343 = vst.msk [vmem:[%s11382_s9 + $0x2c8] sm:$0xff] %vm253_vm9, %v7721_v58  ;;  %v11826_v1 = vpop.xlane.xlu0 %6093  ;;  %vm5806_vm3 = vcmp.gt.f32.partialorder %v5644_v25, 0.0 }
 0xb08   : > { %344 = vst.msk [vmem:[%s11382_s9 + $0x2d0] sm:$0xff] %vm253_vm9, %v7721_v58  ;;  %v11844_v36 = vpop.xlane.xlu2 %6192  ;;  %v5511_v50 = vpop.f32.mrf.mxu1 }
 0xb09   : > { %345 = vst.msk [vmem:[%s11382_s9 + $0x2d8] sm:$0xff] %vm253_vm9, %v7721_v58 }
 0xb0a   : > { %346 = vst.msk [vmem:[%s11382_s9 + $0x2e0] sm:$0xff] %vm253_vm9, %v7721_v58 }
 0xb0b   : > { %347 = vst.msk [vmem:[%s11382_s9 + $0x2e8] sm:$0xff] %vm253_vm9, %v7721_v58  ;;  %6129 = vmax.xlane.f32.xlu2 %v6128_v26  ;;  %6132 = vmax.xlane.f32.xlu0 %v6131_v38  ;;  %v5642_v26 = vadd.f32 %v5641_v52, %v11312_v8  ;;  %v5880_v8 = vmul.f32 0.2, %v5509_v35  ;;  %v5426_v9 = vpop.f32.mrf.mxu0  ;;  %v11884_v52 = vpop.xlane.xlu1 %6288  ;;  %v5973_v38 = vsel %vm5717_vm14, %v5422_v34, %v5845_v20 }
 0xb0c   : > { %348 = vst.msk [vmem:[%s11382_s9 + $0x2f0] sm:$0xff] %vm253_vm9, %v7721_v58  ;;  %6234 = vmax.xlane.f32.xlu1 %v6233_v7  ;;  %v5587_v7 = vadd.f32 %v5586_v27, %v11228_v24  ;;  %v5588_v32 = vpop.f32.mrf.mxu2  ;;  %v11898_v34 = vpop.f32.mrf.mxu3  ;;  %v6134_v27 = vsel %vm6085_vm8, %v5973_v38, -inf  ;;  %v5427_v20 = vadd.f32 %v5426_v9, %v13009_v56 }
 0xb0d   : > { %349 = vst.msk [vmem:[%s11382_s9 + $0x2f8] sm:$0xff] %vm253_vm9, %v7721_v58  ;;  %v5933_v13 = vmul.f32 0.2, %v5642_v26  ;;  %vm5805_vm2 = vcmp.gt.f32.partialorder %v5642_v26, 0.0  ;;  %v6008_v57 = vsel %vm5752_vm15, %v5509_v35, %v5880_v8  ;;  %v5934_v35 = vmul.f32 0.2, %v5644_v25 }
 0xb0e   : > { %350 = vst.msk [vmem:[%s11382_s9 + $0x300] sm:$0xff] %vm253_vm9, %v7721_v58  ;;  %v6239_v5 = vsel %vm6085_vm8, %v6008_v57, -inf  ;;  %vm5783_vm4 = vcmp.gt.f32.partialorder %v5587_v7, 0.0  ;;  %v5512_v8 = vadd.f32 %v5511_v50, %v11096_v16  ;;  %v5589_v9 = vadd.f32 %v5588_v32, %v11208_v60  ;;  %v6471_v57 = vld [vmem:[%s11382_s9 + $0x8] sm:$0xff]  ;;  %v6505_v16 = vld [vmem:[%s11382_s9 + $0x118] sm:$0xff] }
 0xb0f   : > { %351 = vst.msk [vmem:[%s11382_s9 + $0x308] sm:$0xff] %vm253_vm9, %v7721_v58  ;;  %v11862_v42 = vpop.xlane.xlu0 %6195  ;;  %v6061_v49 = vsel %vm5805_vm2, %v5642_v26, %v5933_v13  ;;  %v6062_v45 = vsel %vm5806_vm3, %v5644_v25, %v5934_v35  ;;  %v6536_v13 = vld [vmem:[%s11382_s9 + $0x210] sm:$0xff]  ;;  %v5847_v50 = vmul.f32 0.2, %v5427_v20  ;;  %vm5719_vm6 = vcmp.gt.f32.partialorder %v5427_v20, 0.0 }
 0xb10   : > { %352 = vst.msk [vmem:[%s11382_s9 + $0x310] sm:$0xff] %vm253_vm9, %v7721_v58  ;;  %v11882_v48 = vpop.xlane.xlu2 %6354  ;;  %v6398_v10 = vsel %vm6085_vm8, %v6061_v49, -inf  ;;  %v11916_v30 = vpop.f32.mrf.mxu1  ;;  %v6472_v49 = vld [vmem:[%s11382_s9 + $0x10] sm:$0xff]  ;;  %v6401_v25 = vsel %vm6085_vm8, %v6062_v45, -inf  ;;  %v5881_v32 = vmul.f32 0.2, %v5512_v8 }
 0xb11   : > { %353 = vst.msk [vmem:[%s11382_s9 + $0x318] sm:$0xff] %vm253_vm9, %v7721_v58  ;;  %vm5753_vm7 = vcmp.gt.f32.partialorder %v5512_v8, 0.0  ;;  %vm5784_vm10 = vcmp.gt.f32.partialorder %v5589_v9, 0.0 }
 0xb12   : > { %354 = vst.msk [vmem:[%s11382_s9 + $0x320] sm:$0xff] %vm253_vm9, %v7721_v58 }
 0xb13   : > { %355 = vst.msk [vmem:[%s11382_s9 + $0x328] sm:$0xff] %vm253_vm9, %v7721_v58  ;;  %6327 = vmax.xlane.f32.xlu2 %v6326_v55  ;;  %6330 = vmax.xlane.f32.xlu0 %v6329_v39  ;;  %v13008_v55 = vld [vmem:[#allocation3_spill] sm:$0xff]  ;;  %v11914_v26 = vpop.f32.mrf.mxu0 }
 0xb14   : > { %356 = vst.msk [vmem:[%s11382_s9 + $0x330] sm:$0xff] %vm253_vm9, %v7721_v58  ;;  %6396 = vmax.xlane.f32.xlu1 %v6395_v62  ;;  %v5424_v0 = vadd.f32 %v5423_v18, %v13008_v55  ;;  %v5911_v18 = vmul.f32 0.2, %v5587_v7  ;;  %v11927_v62 = vpop.xlane.xlu1 %6198  ;;  %v6504_v55 = vld [vmem:[%s11382_s9 + $0x110] sm:$0xff] }
 0xb15   : > { %357 = vst.msk [vmem:[%s11382_s9 + $0x338] sm:$0xff] %vm253_vm9, %v7721_v58  ;;  %v6632_v45 = vmax.f32 %v6504_v55, %v11810_v37  ;;  %v5975_v37 = vsel %vm5719_vm6, %v5427_v20, %v5847_v50  ;;  %v6559_v55 = vld [vmem:[%s11382_s9 + $0x2c8] sm:$0xff]  ;;  %v6537_v20 = vld [vmem:[%s11382_s9 + $0x218] sm:$0xff] }
 0xb16   : > { %358 = vst.msk [vmem:[%s11382_s9 + $0x340] sm:$0xff] %vm253_vm9, %v7721_v58  ;;  %v5846_v63 = vmul.f32 0.2, %v5424_v0  ;;  %vm5718_vm5 = vcmp.gt.f32.partialorder %v5424_v0, 0.0 }
 0xb17   : > { %359 = vst.msk [vmem:[%s11382_s9 + $0x348] sm:$0xff] %vm253_vm9, %v7721_v58  ;;  %v11903_v24 = vpop.xlane.xlu0 %6357 }
 0xb18   : > { %360 = vst.msk [vmem:[%s11382_s9 + $0x350] sm:$0xff] %vm253_vm9, %v7721_v58  ;;  %v11925_v39 = vpop.xlane.xlu2 %6291  ;;  %v5974_v38 = vsel %vm5718_vm5, %v5424_v0, %v5846_v63  ;;  %v6664_v0 = vmax.f32 %v6536_v13, %v11784_v54  ;;  %v5912_v54 = vmul.f32 0.2, %v5589_v9  ;;  %v5516_v56 = vpop.f32.mrf.mxu1  ;;  %v6633_v13 = vmax.f32 %v6505_v16, %v11844_v36 }
 0xb19   : > { %361 = vst.msk [vmem:[%s11382_s9 + $0x358] sm:$0xff] %vm253_vm9, %v7721_v58  ;;  %v6137_v35 = vsel %vm6085_vm8, %v5974_v38, -inf  ;;  %v6506_v38 = vld [vmem:[%s11382_s9 + $0x120] sm:$0xff]  ;;  %v6009_v36 = vsel %vm5753_vm7, %v5512_v8, %v5881_v32  ;;  %v5514_v16 = vadd.f32 %v11916_v30, %v11076_v4  ;;  %v6507_v8 = vld [vmem:[%s11382_s9 + $0x128] sm:$0xff]  ;;  %v6140_v4 = vsel %vm6085_vm8, %v5975_v37, -inf  ;;  %v6561_v37 = vld [vmem:[%s11382_s9 + $0x2d8] sm:$0xff] }
 0xb1a   : > { %362 = vst.msk [vmem:[%s11382_s9 + $0x360] sm:$0xff] %vm253_vm9, %v7721_v58  ;;  %v6040_v50 = vsel %vm5784_vm10, %v5589_v9, %v5912_v54  ;;  %v6242_v30 = vsel %vm6085_vm8, %v6009_v36, -inf }
 0xb1b   : > { %363 = vst.msk [vmem:[%s11382_s9 + $0x368] sm:$0xff] %vm253_vm9, %v7721_v58  ;;  %6237 = vmax.xlane.f32.xlu2 %v6236_v33  ;;  %6240 = vmax.xlane.f32.xlu0 %v6239_v5  ;;  %v6039_v33 = vsel %vm5783_vm4, %v5587_v7, %v5911_v18  ;;  %v11944_v5 = vpop.f32.mrf.mxu3  ;;  %v7572_v18 = vld [vmem:[%s12590_s3 + $0x1f0] sm:$0xff]  ;;  %v11966_v63 = vpop.f32.mrf.mxu0  ;;  %vm5754_vm12 = vcmp.gt.f32.partialorder %v5514_v16, 0.0 }
 0xb1c   : > { %364 = vst.msk [vmem:[%s11382_s9 + $0x370] sm:$0xff] %vm253_vm9, %v7721_v58  ;;  %6135 = vmax.xlane.f32.xlu1 %v6134_v27  ;;  %v6332_v60 = vsel %vm6085_vm8, %v6039_v33, -inf  ;;  %v5591_v27 = vpop.f32.mrf.mxu2  ;;  %v6558_v33 = vld [vmem:[%s11382_s9 + $0x2c0] sm:$0xff]  ;;  %5690 = vmatmul.bf16.gmra.mxu3 %v7572_v18 }
 0xb1d   : > { %365 = vst.msk [vmem:[%s11382_s9 + $0x378] sm:$0xff] %vm253_vm9, %v7721_v58 }
 0xb1e   : > { %366 = vst.msk [vmem:[%s11382_s9 + $0x380] sm:$0xff] %vm253_vm9, %v7721_v58 }
 0xb1f   : > { %367 = vst.msk [vmem:[%s11382_s9 + $0x388] sm:$0xff] %vm253_vm9, %v7721_v58  ;;  %v11950_v7 = vpop.xlane.xlu0 %6294 }
 0xb20   : > { %368 = vst.msk [vmem:[%s11382_s9 + $0x390] sm:$0xff] %vm253_vm9, %v7721_v58  ;;  %v12023_v54 = vpop.f32.mrf.mxu1 }
 0xb21   : > { %369 = vst.msk [vmem:[%s11382_s9 + $0x398] sm:$0xff] %vm253_vm9, %v7721_v58 }
 0xb22   : > { %370 = vst.msk [vmem:[%s11382_s9 + $0x3a0] sm:$0xff] %vm253_vm9, %v7721_v58 }
 0xb23   : > { %371 = vst.msk [vmem:[%s11382_s9 + $0x3a8] sm:$0xff] %vm253_vm9, %v7721_v58  ;;  %6399 = vmax.xlane.f32.xlu2 %v6398_v10  ;;  %6402 = vmax.xlane.f32.xlu0 %v6401_v25  ;;  %v6599_v10 = vmax.f32 %v6471_v57, %v11808_v47  ;;  %v6600_v47 = vmax.f32 %v6472_v49, %v11826_v1  ;;  %v11979_v57 = vpop.xlane.xlu2 %6096  ;;  %v11981_v25 = vpop.xlane.xlu1 %6360 }
 0xb24   : > { %372 = vst.msk [vmem:[%s11382_s9 + $0x3b0] sm:$0xff] %vm253_vm9, %v7721_v58  ;;  %6333 = vmax.xlane.f32.xlu1 %v6332_v60  ;;  %v5647_v1 = vadd.f32 %v11898_v34, %v11454_v53  ;;  %v6686_v49 = vmax.f32 %v6558_v33, %v11846_v15  ;;  %v6560_v60 = vld [vmem:[%s11382_s9 + $0x2d0] sm:$0xff]  ;;  %v12002_v53 = vpop.f32.mrf.mxu3  ;;  %v6687_v34 = vmax.f32 %v6559_v55, %v11882_v48  ;;  %v6538_v15 = vld [vmem:[%s11382_s9 + $0x220] sm:$0xff]  ;;  %v6335_v48 = vsel %vm6085_vm8, %v6040_v50, -inf }
 0xb25   : > { %373 = vst.msk [vmem:[%s11382_s9 + $0x3b8] sm:$0xff] %vm253_vm9, %v7721_v58  ;;  %v6688_v18 = vmax.f32 %v6560_v60, %v11903_v24  ;;  %v6666_v33 = vmax.f32 %v6538_v15, %v11925_v39  ;;  %v6635_v24 = vmax.f32 %v6507_v8, %v11927_v62  ;;  %v5649_v62 = vadd.f32 %v11944_v5, %v11329_v19  ;;  %v6474_v15 = vld [vmem:[%s11382_s9 + $0x20] sm:$0xff]  ;;  %v6563_v5 = vld [vmem:[%s11382_s9 + $0x2e8] sm:$0xff] }
 0xb26   : > { %374 = vst.msk [vmem:[%s11382_s9 + $0x3c0] sm:$0xff] %vm253_vm9, %v7721_v58  ;;  %v5935_v32 = vmul.f32 0.2, %v5647_v1  ;;  %vm5807_vm11 = vcmp.gt.f32.partialorder %v5647_v1, 0.0 }
 0xb27   : > { %375 = vst.msk [vmem:[%s11382_s9 + $0x3c8] sm:$0xff] %vm253_vm9, %v7721_v58  ;;  %vm5808_vm14 = vcmp.gt.f32.partialorder %v5649_v62, 0.0 }
 0xb28   : > { %376 = vst.msk [vmem:[%s11382_s9 + $0x3d0] sm:$0xff] %vm253_vm9, %v7721_v58  ;;  %v6063_v50 = vsel %vm5807_vm11, %v5647_v1, %v5935_v32  ;;  %v12071_v32 = vpop.f32.mrf.mxu1 }
 0xb29   : > { %377 = vst.msk [vmem:[%s11382_s9 + $0x3d8] sm:$0xff] %vm253_vm9, %v7721_v58 }
 0xb2a   : > { %378 = vst.msk [vmem:[%s11382_s9 + $0x3e0] sm:$0xff] %vm253_vm9, %v7721_v58 }
 0xb2b   : > { %379 = vst.msk [vmem:[%s11382_s9 + $0x3e8] sm:$0xff] %vm253_vm9, %v7721_v58  ;;  %6138 = vmax.xlane.f32.xlu2 %v6137_v35  ;;  %6141 = vmax.xlane.f32.xlu0 %v6140_v4  ;;  %v6539_v35 = vld [vmem:[%s11382_s9 + $0x228] sm:$0xff]  ;;  %v6202_v55 = vpop.xlane.xlu2 %6201  ;;  %v6100_v36 = vpop.xlane.xlu1 %6099  ;;  %v7573_v4 = vld [vmem:[%s12590_s3 + $0x1f8] sm:$0xff] }
 0xb2c   : > { %380 = vst.msk [vmem:[%s11382_s9 + $0x3f0] sm:$0xff] %vm253_vm9, %v7721_v58  ;;  %6243 = vmax.xlane.f32.xlu1 %v6242_v30  ;;  %v6667_v39 = vmax.f32 %v6539_v35, %v11950_v7  ;;  %v6689_v7 = vmax.f32 %v6561_v37, %v11981_v25  ;;  %v5936_v30 = vmul.f32 0.2, %v5649_v62  ;;  %v13012_v35 = vld [vmem:[#allocation52_spill] sm:$0xff]  ;;  %v5652_v37 = vadd.f32 %v12002_v53, %v11528_v44 }
 0xb2d   : > { %381 = vst.msk [vmem:[%s11382_s9 + $0x3f8] sm:$0xff] %vm253_vm9, %v7721_v58  ;;  %v5592_v58 = vadd.f32 %v5591_v27, %v11250_v46  ;;  %v6634_v46 = vmax.f32 %v6506_v38, %v11862_v42  ;;  %v6665_v42 = vmax.f32 %v6537_v20, %v11884_v52  ;;  %v5882_v27 = vmul.f32 0.2, %v5514_v16  ;;  %v13010_v52 = vld [vmem:[#allocation30_spill] sm:$0xff]  ;;  %5695 = vmatmul.bf16.gmra.mxu3 %v7573_v4 }
 0xb2e   : > { %6793 = vst.msk [vmem:[%s11382_s9 + $0x210] sm:$0xff] %vm253_vm9, %v6664_v0  ;;  %v12009_v0 = vpop.xlane.xlu0 %6204  ;;  %vm5809_vm2 = vcmp.gt.f32.partialorder %v5652_v37, 0.0 }
 0xb2f   : > { %6728 = vst.msk [vmem:[%s11382_s9 + $0x8] sm:$0xff] %vm253_vm9, %v6599_v10  ;;  %v5913_v9 = vmul.f32 0.2, %v5592_v58  ;;  %v12021_v10 = vpop.f32.mrf.mxu0  ;;  %vm5785_vm1 = vcmp.gt.f32.partialorder %v5592_v58, 0.0  ;;  %v6010_v60 = vsel %vm5754_vm12, %v5514_v16, %v5882_v27  ;;  %v6404_v16 = vsel %vm6085_vm8, %v6063_v50, -inf  ;;  %v6540_v27 = vld [vmem:[%s11382_s9 + $0x230] sm:$0xff] }
 0xb30   : > { %6761 = vst.msk [vmem:[%s11382_s9 + $0x110] sm:$0xff] %vm253_vm9, %v6632_v45  ;;  %v5429_v45 = vadd.f32 %v11914_v26, %v13010_v52  ;;  %v5593_v26 = vpop.f32.mrf.mxu2 }
 0xb31   : > { %6729 = vst.msk [vmem:[%s11382_s9 + $0x10] sm:$0xff] %vm253_vm9, %v6600_v47  ;;  %v6473_v47 = vld [vmem:[%s11382_s9 + $0x18] sm:$0xff]  ;;  %v6041_v20 = vsel %vm5785_vm1, %v5592_v58, %v5913_v9  ;;  %v12053_v58 = vpop.f32.mrf.mxu3  ;;  %v5594_v52 = vadd.f32 %v5593_v26, %v13012_v35  ;;  %v13013_v26 = vld [vmem:[#allocation4_spill] sm:$0xff] }
 0xb32   : > { %6762 = vst.msk [vmem:[%s11382_s9 + $0x118] sm:$0xff] %vm253_vm9, %v6633_v13  ;;  %v13011_v13 = vld [vmem:[#allocation43_spill] sm:$0xff]  ;;  %vm5720_vm13 = vcmp.gt.f32.partialorder %v5429_v45, 0.0 }
 0xb33   : > { %6815 = vst.msk [vmem:[%s11382_s9 + $0x2c0] sm:$0xff] %vm253_vm9, %v6686_v49  ;;  %6336 = vmax.xlane.f32.xlu2 %v6335_v48  ;;  %v5517_v38 = vadd.f32 %v5516_v56, %v13011_v13  ;;  %v6509_v49 = vld [vmem:[%s11382_s9 + $0x138] sm:$0xff]  ;;  %v6601_v56 = vmax.f32 %v6473_v47, %v11979_v57  ;;  %v6338_v57 = vsel %vm6085_vm8, %v6041_v20, -inf  ;;  %v6562_v48 = vld [vmem:[%s11382_s9 + $0x2e0] sm:$0xff]  ;;  %v6298_v47 = vpop.xlane.xlu1 %6297  ;;  %v6064_v20 = vsel %vm5808_vm14, %v5649_v62, %v5936_v30 }
 0xb34   : > { %6763 = vst.msk [vmem:[%s11382_s9 + $0x120] sm:$0xff] %vm253_vm9, %v6634_v46  ;;  %v6508_v46 = vld [vmem:[%s11382_s9 + $0x130] sm:$0xff]  ;;  %v6637_v19 = vmax.f32 %v6509_v49, %v12009_v0  ;;  %6339 = vmax.xlane.f32.xlu0 %v6338_v57  ;;  %6405 = vmax.xlane.f32.xlu1 %v6404_v16  ;;  %v6245_v0 = vsel %vm6085_vm8, %v6010_v60, -inf  ;;  %v5914_v44 = vmul.f32 0.2, %v5594_v52  ;;  %vm5786_vm15 = vcmp.gt.f32.partialorder %v5594_v52, 0.0 }
 0xb35   : > { %6816 = vst.msk [vmem:[%s11382_s9 + $0x2c8] sm:$0xff] %vm253_vm9, %v6687_v34  ;;  %v5848_v34 = vmul.f32 0.2, %v5429_v45  ;;  %v5883_v1 = vmul.f32 0.2, %v5517_v38  ;;  %v6636_v25 = vmax.f32 %v6508_v46, %v6202_v55  ;;  %vm5755_vm0 = vcmp.gt.f32.partialorder %v5517_v38, 0.0 }
 0xb36   : > { %6794 = vst.msk [vmem:[%s11382_s9 + $0x218] sm:$0xff] %vm253_vm9, %v6665_v42  ;;  %v6367_v8 = vpop.xlane.xlu0 %6366  ;;  %v6602_v42 = vmax.f32 %v6474_v15, %v6100_v36  ;;  %v6668_v36 = vmax.f32 %v6540_v27, %v6298_v47  ;;  %v6476_v49 = vld [vmem:[%s11382_s9 + $0x30] sm:$0xff]  ;;  %v6407_v46 = vsel %vm6085_vm8, %v6064_v20, -inf  ;;  %v6510_v15 = vld [vmem:[%s11382_s9 + $0x140] sm:$0xff]  ;;  %v6042_v16 = vsel %vm5786_vm15, %v5594_v52, %v5914_v44  ;;  %v13017_v20 = vld [vmem:[#allocation53_spill] sm:$0xff] }
 0xb37   : > { %6817 = vst.msk [vmem:[%s11382_s9 + $0x2d0] sm:$0xff] %vm253_vm9, %v6688_v18  ;;  %v12069_v9 = vpop.f32.mrf.mxu0  ;;  %v6691_v18 = vmax.f32 %v6563_v5, %v6367_v8  ;;  %v5976_v13 = vsel %vm5720_vm13, %v5429_v45, %v5848_v34  ;;  %v6341_v47 = vsel %vm6085_vm8, %v6042_v16, -inf }
 0xb38   : > { %6795 = vst.msk [vmem:[%s11382_s9 + $0x220] sm:$0xff] %vm253_vm9, %v6666_v33  ;;  %v6364_v33 = vpop.xlane.xlu2 %6363  ;;  %v5596_v50 = vpop.f32.mrf.mxu2 }
 0xb39   : > { %6764 = vst.msk [vmem:[%s11382_s9 + $0x128] sm:$0xff] %vm253_vm9, %v6635_v24  ;;  %v6011_v24 = vsel %vm5755_vm0, %v5517_v38, %v5883_v1  ;;  %v6690_v55 = vmax.f32 %v6562_v48, %v6364_v33  ;;  %v12093_v45 = vpop.f32.mrf.mxu3  ;;  %v12106_v1 = vpop.f32.mrf.mxu1  ;;  %v13016_v48 = vld [vmem:[#allocation51_spill] sm:$0xff] }
 0xb3a   : > { %6796 = vst.msk [vmem:[%s11382_s9 + $0x228] sm:$0xff] %vm253_vm9, %v6667_v39  ;;  %v5432_v39 = vadd.f32 %v11966_v63, %v13013_v26  ;;  %v6248_v38 = vsel %vm6085_vm8, %v6011_v24, -inf  ;;  %v6143_v63 = vsel %vm6085_vm8, %v5976_v13, -inf  ;;  %v5597_v27 = vadd.f32 %v5596_v50, %v13016_v48  ;;  %v6477_v48 = vld [vmem:[%s11382_s9 + $0x38] sm:$0xff] }
 0xb3b   : > { %6730 = vst.msk [vmem:[%s11382_s9 + $0x18] sm:$0xff] %vm253_vm9, %v6601_v56  ;;  %6246 = vmax.xlane.f32.xlu2 %v6245_v0  ;;  %v5937_v56 = vmul.f32 0.2, %v5652_v37  ;;  %v6208_v57 = vpop.xlane.xlu1 %6207 }
 0xb3c   : > { %6818 = vst.msk [vmem:[%s11382_s9 + $0x2d8] sm:$0xff] %vm253_vm9, %v6689_v7  ;;  %6249 = vmax.xlane.f32.xlu0 %v6248_v38  ;;  %6144 = vmax.xlane.f32.xlu1 %v6143_v63  ;;  %v5849_v60 = vmul.f32 0.2, %v5432_v39  ;;  %v6475_v7 = vld [vmem:[%s11382_s9 + $0x28] sm:$0xff]  ;;  %vm5721_vm3 = vcmp.gt.f32.partialorder %v5432_v39, 0.0  ;;  %v6638_v30 = vmax.f32 %v6510_v15, %v6208_v57  ;;  %vm5787_vm6 = vcmp.gt.f32.partialorder %v5597_v27, 0.0 }
 0xb3d   : > { %6766 = vst.msk [vmem:[%s11382_s9 + $0x138] sm:$0xff] %vm253_vm9, %v6637_v19  ;;  %v13014_v19 = vld [vmem:[#allocation33_spill] sm:$0xff]  ;;  %v5654_v63 = vadd.f32 %v12053_v58, %v11497_v59 }
 0xb3e   : > { %6765 = vst.msk [vmem:[%s11382_s9 + $0x130] sm:$0xff] %vm253_vm9, %v6636_v25  ;;  %v6106_v53 = vpop.xlane.xlu0 %6105  ;;  %v5434_v5 = vadd.f32 %v12021_v10, %v13014_v19  ;;  %v13015_v25 = vld [vmem:[#allocation42_spill] sm:$0xff]  ;;  %v5977_v35 = vsel %vm5721_vm3, %v5432_v39, %v5849_v60  ;;  %v6541_v39 = vld [vmem:[%s11382_s9 + $0x238] sm:$0xff]  ;;  %v6512_v19 = vld [vmem:[%s11382_s9 + $0x150] sm:$0xff] }
 0xb3f   : > { %6731 = vst.msk [vmem:[%s11382_s9 + $0x20] sm:$0xff] %vm253_vm9, %v6602_v42  ;;  %v6604_v62 = vmax.f32 %v6476_v49, %v6106_v53  ;;  %v12102_v34 = vpop.f32.mrf.mxu0  ;;  %v5519_v4 = vadd.f32 %v12023_v54, %v13015_v25  ;;  %v6065_v42 = vsel %vm5809_vm2, %v5652_v37, %v5937_v56  ;;  %v6564_v49 = vld [vmem:[%s11382_s9 + $0x2f0] sm:$0xff]  ;;  %v5938_v25 = vmul.f32 0.2, %v5654_v63 }
 0xb40   : > { %6820 = vst.msk [vmem:[%s11382_s9 + $0x2e8] sm:$0xff] %vm253_vm9, %v6691_v18  ;;  %v6103_v8 = vpop.xlane.xlu2 %6102  ;;  %v6542_v18 = vld [vmem:[%s11382_s9 + $0x240] sm:$0xff]  ;;  %v5850_v10 = vmul.f32 0.2, %v5434_v5  ;;  %v6410_v54 = vsel %vm6085_vm8, %v6065_v42, -inf  ;;  %v5598_v13 = vpop.f32.mrf.mxu2  ;;  %vm5722_vm4 = vcmp.gt.f32.partialorder %v5434_v5, 0.0 }
 0xb41   : > { %6819 = vst.msk [vmem:[%s11382_s9 + $0x2e0] sm:$0xff] %vm253_vm9, %v6690_v55  ;;  %v6603_v0 = vmax.f32 %v6475_v7, %v6103_v8  ;;  %v12118_v33 = vpop.f32.mrf.mxu3  ;;  %v5884_v24 = vmul.f32 0.2, %v5519_v4  ;;  %v6146_v55 = vsel %vm6085_vm8, %v5977_v35, -inf  ;;  %vm5756_vm5 = vcmp.gt.f32.partialorder %v5519_v4, 0.0  ;;  %v12134_v56 = vpop.f32.mrf.mxu1  ;;  %v13018_v7 = vld [vmem:[#allocation20_spill] sm:$0xff] }
 0xb42   : > { %6797 = vst.msk [vmem:[%s11382_s9 + $0x230] sm:$0xff] %vm253_vm9, %v6668_v36  ;;  %v5915_v36 = vmul.f32 0.2, %v5597_v27  ;;  %v5599_v50 = vadd.f32 %v5598_v13, %v13017_v20  ;;  %v5978_v38 = vsel %vm5722_vm4, %v5434_v5, %v5850_v10  ;;  %v5522_v15 = vadd.f32 %v12071_v32, %v13018_v7  ;;  %v6511_v42 = vld [vmem:[%s11382_s9 + $0x148] sm:$0xff] }
 0xb43   : > { %6408 = vmax.xlane.f32.xlu2 %v6407_v46  ;;  %6733 = vst.msk [vmem:[%s11382_s9 + $0x30] sm:$0xff] %vm253_vm9, %v6604_v62  ;;  %v6370_v53 = vpop.xlane.xlu1 %6369  ;;  %v6012_v60 = vsel %vm5756_vm5, %v5519_v4, %v5884_v24  ;;  %v6149_v58 = vsel %vm6085_vm8, %v5978_v38, -inf  ;;  %vm5810_vm10 = vcmp.gt.f32.partialorder %v5654_v63, 0.0 }
 0xb44   : > { %6732 = vst.msk [vmem:[%s11382_s9 + $0x28] sm:$0xff] %vm253_vm9, %v6603_v0  ;;  %6411 = vmax.xlane.f32.xlu0 %v6410_v54  ;;  %6342 = vmax.xlane.f32.xlu1 %v6341_v47  ;;  %v6692_v46 = vmax.f32 %v6564_v49, %v6370_v53  ;;  %v6043_v8 = vsel %vm5787_vm6, %v5597_v27, %v5915_v36  ;;  %v5916_v5 = vmul.f32 0.2, %v5599_v50  ;;  %v6251_v16 = vsel %vm6085_vm8, %v6012_v60, -inf  ;;  %v13019_v27 = vld [vmem:[#allocation32_spill] sm:$0xff]  ;;  %v13020_v54 = vld [vmem:[#allocation45_spill] sm:$0xff] }
 0xb45   : > { %6767 = vst.msk [vmem:[%s11382_s9 + $0x140] sm:$0xff] %vm253_vm9, %v6638_v30  ;;  %vm5788_vm7 = vcmp.gt.f32.partialorder %v5599_v50, 0.0  ;;  %v6344_v32 = vsel %vm6085_vm8, %v6043_v8, -inf  ;;  %v5885_v0 = vmul.f32 0.2, %v5522_v15  ;;  %vm5757_vm1 = vcmp.gt.f32.partialorder %v5522_v15, 0.0 }
 0xb46   : > { %v6304_v52 = vpop.xlane.xlu0 %6303  ;;  %6821 = vst.msk [vmem:[%s11382_s9 + $0x2f0] sm:$0xff] %vm253_vm9, %v6692_v46  ;;  %v5524_v47 = vadd.f32 %v12106_v1, %v13020_v54  ;;  %v6566_v36 = vld [vmem:[%s11382_s9 + $0x300] sm:$0xff]  ;;  %v5659_v60 = vadd.f32 %v12118_v33, %v11569_v3  ;;  %v13021_v8 = vld [vmem:[#allocation44_spill] sm:$0xff]  ;;  %v6513_v54 = vld [vmem:[%s11382_s9 + $0x158] sm:$0xff] }
 0xb47   : > { %v6670_v37 = vmax.f32 %v6542_v18, %v6304_v52  ;;  %v12125_v26 = vpop.f32.mrf.mxu0  ;;  %v5437_v18 = vadd.f32 %v12069_v9, %v13019_v27  ;;  %v6044_v52 = vsel %vm5788_vm7, %v5599_v50, %v5916_v5  ;;  %v5527_v5 = vadd.f32 %v12134_v56, %v13021_v8 }
 0xb48   : > { %v6301_v44 = vpop.xlane.xlu2 %6300  ;;  %v6347_v50 = vsel %vm6085_vm8, %v6044_v52, -inf  ;;  %vm5758_vm12 = vcmp.gt.f32.partialorder %v5524_v47, 0.0  ;;  %v5940_v3 = vmul.f32 0.2, %v5659_v60  ;;  %vm5812_vm13 = vcmp.gt.f32.partialorder %v5659_v60, 0.0  ;;  %v6478_v52 = vld [vmem:[%s11382_s9 + $0x40] sm:$0xff] }
 0xb49   : > { %6799 = vst.msk [vmem:[%s11382_s9 + $0x240] sm:$0xff] %vm253_vm9, %v6670_v37  ;;  %v6669_v62 = vmax.f32 %v6541_v39, %v6301_v44  ;;  %v12141_v57 = vpop.f32.mrf.mxu3  ;;  %v6066_v37 = vsel %vm5810_vm10, %v5654_v63, %v5938_v25  ;;  %v6013_v39 = vsel %vm5757_vm1, %v5522_v15, %v5885_v0  ;;  %v12161_v49 = vpop.f32.mrf.mxu1  ;;  %v5851_v20 = vmul.f32 0.2, %v5437_v18  ;;  %v6565_v63 = vld [vmem:[%s11382_s9 + $0x2f8] sm:$0xff]  ;;  %v13022_v25 = vld [vmem:[#allocation6_spill] sm:$0xff] }
 0xb4a   : > { %v6413_v44 = vsel %vm6085_vm8, %v6066_v37, -inf  ;;  %v6254_v53 = vsel %vm6085_vm8, %v6013_v39, -inf  ;;  %vm5723_vm11 = vcmp.gt.f32.partialorder %v5437_v18, 0.0  ;;  %v5887_v27 = vmul.f32 0.2, %v5527_v5 }
 0xb4b   : > { %6147 = vmax.xlane.f32.xlu2 %v6146_v55  ;;  %6798 = vst.msk [vmem:[%s11382_s9 + $0x238] sm:$0xff] %vm253_vm9, %v6669_v62  ;;  %v6109_v10 = vpop.xlane.xlu1 %6108  ;;  %v5657_v55 = vadd.f32 %v12093_v45, %v11346_v14  ;;  %v5886_v14 = vmul.f32 0.2, %v5524_v47  ;;  %v6543_v62 = vld [vmem:[%s11382_s9 + $0x248] sm:$0xff]  ;;  %vm5759_vm14 = vcmp.gt.f32.partialorder %v5527_v5, 0.0 }
 0xb4c   : > { %6150 = vmax.xlane.f32.xlu0 %v6149_v58  ;;  %6252 = vmax.xlane.f32.xlu1 %v6251_v16  ;;  %v6605_v13 = vmax.f32 %v6477_v48, %v6109_v10 }
 0xb4d   : > { %v5939_v38 = vmul.f32 0.2, %v5657_v55  ;;  %vm5811_vm0 = vcmp.gt.f32.partialorder %v5657_v55, 0.0  ;;  %v6014_v16 = vsel %vm5758_vm12, %v5524_v47, %v5886_v14  ;;  %v13023_v47 = vld [vmem:[#allocation10_spill] sm:$0xff] }
 0xb4e   : > { %v6214_v59 = vpop.xlane.xlu0 %6213  ;;  %6734 = vst.msk [vmem:[%s11382_s9 + $0x38] sm:$0xff] %vm253_vm9, %v6605_v13  ;;  %v6257_v56 = vsel %vm6085_vm8, %v6014_v16, -inf }
 0xb4f   : > { %v6640_v4 = vmax.f32 %v6512_v19, %v6214_v59  ;;  %v12148_v30 = vpop.f32.mrf.mxu0  ;;  %v5979_v19 = vsel %vm5723_vm11, %v5437_v18, %v5851_v20  ;;  %v6067_v0 = vsel %vm5811_vm0, %v5657_v55, %v5939_v38  ;;  %v6068_v55 = vsel %vm5812_vm13, %v5659_v60, %v5940_v3 }
 0xb50   : > { %v6211_v35 = vpop.xlane.xlu2 %6210  ;;  %v6152_v48 = vsel %vm6085_vm8, %v5979_v19, -inf  ;;  %v6567_v19 = vld [vmem:[%s11382_s9 + $0x308] sm:$0xff] }
 0xb51   : > { %6769 = vst.msk [vmem:[%s11382_s9 + $0x150] sm:$0xff] %vm253_vm9, %v6640_v4  ;;  %v6639_v24 = vmax.f32 %v6511_v42, %v6211_v35  ;;  %v12165_v9 = vpop.f32.mrf.mxu3  ;;  %v5439_v4 = vadd.f32 %v12102_v34, %v13022_v25  ;;  %v5531_v18 = vpop.f32.mrf.mxu1  ;;  %v6416_v35 = vsel %vm6085_vm8, %v6067_v0, -inf }
 0xb53   : > { %6345 = vmax.xlane.f32.xlu2 %v6344_v32  ;;  %6768 = vst.msk [vmem:[%s11382_s9 + $0x148] sm:$0xff] %vm253_vm9, %v6639_v24  ;;  %v6307_v15 = vpop.xlane.xlu1 %6306  ;;  %v6479_v32 = vld [vmem:[%s11382_s9 + $0x48] sm:$0xff]  ;;  %v5852_v10 = vmul.f32 0.2, %v5439_v4  ;;  %vm5724_vm15 = vcmp.gt.f32.partialorder %v5439_v4, 0.0  ;;  %v5442_v24 = vadd.f32 %v12125_v26, %v13023_v47 }
 0xb54   : > { %6348 = vmax.xlane.f32.xlu0 %v6347_v50  ;;  %6414 = vmax.xlane.f32.xlu1 %v6413_v44  ;;  %v6671_v58 = vmax.f32 %v6543_v62, %v6307_v15  ;;  %v6015_v50 = vsel %vm5759_vm14, %v5527_v5, %v5887_v27  ;;  %v13024_v44 = vld [vmem:[#allocation41_spill] sm:$0xff]  ;;  %v6544_v15 = vld [vmem:[%s11382_s9 + $0x250] sm:$0xff]  ;;  %v13025_v5 = vld [vmem:[#allocation35_spill] sm:$0xff] }
 0xb55   : > { %v5529_v14 = vadd.f32 %v12161_v49, %v13024_v44  ;;  %v5853_v38 = vmul.f32 0.2, %v5442_v24  ;;  %vm5725_vm2 = vcmp.gt.f32.partialorder %v5442_v24, 0.0 }
 0xb56   : > { %v6376_v1 = vpop.xlane.xlu0 %6375  ;;  %6800 = vst.msk [vmem:[%s11382_s9 + $0x248] sm:$0xff] %vm253_vm9, %v6671_v58 }
 0xb57   : > { %v6694_v45 = vmax.f32 %v6566_v36, %v6376_v1  ;;  %v12174_v46 = vpop.f32.mrf.mxu0  ;;  %v5662_v36 = vadd.f32 %v12141_v57, %v11551_v29  ;;  %v6419_v57 = vsel %vm6085_vm8, %v6068_v55, -inf  ;;  %vm5760_vm4 = vcmp.gt.f32.partialorder %v5529_v14, 0.0 }
 0xb58   : > { %v6373_v7 = vpop.xlane.xlu2 %6372  ;;  %v5981_v25 = vsel %vm5725_vm2, %v5442_v24, %v5853_v38  ;;  %v6514_v24 = vld [vmem:[%s11382_s9 + $0x160] sm:$0xff]  ;;  %v13028_v38 = vld [vmem:[#allocation9_spill] sm:$0xff] }
 0xb59   : > { %6823 = vst.msk [vmem:[%s11382_s9 + $0x300] sm:$0xff] %vm253_vm9, %v6694_v45  ;;  %v6693_v59 = vmax.f32 %v6565_v63, %v6373_v7  ;;  %v12187_v42 = vpop.f32.mrf.mxu3  ;;  %v6545_v45 = vld [vmem:[%s11382_s9 + $0x258] sm:$0xff]  ;;  %v6260_v63 = vsel %vm6085_vm8, %v6015_v50, -inf  ;;  %v5941_v62 = vmul.f32 0.2, %v5662_v36  ;;  %vm5813_vm3 = vcmp.gt.f32.partialorder %v5662_v36, 0.0  ;;  %v5533_v8 = vpop.f32.mrf.mxu1 }
 0xb5a   : > { %v5888_v7 = vmul.f32 0.2, %v5529_v14 }
 0xb5b   : > { %6255 = vmax.xlane.f32.xlu2 %v6254_v53  ;;  %6822 = vst.msk [vmem:[%s11382_s9 + $0x2f8] sm:$0xff] %vm253_vm9, %v6693_v59  ;;  %v6217_v37 = vpop.xlane.xlu1 %6216  ;;  %v5980_v53 = vsel %vm5724_vm15, %v5439_v4, %v5852_v10  ;;  %v5444_v59 = vadd.f32 %v12148_v30, %v13025_v5  ;;  %v13026_v4 = vld [vmem:[#allocation37_spill] sm:$0xff]  ;;  %v6158_v10 = vsel %vm6085_vm8, %v5981_v25, -inf  ;;  %v6568_v5 = vld [vmem:[%s11382_s9 + $0x310] sm:$0xff] }
 0xb5c   : > { %6258 = vmax.xlane.f32.xlu0 %v6257_v56  ;;  %6153 = vmax.xlane.f32.xlu1 %v6152_v48  ;;  %v6641_v1 = vmax.f32 %v6513_v54, %v6217_v37  ;;  %v6155_v49 = vsel %vm6085_vm8, %v5980_v53, -inf  ;;  %v5664_v56 = vadd.f32 %v12165_v9, %v11358_v31  ;;  %v6515_v48 = vld [vmem:[%s11382_s9 + $0x168] sm:$0xff]  ;;  %v6016_v27 = vsel %vm5760_vm4, %v5529_v14, %v5888_v7 }
 0xb5d   : > { %v6263_v54 = vsel %vm6085_vm8, %v6016_v27, -inf  ;;  %vm5726_vm5 = vcmp.gt.f32.partialorder %v5444_v59, 0.0  ;;  %v5667_v37 = vadd.f32 %v12187_v42, %v11605_v11 }
 0xb5e   : > { %v6115_v33 = vpop.xlane.xlu0 %6114  ;;  %6770 = vst.msk [vmem:[%s11382_s9 + $0x158] sm:$0xff] %vm253_vm9, %v6641_v1  ;;  %v5942_v47 = vmul.f32 0.2, %v5664_v56  ;;  %vm5814_vm7 = vcmp.gt.f32.partialorder %v5664_v56, 0.0  ;;  %v13027_v1 = vld [vmem:[#allocation47_spill] sm:$0xff] }
 0xb5f   : > { %v6607_v34 = vmax.f32 %v6479_v32, %v6115_v33  ;;  %v12202_v39 = vpop.f32.mrf.mxu0  ;;  %v5532_v32 = vadd.f32 %v5531_v18, %v13026_v4  ;;  %v6069_v33 = vsel %vm5813_vm3, %v5662_v36, %v5941_v62  ;;  %v5534_v50 = vadd.f32 %v5533_v8, %v13027_v1 }
 0xb60   : > { %v6112_v13 = vpop.xlane.xlu2 %6111  ;;  %v5943_v11 = vmul.f32 0.2, %v5667_v37  ;;  %vm5815_vm10 = vcmp.gt.f32.partialorder %v5667_v37, 0.0 }
 0xb61   : > { %6736 = vst.msk [vmem:[%s11382_s9 + $0x48] sm:$0xff] %vm253_vm9, %v6607_v34  ;;  %v6606_v20 = vmax.f32 %v6478_v52, %v6112_v13  ;;  %v12209_v26 = vpop.f32.mrf.mxu3  ;;  %v6422_v52 = vsel %vm6085_vm8, %v6069_v33, -inf  ;;  %v5889_v31 = vmul.f32 0.2, %v5532_v32  ;;  %v6480_v13 = vld [vmem:[%s11382_s9 + $0x50] sm:$0xff]  ;;  %vm5761_vm6 = vcmp.gt.f32.partialorder %v5532_v32, 0.0  ;;  %v5536_v44 = vpop.f32.mrf.mxu1 }
 0xb62   : > { %v5890_v7 = vmul.f32 0.2, %v5534_v50  ;;  %vm5762_vm1 = vcmp.gt.f32.partialorder %v5534_v50, 0.0 }
 0xb63   : > { %6417 = vmax.xlane.f32.xlu2 %v6416_v35  ;;  %6735 = vst.msk [vmem:[%s11382_s9 + $0x40] sm:$0xff] %vm253_vm9, %v6606_v20  ;;  %v6379_v16 = vpop.xlane.xlu1 %6378  ;;  %v5854_v35 = vmul.f32 0.2, %v5444_v59  ;;  %v6017_v53 = vsel %vm5761_vm6, %v5532_v32, %v5889_v31  ;;  %v6071_v32 = vsel %vm5815_vm10, %v5667_v37, %v5943_v11  ;;  %v6516_v37 = vld [vmem:[%s11382_s9 + $0x170] sm:$0xff] }
 0xb64   : > { %6420 = vmax.xlane.f32.xlu0 %v6419_v57  ;;  %6261 = vmax.xlane.f32.xlu1 %v6260_v63  ;;  %v6695_v3 = vmax.f32 %v6567_v19, %v6379_v16  ;;  %v6569_v57 = vld [vmem:[%s11382_s9 + $0x318] sm:$0xff]  ;;  %v6070_v63 = vsel %vm5814_vm7, %v5664_v56, %v5942_v47  ;;  %v6018_v56 = vsel %vm5762_vm1, %v5534_v50, %v5890_v7 }
 0xb65   : > { %v5982_v20 = vsel %vm5726_vm5, %v5444_v59, %v5854_v35  ;;  %v6425_v19 = vsel %vm6085_vm8, %v6070_v63, -inf  ;;  %v6546_v59 = vld [vmem:[%s11382_s9 + $0x260] sm:$0xff]  ;;  %v6548_v63 = vld [vmem:[%s11382_s9 + $0x270] sm:$0xff] }
 0xb66   : > { %v6313_v29 = vpop.xlane.xlu0 %6312  ;;  %6824 = vst.msk [vmem:[%s11382_s9 + $0x308] sm:$0xff] %vm253_vm9, %v6695_v3  ;;  %v6482_v35 = vld [vmem:[%s11382_s9 + $0x60] sm:$0xff] }
 0xb67   : > { %v6673_v60 = vmax.f32 %v6545_v45, %v6313_v29  ;;  %v12226_v34 = vpop.f32.mrf.mxu0  ;;  %v5447_v29 = vadd.f32 %v12174_v46, %v13028_v38 }
 0xb68   : > { %v6310_v58 = vpop.xlane.xlu2 %6309 }
 0xb69   : > { %6802 = vst.msk [vmem:[%s11382_s9 + $0x258] sm:$0xff] %vm253_vm9, %v6673_v60  ;;  %v6672_v0 = vmax.f32 %v6544_v15, %v6310_v58  ;;  %v12230_v30 = vpop.f32.mrf.mxu3  ;;  %v6266_v60 = vsel %vm6085_vm8, %v6017_v53, -inf  ;;  %v5855_v8 = vmul.f32 0.2, %v5447_v29  ;;  %vm5727_vm11 = vcmp.gt.f32.partialorder %v5447_v29, 0.0  ;;  %v13029_v58 = vld [vmem:[#allocation38_spill] sm:$0xff] }
 0xb6a   : > { %v5449_v16 = vadd.f32 %v12202_v39, %v13029_v58 }
 0xb6b   : > { %6156 = vmax.xlane.f32.xlu2 %v6155_v49  ;;  %6801 = vst.msk [vmem:[%s11382_s9 + $0x250] sm:$0xff] %vm253_vm9, %v6672_v0  ;;  %v6118_v36 = vpop.xlane.xlu1 %6117  ;;  %v6161_v49 = vsel %vm6085_vm8, %v5982_v20, -inf  ;;  %v5669_v0 = vadd.f32 %v12209_v26, %v11588_v21  ;;  %v6428_v21 = vsel %vm6085_vm8, %v6071_v32, -inf  ;;  %v6269_v26 = vsel %vm6085_vm8, %v6018_v56, -inf  ;;  %v13033_v32 = vld [vmem:[#allocation49_spill] sm:$0xff] }
 0xb6c   : > { %6159 = vmax.xlane.f32.xlu0 %v6158_v10  ;;  %6423 = vmax.xlane.f32.xlu1 %v6422_v52  ;;  %v6608_v45 = vmax.f32 %v6480_v13, %v6118_v36  ;;  %v5538_v10 = vpop.f32.mrf.mxu1  ;;  %v5856_v39 = vmul.f32 0.2, %v5449_v16  ;;  %vm5728_vm12 = vcmp.gt.f32.partialorder %v5449_v16, 0.0  ;;  %v6481_v13 = vld [vmem:[%s11382_s9 + $0x58] sm:$0xff]  ;;  %v13031_v36 = vld [vmem:[#allocation48_spill] sm:$0xff] }
 0xb6d   : > { %vm5816_vm0 = vcmp.gt.f32.partialorder %v5669_v0, 0.0  ;;  %v5452_v20 = vadd.f32 %v12226_v34, %v13031_v36 }
 0xb6e   : > { %v6223_v18 = vpop.xlane.xlu0 %6222  ;;  %6737 = vst.msk [vmem:[%s11382_s9 + $0x50] sm:$0xff] %vm253_vm9, %v6608_v45 }
 0xb6f   : > { %v6643_v9 = vmax.f32 %v6515_v48, %v6223_v18  ;;  %v12255_v15 = vpop.f32.mrf.mxu0  ;;  %v13030_v48 = vld [vmem:[#allocation24_spill] sm:$0xff]  ;;  %v5983_v18 = vsel %vm5727_vm11, %v5447_v29, %v5855_v8  ;;  %v5857_v34 = vmul.f32 0.2, %v5452_v20  ;;  %vm5729_vm14 = vcmp.gt.f32.partialorder %v5452_v20, 0.0 }
 0xb70   : > { %v6220_v55 = vpop.xlane.xlu2 %6219  ;;  %v5537_v27 = vadd.f32 %v5536_v44, %v13030_v48  ;;  %v6164_v47 = vsel %vm6085_vm8, %v5983_v18, -inf  ;;  %v5984_v44 = vsel %vm5728_vm12, %v5449_v16, %v5856_v39  ;;  %v6518_v18 = vld [vmem:[%s11382_s9 + $0x180] sm:$0xff] }
 0xb71   : > { %6772 = vst.msk [vmem:[%s11382_s9 + $0x168] sm:$0xff] %vm253_vm9, %v6643_v9  ;;  %v6642_v14 = vmax.f32 %v6514_v24, %v6220_v55  ;;  %v12249_v62 = vpop.f32.mrf.mxu3  ;;  %v5944_v9 = vmul.f32 0.2, %v5669_v0 }
 0xb72   : > { %v5891_v24 = vmul.f32 0.2, %v5537_v27  ;;  %vm5763_vm13 = vcmp.gt.f32.partialorder %v5537_v27, 0.0  ;;  %v5674_v58 = vadd.f32 %v12249_v62, %v11640_v28 }
 0xb73   : > { %6264 = vmax.xlane.f32.xlu2 %v6263_v54  ;;  %6771 = vst.msk [vmem:[%s11382_s9 + $0x160] sm:$0xff] %vm253_vm9, %v6642_v14  ;;  %v6316_v4 = vpop.xlane.xlu1 %6315  ;;  %v13032_v14 = vld [vmem:[#allocation50_spill] sm:$0xff]  ;;  %v6072_v29 = vsel %vm5816_vm0, %v5669_v0, %v5944_v9 }
 0xb74   : > { %6267 = vmax.xlane.f32.xlu0 %v6266_v60  ;;  %6162 = vmax.xlane.f32.xlu1 %v6161_v49  ;;  %v6674_v33 = vmax.f32 %v6546_v59, %v6316_v4  ;;  %v5539_v45 = vadd.f32 %v5538_v10, %v13032_v14  ;;  %v6019_v11 = vsel %vm5763_vm13, %v5537_v27, %v5891_v24  ;;  %v6167_v49 = vsel %vm6085_vm8, %v5984_v44, -inf  ;;  %v6570_v59 = vld [vmem:[%s11382_s9 + $0x320] sm:$0xff]  ;;  %v6483_v24 = vld [vmem:[%s11382_s9 + $0x68] sm:$0xff] }
 0xb75   : > { %v6431_v7 = vsel %vm6085_vm8, %v6072_v29, -inf  ;;  %v5985_v4 = vsel %vm5729_vm14, %v5452_v20, %v5857_v34  ;;  %v13034_v27 = vld [vmem:[#allocation34_spill] sm:$0xff]  ;;  %v5946_v39 = vmul.f32 0.2, %v5674_v58  ;;  %vm5818_vm3 = vcmp.gt.f32.partialorder %v5674_v58, 0.0 }
 0xb76   : > { %v6385_v42 = vpop.xlane.xlu0 %6384  ;;  %6803 = vst.msk [vmem:[%s11382_s9 + $0x260] sm:$0xff] %vm253_vm9, %v6674_v33  ;;  %vm5764_vm15 = vcmp.gt.f32.partialorder %v5539_v45, 0.0 }
 0xb77   : > { %v6697_v46 = vmax.f32 %v6569_v57, %v6385_v42  ;;  %v12279_v55 = vpop.f32.mrf.mxu0  ;;  %v5672_v57 = vadd.f32 %v12230_v30, %v11384_v51  ;;  %v6272_v30 = vsel %vm6085_vm8, %v6019_v11, -inf }
 0xb78   : > { %v6382_v25 = vpop.xlane.xlu2 %6381 }
 0xb79   : > { %6826 = vst.msk [vmem:[%s11382_s9 + $0x318] sm:$0xff] %vm253_vm9, %v6697_v46  ;;  %v6696_v3 = vmax.f32 %v6568_v5, %v6382_v25  ;;  %v12270_v52 = vpop.f32.mrf.mxu3  ;;  %v5892_v46 = vmul.f32 0.2, %v5539_v45  ;;  %v5945_v8 = vmul.f32 0.2, %v5672_v57  ;;  %v6547_v5 = vld [vmem:[%s11382_s9 + $0x268] sm:$0xff] }
 0xb7a   : > { %vm5817_vm2 = vcmp.gt.f32.partialorder %v5672_v57, 0.0  ;;  %v5677_v44 = vadd.f32 %v12270_v52, %v11623_v2 }
 0xb7b   : > { %6426 = vmax.xlane.f32.xlu2 %v6425_v19  ;;  %6825 = vst.msk [vmem:[%s11382_s9 + $0x310] sm:$0xff] %vm253_vm9, %v6696_v3  ;;  %v6226_v50 = vpop.xlane.xlu1 %6225  ;;  %v5541_v19 = vpop.f32.mrf.mxu1  ;;  %v6020_v48 = vsel %vm5764_vm15, %v5539_v45, %v5892_v46  ;;  %v6073_v10 = vsel %vm5817_vm2, %v5672_v57, %v5945_v8  ;;  %v6572_v57 = vld [vmem:[%s11382_s9 + $0x330] sm:$0xff]  ;;  %v13037_v8 = vld [vmem:[#allocation39_spill] sm:$0xff] }
 0xb7c   : > { %6429 = vmax.xlane.f32.xlu0 %v6428_v21  ;;  %6270 = vmax.xlane.f32.xlu1 %v6269_v26  ;;  %v6644_v38 = vmax.f32 %v6516_v37, %v6226_v50  ;;  %v5542_v0 = vadd.f32 %v5541_v19, %v13033_v32  ;;  %v6170_v21 = vsel %vm6085_vm8, %v5985_v4, -inf  ;;  %v13035_v37 = vld [vmem:[#allocation40_spill] sm:$0xff]  ;;  %v6074_v50 = vsel %vm5818_vm3, %v5674_v58, %v5946_v39 }
 0xb7d   : > { %v5457_v36 = vadd.f32 %v12279_v55, %v13035_v37  ;;  %v6437_v2 = vsel %vm6085_vm8, %v6074_v50, -inf  ;;  %vm5819_vm7 = vcmp.gt.f32.partialorder %v5677_v44, 0.0 }
 0xb7e   : > { %v6124_v31 = vpop.xlane.xlu0 %6123  ;;  %6773 = vst.msk [vmem:[%s11382_s9 + $0x170] sm:$0xff] %vm253_vm9, %v6644_v38  ;;  %v5893_v26 = vmul.f32 0.2, %v5542_v0  ;;  %vm5765_vm4 = vcmp.gt.f32.partialorder %v5542_v0, 0.0  ;;  %v13036_v38 = vld [vmem:[#allocation46_spill] sm:$0xff] }
 0xb7f   : > { %v6610_v54 = vmax.f32 %v6482_v35, %v6124_v31  ;;  %v5458_v3 = vpop.f32.mrf.mxu0  ;;  %v5454_v35 = vadd.f32 %v12255_v15, %v13034_v27  ;;  %v6275_v31 = vsel %vm6085_vm8, %v6020_v48, -inf  ;;  %v6434_v15 = vsel %vm6085_vm8, %v6073_v10, -inf }
 0xb80   : > { %v6121_v1 = vpop.xlane.xlu2 %6120  ;;  %v5859_v34 = vmul.f32 0.2, %v5457_v36  ;;  %vm5731_vm6 = vcmp.gt.f32.partialorder %v5457_v36, 0.0 }
 0xb81   : > { %6739 = vst.msk [vmem:[%s11382_s9 + $0x60] sm:$0xff] %vm253_vm9, %v6610_v54  ;;  %v6609_v53 = vmax.f32 %v6481_v13, %v6121_v1  ;;  %v12291_v42 = vpop.f32.mrf.mxu3  ;;  %v5858_v54 = vmul.f32 0.2, %v5454_v35  ;;  %vm5730_vm5 = vcmp.gt.f32.partialorder %v5454_v35, 0.0 }
 0xb83   : > { %6165 = vmax.xlane.f32.xlu2 %v6164_v47  ;;  %6738 = vst.msk [vmem:[%s11382_s9 + $0x58] sm:$0xff] %vm253_vm9, %v6609_v53  ;;  %v6388_v25 = vpop.xlane.xlu1 %6387  ;;  %v6517_v47 = vld [vmem:[%s11382_s9 + $0x178] sm:$0xff]  ;;  %v5543_v13 = vpop.f32.mrf.mxu1  ;;  %v6021_v53 = vsel %vm5765_vm4, %v5542_v0, %v5893_v26 }
 0xb84   : > { %6168 = vmax.xlane.f32.xlu0 %v6167_v49  ;;  %6432 = vmax.xlane.f32.xlu1 %v6431_v7  ;;  %v6698_v56 = vmax.f32 %v6570_v59, %v6388_v25  ;;  %v5544_v29 = vadd.f32 %v5543_v13, %v13036_v38  ;;  %v6278_v52 = vsel %vm6085_vm8, %v6021_v53, -inf  ;;  %v5947_v49 = vmul.f32 0.2, %v5677_v44 }
 0xb86   : > { %v6322_v60 = vpop.xlane.xlu0 %6321  ;;  %6827 = vst.msk [vmem:[%s11382_s9 + $0x320] sm:$0xff] %vm253_vm9, %v6698_v56  ;;  %v5894_v19 = vmul.f32 0.2, %v5544_v29  ;;  %vm5766_vm10 = vcmp.gt.f32.partialorder %v5544_v29, 0.0  ;;  %v6075_v0 = vsel %vm5819_vm7, %v5677_v44, %v5947_v49  ;;  %v6485_v56 = vld [vmem:[%s11382_s9 + $0x78] sm:$0xff] }
 0xb87   : > { %v6676_v51 = vmax.f32 %v6548_v63, %v6322_v60  ;;  %v5986_v63 = vsel %vm5730_vm5, %v5454_v35, %v5858_v54  ;;  %v5461_v11 = vpop.f32.mrf.mxu0 }
 0xb88   : > { %v6319_v16 = vpop.xlane.xlu2 %6318  ;;  %v6173_v46 = vsel %vm6085_vm8, %v5986_v63, -inf  ;;  %v6022_v48 = vsel %vm5766_vm10, %v5544_v29, %v5894_v19 }
 0xb89   : > { %6805 = vst.msk [vmem:[%s11382_s9 + $0x270] sm:$0xff] %vm253_vm9, %v6676_v51  ;;  %v6675_v33 = vmax.f32 %v6547_v5, %v6319_v16  ;;  %v5681_v28 = vpop.f32.mrf.mxu3  ;;  %v6571_v51 = vld [vmem:[%s11382_s9 + $0x328] sm:$0xff]  ;;  %v5459_v5 = vadd.f32 %v5458_v3, %v13037_v8  ;;  %v5987_v16 = vsel %vm5731_vm6, %v5457_v36, %v5859_v34  ;;  %v13039_v36 = vld [vmem:[#allocation36_spill] sm:$0xff]  ;;  %v6573_v34 = vld [vmem:[%s11382_s9 + $0x338] sm:$0xff] }
 0xb8a   : > { %v5682_v25 = vadd.f32 %v5681_v28, %v11681_v22  ;;  %v6176_v22 = vsel %vm6085_vm8, %v5987_v16, -inf }
 0xb8b   : > { %6273 = vmax.xlane.f32.xlu2 %v6272_v30  ;;  %6804 = vst.msk [vmem:[%s11382_s9 + $0x268] sm:$0xff] %vm253_vm9, %v6675_v33  ;;  %v6127_v1 = vpop.xlane.xlu1 %6126  ;;  %v6549_v30 = vld [vmem:[%s11382_s9 + $0x278] sm:$0xff]  ;;  %v5679_v33 = vadd.f32 %v12291_v42, %v11418_v6  ;;  %v5860_v27 = vmul.f32 0.2, %v5459_v5  ;;  %v6281_v6 = vsel %vm6085_vm8, %v6022_v48, -inf  ;;  %vm5732_vm1 = vcmp.gt.f32.partialorder %v5459_v5, 0.0 }
 0xb8c   : > { %6276 = vmax.xlane.f32.xlu0 %v6275_v31  ;;  %6171 = vmax.xlane.f32.xlu1 %v6170_v21  ;;  %v6611_v45 = vmax.f32 %v6483_v24, %v6127_v1  ;;  %v5949_v10 = vmul.f32 0.2, %v5682_v25  ;;  %v6519_v31 = vld [vmem:[%s11382_s9 + $0x188] sm:$0xff]  ;;  %vm5821_vm11 = vcmp.gt.f32.partialorder %v5682_v25, 0.0 }
 0xb8d   : > { %v5948_v42 = vmul.f32 0.2, %v5679_v33  ;;  %vm5820_vm12 = vcmp.gt.f32.partialorder %v5679_v33, 0.0  ;;  %v13038_v21 = vld [vmem:[#allocation15_spill] sm:$0xff]  ;;  %v5988_v54 = vsel %vm5732_vm1, %v5459_v5, %v5860_v27 }
 0xb8e   : > { %v6232_v62 = vpop.xlane.xlu0 %6231  ;;  %6740 = vst.msk [vmem:[%s11382_s9 + $0x68] sm:$0xff] %vm253_vm9, %v6611_v45  ;;  %v6077_v37 = vsel %vm5821_vm11, %v5682_v25, %v5949_v10  ;;  %v6551_v1 = vld [vmem:[%s11382_s9 + $0x288] sm:$0xff] }
 0xb8f   : > { %v6646_v9 = vmax.f32 %v6518_v18, %v6232_v62  ;;  %v6440_v18 = vsel %vm6085_vm8, %v6075_v0, -inf  ;;  %v5463_v39 = vpop.f32.mrf.mxu0  ;;  %v6484_v62 = vld [vmem:[%s11382_s9 + $0x70] sm:$0xff]  ;;  %v6076_v50 = vsel %vm5820_vm12, %v5679_v33, %v5948_v42  ;;  %v6446_v53 = vsel %vm6085_vm8, %v6077_v37, -inf  ;;  %v6486_v0 = vld [vmem:[%s11382_s9 + $0x80] sm:$0xff] }
 0xb90   : > { %v6229_v20 = vpop.xlane.xlu2 %6228  ;;  %v5464_v26 = vadd.f32 %v5463_v39, %v13038_v21  ;;  %v6574_v21 = vld [vmem:[%s11382_s9 + $0x340] sm:$0xff] }
 0xb91   : > { %6775 = vst.msk [vmem:[%s11382_s9 + $0x180] sm:$0xff] %vm253_vm9, %v6646_v9  ;;  %v6645_v14 = vmax.f32 %v6517_v47, %v6229_v20  ;;  %v5683_v55 = vpop.f32.mrf.mxu3  ;;  %v5462_v20 = vadd.f32 %v5461_v11, %v13039_v36  ;;  %v6550_v11 = vld [vmem:[%s11382_s9 + $0x280] sm:$0xff] }
 0xb92   : > { %v5684_v47 = vadd.f32 %v5683_v55, %v11661_v12  ;;  %v5862_v44 = vmul.f32 0.2, %v5464_v26  ;;  %v6179_v12 = vsel %vm6085_vm8, %v5988_v54, -inf  ;;  %vm5734_vm0 = vcmp.gt.f32.partialorder %v5464_v26, 0.0 }
 0xb93   : > { %6435 = vmax.xlane.f32.xlu2 %v6434_v15  ;;  %6774 = vst.msk [vmem:[%s11382_s9 + $0x178] sm:$0xff] %vm253_vm9, %v6645_v14  ;;  %v6325_v58 = vpop.xlane.xlu1 %6324  ;;  %v5861_v63 = vmul.f32 0.2, %v5462_v20  ;;  %vm5733_vm14 = vcmp.gt.f32.partialorder %v5462_v20, 0.0 }
 0xb94   : > { %6438 = vmax.xlane.f32.xlu0 %v6437_v2  ;;  %6279 = vmax.xlane.f32.xlu1 %v6278_v52  ;;  %v6677_v32 = vmax.f32 %v6549_v30, %v6325_v58  ;;  %v5950_v38 = vmul.f32 0.2, %v5684_v47  ;;  %vm5822_vm13 = vcmp.gt.f32.partialorder %v5684_v47, 0.0  ;;  %v5990_v2 = vsel %vm5734_vm0, %v5464_v26, %v5862_v44  ;;  %v6552_v26 = vld [vmem:[%s11382_s9 + $0x290] sm:$0xff]  ;;  %v6487_v44 = vld [vmem:[%s11382_s9 + $0x88] sm:$0xff] }
 0xb95   : > { %v5989_v30 = vsel %vm5733_vm14, %v5462_v20, %v5861_v63 }
 0xb96   : > { %v6394_v60 = vpop.xlane.xlu0 %6393  ;;  %6806 = vst.msk [vmem:[%s11382_s9 + $0x278] sm:$0xff] %vm253_vm9, %v6677_v32  ;;  %v6520_v32 = vld [vmem:[%s11382_s9 + $0x190] sm:$0xff] }
 0xb97   : > { %v6700_v7 = vmax.f32 %v6572_v57, %v6394_v60  ;;  %v6443_v57 = vsel %vm6085_vm8, %v6076_v50, -inf }
 0xb98   : > { %v6391_v59 = vpop.xlane.xlu2 %6390 }
 0xb99   : > { %6829 = vst.msk [vmem:[%s11382_s9 + $0x330] sm:$0xff] %vm253_vm9, %v6700_v7  ;;  %v6699_v4 = vmax.f32 %v6571_v51, %v6391_v59  ;;  %v5686_v3 = vpop.f32.mrf.mxu3  ;;  %v6521_v51 = vld [vmem:[%s11382_s9 + $0x198] sm:$0xff]  ;;  %v6185_v59 = vsel %vm6085_vm8, %v5990_v2, -inf }
 0xb9a   : > { %v5687_v19 = vadd.f32 %v5686_v3, %v11472_v43  ;;  %v6182_v43 = vsel %vm6085_vm8, %v5989_v30, -inf  ;;  %v6553_v2 = vld [vmem:[%s11382_s9 + $0x298] sm:$0xff] }
 0xb9b   : > { %6174 = vmax.xlane.f32.xlu2 %v6173_v46  ;;  %6828 = vst.msk [vmem:[%s11382_s9 + $0x328] sm:$0xff] %vm253_vm9, %v6699_v4  ;;  %v6235_v15 = vpop.xlane.xlu1 %6234  ;;  %v6078_v46 = vsel %vm5822_vm13, %v5684_v47, %v5950_v38 }
 0xb9c   : > { %6177 = vmax.xlane.f32.xlu0 %v6176_v22  ;;  %6441 = vmax.xlane.f32.xlu1 %v6440_v18  ;;  %v6647_v13 = vmax.f32 %v6519_v31, %v6235_v15  ;;  %v5951_v4 = vmul.f32 0.2, %v5687_v19  ;;  %vm5823_vm3 = vcmp.gt.f32.partialorder %v5687_v19, 0.0  ;;  %v6575_v22 = vld [vmem:[%s11382_s9 + $0x348] sm:$0xff] }
 0xb9e   : > { %v6133_v35 = vpop.xlane.xlu0 %6132  ;;  %6776 = vst.msk [vmem:[%s11382_s9 + $0x188] sm:$0xff] %vm253_vm9, %v6647_v13  ;;  %v6079_v18 = vsel %vm5823_vm3, %v5687_v19, %v5951_v4 }
 0xb9f   : > { %v6613_v28 = vmax.f32 %v6485_v56, %v6133_v35  ;;  %v6452_v31 = vsel %vm6085_vm8, %v6079_v18, -inf }
 0xba0   : > { %v6130_v9 = vpop.xlane.xlu2 %6129 }
 0xba1   : > { %6742 = vst.msk [vmem:[%s11382_s9 + $0x78] sm:$0xff] %vm253_vm9, %v6613_v28  ;;  %v6612_v24 = vmax.f32 %v6484_v62, %v6130_v9  ;;  %v5688_v14 = vpop.f32.mrf.mxu3 }
 0xba2   : > { %v5689_v52 = vadd.f32 %v5688_v14, %v11724_v61  ;;  %v6449_v61 = vsel %vm6085_vm8, %v6078_v46, -inf  ;;  %v6522_v14 = vld [vmem:[%s11382_s9 + $0x1a0] sm:$0xff] }
 0xba3   : > { %6282 = vmax.xlane.f32.xlu2 %v6281_v6  ;;  %6741 = vst.msk [vmem:[%s11382_s9 + $0x70] sm:$0xff] %vm253_vm9, %v6612_v24  ;;  %v6397_v60 = vpop.xlane.xlu1 %6396  ;;  %v6488_v24 = vld [vmem:[%s11382_s9 + $0x90] sm:$0xff] }
 0xba4   : > { %6447 = vmax.xlane.f32.xlu0 %v6446_v53  ;;  %6180 = vmax.xlane.f32.xlu1 %v6179_v12  ;;  %v6701_v7 = vmax.f32 %v6573_v34, %v6397_v60  ;;  %v5952_v58 = vmul.f32 0.2, %v5689_v52  ;;  %vm5824_vm15 = vcmp.gt.f32.partialorder %v5689_v52, 0.0 }
 0xba6   : > { %v6331_v45 = vpop.xlane.xlu0 %6330  ;;  %6830 = vst.msk [vmem:[%s11382_s9 + $0x338] sm:$0xff] %vm253_vm9, %v6701_v7  ;;  %v6080_v3 = vsel %vm5824_vm15, %v5689_v52, %v5952_v58  ;;  %v6576_v52 = vld [vmem:[%s11382_s9 + $0x350] sm:$0xff]  ;;  %v6489_v58 = vld [vmem:[%s11382_s9 + $0x98] sm:$0xff] }
 0xba7   : > { %v6679_v29 = vmax.f32 %v6551_v1, %v6331_v45  ;;  %v6455_v28 = vsel %vm6085_vm8, %v6080_v3, -inf }
 0xba8   : > { %v6328_v55 = vpop.xlane.xlu2 %6327 }
 0xba9   : > { %6808 = vst.msk [vmem:[%s11382_s9 + $0x288] sm:$0xff] %vm253_vm9, %v6679_v29  ;;  %v6678_v49 = vmax.f32 %v6550_v11, %v6328_v55  ;;  %v5691_v8 = vpop.f32.mrf.mxu3 }
 0xbaa   : > { %v5692_v16 = vadd.f32 %v5691_v8, %v11701_v40  ;;  %v6524_v8 = vld [vmem:[%s11382_s9 + $0x1b0] sm:$0xff] }
 0xbab   : > { %6444 = vmax.xlane.f32.xlu2 %v6443_v57  ;;  %6807 = vst.msk [vmem:[%s11382_s9 + $0x280] sm:$0xff] %vm253_vm9, %v6678_v49  ;;  %v6136_v40 = vpop.xlane.xlu1 %6135  ;;  %v6554_v57 = vld [vmem:[%s11382_s9 + $0x2a0] sm:$0xff] }
 0xbac   : > { %6186 = vmax.xlane.f32.xlu0 %v6185_v59  ;;  %6450 = vmax.xlane.f32.xlu1 %v6449_v61  ;;  %v5953_v33 = vmul.f32 0.2, %v5692_v16  ;;  %vm5825_vm2 = vcmp.gt.f32.partialorder %v5692_v16, 0.0  ;;  %v6614_v27 = vmax.f32 %v6486_v0, %v6136_v40  ;;  %v6523_v61 = vld [vmem:[%s11382_s9 + $0x1a8] sm:$0xff] }
 0xbad   : > { %v6555_v40 = vld [vmem:[%s11382_s9 + $0x2a8] sm:$0xff] }
 0xbae   : > { %v6241_v5 = vpop.xlane.xlu0 %6240  ;;  %v6081_v35 = vsel %vm5825_vm2, %v5692_v16, %v5953_v33  ;;  %6743 = vst.msk [vmem:[%s11382_s9 + $0x80] sm:$0xff] %vm253_vm9, %v6614_v27 }
 0xbaf   : > { %v6649_v25 = vmax.f32 %v6521_v51, %v6241_v5  ;;  %v6458_v6 = vsel %vm6085_vm8, %v6081_v35, -inf }
 0xbb0   : > { %v6238_v56 = vpop.xlane.xlu2 %6237 }
 0xbb1   : > { %6778 = vst.msk [vmem:[%s11382_s9 + $0x198] sm:$0xff] %vm253_vm9, %v6649_v25  ;;  %v6648_v48 = vmax.f32 %v6520_v32, %v6238_v56  ;;  %v5693_v10 = vpop.f32.mrf.mxu3  ;;  %v6578_v32 = vld [vmem:[%s11382_s9 + $0x360] sm:$0xff]  ;;  %v6577_v56 = vld [vmem:[%s11382_s9 + $0x358] sm:$0xff] }
 0xbb2   : > { %v5694_v42 = vadd.f32 %v5693_v10, %v11523_v17 }
 0xbb3   : > { %6183 = vmax.xlane.f32.xlu2 %v6182_v43  ;;  %6777 = vst.msk [vmem:[%s11382_s9 + $0x190] sm:$0xff] %vm253_vm9, %v6648_v48  ;;  %v6334_v54 = vpop.xlane.xlu1 %6333 }
 0xbb4   : > { %6456 = vmax.xlane.f32.xlu0 %v6455_v28  ;;  %6459 = vmax.xlane.f32.xlu1 %v6458_v6  ;;  %v5954_v9 = vmul.f32 0.2, %v5694_v42  ;;  %vm5826_vm4 = vcmp.gt.f32.partialorder %v5694_v42, 0.0  ;;  %v6680_v47 = vmax.f32 %v6552_v26, %v6334_v54  ;;  %v6525_v28 = vld [vmem:[%s11382_s9 + $0x1b8] sm:$0xff]  ;;  %v6579_v54 = vld [vmem:[%s11382_s9 + $0x368] sm:$0xff] }
 0xbb6   : > { %v6403_v39 = vpop.xlane.xlu0 %6402  ;;  %v6082_v13 = vsel %vm5826_vm4, %v5694_v42, %v5954_v9  ;;  %6809 = vst.msk [vmem:[%s11382_s9 + $0x290] sm:$0xff] %vm253_vm9, %v6680_v47 }
 0xbb7   : > { %v6703_v62 = vmax.f32 %v6575_v22, %v6403_v39  ;;  %v6461_v50 = vsel %vm6085_vm8, %v6082_v13, -inf  ;;  %v6491_v22 = vld [vmem:[%s11382_s9 + $0xa8] sm:$0xff]  ;;  %v6490_v39 = vld [vmem:[%s11382_s9 + $0xa0] sm:$0xff] }
 0xbb8   : > { %v6400_v15 = vpop.xlane.xlu2 %6399 }
 0xbb9   : > { %6832 = vst.msk [vmem:[%s11382_s9 + $0x348] sm:$0xff] %vm253_vm9, %v6703_v62  ;;  %v6702_v17 = vmax.f32 %v6574_v21, %v6400_v15  ;;  %v5696_v37 = vpop.f32.mrf.mxu3  ;;  %v6557_v21 = vld [vmem:[%s11382_s9 + $0x2b8] sm:$0xff]  ;;  %v6556_v15 = vld [vmem:[%s11382_s9 + $0x2b0] sm:$0xff] }
 0xbba   : > { %v5697_v20 = vadd.f32 %v5696_v37, %v11764_v23  ;;  %v6527_v37 = vld [vmem:[%s11382_s9 + $0x1c8] sm:$0xff] }
 0xbbb   : > { %6453 = vmax.xlane.f32.xlu2 %v6452_v31  ;;  %6831 = vst.msk [vmem:[%s11382_s9 + $0x340] sm:$0xff] %vm253_vm9, %v6702_v17  ;;  %v6244_v12 = vpop.xlane.xlu1 %6243 }
 0xbbc   : > { %v5955_v45 = vmul.f32 0.2, %v5697_v20  ;;  %vm5827_vm5 = vcmp.gt.f32.partialorder %v5697_v20, 0.0  ;;  %v6650_v29 = vmax.f32 %v6522_v14, %v6244_v12  ;;  %v6581_v12 = vld [vmem:[%s11382_s9 + $0x378] sm:$0xff] }
 0xbbe   : > { %v6142_v36 = vpop.xlane.xlu0 %6141  ;;  %v6083_v23 = vsel %vm5827_vm5, %v5697_v20, %v5955_v45  ;;  %6779 = vst.msk [vmem:[%s11382_s9 + $0x1a0] sm:$0xff] %vm253_vm9, %v6650_v29 }
 0xbbf   : > { %v6616_v1 = vmax.f32 %v6488_v24, %v6142_v36  ;;  %v6464_v63 = vsel %vm6085_vm8, %v6083_v23, -inf  ;;  %v6580_v23 = vld [vmem:[%s11382_s9 + $0x370] sm:$0xff] }
 0xbc0   : > { %v6139_v53 = vpop.xlane.xlu2 %6138  ;;  %6465 = vmax.xlane.f32.xlu0 %v6464_v63 }
 0xbc1   : > { %6745 = vst.msk [vmem:[%s11382_s9 + $0x90] sm:$0xff] %vm253_vm9, %v6616_v1  ;;  %v6615_v38 = vmax.f32 %v6487_v44, %v6139_v53  ;;  %v5698_v11 = vpop.f32.mrf.mxu3  ;;  %v6526_v1 = vld [vmem:[%s11382_s9 + $0x1c0] sm:$0xff] }
 0xbc2   : > { %v5699_v55 = vadd.f32 %v5698_v11, %v11744_v41 }
 0xbc3   : > { %6462 = vmax.xlane.f32.xlu2 %v6461_v50  ;;  %6744 = vst.msk [vmem:[%s11382_s9 + $0x88] sm:$0xff] %vm253_vm9, %v6615_v38  ;;  %v6406_v46 = vpop.xlane.xlu1 %6405  ;;  %v6492_v50 = vld [vmem:[%s11382_s9 + $0xb0] sm:$0xff] }
 0xbc4   : > { %v5956_v49 = vmul.f32 0.2, %v5699_v55  ;;  %vm5828_vm6 = vcmp.gt.f32.partialorder %v5699_v55, 0.0  ;;  %v6704_v51 = vmax.f32 %v6576_v52, %v6406_v46 }
 0xbc6   : > { %v6340_v34 = vpop.xlane.xlu0 %6339  ;;  %v6084_v30 = vsel %vm5828_vm6, %v5699_v55, %v5956_v49  ;;  %6833 = vst.msk [vmem:[%s11382_s9 + $0x350] sm:$0xff] %vm253_vm9, %v6704_v51  ;;  %v6493_v49 = vld [vmem:[%s11382_s9 + $0xb8] sm:$0xff] }
 0xbc7   : > { %v6682_v60 = vmax.f32 %v6554_v57, %v6340_v34  ;;  %v6467_v41 = vsel %vm6085_vm8, %v6084_v30, -inf  ;;  %v6528_v57 = vld [vmem:[%s11382_s9 + $0x1d0] sm:$0xff] }
 0xbc8   : > { %v6337_v7 = vpop.xlane.xlu2 %6336  ;;  %6468 = vmax.xlane.f32.xlu1 %v6467_v41 }
 0xbc9   : > { %6811 = vst.msk [vmem:[%s11382_s9 + $0x2a0] sm:$0xff] %vm253_vm9, %v6682_v60  ;;  %v6681_v19 = vmax.f32 %v6553_v2, %v6337_v7  ;;  %v6494_v60 = vld [vmem:[%s11382_s9 + $0xc0] sm:$0xff] }
 0xbca   : > { %v6582_v7 = vld [vmem:[%s11382_s9 + $0x380] sm:$0xff] }
 0xbcb   : > { %6810 = vst.msk [vmem:[%s11382_s9 + $0x298] sm:$0xff] %vm253_vm9, %v6681_v19  ;;  %v6145_v25 = vpop.xlane.xlu1 %6144 }
 0xbcc   : > { %v6617_v4 = vmax.f32 %v6489_v58, %v6145_v25 }
 0xbce   : > { %v6250_v5 = vpop.xlane.xlu0 %6249  ;;  %6746 = vst.msk [vmem:[%s11382_s9 + $0x98] sm:$0xff] %vm253_vm9, %v6617_v4  ;;  %v6584_v4 = vld [vmem:[%s11382_s9 + $0x390] sm:$0xff] }
 0xbcf   : > { %v6652_v59 = vmax.f32 %v6524_v8, %v6250_v5  ;;  %v6530_v8 = vld [vmem:[%s11382_s9 + $0x1e0] sm:$0xff] }
 0xbd0   : > { %v6247_v16 = vpop.xlane.xlu2 %6246 }
 0xbd1   : > { %6781 = vst.msk [vmem:[%s11382_s9 + $0x1b0] sm:$0xff] %vm253_vm9, %v6652_v59  ;;  %v6651_v43 = vmax.f32 %v6523_v61, %v6247_v16  ;;  %v6529_v59 = vld [vmem:[%s11382_s9 + $0x1d8] sm:$0xff]  ;;  %v6495_v61 = vld [vmem:[%s11382_s9 + $0xc8] sm:$0xff] }
 0xbd3   : > { %6780 = vst.msk [vmem:[%s11382_s9 + $0x1a8] sm:$0xff] %vm253_vm9, %v6651_v43  ;;  %v6343_v27 = vpop.xlane.xlu1 %6342 }
 0xbd4   : > { %v6683_v35 = vmax.f32 %v6555_v40, %v6343_v27 }
 0xbd6   : > { %v6412_v0 = vpop.xlane.xlu0 %6411  ;;  %6812 = vst.msk [vmem:[%s11382_s9 + $0x2a8] sm:$0xff] %vm253_vm9, %v6683_v35  ;;  %v6497_v35 = vld [vmem:[%s11382_s9 + $0xd8] sm:$0xff] }
 0xbd7   : > { %v6706_v33 = vmax.f32 %v6578_v32, %v6412_v0 }
 0xbd8   : > { %v6409_v48 = vpop.xlane.xlu2 %6408 }
 0xbd9   : > { %6835 = vst.msk [vmem:[%s11382_s9 + $0x360] sm:$0xff] %vm253_vm9, %v6706_v33  ;;  %v6705_v3 = vmax.f32 %v6577_v56, %v6409_v48  ;;  %v6583_v33 = vld [vmem:[%s11382_s9 + $0x388] sm:$0xff] }
 0xbda   : > { %v6531_v56 = vld [vmem:[%s11382_s9 + $0x1e8] sm:$0xff] }
 0xbdb   : > { %6834 = vst.msk [vmem:[%s11382_s9 + $0x358] sm:$0xff] %vm253_vm9, %v6705_v3  ;;  %v6253_v42 = vpop.xlane.xlu1 %6252 }
 0xbdc   : > { %v6653_v31 = vmax.f32 %v6525_v28, %v6253_v42 }
 0xbde   : > { %v6151_v18 = vpop.xlane.xlu0 %6150  ;;  %6782 = vst.msk [vmem:[%s11382_s9 + $0x1b8] sm:$0xff] %vm253_vm9, %v6653_v31  ;;  %v6533_v31 = vld [vmem:[%s11382_s9 + $0x1f8] sm:$0xff] }
 0xbdf   : > { %v6619_v10 = vmax.f32 %v6491_v22, %v6151_v18 }
 0xbe0   : > { %v6148_v6 = vpop.xlane.xlu2 %6147 }
 0xbe1   : > { %6748 = vst.msk [vmem:[%s11382_s9 + $0xa8] sm:$0xff] %vm253_vm9, %v6619_v10  ;;  %v6618_v62 = vmax.f32 %v6490_v39, %v6148_v6  ;;  %v6496_v10 = vld [vmem:[%s11382_s9 + $0xd0] sm:$0xff]  ;;  %v6585_v39 = vld [vmem:[%s11382_s9 + $0x398] sm:$0xff] }
 0xbe3   : > { %6747 = vst.msk [vmem:[%s11382_s9 + $0xa0] sm:$0xff] %vm253_vm9, %v6618_v62  ;;  %v6415_v47 = vpop.xlane.xlu1 %6414 }
 0xbe4   : > { %v6707_v13 = vmax.f32 %v6579_v54, %v6415_v47 }
 0xbe6   : > { %v6349_v26 = vpop.xlane.xlu0 %6348  ;;  %6836 = vst.msk [vmem:[%s11382_s9 + $0x368] sm:$0xff] %vm253_vm9, %v6707_v13  ;;  %v6587_v13 = vld [vmem:[%s11382_s9 + $0x3a8] sm:$0xff] }
 0xbe7   : > { %v6685_v9 = vmax.f32 %v6557_v21, %v6349_v26 }
 0xbe8   : > { %v6346_v17 = vpop.xlane.xlu2 %6345 }
 0xbe9   : > { %6814 = vst.msk [vmem:[%s11382_s9 + $0x2b8] sm:$0xff] %vm253_vm9, %v6685_v9  ;;  %v6684_v24 = vmax.f32 %v6556_v15, %v6346_v17  ;;  %v6532_v9 = vld [vmem:[%s11382_s9 + $0x1f0] sm:$0xff]  ;;  %v6498_v15 = vld [vmem:[%s11382_s9 + $0xe0] sm:$0xff] }
 0xbeb   : > { %6813 = vst.msk [vmem:[%s11382_s9 + $0x2b0] sm:$0xff] %vm253_vm9, %v6684_v24  ;;  %v6154_v14 = vpop.xlane.xlu1 %6153 }
 0xbec   : > { %v6620_v53 = vmax.f32 %v6492_v50, %v6154_v14 }
 0xbee   : > { %v6259_v36 = vpop.xlane.xlu0 %6258  ;;  %6749 = vst.msk [vmem:[%s11382_s9 + $0xb0] sm:$0xff] %vm253_vm9, %v6620_v53  ;;  %v6500_v53 = vld [vmem:[%s11382_s9 + $0xf0] sm:$0xff] }
 0xbef   : > { %v6655_v20 = vmax.f32 %v6527_v37, %v6259_v36 }
 0xbf0   : > { %v6256_v44 = vpop.xlane.xlu2 %6255 }
 0xbf1   : > { %6784 = vst.msk [vmem:[%s11382_s9 + $0x1c8] sm:$0xff] %vm253_vm9, %v6655_v20  ;;  %v6654_v45 = vmax.f32 %v6526_v1, %v6256_v44  ;;  %v6586_v20 = vld [vmem:[%s11382_s9 + $0x3a0] sm:$0xff] }
 0xbf2   : > { %v6534_v1 = vld [vmem:[%s11382_s9 + $0x200] sm:$0xff] }
 0xbf3   : > { %6783 = vst.msk [vmem:[%s11382_s9 + $0x1c0] sm:$0xff] %vm253_vm9, %v6654_v45  ;;  %v6262_v11 = vpop.xlane.xlu1 %6261 }
 0xbf4   : > { %v6656_v55 = vmax.f32 %v6528_v57, %v6262_v11 }
 0xbf6   : > { %v6421_v38 = vpop.xlane.xlu0 %6420  ;;  %6785 = vst.msk [vmem:[%s11382_s9 + $0x1d0] sm:$0xff] %vm253_vm9, %v6656_v55  ;;  %v6590_v55 = vld [vmem:[%s11382_s9 + $0x3c0] sm:$0xff] }
 0xbf7   : > { %v6709_v29 = vmax.f32 %v6581_v12, %v6421_v38 }
 0xbf8   : > { %v6418_v63 = vpop.xlane.xlu2 %6417 }
 0xbf9   : > { %6838 = vst.msk [vmem:[%s11382_s9 + $0x378] sm:$0xff] %vm253_vm9, %v6709_v29  ;;  %v6708_v34 = vmax.f32 %v6580_v23, %v6418_v63  ;;  %v6499_v29 = vld [vmem:[%s11382_s9 + $0xe8] sm:$0xff]  ;;  %v6588_v23 = vld [vmem:[%s11382_s9 + $0x3b0] sm:$0xff] }
 0xbfb   : > { %6837 = vst.msk [vmem:[%s11382_s9 + $0x370] sm:$0xff] %vm253_vm9, %v6708_v34  ;;  %v6424_v19 = vpop.xlane.xlu1 %6423 }
 0xbfc   : > { %v6710_v30 = vmax.f32 %v6582_v7, %v6424_v19 }
 0xbfe   : > { %v6160_v2 = vpop.xlane.xlu0 %6159  ;;  %6839 = vst.msk [vmem:[%s11382_s9 + $0x380] sm:$0xff] %vm253_vm9, %v6710_v30  ;;  %v6503_v30 = vld [vmem:[%s11382_s9 + $0x108] sm:$0xff] }
 0xbff   : > { %v6622_v52 = vmax.f32 %v6494_v60, %v6160_v2 }
 0xc00   : > { %v6157_v46 = vpop.xlane.xlu2 %6156 }
 0xc01   : > { %6751 = vst.msk [vmem:[%s11382_s9 + $0xc0] sm:$0xff] %vm253_vm9, %v6622_v52  ;;  %v6621_v51 = vmax.f32 %v6493_v49, %v6157_v46  ;;  %v6535_v52 = vld [vmem:[%s11382_s9 + $0x208] sm:$0xff]  ;;  %v6501_v49 = vld [vmem:[%s11382_s9 + $0xf8] sm:$0xff] }
 0xc03   : > { %6750 = vst.msk [vmem:[%s11382_s9 + $0xb8] sm:$0xff] %vm253_vm9, %v6621_v51  ;;  %v6163_v16 = vpop.xlane.xlu1 %6162 }
 0xc04   : > { %v6623_v43 = vmax.f32 %v6495_v61, %v6163_v16 }
 0xc06   : > { %v6268_v41 = vpop.xlane.xlu0 %6267  ;;  %6752 = vst.msk [vmem:[%s11382_s9 + $0xc8] sm:$0xff] %vm253_vm9, %v6623_v43  ;;  %v6593_v43 = vld [vmem:[%s11382_s9 + $0x3d8] sm:$0xff] }
 0xc07   : > { %v6658_v5 = vmax.f32 %v6530_v8, %v6268_v41 }
 0xc08   : > { %v6265_v58 = vpop.xlane.xlu2 %6264 }
 0xc09   : > { %6787 = vst.msk [vmem:[%s11382_s9 + $0x1e0] sm:$0xff] %vm253_vm9, %v6658_v5  ;;  %v6657_v25 = vmax.f32 %v6529_v59, %v6265_v58  ;;  %v6589_v5 = vld [vmem:[%s11382_s9 + $0x3b8] sm:$0xff]  ;;  %v6591_v59 = vld [vmem:[%s11382_s9 + $0x3c8] sm:$0xff] }
 0xc0b   : > { %6786 = vst.msk [vmem:[%s11382_s9 + $0x1d8] sm:$0xff] %vm253_vm9, %v6657_v25  ;;  %v6271_v48 = vpop.xlane.xlu1 %6270 }
 0xc0c   : > { %v6659_v3 = vmax.f32 %v6531_v56, %v6271_v48 }
 0xc0e   : > { %v6430_v32 = vpop.xlane.xlu0 %6429  ;;  %6788 = vst.msk [vmem:[%s11382_s9 + $0x1e8] sm:$0xff] %vm253_vm9, %v6659_v3  ;;  %v6596_v3 = vld [vmem:[%s11382_s9 + $0x3f0] sm:$0xff] }
 0xc0f   : > { %v6712_v0 = vmax.f32 %v6584_v4, %v6430_v32 }
 0xc10   : > { %v6427_v40 = vpop.xlane.xlu2 %6426 }
 0xc11   : > { %6841 = vst.msk [vmem:[%s11382_s9 + $0x390] sm:$0xff] %vm253_vm9, %v6712_v0  ;;  %v6711_v27 = vmax.f32 %v6583_v33, %v6427_v40  ;;  %v6502_v0 = vld [vmem:[%s11382_s9 + $0x100] sm:$0xff] }
 0xc12   : > { %v6594_v33 = vld [vmem:[%s11382_s9 + $0x3e0] sm:$0xff] }
 0xc13   : > { %6840 = vst.msk [vmem:[%s11382_s9 + $0x388] sm:$0xff] %vm253_vm9, %v6711_v27  ;;  %v6433_v6 = vpop.xlane.xlu1 %6432 }
 0xc14   : > { %v6713_v62 = vmax.f32 %v6585_v39, %v6433_v6 }
 0xc16   : > { %v6169_v22 = vpop.xlane.xlu0 %6168  ;;  %6842 = vst.msk [vmem:[%s11382_s9 + $0x398] sm:$0xff] %vm253_vm9, %v6713_v62  ;;  %v6595_v62 = vld [vmem:[%s11382_s9 + $0x3e8] sm:$0xff] }
 0xc17   : > { %v6625_v18 = vmax.f32 %v6497_v35, %v6169_v22 }
 0xc18   : > { %v6166_v28 = vpop.xlane.xlu2 %6165 }
 0xc19   : > { %6754 = vst.msk [vmem:[%s11382_s9 + $0xd8] sm:$0xff] %vm253_vm9, %v6625_v18  ;;  %v6624_v42 = vmax.f32 %v6496_v10, %v6166_v28  ;;  %v6592_v18 = vld [vmem:[%s11382_s9 + $0x3d0] sm:$0xff]  ;;  %v6597_v10 = vld [vmem:[%s11382_s9 + $0x3f8] sm:$0xff] }
 0xc1b   : > { %6753 = vst.msk [vmem:[%s11382_s9 + $0xd0] sm:$0xff] %vm253_vm9, %v6624_v42  ;;  %v6172_v17 = vpop.xlane.xlu1 %6171 }
 0xc1c   : > { %v6626_v24 = vmax.f32 %v6498_v15, %v6172_v17 }
 0xc1e   : > { %v6277_v21 = vpop.xlane.xlu0 %6276  ;;  %6755 = vst.msk [vmem:[%s11382_s9 + $0xe0] sm:$0xff] %vm253_vm9, %v6626_v24 }
 0xc1f   : > { %v6661_v26 = vmax.f32 %v6533_v31, %v6277_v21 }
 0xc20   : > { %v6274_v54 = vpop.xlane.xlu2 %6273 }
 0xc21   : > { %6790 = vst.msk [vmem:[%s11382_s9 + $0x1f8] sm:$0xff] %vm253_vm9, %v6661_v26  ;;  %v6660_v47 = vmax.f32 %v6532_v9, %v6274_v54 }
 0xc23   : > { %6789 = vst.msk [vmem:[%s11382_s9 + $0x1f0] sm:$0xff] %vm253_vm9, %v6660_v47  ;;  %v6280_v44 = vpop.xlane.xlu1 %6279 }
 0xc24   : > { %v6662_v45 = vmax.f32 %v6534_v1, %v6280_v44 }
 0xc26   : > { %v6439_v37 = vpop.xlane.xlu0 %6438  ;;  %6791 = vst.msk [vmem:[%s11382_s9 + $0x200] sm:$0xff] %vm253_vm9, %v6662_v45 }
 0xc27   : > { %v6715_v36 = vmax.f32 %v6587_v13, %v6439_v37 }
 0xc28   : > { %v6436_v50 = vpop.xlane.xlu2 %6435 }
 0xc29   : > { %6844 = vst.msk [vmem:[%s11382_s9 + $0x3a8] sm:$0xff] %vm253_vm9, %v6715_v36  ;;  %v6714_v14 = vmax.f32 %v6586_v20, %v6436_v50 }
 0xc2b   : > { %6843 = vst.msk [vmem:[%s11382_s9 + $0x3a0] sm:$0xff] %vm253_vm9, %v6714_v14  ;;  %v6442_v63 = vpop.xlane.xlu1 %6441 }
 0xc2c   : > { %v6716_v34 = vmax.f32 %v6588_v23, %v6442_v63 }
 0xc2e   : > { %v6178_v12 = vpop.xlane.xlu0 %6177  ;;  %6845 = vst.msk [vmem:[%s11382_s9 + $0x3b0] sm:$0xff] %vm253_vm9, %v6716_v34 }
 0xc2f   : > { %v6628_v38 = vmax.f32 %v6500_v53, %v6178_v12 }
 0xc30   : > { %v6175_v57 = vpop.xlane.xlu2 %6174 }
 0xc31   : > { %6757 = vst.msk [vmem:[%s11382_s9 + $0xf0] sm:$0xff] %vm253_vm9, %v6628_v38  ;;  %v6627_v11 = vmax.f32 %v6499_v29, %v6175_v57 }
 0xc33   : > { %6756 = vst.msk [vmem:[%s11382_s9 + $0xe8] sm:$0xff] %vm253_vm9, %v6627_v11  ;;  %v6181_v46 = vpop.xlane.xlu1 %6180 }
 0xc34   : > { %v6629_v51 = vmax.f32 %v6501_v49, %v6181_v46 }
 0xc36   : > { %v6448_v60 = vpop.xlane.xlu0 %6447  ;;  %6758 = vst.msk [vmem:[%s11382_s9 + $0xf8] sm:$0xff] %vm253_vm9, %v6629_v51 }
 0xc37   : > { %v6718_v2 = vmax.f32 %v6590_v55, %v6448_v60 }
 0xc38   : > { %v6283_v7 = vpop.xlane.xlu2 %6282 }
 0xc39   : > { %6847 = vst.msk [vmem:[%s11382_s9 + $0x3c0] sm:$0xff] %vm253_vm9, %v6718_v2  ;;  %v6663_v19 = vmax.f32 %v6535_v52, %v6283_v7 }
 0xc3b   : > { %6792 = vst.msk [vmem:[%s11382_s9 + $0x208] sm:$0xff] %vm253_vm9, %v6663_v19  ;;  %v6451_v58 = vpop.xlane.xlu1 %6450 }
 0xc3c   : > { %v6719_v25 = vmax.f32 %v6591_v59, %v6451_v58 }
 0xc3e   : > { %v6187_v8 = vpop.xlane.xlu0 %6186  ;;  %6848 = vst.msk [vmem:[%s11382_s9 + $0x3c8] sm:$0xff] %vm253_vm9, %v6719_v25 }
 0xc3f   : > { %v6631_v41 = vmax.f32 %v6503_v30, %v6187_v8 }
 0xc40   : > { %v6445_v61 = vpop.xlane.xlu2 %6444 }
 0xc41   : > { %6760 = vst.msk [vmem:[%s11382_s9 + $0x108] sm:$0xff] %vm253_vm9, %v6631_v41  ;;  %v6717_v16 = vmax.f32 %v6589_v5, %v6445_v61 }
 0xc43   : > { %6846 = vst.msk [vmem:[%s11382_s9 + $0x3b8] sm:$0xff] %vm253_vm9, %v6717_v16  ;;  %v6460_v40 = vpop.xlane.xlu1 %6459 }
 0xc44   : > { %v6722_v27 = vmax.f32 %v6594_v33, %v6460_v40 }
 0xc46   : > { %v6457_v4 = vpop.xlane.xlu0 %6456  ;;  %6851 = vst.msk [vmem:[%s11382_s9 + $0x3e0] sm:$0xff] %vm253_vm9, %v6722_v27 }
 0xc47   : > { %v6721_v32 = vmax.f32 %v6593_v43, %v6457_v4 }
 0xc48   : > { %v6184_v56 = vpop.xlane.xlu2 %6183 }
 0xc49   : > { %6850 = vst.msk [vmem:[%s11382_s9 + $0x3d8] sm:$0xff] %vm253_vm9, %v6721_v32  ;;  %v6630_v48 = vmax.f32 %v6502_v0, %v6184_v56 }
 0xc4b   : > { %6759 = vst.msk [vmem:[%s11382_s9 + $0x100] sm:$0xff] %vm253_vm9, %v6630_v48  ;;  %v6469_v28 = vpop.xlane.xlu1 %6468 }
 0xc4c   : > { %v6725_v42 = vmax.f32 %v6597_v10, %v6469_v28 }
 0xc4e   : > { %v6466_v35 = vpop.xlane.xlu0 %6465  ;;  %6854 = vst.msk [vmem:[%s11382_s9 + $0x3f8] sm:$0xff] %vm253_vm9, %v6725_v42 }
 0xc4f   : > { %v6724_v22 = vmax.f32 %v6596_v3, %v6466_v35 }
 0xc50   : > { %v6454_v39 = vpop.xlane.xlu2 %6453 }
 0xc51   : > { %6853 = vst.msk [vmem:[%s11382_s9 + $0x3f0] sm:$0xff] %vm253_vm9, %v6724_v22  ;;  %v6720_v6 = vmax.f32 %v6592_v18, %v6454_v39 }
 0xc53   : > { %6849 = vst.msk [vmem:[%s11382_s9 + $0x3d0] sm:$0xff] %vm253_vm9, %v6720_v6 }
 0xc58   : > { %v6463_v31 = vpop.xlane.xlu2 %6462 }
 0xc59   : > { %v6723_v21 = vmax.f32 %v6595_v62, %v6463_v31 }
 0xc5b   : > { %6852 = vst.msk [vmem:[%s11382_s9 + $0x3e8] sm:$0xff] %vm253_vm9, %v6723_v21 }
 0xc5c PF: > { %s15_s20 = sadd.s32 1, %s7716_s20   ;;  %s13040_s18 = smov %s7712_s19 }
 0xc5d   : > { %p12_p5 = scmp.ge.s32.totalorder %s15_s20, 4   ;;  %s13041_s19 = smov %s13043_s21 }
 0xc5f   :  { %14 = sbr.rel (!%p12_p5) target bundleno = 2 (0x2), region = 93 }

</bundles_post_ra>
